<compile_context>
chip_gen: v7x
topology: tpu7x:2x2x1
jax: 0.10.0
libtpu: 0.0.40
codegen_flags: <defaults>
</compile_context>

<pallas_src>
import math
import numpy as np
import jax
import jax.numpy as jnp
from jax.experimental import pallas as pl
from jax.experimental.pallas import tpu as pltpu

S, B, D = 8, 2, 32          # seq_len, batch, hidden_dim (d_model)
H = 8                       # nhead
HD = D // H                 # head dim
F = 128                     # dim_feedforward
L = 5                       # num encoder layers
N_SPK = 8                   # n_speakers
EPS = 1e-5                  # LayerNorm eps (PyTorch default)
NEG_SLOPE = 0.01            # LeakyReLU default negative_slope
SB = S * B                  # tokens (rows of the activation matrix)
SBH = S * B * H             # attention rows: one per (head, seq, batch) -> 128 = full lane width
MASK_NEG = -1e30


def _layer_norm(x, w, b):
    mu = jnp.mean(x, axis=-1, keepdims=True)
    var = jnp.mean((x - mu) ** 2, axis=-1, keepdims=True)
    return (x - mu) * jax.lax.rsqrt(var + EPS) * w + b


def speech_classifier_kernel(
    x_ref, noise_ref, pe_ref, maskb_ref,
    wqkv_ref, bqkv_ref, wo_ref, bo_ref,
    ln1w_ref, ln1b_ref, ln2w_ref, ln2b_ref,
    w1_ref, b1_ref, w2_ref, b2_ref,
    wd_ref, bd_ref,
    out_ref,
):
    scale = 1.0 / math.sqrt(HD)

    # x = x + randn_like(x) * 0.03 ; x = x + positional_encoding
    # TODO(synk): dropout (p=0.4 in the PE and encoder layers) is inference-mode identity here;
    #             the Gaussian input noise is generated host-side and passed in.
    x = x_ref[...] + noise_ref[...] * 0.03 + pe_ref[...]            # (SB, D) f32

    def heads_to_rows(mat, col_off):
        # (SB, 3D) lane slices -> (SBH, HD); row order = (head, seq, batch).
        return jnp.concatenate(
            [mat[:, col_off + h * HD: col_off + (h + 1) * HD] for h in range(H)],
            axis=0)

    for l in range(L):
        # ---------------- multi-head self-attention (post-LN encoder layer) ----------------
        qkv = jnp.dot(x.astype(jnp.bfloat16), wqkv_ref[l],
                      preferred_element_type=jnp.float32) + bqkv_ref[l]       # (SB, 3D) f32

        q2 = heads_to_rows(qkv, 0 * D) * scale                                # (SBH, HD)
        k2 = heads_to_rows(qkv, 1 * D)                                        # (SBH, HD)
        v2 = heads_to_rows(qkv, 2 * D)                                        # (SBH, HD)

        # One wide score matrix for all (batch, head) pairs; off-block entries masked to -1e30.
        scores = jax.lax.dot_general(q2, k2, (((1,), (1,)), ((), ())),
                                     preferred_element_type=jnp.float32)      # (SBH, SBH)
        scores = scores + maskb_ref[...]
        scores = scores - jnp.max(scores, axis=-1, keepdims=True)
        p = jnp.exp(scores)
        p = p * pl.reciprocal(jnp.sum(p, axis=-1, keepdims=True), approx=True)

        attn2 = jnp.dot(p, v2, preferred_element_type=jnp.float32)            # (SBH, HD)
        # (head, seq, batch) rows -> lane-dense (SB, D) with heads back in the lane axis.
        attn = jnp.concatenate(
            [attn2[h * SB:(h + 1) * SB, :] for h in range(H)], axis=1)        # (SB, D)

        attn = jnp.dot(attn.astype(jnp.bfloat16), wo_ref[l],
                       preferred_element_type=jnp.float32) + bo_ref[l]
        x = _layer_norm(x + attn, ln1w_ref[l], ln1b_ref[l])

        # ---------------- feed-forward ----------------
        hid = jnp.dot(x.astype(jnp.bfloat16), w1_ref[l],
                      preferred_element_type=jnp.float32) + b1_ref[l]         # (SB, F)
        hid = jnp.maximum(hid, 0.0)                                           # ReLU
        ff = jnp.dot(hid.astype(jnp.bfloat16), w2_ref[l],
                     preferred_element_type=jnp.float32) + b2_ref[l]          # (SB, D)
        x = _layer_norm(x + ff, ln2w_ref[l], ln2b_ref[l])

    # ---------------- decoder + LeakyReLU + mean over seq (dim 0) ----------------
    logits = jnp.dot(x.astype(jnp.bfloat16), wd_ref[...],
                     preferred_element_type=jnp.float32) + bd_ref[...]        # (SB, N_SPK)
    logits = jnp.where(logits >= 0, logits, NEG_SLOPE * logits)
    out_ref[...] = jnp.sum(logits.reshape(S, B, N_SPK), axis=0) * (1.0 / S)


def make_positional_encoding(seq_len, d_model):
    pe = np.zeros((seq_len, d_model), dtype=np.float32)
    position = np.arange(seq_len, dtype=np.float32)[:, None]
    div_term = np.exp(np.arange(0, d_model, 2, dtype=np.float32) *
                      (-math.log(10000.0) / d_model))
    pe[:, 0::2] = np.sin(position * div_term)
    pe[:, 1::2] = np.cos(position * div_term)
    return jnp.asarray(pe)  # (S, D)


def make_attention_mask_bias():
    # Rows/cols indexed by r = h*(S*B) + s*B + b ; attend only within same (batch b, head h).
    r = np.arange(SBH)
    h_idx = r // SB
    b_idx = r % B
    valid = (h_idx[:, None] == h_idx[None, :]) & (b_idx[:, None] == b_idx[None, :])
    return jnp.asarray(np.where(valid, 0.0, MASK_NEG).astype(np.float32))  # (SBH, SBH)


def init_params(key):
    ks = jax.random.split(key, 10)

    def w(k, shape, scale=0.05):
        return jax.random.normal(k, shape, dtype=jnp.float32) * scale

    return dict(
        wqkv=w(ks[0], (L, 3 * D, D)),      # MHA in_proj_weight per layer, (3D, D) PyTorch layout
        bqkv=w(ks[1], (L, 1, 3 * D), 0.01),
        wo=w(ks[2], (L, D, D)),            # MHA out_proj weight, (D, D)
        bo=w(ks[3], (L, 1, D), 0.01),
        ln1w=jnp.ones((L, 1, D), jnp.float32),
        ln1b=jnp.zeros((L, 1, D), jnp.float32),
        ln2w=jnp.ones((L, 1, D), jnp.float32),
        ln2b=jnp.zeros((L, 1, D), jnp.float32),
        w1=w(ks[4], (L, F, D)),            # linear1 weight, (F, D)
        b1=w(ks[5], (L, 1, F), 0.01),
        w2=w(ks[6], (L, D, F)),            # linear2 weight, (D, F)
        b2=w(ks[7], (L, 1, D), 0.01),
        wd=w(ks[8], (N_SPK, D)),           # decoder weight, (n_speakers, D)
        bd=w(ks[9], (1, N_SPK), 0.01),
    )


def speech_classifier_forward(x, noise, pe, mask_bias, params):
    bf16 = jnp.bfloat16
    # Host-side layout plumbing: (out,in)->(in,out) weight transposes + bf16 MXU operands,
    # flattened (S*B, D) activations, PE broadcast over batch.
    wqkv_t = jnp.transpose(params["wqkv"], (0, 2, 1)).astype(bf16)   # (L, D, 3D)
    wo_t = jnp.transpose(params["wo"], (0, 2, 1)).astype(bf16)       # (L, D, D)
    w1_t = jnp.transpose(params["w1"], (0, 2, 1)).astype(bf16)       # (L, D, F)
    w2_t = jnp.transpose(params["w2"], (0, 2, 1)).astype(bf16)       # (L, F, D)
    wd_t = params["wd"].T.astype(bf16)                               # (D, N_SPK)

    x_flat = x.reshape(SB, D)
    noise_flat = noise.reshape(SB, D)
    pe_flat = jnp.broadcast_to(pe[:, None, :], (S, B, D)).reshape(SB, D)

    vmem_spec = pl.BlockSpec(memory_space=pltpu.MemorySpace.VMEM)
    n_in = 18
    return pl.pallas_call(
        speech_classifier_kernel,
        out_shape=jax.ShapeDtypeStruct((B, N_SPK), jnp.float32),
        in_specs=[vmem_spec] * n_in,
        out_specs=vmem_spec,
    )(x_flat, noise_flat, pe_flat, mask_bias,
      wqkv_t, params["bqkv"], wo_t, params["bo"],
      params["ln1w"], params["ln1b"], params["ln2w"], params["ln2b"],
      w1_t, params["b1"], w2_t, params["b2"],
      wd_t, params["bd"])


if __name__ == "__main__":
    key = jax.random.PRNGKey(0)
    k_x, k_noise, k_params = jax.random.split(key, 3)

    # speech_features: (seq_len, batch, hidden_dim)
    x = jax.random.normal(k_x, (S, B, D), dtype=jnp.float32)
    # stand-in for torch.randn_like(speech_features)
    noise = jax.random.normal(k_noise, (S, B, D), dtype=jnp.float32)
    pe = make_positional_encoding(S, D)
    mask_bias = make_attention_mask_bias()
    params = init_params(k_params)

    fwd = jax.jit(lambda xx, nn_: speech_classifier_forward(xx, nn_, pe, mask_bias, params))
    out = jax.block_until_ready(fwd(x, noise))

    assert out.shape == (B, N_SPK), out.shape
    assert bool(jnp.all(jnp.isfinite(out)))
    print("KERNEL_OK")
</pallas_src>

<mosaic_0001>
module attributes {stable_mosaic.version = 11 : i64} {
  func.func @speech_classifier_kernel(%arg0: memref<16x32xf32, #tpu.memory_space<vmem>>, %arg1: memref<16x32xf32, #tpu.memory_space<vmem>>, %arg2: memref<16x32xf32, #tpu.memory_space<vmem>>, %arg3: memref<128x128xf32, #tpu.memory_space<vmem>>, %arg4: memref<5x32x96xbf16, #tpu.memory_space<vmem>>, %arg5: memref<5x1x96xf32, #tpu.memory_space<vmem>>, %arg6: memref<5x32x32xbf16, #tpu.memory_space<vmem>>, %arg7: memref<5x1x32xf32, #tpu.memory_space<vmem>>, %arg8: memref<5x1x32xf32, #tpu.memory_space<vmem>>, %arg9: memref<5x1x32xf32, #tpu.memory_space<vmem>>, %arg10: memref<5x1x32xf32, #tpu.memory_space<vmem>>, %arg11: memref<5x1x32xf32, #tpu.memory_space<vmem>>, %arg12: memref<5x32x128xbf16, #tpu.memory_space<vmem>>, %arg13: memref<5x1x128xf32, #tpu.memory_space<vmem>>, %arg14: memref<5x128x32xbf16, #tpu.memory_space<vmem>>, %arg15: memref<5x1x32xf32, #tpu.memory_space<vmem>>, %arg16: memref<32x8xbf16, #tpu.memory_space<vmem>>, %arg17: memref<1x8xf32, #tpu.memory_space<vmem>>, %arg18: memref<2x8xf32, #tpu.memory_space<vmem>>) attributes {dimension_semantics = [], scalar_prefetch = 0 : i64, scratch_operands = 0 : i64, tpu.core_type = #tpu.core_type<tc>} {
    %c0 = arith.constant 0 : index
    %c0_0 = arith.constant 0 : index
    %0 = vector.load %arg0[%c0, %c0_0] : memref<16x32xf32, #tpu.memory_space<vmem>>, vector<16x32xf32>
    %c0_1 = arith.constant 0 : index
    %c0_2 = arith.constant 0 : index
    %1 = vector.load %arg1[%c0_1, %c0_2] : memref<16x32xf32, #tpu.memory_space<vmem>>, vector<16x32xf32>
    %cst = arith.constant 3.000000e-02 : f32
    %2 = vector.broadcast %cst : f32 to vector<16x32xf32>
    %3 = arith.mulf %1, %2 : vector<16x32xf32>
    %4 = arith.addf %0, %3 : vector<16x32xf32>
    %c0_3 = arith.constant 0 : index
    %c0_4 = arith.constant 0 : index
    %5 = vector.load %arg2[%c0_3, %c0_4] : memref<16x32xf32, #tpu.memory_space<vmem>>, vector<16x32xf32>
    %6 = arith.addf %4, %5 : vector<16x32xf32>
    %7 = arith.truncf %6 : vector<16x32xf32> to vector<16x32xbf16>
    %c0_5 = arith.constant 0 : index
    %c0_6 = arith.constant 0 : index
    %c0_7 = arith.constant 0 : index
    %8 = vector.load %arg4[%c0_5, %c0_6, %c0_7] : memref<5x32x96xbf16, #tpu.memory_space<vmem>>, vector<1x32x96xbf16>
    %9 = vector.shape_cast %8 : vector<1x32x96xbf16> to vector<32x96xbf16>
    %cst_8 = arith.constant dense<0.000000e+00> : vector<16x96xf32>
    %10 = tpu.matmul %7, %9, %cst_8 {dimension_numbers = #tpu.dot_dimension_numbers<[1], [0], [0], [1], [0, 0, 1, 1], [], []>} : vector<16x32xbf16>, vector<32x96xbf16>, vector<16x96xf32> -> vector<16x96xf32>
    %c0_9 = arith.constant 0 : index
    %c0_10 = arith.constant 0 : index
    %c0_11 = arith.constant 0 : index
    %11 = vector.load %arg5[%c0_9, %c0_10, %c0_11] : memref<5x1x96xf32, #tpu.memory_space<vmem>>, vector<1x1x96xf32>
    %12 = vector.shape_cast %11 : vector<1x1x96xf32> to vector<1x96xf32>
    %13 = vector.broadcast %12 : vector<1x96xf32> to vector<16x96xf32>
    %14 = arith.addf %10, %13 : vector<16x96xf32>
    %15 = vector.extract_strided_slice %14 {offsets = [0, 0], sizes = [16, 4], strides = [1, 1]} : vector<16x96xf32> to vector<16x4xf32>
    %16 = vector.extract_strided_slice %14 {offsets = [0, 4], sizes = [16, 4], strides = [1, 1]} : vector<16x96xf32> to vector<16x4xf32>
    %17 = vector.extract_strided_slice %14 {offsets = [0, 8], sizes = [16, 4], strides = [1, 1]} : vector<16x96xf32> to vector<16x4xf32>
    %18 = vector.extract_strided_slice %14 {offsets = [0, 12], sizes = [16, 4], strides = [1, 1]} : vector<16x96xf32> to vector<16x4xf32>
    %19 = vector.extract_strided_slice %14 {offsets = [0, 16], sizes = [16, 4], strides = [1, 1]} : vector<16x96xf32> to vector<16x4xf32>
    %20 = vector.extract_strided_slice %14 {offsets = [0, 20], sizes = [16, 4], strides = [1, 1]} : vector<16x96xf32> to vector<16x4xf32>
    %21 = vector.extract_strided_slice %14 {offsets = [0, 24], sizes = [16, 4], strides = [1, 1]} : vector<16x96xf32> to vector<16x4xf32>
    %22 = vector.extract_strided_slice %14 {offsets = [0, 28], sizes = [16, 4], strides = [1, 1]} : vector<16x96xf32> to vector<16x4xf32>
    %23 = tpu.concatenate %15, %16, %17, %18, %19, %20, %21, %22 in 0 : vector<16x4xf32>, vector<16x4xf32>, vector<16x4xf32>, vector<16x4xf32>, vector<16x4xf32>, vector<16x4xf32>, vector<16x4xf32>, vector<16x4xf32> -> vector<128x4xf32>
    %cst_12 = arith.constant 5.000000e-01 : f32
    %24 = vector.broadcast %cst_12 : f32 to vector<128x4xf32>
    %25 = arith.mulf %23, %24 : vector<128x4xf32>
    %26 = vector.extract_strided_slice %14 {offsets = [0, 32], sizes = [16, 4], strides = [1, 1]} : vector<16x96xf32> to vector<16x4xf32>
    %27 = vector.extract_strided_slice %14 {offsets = [0, 36], sizes = [16, 4], strides = [1, 1]} : vector<16x96xf32> to vector<16x4xf32>
    %28 = vector.extract_strided_slice %14 {offsets = [0, 40], sizes = [16, 4], strides = [1, 1]} : vector<16x96xf32> to vector<16x4xf32>
    %29 = vector.extract_strided_slice %14 {offsets = [0, 44], sizes = [16, 4], strides = [1, 1]} : vector<16x96xf32> to vector<16x4xf32>
    %30 = vector.extract_strided_slice %14 {offsets = [0, 48], sizes = [16, 4], strides = [1, 1]} : vector<16x96xf32> to vector<16x4xf32>
    %31 = vector.extract_strided_slice %14 {offsets = [0, 52], sizes = [16, 4], strides = [1, 1]} : vector<16x96xf32> to vector<16x4xf32>
    %32 = vector.extract_strided_slice %14 {offsets = [0, 56], sizes = [16, 4], strides = [1, 1]} : vector<16x96xf32> to vector<16x4xf32>
    %33 = vector.extract_strided_slice %14 {offsets = [0, 60], sizes = [16, 4], strides = [1, 1]} : vector<16x96xf32> to vector<16x4xf32>
    %34 = tpu.concatenate %26, %27, %28, %29, %30, %31, %32, %33 in 0 : vector<16x4xf32>, vector<16x4xf32>, vector<16x4xf32>, vector<16x4xf32>, vector<16x4xf32>, vector<16x4xf32>, vector<16x4xf32>, vector<16x4xf32> -> vector<128x4xf32>
    %35 = vector.extract_strided_slice %14 {offsets = [0, 64], sizes = [16, 4], strides = [1, 1]} : vector<16x96xf32> to vector<16x4xf32>
    %36 = vector.extract_strided_slice %14 {offsets = [0, 68], sizes = [16, 4], strides = [1, 1]} : vector<16x96xf32> to vector<16x4xf32>
    %37 = vector.extract_strided_slice %14 {offsets = [0, 72], sizes = [16, 4], strides = [1, 1]} : vector<16x96xf32> to vector<16x4xf32>
    %38 = vector.extract_strided_slice %14 {offsets = [0, 76], sizes = [16, 4], strides = [1, 1]} : vector<16x96xf32> to vector<16x4xf32>
    %39 = vector.extract_strided_slice %14 {offsets = [0, 80], sizes = [16, 4], strides = [1, 1]} : vector<16x96xf32> to vector<16x4xf32>
    %40 = vector.extract_strided_slice %14 {offsets = [0, 84], sizes = [16, 4], strides = [1, 1]} : vector<16x96xf32> to vector<16x4xf32>
    %41 = vector.extract_strided_slice %14 {offsets = [0, 88], sizes = [16, 4], strides = [1, 1]} : vector<16x96xf32> to vector<16x4xf32>
    %42 = vector.extract_strided_slice %14 {offsets = [0, 92], sizes = [16, 4], strides = [1, 1]} : vector<16x96xf32> to vector<16x4xf32>
    %43 = tpu.concatenate %35, %36, %37, %38, %39, %40, %41, %42 in 0 : vector<16x4xf32>, vector<16x4xf32>, vector<16x4xf32>, vector<16x4xf32>, vector<16x4xf32>, vector<16x4xf32>, vector<16x4xf32>, vector<16x4xf32> -> vector<128x4xf32>
    %cst_13 = arith.constant dense<0.000000e+00> : vector<128x128xf32>
    %44 = tpu.matmul %25, %34, %cst_13 {dimension_numbers = #tpu.dot_dimension_numbers<[1], [1], [0], [0], [0, 0, 1, 0], [], []>} : vector<128x4xf32>, vector<128x4xf32>, vector<128x128xf32> -> vector<128x128xf32>
    %c0_14 = arith.constant 0 : index
    %c0_15 = arith.constant 0 : index
    %45 = vector.load %arg3[%c0_14, %c0_15] : memref<128x128xf32, #tpu.memory_space<vmem>>, vector<128x128xf32>
    %46 = arith.addf %44, %45 : vector<128x128xf32>
    %cst_16 = arith.constant dense<0xFF800000> : vector<128xf32>
    %47 = vector.multi_reduction <maximumf>, %46, %cst_16 [1] : vector<128x128xf32> to vector<128xf32>
    %48 = vector.shape_cast %47 : vector<128xf32> to vector<128x1xf32>
    %49 = vector.broadcast %48 : vector<128x1xf32> to vector<128x128xf32>
    %50 = arith.subf %46, %49 : vector<128x128xf32>
    %51 = math.exp %50 : vector<128x128xf32>
    %cst_17 = arith.constant dense<0.000000e+00> : vector<128xf32>
    %52 = vector.multi_reduction <add>, %51, %cst_17 [1] : vector<128x128xf32> to vector<128xf32>
    %53 = vector.shape_cast %52 : vector<128xf32> to vector<128x1xf32>
    %54 = tpu.reciprocal %53 {approx = true} : vector<128x1xf32> -> vector<128x1xf32>
    %55 = vector.broadcast %54 : vector<128x1xf32> to vector<128x128xf32>
    %56 = arith.mulf %51, %55 : vector<128x128xf32>
    %cst_18 = arith.constant dense<0.000000e+00> : vector<128x4xf32>
    %57 = tpu.matmul %56, %43, %cst_18 {dimension_numbers = #tpu.dot_dimension_numbers<[1], [0], [0], [1], [0, 0, 1, 1], [], []>} : vector<128x128xf32>, vector<128x4xf32>, vector<128x4xf32> -> vector<128x4xf32>
    %58 = vector.extract_strided_slice %57 {offsets = [0, 0], sizes = [16, 4], strides = [1, 1]} : vector<128x4xf32> to vector<16x4xf32>
    %59 = vector.extract_strided_slice %57 {offsets = [16, 0], sizes = [16, 4], strides = [1, 1]} : vector<128x4xf32> to vector<16x4xf32>
    %60 = vector.extract_strided_slice %57 {offsets = [32, 0], sizes = [16, 4], strides = [1, 1]} : vector<128x4xf32> to vector<16x4xf32>
    %61 = vector.extract_strided_slice %57 {offsets = [48, 0], sizes = [16, 4], strides = [1, 1]} : vector<128x4xf32> to vector<16x4xf32>
    %62 = vector.extract_strided_slice %57 {offsets = [64, 0], sizes = [16, 4], strides = [1, 1]} : vector<128x4xf32> to vector<16x4xf32>
    %63 = vector.extract_strided_slice %57 {offsets = [80, 0], sizes = [16, 4], strides = [1, 1]} : vector<128x4xf32> to vector<16x4xf32>
    %64 = vector.extract_strided_slice %57 {offsets = [96, 0], sizes = [16, 4], strides = [1, 1]} : vector<128x4xf32> to vector<16x4xf32>
    %65 = vector.extract_strided_slice %57 {offsets = [112, 0], sizes = [16, 4], strides = [1, 1]} : vector<128x4xf32> to vector<16x4xf32>
    %66 = tpu.concatenate %58, %59, %60, %61, %62, %63, %64, %65 in 1 : vector<16x4xf32>, vector<16x4xf32>, vector<16x4xf32>, vector<16x4xf32>, vector<16x4xf32>, vector<16x4xf32>, vector<16x4xf32>, vector<16x4xf32> -> vector<16x32xf32>
    %67 = arith.truncf %66 : vector<16x32xf32> to vector<16x32xbf16>
    %c0_19 = arith.constant 0 : index
    %c0_20 = arith.constant 0 : index
    %c0_21 = arith.constant 0 : index
    %68 = vector.load %arg6[%c0_19, %c0_20, %c0_21] : memref<5x32x32xbf16, #tpu.memory_space<vmem>>, vector<1x32x32xbf16>
    %69 = vector.shape_cast %68 : vector<1x32x32xbf16> to vector<32x32xbf16>
    %cst_22 = arith.constant dense<0.000000e+00> : vector<16x32xf32>
    %70 = tpu.matmul %67, %69, %cst_22 {dimension_numbers = #tpu.dot_dimension_numbers<[1], [0], [0], [1], [0, 0, 1, 1], [], []>} : vector<16x32xbf16>, vector<32x32xbf16>, vector<16x32xf32> -> vector<16x32xf32>
    %c0_23 = arith.constant 0 : index
    %c0_24 = arith.constant 0 : index
    %c0_25 = arith.constant 0 : index
    %71 = vector.load %arg7[%c0_23, %c0_24, %c0_25] : memref<5x1x32xf32, #tpu.memory_space<vmem>>, vector<1x1x32xf32>
    %72 = vector.shape_cast %71 : vector<1x1x32xf32> to vector<1x32xf32>
    %73 = vector.broadcast %72 : vector<1x32xf32> to vector<16x32xf32>
    %74 = arith.addf %70, %73 : vector<16x32xf32>
    %75 = arith.addf %6, %74 : vector<16x32xf32>
    %c0_26 = arith.constant 0 : index
    %c0_27 = arith.constant 0 : index
    %c0_28 = arith.constant 0 : index
    %76 = vector.load %arg8[%c0_26, %c0_27, %c0_28] : memref<5x1x32xf32, #tpu.memory_space<vmem>>, vector<1x1x32xf32>
    %77 = vector.shape_cast %76 : vector<1x1x32xf32> to vector<1x32xf32>
    %c0_29 = arith.constant 0 : index
    %c0_30 = arith.constant 0 : index
    %c0_31 = arith.constant 0 : index
    %78 = vector.load %arg9[%c0_29, %c0_30, %c0_31] : memref<5x1x32xf32, #tpu.memory_space<vmem>>, vector<1x1x32xf32>
    %79 = vector.shape_cast %78 : vector<1x1x32xf32> to vector<1x32xf32>
    %cst_32 = arith.constant dense<0.000000e+00> : vector<16xf32>
    %80 = vector.multi_reduction <add>, %75, %cst_32 [1] : vector<16x32xf32> to vector<16xf32>
    %81 = vector.shape_cast %80 : vector<16xf32> to vector<16x1xf32>
    %cst_33 = arith.constant 3.200000e+01 : f32
    %82 = vector.broadcast %cst_33 : f32 to vector<16x1xf32>
    %83 = arith.divf %81, %82 : vector<16x1xf32>
    %84 = vector.broadcast %83 : vector<16x1xf32> to vector<16x32xf32>
    %85 = arith.subf %75, %84 : vector<16x32xf32>
    %86 = arith.mulf %85, %85 : vector<16x32xf32>
    %cst_34 = arith.constant dense<0.000000e+00> : vector<16xf32>
    %87 = vector.multi_reduction <add>, %86, %cst_34 [1] : vector<16x32xf32> to vector<16xf32>
    %88 = vector.shape_cast %87 : vector<16xf32> to vector<16x1xf32>
    %cst_35 = arith.constant 3.200000e+01 : f32
    %89 = vector.broadcast %cst_35 : f32 to vector<16x1xf32>
    %90 = arith.divf %88, %89 : vector<16x1xf32>
    %91 = vector.broadcast %83 : vector<16x1xf32> to vector<16x32xf32>
    %92 = arith.subf %75, %91 : vector<16x32xf32>
    %cst_36 = arith.constant 9.99999974E-6 : f32
    %93 = vector.broadcast %cst_36 : f32 to vector<16x1xf32>
    %94 = arith.addf %90, %93 : vector<16x1xf32>
    %95 = math.rsqrt %94 : vector<16x1xf32>
    %96 = vector.broadcast %95 : vector<16x1xf32> to vector<16x32xf32>
    %97 = arith.mulf %92, %96 : vector<16x32xf32>
    %98 = vector.broadcast %77 : vector<1x32xf32> to vector<16x32xf32>
    %99 = arith.mulf %97, %98 : vector<16x32xf32>
    %100 = vector.broadcast %79 : vector<1x32xf32> to vector<16x32xf32>
    %101 = arith.addf %99, %100 : vector<16x32xf32>
    %102 = arith.truncf %101 : vector<16x32xf32> to vector<16x32xbf16>
    %c0_37 = arith.constant 0 : index
    %c0_38 = arith.constant 0 : index
    %c0_39 = arith.constant 0 : index
    %103 = vector.load %arg12[%c0_37, %c0_38, %c0_39] : memref<5x32x128xbf16, #tpu.memory_space<vmem>>, vector<1x32x128xbf16>
    %104 = vector.shape_cast %103 : vector<1x32x128xbf16> to vector<32x128xbf16>
    %cst_40 = arith.constant dense<0.000000e+00> : vector<16x128xf32>
    %105 = tpu.matmul %102, %104, %cst_40 {dimension_numbers = #tpu.dot_dimension_numbers<[1], [0], [0], [1], [0, 0, 1, 1], [], []>} : vector<16x32xbf16>, vector<32x128xbf16>, vector<16x128xf32> -> vector<16x128xf32>
    %c0_41 = arith.constant 0 : index
    %c0_42 = arith.constant 0 : index
    %c0_43 = arith.constant 0 : index
    %106 = vector.load %arg13[%c0_41, %c0_42, %c0_43] : memref<5x1x128xf32, #tpu.memory_space<vmem>>, vector<1x1x128xf32>
    %107 = vector.shape_cast %106 : vector<1x1x128xf32> to vector<1x128xf32>
    %108 = vector.broadcast %107 : vector<1x128xf32> to vector<16x128xf32>
    %109 = arith.addf %105, %108 : vector<16x128xf32>
    %cst_44 = arith.constant 0.000000e+00 : f32
    %110 = vector.broadcast %cst_44 : f32 to vector<16x128xf32>
    %111 = arith.maximumf %109, %110 : vector<16x128xf32>
    %112 = arith.truncf %111 : vector<16x128xf32> to vector<16x128xbf16>
    %c0_45 = arith.constant 0 : index
    %c0_46 = arith.constant 0 : index
    %c0_47 = arith.constant 0 : index
    %113 = vector.load %arg14[%c0_45, %c0_46, %c0_47] : memref<5x128x32xbf16, #tpu.memory_space<vmem>>, vector<1x128x32xbf16>
    %114 = vector.shape_cast %113 : vector<1x128x32xbf16> to vector<128x32xbf16>
    %cst_48 = arith.constant dense<0.000000e+00> : vector<16x32xf32>
    %115 = tpu.matmul %112, %114, %cst_48 {dimension_numbers = #tpu.dot_dimension_numbers<[1], [0], [0], [1], [0, 0, 1, 1], [], []>} : vector<16x128xbf16>, vector<128x32xbf16>, vector<16x32xf32> -> vector<16x32xf32>
    %c0_49 = arith.constant 0 : index
    %c0_50 = arith.constant 0 : index
    %c0_51 = arith.constant 0 : index
    %116 = vector.load %arg15[%c0_49, %c0_50, %c0_51] : memref<5x1x32xf32, #tpu.memory_space<vmem>>, vector<1x1x32xf32>
    %117 = vector.shape_cast %116 : vector<1x1x32xf32> to vector<1x32xf32>
    %118 = vector.broadcast %117 : vector<1x32xf32> to vector<16x32xf32>
    %119 = arith.addf %115, %118 : vector<16x32xf32>
    %120 = arith.addf %101, %119 : vector<16x32xf32>
    %c0_52 = arith.constant 0 : index
    %c0_53 = arith.constant 0 : index
    %c0_54 = arith.constant 0 : index
    %121 = vector.load %arg10[%c0_52, %c0_53, %c0_54] : memref<5x1x32xf32, #tpu.memory_space<vmem>>, vector<1x1x32xf32>
    %122 = vector.shape_cast %121 : vector<1x1x32xf32> to vector<1x32xf32>
    %c0_55 = arith.constant 0 : index
    %c0_56 = arith.constant 0 : index
    %c0_57 = arith.constant 0 : index
    %123 = vector.load %arg11[%c0_55, %c0_56, %c0_57] : memref<5x1x32xf32, #tpu.memory_space<vmem>>, vector<1x1x32xf32>
    %124 = vector.shape_cast %123 : vector<1x1x32xf32> to vector<1x32xf32>
    %cst_58 = arith.constant dense<0.000000e+00> : vector<16xf32>
    %125 = vector.multi_reduction <add>, %120, %cst_58 [1] : vector<16x32xf32> to vector<16xf32>
    %126 = vector.shape_cast %125 : vector<16xf32> to vector<16x1xf32>
    %cst_59 = arith.constant 3.200000e+01 : f32
    %127 = vector.broadcast %cst_59 : f32 to vector<16x1xf32>
    %128 = arith.divf %126, %127 : vector<16x1xf32>
    %129 = vector.broadcast %128 : vector<16x1xf32> to vector<16x32xf32>
    %130 = arith.subf %120, %129 : vector<16x32xf32>
    %131 = arith.mulf %130, %130 : vector<16x32xf32>
    %cst_60 = arith.constant dense<0.000000e+00> : vector<16xf32>
    %132 = vector.multi_reduction <add>, %131, %cst_60 [1] : vector<16x32xf32> to vector<16xf32>
    %133 = vector.shape_cast %132 : vector<16xf32> to vector<16x1xf32>
    %cst_61 = arith.constant 3.200000e+01 : f32
    %134 = vector.broadcast %cst_61 : f32 to vector<16x1xf32>
    %135 = arith.divf %133, %134 : vector<16x1xf32>
    %136 = vector.broadcast %128 : vector<16x1xf32> to vector<16x32xf32>
    %137 = arith.subf %120, %136 : vector<16x32xf32>
    %cst_62 = arith.constant 9.99999974E-6 : f32
    %138 = vector.broadcast %cst_62 : f32 to vector<16x1xf32>
    %139 = arith.addf %135, %138 : vector<16x1xf32>
    %140 = math.rsqrt %139 : vector<16x1xf32>
    %141 = vector.broadcast %140 : vector<16x1xf32> to vector<16x32xf32>
    %142 = arith.mulf %137, %141 : vector<16x32xf32>
    %143 = vector.broadcast %122 : vector<1x32xf32> to vector<16x32xf32>
    %144 = arith.mulf %142, %143 : vector<16x32xf32>
    %145 = vector.broadcast %124 : vector<1x32xf32> to vector<16x32xf32>
    %146 = arith.addf %144, %145 : vector<16x32xf32>
    %147 = arith.truncf %146 : vector<16x32xf32> to vector<16x32xbf16>
    %c1 = arith.constant 1 : index
    %c0_63 = arith.constant 0 : index
    %c0_64 = arith.constant 0 : index
    %148 = vector.load %arg4[%c1, %c0_63, %c0_64] : memref<5x32x96xbf16, #tpu.memory_space<vmem>>, vector<1x32x96xbf16>
    %149 = vector.shape_cast %148 : vector<1x32x96xbf16> to vector<32x96xbf16>
    %cst_65 = arith.constant dense<0.000000e+00> : vector<16x96xf32>
    %150 = tpu.matmul %147, %149, %cst_65 {dimension_numbers = #tpu.dot_dimension_numbers<[1], [0], [0], [1], [0, 0, 1, 1], [], []>} : vector<16x32xbf16>, vector<32x96xbf16>, vector<16x96xf32> -> vector<16x96xf32>
    %c1_66 = arith.constant 1 : index
    %c0_67 = arith.constant 0 : index
    %c0_68 = arith.constant 0 : index
    %151 = vector.load %arg5[%c1_66, %c0_67, %c0_68] : memref<5x1x96xf32, #tpu.memory_space<vmem>>, vector<1x1x96xf32>
    %152 = vector.shape_cast %151 : vector<1x1x96xf32> to vector<1x96xf32>
    %153 = vector.broadcast %152 : vector<1x96xf32> to vector<16x96xf32>
    %154 = arith.addf %150, %153 : vector<16x96xf32>
    %155 = vector.extract_strided_slice %154 {offsets = [0, 0], sizes = [16, 4], strides = [1, 1]} : vector<16x96xf32> to vector<16x4xf32>
    %156 = vector.extract_strided_slice %154 {offsets = [0, 4], sizes = [16, 4], strides = [1, 1]} : vector<16x96xf32> to vector<16x4xf32>
    %157 = vector.extract_strided_slice %154 {offsets = [0, 8], sizes = [16, 4], strides = [1, 1]} : vector<16x96xf32> to vector<16x4xf32>
    %158 = vector.extract_strided_slice %154 {offsets = [0, 12], sizes = [16, 4], strides = [1, 1]} : vector<16x96xf32> to vector<16x4xf32>
    %159 = vector.extract_strided_slice %154 {offsets = [0, 16], sizes = [16, 4], strides = [1, 1]} : vector<16x96xf32> to vector<16x4xf32>
    %160 = vector.extract_strided_slice %154 {offsets = [0, 20], sizes = [16, 4], strides = [1, 1]} : vector<16x96xf32> to vector<16x4xf32>
    %161 = vector.extract_strided_slice %154 {offsets = [0, 24], sizes = [16, 4], strides = [1, 1]} : vector<16x96xf32> to vector<16x4xf32>
    %162 = vector.extract_strided_slice %154 {offsets = [0, 28], sizes = [16, 4], strides = [1, 1]} : vector<16x96xf32> to vector<16x4xf32>
    %163 = tpu.concatenate %155, %156, %157, %158, %159, %160, %161, %162 in 0 : vector<16x4xf32>, vector<16x4xf32>, vector<16x4xf32>, vector<16x4xf32>, vector<16x4xf32>, vector<16x4xf32>, vector<16x4xf32>, vector<16x4xf32> -> vector<128x4xf32>
    %cst_69 = arith.constant 5.000000e-01 : f32
    %164 = vector.broadcast %cst_69 : f32 to vector<128x4xf32>
    %165 = arith.mulf %163, %164 : vector<128x4xf32>
    %166 = vector.extract_strided_slice %154 {offsets = [0, 32], sizes = [16, 4], strides = [1, 1]} : vector<16x96xf32> to vector<16x4xf32>
    %167 = vector.extract_strided_slice %154 {offsets = [0, 36], sizes = [16, 4], strides = [1, 1]} : vector<16x96xf32> to vector<16x4xf32>
    %168 = vector.extract_strided_slice %154 {offsets = [0, 40], sizes = [16, 4], strides = [1, 1]} : vector<16x96xf32> to vector<16x4xf32>
    %169 = vector.extract_strided_slice %154 {offsets = [0, 44], sizes = [16, 4], strides = [1, 1]} : vector<16x96xf32> to vector<16x4xf32>
    %170 = vector.extract_strided_slice %154 {offsets = [0, 48], sizes = [16, 4], strides = [1, 1]} : vector<16x96xf32> to vector<16x4xf32>
    %171 = vector.extract_strided_slice %154 {offsets = [0, 52], sizes = [16, 4], strides = [1, 1]} : vector<16x96xf32> to vector<16x4xf32>
    %172 = vector.extract_strided_slice %154 {offsets = [0, 56], sizes = [16, 4], strides = [1, 1]} : vector<16x96xf32> to vector<16x4xf32>
    %173 = vector.extract_strided_slice %154 {offsets = [0, 60], sizes = [16, 4], strides = [1, 1]} : vector<16x96xf32> to vector<16x4xf32>
    %174 = tpu.concatenate %166, %167, %168, %169, %170, %171, %172, %173 in 0 : vector<16x4xf32>, vector<16x4xf32>, vector<16x4xf32>, vector<16x4xf32>, vector<16x4xf32>, vector<16x4xf32>, vector<16x4xf32>, vector<16x4xf32> -> vector<128x4xf32>
    %175 = vector.extract_strided_slice %154 {offsets = [0, 64], sizes = [16, 4], strides = [1, 1]} : vector<16x96xf32> to vector<16x4xf32>
    %176 = vector.extract_strided_slice %154 {offsets = [0, 68], sizes = [16, 4], strides = [1, 1]} : vector<16x96xf32> to vector<16x4xf32>
    %177 = vector.extract_strided_slice %154 {offsets = [0, 72], sizes = [16, 4], strides = [1, 1]} : vector<16x96xf32> to vector<16x4xf32>
    %178 = vector.extract_strided_slice %154 {offsets = [0, 76], sizes = [16, 4], strides = [1, 1]} : vector<16x96xf32> to vector<16x4xf32>
    %179 = vector.extract_strided_slice %154 {offsets = [0, 80], sizes = [16, 4], strides = [1, 1]} : vector<16x96xf32> to vector<16x4xf32>
    %180 = vector.extract_strided_slice %154 {offsets = [0, 84], sizes = [16, 4], strides = [1, 1]} : vector<16x96xf32> to vector<16x4xf32>
    %181 = vector.extract_strided_slice %154 {offsets = [0, 88], sizes = [16, 4], strides = [1, 1]} : vector<16x96xf32> to vector<16x4xf32>
    %182 = vector.extract_strided_slice %154 {offsets = [0, 92], sizes = [16, 4], strides = [1, 1]} : vector<16x96xf32> to vector<16x4xf32>
    %183 = tpu.concatenate %175, %176, %177, %178, %179, %180, %181, %182 in 0 : vector<16x4xf32>, vector<16x4xf32>, vector<16x4xf32>, vector<16x4xf32>, vector<16x4xf32>, vector<16x4xf32>, vector<16x4xf32>, vector<16x4xf32> -> vector<128x4xf32>
    %cst_70 = arith.constant dense<0.000000e+00> : vector<128x128xf32>
    %184 = tpu.matmul %165, %174, %cst_70 {dimension_numbers = #tpu.dot_dimension_numbers<[1], [1], [0], [0], [0, 0, 1, 0], [], []>} : vector<128x4xf32>, vector<128x4xf32>, vector<128x128xf32> -> vector<128x128xf32>
    %c0_71 = arith.constant 0 : index
    %c0_72 = arith.constant 0 : index
    %185 = vector.load %arg3[%c0_71, %c0_72] : memref<128x128xf32, #tpu.memory_space<vmem>>, vector<128x128xf32>
    %186 = arith.addf %184, %185 : vector<128x128xf32>
    %cst_73 = arith.constant dense<0xFF800000> : vector<128xf32>
    %187 = vector.multi_reduction <maximumf>, %186, %cst_73 [1] : vector<128x128xf32> to vector<128xf32>
    %188 = vector.shape_cast %187 : vector<128xf32> to vector<128x1xf32>
    %189 = vector.broadcast %188 : vector<128x1xf32> to vector<128x128xf32>
    %190 = arith.subf %186, %189 : vector<128x128xf32>
    %191 = math.exp %190 : vector<128x128xf32>
    %cst_74 = arith.constant dense<0.000000e+00> : vector<128xf32>
    %192 = vector.multi_reduction <add>, %191, %cst_74 [1] : vector<128x128xf32> to vector<128xf32>
    %193 = vector.shape_cast %192 : vector<128xf32> to vector<128x1xf32>
    %194 = tpu.reciprocal %193 {approx = true} : vector<128x1xf32> -> vector<128x1xf32>
    %195 = vector.broadcast %194 : vector<128x1xf32> to vector<128x128xf32>
    %196 = arith.mulf %191, %195 : vector<128x128xf32>
    %cst_75 = arith.constant dense<0.000000e+00> : vector<128x4xf32>
    %197 = tpu.matmul %196, %183, %cst_75 {dimension_numbers = #tpu.dot_dimension_numbers<[1], [0], [0], [1], [0, 0, 1, 1], [], []>} : vector<128x128xf32>, vector<128x4xf32>, vector<128x4xf32> -> vector<128x4xf32>
    %198 = vector.extract_strided_slice %197 {offsets = [0, 0], sizes = [16, 4], strides = [1, 1]} : vector<128x4xf32> to vector<16x4xf32>
    %199 = vector.extract_strided_slice %197 {offsets = [16, 0], sizes = [16, 4], strides = [1, 1]} : vector<128x4xf32> to vector<16x4xf32>
    %200 = vector.extract_strided_slice %197 {offsets = [32, 0], sizes = [16, 4], strides = [1, 1]} : vector<128x4xf32> to vector<16x4xf32>
    %201 = vector.extract_strided_slice %197 {offsets = [48, 0], sizes = [16, 4], strides = [1, 1]} : vector<128x4xf32> to vector<16x4xf32>
    %202 = vector.extract_strided_slice %197 {offsets = [64, 0], sizes = [16, 4], strides = [1, 1]} : vector<128x4xf32> to vector<16x4xf32>
    %203 = vector.extract_strided_slice %197 {offsets = [80, 0], sizes = [16, 4], strides = [1, 1]} : vector<128x4xf32> to vector<16x4xf32>
    %204 = vector.extract_strided_slice %197 {offsets = [96, 0], sizes = [16, 4], strides = [1, 1]} : vector<128x4xf32> to vector<16x4xf32>
    %205 = vector.extract_strided_slice %197 {offsets = [112, 0], sizes = [16, 4], strides = [1, 1]} : vector<128x4xf32> to vector<16x4xf32>
    %206 = tpu.concatenate %198, %199, %200, %201, %202, %203, %204, %205 in 1 : vector<16x4xf32>, vector<16x4xf32>, vector<16x4xf32>, vector<16x4xf32>, vector<16x4xf32>, vector<16x4xf32>, vector<16x4xf32>, vector<16x4xf32> -> vector<16x32xf32>
    %207 = arith.truncf %206 : vector<16x32xf32> to vector<16x32xbf16>
    %c1_76 = arith.constant 1 : index
    %c0_77 = arith.constant 0 : index
    %c0_78 = arith.constant 0 : index
    %208 = vector.load %arg6[%c1_76, %c0_77, %c0_78] : memref<5x32x32xbf16, #tpu.memory_space<vmem>>, vector<1x32x32xbf16>
    %209 = vector.shape_cast %208 : vector<1x32x32xbf16> to vector<32x32xbf16>
    %cst_79 = arith.constant dense<0.000000e+00> : vector<16x32xf32>
    %210 = tpu.matmul %207, %209, %cst_79 {dimension_numbers = #tpu.dot_dimension_numbers<[1], [0], [0], [1], [0, 0, 1, 1], [], []>} : vector<16x32xbf16>, vector<32x32xbf16>, vector<16x32xf32> -> vector<16x32xf32>
    %c1_80 = arith.constant 1 : index
    %c0_81 = arith.constant 0 : index
    %c0_82 = arith.constant 0 : index
    %211 = vector.load %arg7[%c1_80, %c0_81, %c0_82] : memref<5x1x32xf32, #tpu.memory_space<vmem>>, vector<1x1x32xf32>
    %212 = vector.shape_cast %211 : vector<1x1x32xf32> to vector<1x32xf32>
    %213 = vector.broadcast %212 : vector<1x32xf32> to vector<16x32xf32>
    %214 = arith.addf %210, %213 : vector<16x32xf32>
    %215 = arith.addf %146, %214 : vector<16x32xf32>
    %c1_83 = arith.constant 1 : index
    %c0_84 = arith.constant 0 : index
    %c0_85 = arith.constant 0 : index
    %216 = vector.load %arg8[%c1_83, %c0_84, %c0_85] : memref<5x1x32xf32, #tpu.memory_space<vmem>>, vector<1x1x32xf32>
    %217 = vector.shape_cast %216 : vector<1x1x32xf32> to vector<1x32xf32>
    %c1_86 = arith.constant 1 : index
    %c0_87 = arith.constant 0 : index
    %c0_88 = arith.constant 0 : index
    %218 = vector.load %arg9[%c1_86, %c0_87, %c0_88] : memref<5x1x32xf32, #tpu.memory_space<vmem>>, vector<1x1x32xf32>
    %219 = vector.shape_cast %218 : vector<1x1x32xf32> to vector<1x32xf32>
    %cst_89 = arith.constant dense<0.000000e+00> : vector<16xf32>
    %220 = vector.multi_reduction <add>, %215, %cst_89 [1] : vector<16x32xf32> to vector<16xf32>
    %221 = vector.shape_cast %220 : vector<16xf32> to vector<16x1xf32>
    %cst_90 = arith.constant 3.200000e+01 : f32
    %222 = vector.broadcast %cst_90 : f32 to vector<16x1xf32>
    %223 = arith.divf %221, %222 : vector<16x1xf32>
    %224 = vector.broadcast %223 : vector<16x1xf32> to vector<16x32xf32>
    %225 = arith.subf %215, %224 : vector<16x32xf32>
    %226 = arith.mulf %225, %225 : vector<16x32xf32>
    %cst_91 = arith.constant dense<0.000000e+00> : vector<16xf32>
    %227 = vector.multi_reduction <add>, %226, %cst_91 [1] : vector<16x32xf32> to vector<16xf32>
    %228 = vector.shape_cast %227 : vector<16xf32> to vector<16x1xf32>
    %cst_92 = arith.constant 3.200000e+01 : f32
    %229 = vector.broadcast %cst_92 : f32 to vector<16x1xf32>
    %230 = arith.divf %228, %229 : vector<16x1xf32>
    %231 = vector.broadcast %223 : vector<16x1xf32> to vector<16x32xf32>
    %232 = arith.subf %215, %231 : vector<16x32xf32>
    %cst_93 = arith.constant 9.99999974E-6 : f32
    %233 = vector.broadcast %cst_93 : f32 to vector<16x1xf32>
    %234 = arith.addf %230, %233 : vector<16x1xf32>
    %235 = math.rsqrt %234 : vector<16x1xf32>
    %236 = vector.broadcast %235 : vector<16x1xf32> to vector<16x32xf32>
    %237 = arith.mulf %232, %236 : vector<16x32xf32>
    %238 = vector.broadcast %217 : vector<1x32xf32> to vector<16x32xf32>
    %239 = arith.mulf %237, %238 : vector<16x32xf32>
    %240 = vector.broadcast %219 : vector<1x32xf32> to vector<16x32xf32>
    %241 = arith.addf %239, %240 : vector<16x32xf32>
    %242 = arith.truncf %241 : vector<16x32xf32> to vector<16x32xbf16>
    %c1_94 = arith.constant 1 : index
    %c0_95 = arith.constant 0 : index
    %c0_96 = arith.constant 0 : index
    %243 = vector.load %arg12[%c1_94, %c0_95, %c0_96] : memref<5x32x128xbf16, #tpu.memory_space<vmem>>, vector<1x32x128xbf16>
    %244 = vector.shape_cast %243 : vector<1x32x128xbf16> to vector<32x128xbf16>
    %cst_97 = arith.constant dense<0.000000e+00> : vector<16x128xf32>
    %245 = tpu.matmul %242, %244, %cst_97 {dimension_numbers = #tpu.dot_dimension_numbers<[1], [0], [0], [1], [0, 0, 1, 1], [], []>} : vector<16x32xbf16>, vector<32x128xbf16>, vector<16x128xf32> -> vector<16x128xf32>
    %c1_98 = arith.constant 1 : index
    %c0_99 = arith.constant 0 : index
    %c0_100 = arith.constant 0 : index
    %246 = vector.load %arg13[%c1_98, %c0_99, %c0_100] : memref<5x1x128xf32, #tpu.memory_space<vmem>>, vector<1x1x128xf32>
    %247 = vector.shape_cast %246 : vector<1x1x128xf32> to vector<1x128xf32>
    %248 = vector.broadcast %247 : vector<1x128xf32> to vector<16x128xf32>
    %249 = arith.addf %245, %248 : vector<16x128xf32>
    %cst_101 = arith.constant 0.000000e+00 : f32
    %250 = vector.broadcast %cst_101 : f32 to vector<16x128xf32>
    %251 = arith.maximumf %249, %250 : vector<16x128xf32>
    %252 = arith.truncf %251 : vector<16x128xf32> to vector<16x128xbf16>
    %c1_102 = arith.constant 1 : index
    %c0_103 = arith.constant 0 : index
    %c0_104 = arith.constant 0 : index
    %253 = vector.load %arg14[%c1_102, %c0_103, %c0_104] : memref<5x128x32xbf16, #tpu.memory_space<vmem>>, vector<1x128x32xbf16>
    %254 = vector.shape_cast %253 : vector<1x128x32xbf16> to vector<128x32xbf16>
    %cst_105 = arith.constant dense<0.000000e+00> : vector<16x32xf32>
    %255 = tpu.matmul %252, %254, %cst_105 {dimension_numbers = #tpu.dot_dimension_numbers<[1], [0], [0], [1], [0, 0, 1, 1], [], []>} : vector<16x128xbf16>, vector<128x32xbf16>, vector<16x32xf32> -> vector<16x32xf32>
    %c1_106 = arith.constant 1 : index
    %c0_107 = arith.constant 0 : index
    %c0_108 = arith.constant 0 : index
    %256 = vector.load %arg15[%c1_106, %c0_107, %c0_108] : memref<5x1x32xf32, #tpu.memory_space<vmem>>, vector<1x1x32xf32>
    %257 = vector.shape_cast %256 : vector<1x1x32xf32> to vector<1x32xf32>
    %258 = vector.broadcast %257 : vector<1x32xf32> to vector<16x32xf32>
    %259 = arith.addf %255, %258 : vector<16x32xf32>
    %260 = arith.addf %241, %259 : vector<16x32xf32>
    %c1_109 = arith.constant 1 : index
    %c0_110 = arith.constant 0 : index
    %c0_111 = arith.constant 0 : index
    %261 = vector.load %arg10[%c1_109, %c0_110, %c0_111] : memref<5x1x32xf32, #tpu.memory_space<vmem>>, vector<1x1x32xf32>
    %262 = vector.shape_cast %261 : vector<1x1x32xf32> to vector<1x32xf32>
    %c1_112 = arith.constant 1 : index
    %c0_113 = arith.constant 0 : index
    %c0_114 = arith.constant 0 : index
    %263 = vector.load %arg11[%c1_112, %c0_113, %c0_114] : memref<5x1x32xf32, #tpu.memory_space<vmem>>, vector<1x1x32xf32>
    %264 = vector.shape_cast %263 : vector<1x1x32xf32> to vector<1x32xf32>
    %cst_115 = arith.constant dense<0.000000e+00> : vector<16xf32>
    %265 = vector.multi_reduction <add>, %260, %cst_115 [1] : vector<16x32xf32> to vector<16xf32>
    %266 = vector.shape_cast %265 : vector<16xf32> to vector<16x1xf32>
    %cst_116 = arith.constant 3.200000e+01 : f32
    %267 = vector.broadcast %cst_116 : f32 to vector<16x1xf32>
    %268 = arith.divf %266, %267 : vector<16x1xf32>
    %269 = vector.broadcast %268 : vector<16x1xf32> to vector<16x32xf32>
    %270 = arith.subf %260, %269 : vector<16x32xf32>
    %271 = arith.mulf %270, %270 : vector<16x32xf32>
    %cst_117 = arith.constant dense<0.000000e+00> : vector<16xf32>
    %272 = vector.multi_reduction <add>, %271, %cst_117 [1] : vector<16x32xf32> to vector<16xf32>
    %273 = vector.shape_cast %272 : vector<16xf32> to vector<16x1xf32>
    %cst_118 = arith.constant 3.200000e+01 : f32
    %274 = vector.broadcast %cst_118 : f32 to vector<16x1xf32>
    %275 = arith.divf %273, %274 : vector<16x1xf32>
    %276 = vector.broadcast %268 : vector<16x1xf32> to vector<16x32xf32>
    %277 = arith.subf %260, %276 : vector<16x32xf32>
    %cst_119 = arith.constant 9.99999974E-6 : f32
    %278 = vector.broadcast %cst_119 : f32 to vector<16x1xf32>
    %279 = arith.addf %275, %278 : vector<16x1xf32>
    %280 = math.rsqrt %279 : vector<16x1xf32>
    %281 = vector.broadcast %280 : vector<16x1xf32> to vector<16x32xf32>
    %282 = arith.mulf %277, %281 : vector<16x32xf32>
    %283 = vector.broadcast %262 : vector<1x32xf32> to vector<16x32xf32>
    %284 = arith.mulf %282, %283 : vector<16x32xf32>
    %285 = vector.broadcast %264 : vector<1x32xf32> to vector<16x32xf32>
    %286 = arith.addf %284, %285 : vector<16x32xf32>
    %287 = arith.truncf %286 : vector<16x32xf32> to vector<16x32xbf16>
    %c2 = arith.constant 2 : index
    %c0_120 = arith.constant 0 : index
    %c0_121 = arith.constant 0 : index
    %288 = vector.load %arg4[%c2, %c0_120, %c0_121] : memref<5x32x96xbf16, #tpu.memory_space<vmem>>, vector<1x32x96xbf16>
    %289 = vector.shape_cast %288 : vector<1x32x96xbf16> to vector<32x96xbf16>
    %cst_122 = arith.constant dense<0.000000e+00> : vector<16x96xf32>
    %290 = tpu.matmul %287, %289, %cst_122 {dimension_numbers = #tpu.dot_dimension_numbers<[1], [0], [0], [1], [0, 0, 1, 1], [], []>} : vector<16x32xbf16>, vector<32x96xbf16>, vector<16x96xf32> -> vector<16x96xf32>
    %c2_123 = arith.constant 2 : index
    %c0_124 = arith.constant 0 : index
    %c0_125 = arith.constant 0 : index
    %291 = vector.load %arg5[%c2_123, %c0_124, %c0_125] : memref<5x1x96xf32, #tpu.memory_space<vmem>>, vector<1x1x96xf32>
    %292 = vector.shape_cast %291 : vector<1x1x96xf32> to vector<1x96xf32>
    %293 = vector.broadcast %292 : vector<1x96xf32> to vector<16x96xf32>
    %294 = arith.addf %290, %293 : vector<16x96xf32>
    %295 = vector.extract_strided_slice %294 {offsets = [0, 0], sizes = [16, 4], strides = [1, 1]} : vector<16x96xf32> to vector<16x4xf32>
    %296 = vector.extract_strided_slice %294 {offsets = [0, 4], sizes = [16, 4], strides = [1, 1]} : vector<16x96xf32> to vector<16x4xf32>
    %297 = vector.extract_strided_slice %294 {offsets = [0, 8], sizes = [16, 4], strides = [1, 1]} : vector<16x96xf32> to vector<16x4xf32>
    %298 = vector.extract_strided_slice %294 {offsets = [0, 12], sizes = [16, 4], strides = [1, 1]} : vector<16x96xf32> to vector<16x4xf32>
    %299 = vector.extract_strided_slice %294 {offsets = [0, 16], sizes = [16, 4], strides = [1, 1]} : vector<16x96xf32> to vector<16x4xf32>
    %300 = vector.extract_strided_slice %294 {offsets = [0, 20], sizes = [16, 4], strides = [1, 1]} : vector<16x96xf32> to vector<16x4xf32>
    %301 = vector.extract_strided_slice %294 {offsets = [0, 24], sizes = [16, 4], strides = [1, 1]} : vector<16x96xf32> to vector<16x4xf32>
    %302 = vector.extract_strided_slice %294 {offsets = [0, 28], sizes = [16, 4], strides = [1, 1]} : vector<16x96xf32> to vector<16x4xf32>
    %303 = tpu.concatenate %295, %296, %297, %298, %299, %300, %301, %302 in 0 : vector<16x4xf32>, vector<16x4xf32>, vector<16x4xf32>, vector<16x4xf32>, vector<16x4xf32>, vector<16x4xf32>, vector<16x4xf32>, vector<16x4xf32> -> vector<128x4xf32>
    %cst_126 = arith.constant 5.000000e-01 : f32
    %304 = vector.broadcast %cst_126 : f32 to vector<128x4xf32>
    %305 = arith.mulf %303, %304 : vector<128x4xf32>
    %306 = vector.extract_strided_slice %294 {offsets = [0, 32], sizes = [16, 4], strides = [1, 1]} : vector<16x96xf32> to vector<16x4xf32>
    %307 = vector.extract_strided_slice %294 {offsets = [0, 36], sizes = [16, 4], strides = [1, 1]} : vector<16x96xf32> to vector<16x4xf32>
    %308 = vector.extract_strided_slice %294 {offsets = [0, 40], sizes = [16, 4], strides = [1, 1]} : vector<16x96xf32> to vector<16x4xf32>
    %309 = vector.extract_strided_slice %294 {offsets = [0, 44], sizes = [16, 4], strides = [1, 1]} : vector<16x96xf32> to vector<16x4xf32>
    %310 = vector.extract_strided_slice %294 {offsets = [0, 48], sizes = [16, 4], strides = [1, 1]} : vector<16x96xf32> to vector<16x4xf32>
    %311 = vector.extract_strided_slice %294 {offsets = [0, 52], sizes = [16, 4], strides = [1, 1]} : vector<16x96xf32> to vector<16x4xf32>
    %312 = vector.extract_strided_slice %294 {offsets = [0, 56], sizes = [16, 4], strides = [1, 1]} : vector<16x96xf32> to vector<16x4xf32>
    %313 = vector.extract_strided_slice %294 {offsets = [0, 60], sizes = [16, 4], strides = [1, 1]} : vector<16x96xf32> to vector<16x4xf32>
    %314 = tpu.concatenate %306, %307, %308, %309, %310, %311, %312, %313 in 0 : vector<16x4xf32>, vector<16x4xf32>, vector<16x4xf32>, vector<16x4xf32>, vector<16x4xf32>, vector<16x4xf32>, vector<16x4xf32>, vector<16x4xf32> -> vector<128x4xf32>
    %315 = vector.extract_strided_slice %294 {offsets = [0, 64], sizes = [16, 4], strides = [1, 1]} : vector<16x96xf32> to vector<16x4xf32>
    %316 = vector.extract_strided_slice %294 {offsets = [0, 68], sizes = [16, 4], strides = [1, 1]} : vector<16x96xf32> to vector<16x4xf32>
    %317 = vector.extract_strided_slice %294 {offsets = [0, 72], sizes = [16, 4], strides = [1, 1]} : vector<16x96xf32> to vector<16x4xf32>
    %318 = vector.extract_strided_slice %294 {offsets = [0, 76], sizes = [16, 4], strides = [1, 1]} : vector<16x96xf32> to vector<16x4xf32>
    %319 = vector.extract_strided_slice %294 {offsets = [0, 80], sizes = [16, 4], strides = [1, 1]} : vector<16x96xf32> to vector<16x4xf32>
    %320 = vector.extract_strided_slice %294 {offsets = [0, 84], sizes = [16, 4], strides = [1, 1]} : vector<16x96xf32> to vector<16x4xf32>
    %321 = vector.extract_strided_slice %294 {offsets = [0, 88], sizes = [16, 4], strides = [1, 1]} : vector<16x96xf32> to vector<16x4xf32>
    %322 = vector.extract_strided_slice %294 {offsets = [0, 92], sizes = [16, 4], strides = [1, 1]} : vector<16x96xf32> to vector<16x4xf32>
    %323 = tpu.concatenate %315, %316, %317, %318, %319, %320, %321, %322 in 0 : vector<16x4xf32>, vector<16x4xf32>, vector<16x4xf32>, vector<16x4xf32>, vector<16x4xf32>, vector<16x4xf32>, vector<16x4xf32>, vector<16x4xf32> -> vector<128x4xf32>
    %cst_127 = arith.constant dense<0.000000e+00> : vector<128x128xf32>
    %324 = tpu.matmul %305, %314, %cst_127 {dimension_numbers = #tpu.dot_dimension_numbers<[1], [1], [0], [0], [0, 0, 1, 0], [], []>} : vector<128x4xf32>, vector<128x4xf32>, vector<128x128xf32> -> vector<128x128xf32>
    %c0_128 = arith.constant 0 : index
    %c0_129 = arith.constant 0 : index
    %325 = vector.load %arg3[%c0_128, %c0_129] : memref<128x128xf32, #tpu.memory_space<vmem>>, vector<128x128xf32>
    %326 = arith.addf %324, %325 : vector<128x128xf32>
    %cst_130 = arith.constant dense<0xFF800000> : vector<128xf32>
    %327 = vector.multi_reduction <maximumf>, %326, %cst_130 [1] : vector<128x128xf32> to vector<128xf32>
    %328 = vector.shape_cast %327 : vector<128xf32> to vector<128x1xf32>
    %329 = vector.broadcast %328 : vector<128x1xf32> to vector<128x128xf32>
    %330 = arith.subf %326, %329 : vector<128x128xf32>
    %331 = math.exp %330 : vector<128x128xf32>
    %cst_131 = arith.constant dense<0.000000e+00> : vector<128xf32>
    %332 = vector.multi_reduction <add>, %331, %cst_131 [1] : vector<128x128xf32> to vector<128xf32>
    %333 = vector.shape_cast %332 : vector<128xf32> to vector<128x1xf32>
    %334 = tpu.reciprocal %333 {approx = true} : vector<128x1xf32> -> vector<128x1xf32>
    %335 = vector.broadcast %334 : vector<128x1xf32> to vector<128x128xf32>
    %336 = arith.mulf %331, %335 : vector<128x128xf32>
    %cst_132 = arith.constant dense<0.000000e+00> : vector<128x4xf32>
    %337 = tpu.matmul %336, %323, %cst_132 {dimension_numbers = #tpu.dot_dimension_numbers<[1], [0], [0], [1], [0, 0, 1, 1], [], []>} : vector<128x128xf32>, vector<128x4xf32>, vector<128x4xf32> -> vector<128x4xf32>
    %338 = vector.extract_strided_slice %337 {offsets = [0, 0], sizes = [16, 4], strides = [1, 1]} : vector<128x4xf32> to vector<16x4xf32>
    %339 = vector.extract_strided_slice %337 {offsets = [16, 0], sizes = [16, 4], strides = [1, 1]} : vector<128x4xf32> to vector<16x4xf32>
    %340 = vector.extract_strided_slice %337 {offsets = [32, 0], sizes = [16, 4], strides = [1, 1]} : vector<128x4xf32> to vector<16x4xf32>
    %341 = vector.extract_strided_slice %337 {offsets = [48, 0], sizes = [16, 4], strides = [1, 1]} : vector<128x4xf32> to vector<16x4xf32>
    %342 = vector.extract_strided_slice %337 {offsets = [64, 0], sizes = [16, 4], strides = [1, 1]} : vector<128x4xf32> to vector<16x4xf32>
    %343 = vector.extract_strided_slice %337 {offsets = [80, 0], sizes = [16, 4], strides = [1, 1]} : vector<128x4xf32> to vector<16x4xf32>
    %344 = vector.extract_strided_slice %337 {offsets = [96, 0], sizes = [16, 4], strides = [1, 1]} : vector<128x4xf32> to vector<16x4xf32>
    %345 = vector.extract_strided_slice %337 {offsets = [112, 0], sizes = [16, 4], strides = [1, 1]} : vector<128x4xf32> to vector<16x4xf32>
    %346 = tpu.concatenate %338, %339, %340, %341, %342, %343, %344, %345 in 1 : vector<16x4xf32>, vector<16x4xf32>, vector<16x4xf32>, vector<16x4xf32>, vector<16x4xf32>, vector<16x4xf32>, vector<16x4xf32>, vector<16x4xf32> -> vector<16x32xf32>
    %347 = arith.truncf %346 : vector<16x32xf32> to vector<16x32xbf16>
    %c2_133 = arith.constant 2 : index
    %c0_134 = arith.constant 0 : index
    %c0_135 = arith.constant 0 : index
    %348 = vector.load %arg6[%c2_133, %c0_134, %c0_135] : memref<5x32x32xbf16, #tpu.memory_space<vmem>>, vector<1x32x32xbf16>
    %349 = vector.shape_cast %348 : vector<1x32x32xbf16> to vector<32x32xbf16>
    %cst_136 = arith.constant dense<0.000000e+00> : vector<16x32xf32>
    %350 = tpu.matmul %347, %349, %cst_136 {dimension_numbers = #tpu.dot_dimension_numbers<[1], [0], [0], [1], [0, 0, 1, 1], [], []>} : vector<16x32xbf16>, vector<32x32xbf16>, vector<16x32xf32> -> vector<16x32xf32>
    %c2_137 = arith.constant 2 : index
    %c0_138 = arith.constant 0 : index
    %c0_139 = arith.constant 0 : index
    %351 = vector.load %arg7[%c2_137, %c0_138, %c0_139] : memref<5x1x32xf32, #tpu.memory_space<vmem>>, vector<1x1x32xf32>
    %352 = vector.shape_cast %351 : vector<1x1x32xf32> to vector<1x32xf32>
    %353 = vector.broadcast %352 : vector<1x32xf32> to vector<16x32xf32>
    %354 = arith.addf %350, %353 : vector<16x32xf32>
    %355 = arith.addf %286, %354 : vector<16x32xf32>
    %c2_140 = arith.constant 2 : index
    %c0_141 = arith.constant 0 : index
    %c0_142 = arith.constant 0 : index
    %356 = vector.load %arg8[%c2_140, %c0_141, %c0_142] : memref<5x1x32xf32, #tpu.memory_space<vmem>>, vector<1x1x32xf32>
    %357 = vector.shape_cast %356 : vector<1x1x32xf32> to vector<1x32xf32>
    %c2_143 = arith.constant 2 : index
    %c0_144 = arith.constant 0 : index
    %c0_145 = arith.constant 0 : index
    %358 = vector.load %arg9[%c2_143, %c0_144, %c0_145] : memref<5x1x32xf32, #tpu.memory_space<vmem>>, vector<1x1x32xf32>
    %359 = vector.shape_cast %358 : vector<1x1x32xf32> to vector<1x32xf32>
    %cst_146 = arith.constant dense<0.000000e+00> : vector<16xf32>
    %360 = vector.multi_reduction <add>, %355, %cst_146 [1] : vector<16x32xf32> to vector<16xf32>
    %361 = vector.shape_cast %360 : vector<16xf32> to vector<16x1xf32>
    %cst_147 = arith.constant 3.200000e+01 : f32
    %362 = vector.broadcast %cst_147 : f32 to vector<16x1xf32>
    %363 = arith.divf %361, %362 : vector<16x1xf32>
    %364 = vector.broadcast %363 : vector<16x1xf32> to vector<16x32xf32>
    %365 = arith.subf %355, %364 : vector<16x32xf32>
    %366 = arith.mulf %365, %365 : vector<16x32xf32>
    %cst_148 = arith.constant dense<0.000000e+00> : vector<16xf32>
    %367 = vector.multi_reduction <add>, %366, %cst_148 [1] : vector<16x32xf32> to vector<16xf32>
    %368 = vector.shape_cast %367 : vector<16xf32> to vector<16x1xf32>
    %cst_149 = arith.constant 3.200000e+01 : f32
    %369 = vector.broadcast %cst_149 : f32 to vector<16x1xf32>
    %370 = arith.divf %368, %369 : vector<16x1xf32>
    %371 = vector.broadcast %363 : vector<16x1xf32> to vector<16x32xf32>
    %372 = arith.subf %355, %371 : vector<16x32xf32>
    %cst_150 = arith.constant 9.99999974E-6 : f32
    %373 = vector.broadcast %cst_150 : f32 to vector<16x1xf32>
    %374 = arith.addf %370, %373 : vector<16x1xf32>
    %375 = math.rsqrt %374 : vector<16x1xf32>
    %376 = vector.broadcast %375 : vector<16x1xf32> to vector<16x32xf32>
    %377 = arith.mulf %372, %376 : vector<16x32xf32>
    %378 = vector.broadcast %357 : vector<1x32xf32> to vector<16x32xf32>
    %379 = arith.mulf %377, %378 : vector<16x32xf32>
    %380 = vector.broadcast %359 : vector<1x32xf32> to vector<16x32xf32>
    %381 = arith.addf %379, %380 : vector<16x32xf32>
    %382 = arith.truncf %381 : vector<16x32xf32> to vector<16x32xbf16>
    %c2_151 = arith.constant 2 : index
    %c0_152 = arith.constant 0 : index
    %c0_153 = arith.constant 0 : index
    %383 = vector.load %arg12[%c2_151, %c0_152, %c0_153] : memref<5x32x128xbf16, #tpu.memory_space<vmem>>, vector<1x32x128xbf16>
    %384 = vector.shape_cast %383 : vector<1x32x128xbf16> to vector<32x128xbf16>
    %cst_154 = arith.constant dense<0.000000e+00> : vector<16x128xf32>
    %385 = tpu.matmul %382, %384, %cst_154 {dimension_numbers = #tpu.dot_dimension_numbers<[1], [0], [0], [1], [0, 0, 1, 1], [], []>} : vector<16x32xbf16>, vector<32x128xbf16>, vector<16x128xf32> -> vector<16x128xf32>
    %c2_155 = arith.constant 2 : index
    %c0_156 = arith.constant 0 : index
    %c0_157 = arith.constant 0 : index
    %386 = vector.load %arg13[%c2_155, %c0_156, %c0_157] : memref<5x1x128xf32, #tpu.memory_space<vmem>>, vector<1x1x128xf32>
    %387 = vector.shape_cast %386 : vector<1x1x128xf32> to vector<1x128xf32>
    %388 = vector.broadcast %387 : vector<1x128xf32> to vector<16x128xf32>
    %389 = arith.addf %385, %388 : vector<16x128xf32>
    %cst_158 = arith.constant 0.000000e+00 : f32
    %390 = vector.broadcast %cst_158 : f32 to vector<16x128xf32>
    %391 = arith.maximumf %389, %390 : vector<16x128xf32>
    %392 = arith.truncf %391 : vector<16x128xf32> to vector<16x128xbf16>
    %c2_159 = arith.constant 2 : index
    %c0_160 = arith.constant 0 : index
    %c0_161 = arith.constant 0 : index
    %393 = vector.load %arg14[%c2_159, %c0_160, %c0_161] : memref<5x128x32xbf16, #tpu.memory_space<vmem>>, vector<1x128x32xbf16>
    %394 = vector.shape_cast %393 : vector<1x128x32xbf16> to vector<128x32xbf16>
    %cst_162 = arith.constant dense<0.000000e+00> : vector<16x32xf32>
    %395 = tpu.matmul %392, %394, %cst_162 {dimension_numbers = #tpu.dot_dimension_numbers<[1], [0], [0], [1], [0, 0, 1, 1], [], []>} : vector<16x128xbf16>, vector<128x32xbf16>, vector<16x32xf32> -> vector<16x32xf32>
    %c2_163 = arith.constant 2 : index
    %c0_164 = arith.constant 0 : index
    %c0_165 = arith.constant 0 : index
    %396 = vector.load %arg15[%c2_163, %c0_164, %c0_165] : memref<5x1x32xf32, #tpu.memory_space<vmem>>, vector<1x1x32xf32>
    %397 = vector.shape_cast %396 : vector<1x1x32xf32> to vector<1x32xf32>
    %398 = vector.broadcast %397 : vector<1x32xf32> to vector<16x32xf32>
    %399 = arith.addf %395, %398 : vector<16x32xf32>
    %400 = arith.addf %381, %399 : vector<16x32xf32>
    %c2_166 = arith.constant 2 : index
    %c0_167 = arith.constant 0 : index
    %c0_168 = arith.constant 0 : index
    %401 = vector.load %arg10[%c2_166, %c0_167, %c0_168] : memref<5x1x32xf32, #tpu.memory_space<vmem>>, vector<1x1x32xf32>
    %402 = vector.shape_cast %401 : vector<1x1x32xf32> to vector<1x32xf32>
    %c2_169 = arith.constant 2 : index
    %c0_170 = arith.constant 0 : index
    %c0_171 = arith.constant 0 : index
    %403 = vector.load %arg11[%c2_169, %c0_170, %c0_171] : memref<5x1x32xf32, #tpu.memory_space<vmem>>, vector<1x1x32xf32>
    %404 = vector.shape_cast %403 : vector<1x1x32xf32> to vector<1x32xf32>
    %cst_172 = arith.constant dense<0.000000e+00> : vector<16xf32>
    %405 = vector.multi_reduction <add>, %400, %cst_172 [1] : vector<16x32xf32> to vector<16xf32>
    %406 = vector.shape_cast %405 : vector<16xf32> to vector<16x1xf32>
    %cst_173 = arith.constant 3.200000e+01 : f32
    %407 = vector.broadcast %cst_173 : f32 to vector<16x1xf32>
    %408 = arith.divf %406, %407 : vector<16x1xf32>
    %409 = vector.broadcast %408 : vector<16x1xf32> to vector<16x32xf32>
    %410 = arith.subf %400, %409 : vector<16x32xf32>
    %411 = arith.mulf %410, %410 : vector<16x32xf32>
    %cst_174 = arith.constant dense<0.000000e+00> : vector<16xf32>
    %412 = vector.multi_reduction <add>, %411, %cst_174 [1] : vector<16x32xf32> to vector<16xf32>
    %413 = vector.shape_cast %412 : vector<16xf32> to vector<16x1xf32>
    %cst_175 = arith.constant 3.200000e+01 : f32
    %414 = vector.broadcast %cst_175 : f32 to vector<16x1xf32>
    %415 = arith.divf %413, %414 : vector<16x1xf32>
    %416 = vector.broadcast %408 : vector<16x1xf32> to vector<16x32xf32>
    %417 = arith.subf %400, %416 : vector<16x32xf32>
    %cst_176 = arith.constant 9.99999974E-6 : f32
    %418 = vector.broadcast %cst_176 : f32 to vector<16x1xf32>
    %419 = arith.addf %415, %418 : vector<16x1xf32>
    %420 = math.rsqrt %419 : vector<16x1xf32>
    %421 = vector.broadcast %420 : vector<16x1xf32> to vector<16x32xf32>
    %422 = arith.mulf %417, %421 : vector<16x32xf32>
    %423 = vector.broadcast %402 : vector<1x32xf32> to vector<16x32xf32>
    %424 = arith.mulf %422, %423 : vector<16x32xf32>
    %425 = vector.broadcast %404 : vector<1x32xf32> to vector<16x32xf32>
    %426 = arith.addf %424, %425 : vector<16x32xf32>
    %427 = arith.truncf %426 : vector<16x32xf32> to vector<16x32xbf16>
    %c3 = arith.constant 3 : index
    %c0_177 = arith.constant 0 : index
    %c0_178 = arith.constant 0 : index
    %428 = vector.load %arg4[%c3, %c0_177, %c0_178] : memref<5x32x96xbf16, #tpu.memory_space<vmem>>, vector<1x32x96xbf16>
    %429 = vector.shape_cast %428 : vector<1x32x96xbf16> to vector<32x96xbf16>
    %cst_179 = arith.constant dense<0.000000e+00> : vector<16x96xf32>
    %430 = tpu.matmul %427, %429, %cst_179 {dimension_numbers = #tpu.dot_dimension_numbers<[1], [0], [0], [1], [0, 0, 1, 1], [], []>} : vector<16x32xbf16>, vector<32x96xbf16>, vector<16x96xf32> -> vector<16x96xf32>
    %c3_180 = arith.constant 3 : index
    %c0_181 = arith.constant 0 : index
    %c0_182 = arith.constant 0 : index
    %431 = vector.load %arg5[%c3_180, %c0_181, %c0_182] : memref<5x1x96xf32, #tpu.memory_space<vmem>>, vector<1x1x96xf32>
    %432 = vector.shape_cast %431 : vector<1x1x96xf32> to vector<1x96xf32>
    %433 = vector.broadcast %432 : vector<1x96xf32> to vector<16x96xf32>
    %434 = arith.addf %430, %433 : vector<16x96xf32>
    %435 = vector.extract_strided_slice %434 {offsets = [0, 0], sizes = [16, 4], strides = [1, 1]} : vector<16x96xf32> to vector<16x4xf32>
    %436 = vector.extract_strided_slice %434 {offsets = [0, 4], sizes = [16, 4], strides = [1, 1]} : vector<16x96xf32> to vector<16x4xf32>
    %437 = vector.extract_strided_slice %434 {offsets = [0, 8], sizes = [16, 4], strides = [1, 1]} : vector<16x96xf32> to vector<16x4xf32>
    %438 = vector.extract_strided_slice %434 {offsets = [0, 12], sizes = [16, 4], strides = [1, 1]} : vector<16x96xf32> to vector<16x4xf32>
    %439 = vector.extract_strided_slice %434 {offsets = [0, 16], sizes = [16, 4], strides = [1, 1]} : vector<16x96xf32> to vector<16x4xf32>
    %440 = vector.extract_strided_slice %434 {offsets = [0, 20], sizes = [16, 4], strides = [1, 1]} : vector<16x96xf32> to vector<16x4xf32>
    %441 = vector.extract_strided_slice %434 {offsets = [0, 24], sizes = [16, 4], strides = [1, 1]} : vector<16x96xf32> to vector<16x4xf32>
    %442 = vector.extract_strided_slice %434 {offsets = [0, 28], sizes = [16, 4], strides = [1, 1]} : vector<16x96xf32> to vector<16x4xf32>
    %443 = tpu.concatenate %435, %436, %437, %438, %439, %440, %441, %442 in 0 : vector<16x4xf32>, vector<16x4xf32>, vector<16x4xf32>, vector<16x4xf32>, vector<16x4xf32>, vector<16x4xf32>, vector<16x4xf32>, vector<16x4xf32> -> vector<128x4xf32>
    %cst_183 = arith.constant 5.000000e-01 : f32
    %444 = vector.broadcast %cst_183 : f32 to vector<128x4xf32>
    %445 = arith.mulf %443, %444 : vector<128x4xf32>
    %446 = vector.extract_strided_slice %434 {offsets = [0, 32], sizes = [16, 4], strides = [1, 1]} : vector<16x96xf32> to vector<16x4xf32>
    %447 = vector.extract_strided_slice %434 {offsets = [0, 36], sizes = [16, 4], strides = [1, 1]} : vector<16x96xf32> to vector<16x4xf32>
    %448 = vector.extract_strided_slice %434 {offsets = [0, 40], sizes = [16, 4], strides = [1, 1]} : vector<16x96xf32> to vector<16x4xf32>
    %449 = vector.extract_strided_slice %434 {offsets = [0, 44], sizes = [16, 4], strides = [1, 1]} : vector<16x96xf32> to vector<16x4xf32>
    %450 = vector.extract_strided_slice %434 {offsets = [0, 48], sizes = [16, 4], strides = [1, 1]} : vector<16x96xf32> to vector<16x4xf32>
    %451 = vector.extract_strided_slice %434 {offsets = [0, 52], sizes = [16, 4], strides = [1, 1]} : vector<16x96xf32> to vector<16x4xf32>
    %452 = vector.extract_strided_slice %434 {offsets = [0, 56], sizes = [16, 4], strides = [1, 1]} : vector<16x96xf32> to vector<16x4xf32>
    %453 = vector.extract_strided_slice %434 {offsets = [0, 60], sizes = [16, 4], strides = [1, 1]} : vector<16x96xf32> to vector<16x4xf32>
    %454 = tpu.concatenate %446, %447, %448, %449, %450, %451, %452, %453 in 0 : vector<16x4xf32>, vector<16x4xf32>, vector<16x4xf32>, vector<16x4xf32>, vector<16x4xf32>, vector<16x4xf32>, vector<16x4xf32>, vector<16x4xf32> -> vector<128x4xf32>
    %455 = vector.extract_strided_slice %434 {offsets = [0, 64], sizes = [16, 4], strides = [1, 1]} : vector<16x96xf32> to vector<16x4xf32>
    %456 = vector.extract_strided_slice %434 {offsets = [0, 68], sizes = [16, 4], strides = [1, 1]} : vector<16x96xf32> to vector<16x4xf32>
    %457 = vector.extract_strided_slice %434 {offsets = [0, 72], sizes = [16, 4], strides = [1, 1]} : vector<16x96xf32> to vector<16x4xf32>
    %458 = vector.extract_strided_slice %434 {offsets = [0, 76], sizes = [16, 4], strides = [1, 1]} : vector<16x96xf32> to vector<16x4xf32>
    %459 = vector.extract_strided_slice %434 {offsets = [0, 80], sizes = [16, 4], strides = [1, 1]} : vector<16x96xf32> to vector<16x4xf32>
    %460 = vector.extract_strided_slice %434 {offsets = [0, 84], sizes = [16, 4], strides = [1, 1]} : vector<16x96xf32> to vector<16x4xf32>
    %461 = vector.extract_strided_slice %434 {offsets = [0, 88], sizes = [16, 4], strides = [1, 1]} : vector<16x96xf32> to vector<16x4xf32>
    %462 = vector.extract_strided_slice %434 {offsets = [0, 92], sizes = [16, 4], strides = [1, 1]} : vector<16x96xf32> to vector<16x4xf32>
    %463 = tpu.concatenate %455, %456, %457, %458, %459, %460, %461, %462 in 0 : vector<16x4xf32>, vector<16x4xf32>, vector<16x4xf32>, vector<16x4xf32>, vector<16x4xf32>, vector<16x4xf32>, vector<16x4xf32>, vector<16x4xf32> -> vector<128x4xf32>
    %cst_184 = arith.constant dense<0.000000e+00> : vector<128x128xf32>
    %464 = tpu.matmul %445, %454, %cst_184 {dimension_numbers = #tpu.dot_dimension_numbers<[1], [1], [0], [0], [0, 0, 1, 0], [], []>} : vector<128x4xf32>, vector<128x4xf32>, vector<128x128xf32> -> vector<128x128xf32>
    %c0_185 = arith.constant 0 : index
    %c0_186 = arith.constant 0 : index
    %465 = vector.load %arg3[%c0_185, %c0_186] : memref<128x128xf32, #tpu.memory_space<vmem>>, vector<128x128xf32>
    %466 = arith.addf %464, %465 : vector<128x128xf32>
    %cst_187 = arith.constant dense<0xFF800000> : vector<128xf32>
    %467 = vector.multi_reduction <maximumf>, %466, %cst_187 [1] : vector<128x128xf32> to vector<128xf32>
    %468 = vector.shape_cast %467 : vector<128xf32> to vector<128x1xf32>
    %469 = vector.broadcast %468 : vector<128x1xf32> to vector<128x128xf32>
    %470 = arith.subf %466, %469 : vector<128x128xf32>
    %471 = math.exp %470 : vector<128x128xf32>
    %cst_188 = arith.constant dense<0.000000e+00> : vector<128xf32>
    %472 = vector.multi_reduction <add>, %471, %cst_188 [1] : vector<128x128xf32> to vector<128xf32>
    %473 = vector.shape_cast %472 : vector<128xf32> to vector<128x1xf32>
    %474 = tpu.reciprocal %473 {approx = true} : vector<128x1xf32> -> vector<128x1xf32>
    %475 = vector.broadcast %474 : vector<128x1xf32> to vector<128x128xf32>
    %476 = arith.mulf %471, %475 : vector<128x128xf32>
    %cst_189 = arith.constant dense<0.000000e+00> : vector<128x4xf32>
    %477 = tpu.matmul %476, %463, %cst_189 {dimension_numbers = #tpu.dot_dimension_numbers<[1], [0], [0], [1], [0, 0, 1, 1], [], []>} : vector<128x128xf32>, vector<128x4xf32>, vector<128x4xf32> -> vector<128x4xf32>
    %478 = vector.extract_strided_slice %477 {offsets = [0, 0], sizes = [16, 4], strides = [1, 1]} : vector<128x4xf32> to vector<16x4xf32>
    %479 = vector.extract_strided_slice %477 {offsets = [16, 0], sizes = [16, 4], strides = [1, 1]} : vector<128x4xf32> to vector<16x4xf32>
    %480 = vector.extract_strided_slice %477 {offsets = [32, 0], sizes = [16, 4], strides = [1, 1]} : vector<128x4xf32> to vector<16x4xf32>
    %481 = vector.extract_strided_slice %477 {offsets = [48, 0], sizes = [16, 4], strides = [1, 1]} : vector<128x4xf32> to vector<16x4xf32>
    %482 = vector.extract_strided_slice %477 {offsets = [64, 0], sizes = [16, 4], strides = [1, 1]} : vector<128x4xf32> to vector<16x4xf32>
    %483 = vector.extract_strided_slice %477 {offsets = [80, 0], sizes = [16, 4], strides = [1, 1]} : vector<128x4xf32> to vector<16x4xf32>
    %484 = vector.extract_strided_slice %477 {offsets = [96, 0], sizes = [16, 4], strides = [1, 1]} : vector<128x4xf32> to vector<16x4xf32>
    %485 = vector.extract_strided_slice %477 {offsets = [112, 0], sizes = [16, 4], strides = [1, 1]} : vector<128x4xf32> to vector<16x4xf32>
    %486 = tpu.concatenate %478, %479, %480, %481, %482, %483, %484, %485 in 1 : vector<16x4xf32>, vector<16x4xf32>, vector<16x4xf32>, vector<16x4xf32>, vector<16x4xf32>, vector<16x4xf32>, vector<16x4xf32>, vector<16x4xf32> -> vector<16x32xf32>
    %487 = arith.truncf %486 : vector<16x32xf32> to vector<16x32xbf16>
    %c3_190 = arith.constant 3 : index
    %c0_191 = arith.constant 0 : index
    %c0_192 = arith.constant 0 : index
    %488 = vector.load %arg6[%c3_190, %c0_191, %c0_192] : memref<5x32x32xbf16, #tpu.memory_space<vmem>>, vector<1x32x32xbf16>
    %489 = vector.shape_cast %488 : vector<1x32x32xbf16> to vector<32x32xbf16>
    %cst_193 = arith.constant dense<0.000000e+00> : vector<16x32xf32>
    %490 = tpu.matmul %487, %489, %cst_193 {dimension_numbers = #tpu.dot_dimension_numbers<[1], [0], [0], [1], [0, 0, 1, 1], [], []>} : vector<16x32xbf16>, vector<32x32xbf16>, vector<16x32xf32> -> vector<16x32xf32>
    %c3_194 = arith.constant 3 : index
    %c0_195 = arith.constant 0 : index
    %c0_196 = arith.constant 0 : index
    %491 = vector.load %arg7[%c3_194, %c0_195, %c0_196] : memref<5x1x32xf32, #tpu.memory_space<vmem>>, vector<1x1x32xf32>
    %492 = vector.shape_cast %491 : vector<1x1x32xf32> to vector<1x32xf32>
    %493 = vector.broadcast %492 : vector<1x32xf32> to vector<16x32xf32>
    %494 = arith.addf %490, %493 : vector<16x32xf32>
    %495 = arith.addf %426, %494 : vector<16x32xf32>
    %c3_197 = arith.constant 3 : index
    %c0_198 = arith.constant 0 : index
    %c0_199 = arith.constant 0 : index
    %496 = vector.load %arg8[%c3_197, %c0_198, %c0_199] : memref<5x1x32xf32, #tpu.memory_space<vmem>>, vector<1x1x32xf32>
    %497 = vector.shape_cast %496 : vector<1x1x32xf32> to vector<1x32xf32>
    %c3_200 = arith.constant 3 : index
    %c0_201 = arith.constant 0 : index
    %c0_202 = arith.constant 0 : index
    %498 = vector.load %arg9[%c3_200, %c0_201, %c0_202] : memref<5x1x32xf32, #tpu.memory_space<vmem>>, vector<1x1x32xf32>
    %499 = vector.shape_cast %498 : vector<1x1x32xf32> to vector<1x32xf32>
    %cst_203 = arith.constant dense<0.000000e+00> : vector<16xf32>
    %500 = vector.multi_reduction <add>, %495, %cst_203 [1] : vector<16x32xf32> to vector<16xf32>
    %501 = vector.shape_cast %500 : vector<16xf32> to vector<16x1xf32>
    %cst_204 = arith.constant 3.200000e+01 : f32
    %502 = vector.broadcast %cst_204 : f32 to vector<16x1xf32>
    %503 = arith.divf %501, %502 : vector<16x1xf32>
    %504 = vector.broadcast %503 : vector<16x1xf32> to vector<16x32xf32>
    %505 = arith.subf %495, %504 : vector<16x32xf32>
    %506 = arith.mulf %505, %505 : vector<16x32xf32>
    %cst_205 = arith.constant dense<0.000000e+00> : vector<16xf32>
    %507 = vector.multi_reduction <add>, %506, %cst_205 [1] : vector<16x32xf32> to vector<16xf32>
    %508 = vector.shape_cast %507 : vector<16xf32> to vector<16x1xf32>
    %cst_206 = arith.constant 3.200000e+01 : f32
    %509 = vector.broadcast %cst_206 : f32 to vector<16x1xf32>
    %510 = arith.divf %508, %509 : vector<16x1xf32>
    %511 = vector.broadcast %503 : vector<16x1xf32> to vector<16x32xf32>
    %512 = arith.subf %495, %511 : vector<16x32xf32>
    %cst_207 = arith.constant 9.99999974E-6 : f32
    %513 = vector.broadcast %cst_207 : f32 to vector<16x1xf32>
    %514 = arith.addf %510, %513 : vector<16x1xf32>
    %515 = math.rsqrt %514 : vector<16x1xf32>
    %516 = vector.broadcast %515 : vector<16x1xf32> to vector<16x32xf32>
    %517 = arith.mulf %512, %516 : vector<16x32xf32>
    %518 = vector.broadcast %497 : vector<1x32xf32> to vector<16x32xf32>
    %519 = arith.mulf %517, %518 : vector<16x32xf32>
    %520 = vector.broadcast %499 : vector<1x32xf32> to vector<16x32xf32>
    %521 = arith.addf %519, %520 : vector<16x32xf32>
    %522 = arith.truncf %521 : vector<16x32xf32> to vector<16x32xbf16>
    %c3_208 = arith.constant 3 : index
    %c0_209 = arith.constant 0 : index
    %c0_210 = arith.constant 0 : index
    %523 = vector.load %arg12[%c3_208, %c0_209, %c0_210] : memref<5x32x128xbf16, #tpu.memory_space<vmem>>, vector<1x32x128xbf16>
    %524 = vector.shape_cast %523 : vector<1x32x128xbf16> to vector<32x128xbf16>
    %cst_211 = arith.constant dense<0.000000e+00> : vector<16x128xf32>
    %525 = tpu.matmul %522, %524, %cst_211 {dimension_numbers = #tpu.dot_dimension_numbers<[1], [0], [0], [1], [0, 0, 1, 1], [], []>} : vector<16x32xbf16>, vector<32x128xbf16>, vector<16x128xf32> -> vector<16x128xf32>
    %c3_212 = arith.constant 3 : index
    %c0_213 = arith.constant 0 : index
    %c0_214 = arith.constant 0 : index
    %526 = vector.load %arg13[%c3_212, %c0_213, %c0_214] : memref<5x1x128xf32, #tpu.memory_space<vmem>>, vector<1x1x128xf32>
    %527 = vector.shape_cast %526 : vector<1x1x128xf32> to vector<1x128xf32>
    %528 = vector.broadcast %527 : vector<1x128xf32> to vector<16x128xf32>
    %529 = arith.addf %525, %528 : vector<16x128xf32>
    %cst_215 = arith.constant 0.000000e+00 : f32
    %530 = vector.broadcast %cst_215 : f32 to vector<16x128xf32>
    %531 = arith.maximumf %529, %530 : vector<16x128xf32>
    %532 = arith.truncf %531 : vector<16x128xf32> to vector<16x128xbf16>
    %c3_216 = arith.constant 3 : index
    %c0_217 = arith.constant 0 : index
    %c0_218 = arith.constant 0 : index
    %533 = vector.load %arg14[%c3_216, %c0_217, %c0_218] : memref<5x128x32xbf16, #tpu.memory_space<vmem>>, vector<1x128x32xbf16>
    %534 = vector.shape_cast %533 : vector<1x128x32xbf16> to vector<128x32xbf16>
    %cst_219 = arith.constant dense<0.000000e+00> : vector<16x32xf32>
    %535 = tpu.matmul %532, %534, %cst_219 {dimension_numbers = #tpu.dot_dimension_numbers<[1], [0], [0], [1], [0, 0, 1, 1], [], []>} : vector<16x128xbf16>, vector<128x32xbf16>, vector<16x32xf32> -> vector<16x32xf32>
    %c3_220 = arith.constant 3 : index
    %c0_221 = arith.constant 0 : index
    %c0_222 = arith.constant 0 : index
    %536 = vector.load %arg15[%c3_220, %c0_221, %c0_222] : memref<5x1x32xf32, #tpu.memory_space<vmem>>, vector<1x1x32xf32>
    %537 = vector.shape_cast %536 : vector<1x1x32xf32> to vector<1x32xf32>
    %538 = vector.broadcast %537 : vector<1x32xf32> to vector<16x32xf32>
    %539 = arith.addf %535, %538 : vector<16x32xf32>
    %540 = arith.addf %521, %539 : vector<16x32xf32>
    %c3_223 = arith.constant 3 : index
    %c0_224 = arith.constant 0 : index
    %c0_225 = arith.constant 0 : index
    %541 = vector.load %arg10[%c3_223, %c0_224, %c0_225] : memref<5x1x32xf32, #tpu.memory_space<vmem>>, vector<1x1x32xf32>
    %542 = vector.shape_cast %541 : vector<1x1x32xf32> to vector<1x32xf32>
    %c3_226 = arith.constant 3 : index
    %c0_227 = arith.constant 0 : index
    %c0_228 = arith.constant 0 : index
    %543 = vector.load %arg11[%c3_226, %c0_227, %c0_228] : memref<5x1x32xf32, #tpu.memory_space<vmem>>, vector<1x1x32xf32>
    %544 = vector.shape_cast %543 : vector<1x1x32xf32> to vector<1x32xf32>
    %cst_229 = arith.constant dense<0.000000e+00> : vector<16xf32>
    %545 = vector.multi_reduction <add>, %540, %cst_229 [1] : vector<16x32xf32> to vector<16xf32>
    %546 = vector.shape_cast %545 : vector<16xf32> to vector<16x1xf32>
    %cst_230 = arith.constant 3.200000e+01 : f32
    %547 = vector.broadcast %cst_230 : f32 to vector<16x1xf32>
    %548 = arith.divf %546, %547 : vector<16x1xf32>
    %549 = vector.broadcast %548 : vector<16x1xf32> to vector<16x32xf32>
    %550 = arith.subf %540, %549 : vector<16x32xf32>
    %551 = arith.mulf %550, %550 : vector<16x32xf32>
    %cst_231 = arith.constant dense<0.000000e+00> : vector<16xf32>
    %552 = vector.multi_reduction <add>, %551, %cst_231 [1] : vector<16x32xf32> to vector<16xf32>
    %553 = vector.shape_cast %552 : vector<16xf32> to vector<16x1xf32>
    %cst_232 = arith.constant 3.200000e+01 : f32
    %554 = vector.broadcast %cst_232 : f32 to vector<16x1xf32>
    %555 = arith.divf %553, %554 : vector<16x1xf32>
    %556 = vector.broadcast %548 : vector<16x1xf32> to vector<16x32xf32>
    %557 = arith.subf %540, %556 : vector<16x32xf32>
    %cst_233 = arith.constant 9.99999974E-6 : f32
    %558 = vector.broadcast %cst_233 : f32 to vector<16x1xf32>
    %559 = arith.addf %555, %558 : vector<16x1xf32>
    %560 = math.rsqrt %559 : vector<16x1xf32>
    %561 = vector.broadcast %560 : vector<16x1xf32> to vector<16x32xf32>
    %562 = arith.mulf %557, %561 : vector<16x32xf32>
    %563 = vector.broadcast %542 : vector<1x32xf32> to vector<16x32xf32>
    %564 = arith.mulf %562, %563 : vector<16x32xf32>
    %565 = vector.broadcast %544 : vector<1x32xf32> to vector<16x32xf32>
    %566 = arith.addf %564, %565 : vector<16x32xf32>
    %567 = arith.truncf %566 : vector<16x32xf32> to vector<16x32xbf16>
    %c4 = arith.constant 4 : index
    %c0_234 = arith.constant 0 : index
    %c0_235 = arith.constant 0 : index
    %568 = vector.load %arg4[%c4, %c0_234, %c0_235] : memref<5x32x96xbf16, #tpu.memory_space<vmem>>, vector<1x32x96xbf16>
    %569 = vector.shape_cast %568 : vector<1x32x96xbf16> to vector<32x96xbf16>
    %cst_236 = arith.constant dense<0.000000e+00> : vector<16x96xf32>
    %570 = tpu.matmul %567, %569, %cst_236 {dimension_numbers = #tpu.dot_dimension_numbers<[1], [0], [0], [1], [0, 0, 1, 1], [], []>} : vector<16x32xbf16>, vector<32x96xbf16>, vector<16x96xf32> -> vector<16x96xf32>
    %c4_237 = arith.constant 4 : index
    %c0_238 = arith.constant 0 : index
    %c0_239 = arith.constant 0 : index
    %571 = vector.load %arg5[%c4_237, %c0_238, %c0_239] : memref<5x1x96xf32, #tpu.memory_space<vmem>>, vector<1x1x96xf32>
    %572 = vector.shape_cast %571 : vector<1x1x96xf32> to vector<1x96xf32>
    %573 = vector.broadcast %572 : vector<1x96xf32> to vector<16x96xf32>
    %574 = arith.addf %570, %573 : vector<16x96xf32>
    %575 = vector.extract_strided_slice %574 {offsets = [0, 0], sizes = [16, 4], strides = [1, 1]} : vector<16x96xf32> to vector<16x4xf32>
    %576 = vector.extract_strided_slice %574 {offsets = [0, 4], sizes = [16, 4], strides = [1, 1]} : vector<16x96xf32> to vector<16x4xf32>
    %577 = vector.extract_strided_slice %574 {offsets = [0, 8], sizes = [16, 4], strides = [1, 1]} : vector<16x96xf32> to vector<16x4xf32>
    %578 = vector.extract_strided_slice %574 {offsets = [0, 12], sizes = [16, 4], strides = [1, 1]} : vector<16x96xf32> to vector<16x4xf32>
    %579 = vector.extract_strided_slice %574 {offsets = [0, 16], sizes = [16, 4], strides = [1, 1]} : vector<16x96xf32> to vector<16x4xf32>
    %580 = vector.extract_strided_slice %574 {offsets = [0, 20], sizes = [16, 4], strides = [1, 1]} : vector<16x96xf32> to vector<16x4xf32>
    %581 = vector.extract_strided_slice %574 {offsets = [0, 24], sizes = [16, 4], strides = [1, 1]} : vector<16x96xf32> to vector<16x4xf32>
    %582 = vector.extract_strided_slice %574 {offsets = [0, 28], sizes = [16, 4], strides = [1, 1]} : vector<16x96xf32> to vector<16x4xf32>
    %583 = tpu.concatenate %575, %576, %577, %578, %579, %580, %581, %582 in 0 : vector<16x4xf32>, vector<16x4xf32>, vector<16x4xf32>, vector<16x4xf32>, vector<16x4xf32>, vector<16x4xf32>, vector<16x4xf32>, vector<16x4xf32> -> vector<128x4xf32>
    %cst_240 = arith.constant 5.000000e-01 : f32
    %584 = vector.broadcast %cst_240 : f32 to vector<128x4xf32>
    %585 = arith.mulf %583, %584 : vector<128x4xf32>
    %586 = vector.extract_strided_slice %574 {offsets = [0, 32], sizes = [16, 4], strides = [1, 1]} : vector<16x96xf32> to vector<16x4xf32>
    %587 = vector.extract_strided_slice %574 {offsets = [0, 36], sizes = [16, 4], strides = [1, 1]} : vector<16x96xf32> to vector<16x4xf32>
    %588 = vector.extract_strided_slice %574 {offsets = [0, 40], sizes = [16, 4], strides = [1, 1]} : vector<16x96xf32> to vector<16x4xf32>
    %589 = vector.extract_strided_slice %574 {offsets = [0, 44], sizes = [16, 4], strides = [1, 1]} : vector<16x96xf32> to vector<16x4xf32>
    %590 = vector.extract_strided_slice %574 {offsets = [0, 48], sizes = [16, 4], strides = [1, 1]} : vector<16x96xf32> to vector<16x4xf32>
    %591 = vector.extract_strided_slice %574 {offsets = [0, 52], sizes = [16, 4], strides = [1, 1]} : vector<16x96xf32> to vector<16x4xf32>
    %592 = vector.extract_strided_slice %574 {offsets = [0, 56], sizes = [16, 4], strides = [1, 1]} : vector<16x96xf32> to vector<16x4xf32>
    %593 = vector.extract_strided_slice %574 {offsets = [0, 60], sizes = [16, 4], strides = [1, 1]} : vector<16x96xf32> to vector<16x4xf32>
    %594 = tpu.concatenate %586, %587, %588, %589, %590, %591, %592, %593 in 0 : vector<16x4xf32>, vector<16x4xf32>, vector<16x4xf32>, vector<16x4xf32>, vector<16x4xf32>, vector<16x4xf32>, vector<16x4xf32>, vector<16x4xf32> -> vector<128x4xf32>
    %595 = vector.extract_strided_slice %574 {offsets = [0, 64], sizes = [16, 4], strides = [1, 1]} : vector<16x96xf32> to vector<16x4xf32>
    %596 = vector.extract_strided_slice %574 {offsets = [0, 68], sizes = [16, 4], strides = [1, 1]} : vector<16x96xf32> to vector<16x4xf32>
    %597 = vector.extract_strided_slice %574 {offsets = [0, 72], sizes = [16, 4], strides = [1, 1]} : vector<16x96xf32> to vector<16x4xf32>
    %598 = vector.extract_strided_slice %574 {offsets = [0, 76], sizes = [16, 4], strides = [1, 1]} : vector<16x96xf32> to vector<16x4xf32>
    %599 = vector.extract_strided_slice %574 {offsets = [0, 80], sizes = [16, 4], strides = [1, 1]} : vector<16x96xf32> to vector<16x4xf32>
    %600 = vector.extract_strided_slice %574 {offsets = [0, 84], sizes = [16, 4], strides = [1, 1]} : vector<16x96xf32> to vector<16x4xf32>
    %601 = vector.extract_strided_slice %574 {offsets = [0, 88], sizes = [16, 4], strides = [1, 1]} : vector<16x96xf32> to vector<16x4xf32>
    %602 = vector.extract_strided_slice %574 {offsets = [0, 92], sizes = [16, 4], strides = [1, 1]} : vector<16x96xf32> to vector<16x4xf32>
    %603 = tpu.concatenate %595, %596, %597, %598, %599, %600, %601, %602 in 0 : vector<16x4xf32>, vector<16x4xf32>, vector<16x4xf32>, vector<16x4xf32>, vector<16x4xf32>, vector<16x4xf32>, vector<16x4xf32>, vector<16x4xf32> -> vector<128x4xf32>
    %cst_241 = arith.constant dense<0.000000e+00> : vector<128x128xf32>
    %604 = tpu.matmul %585, %594, %cst_241 {dimension_numbers = #tpu.dot_dimension_numbers<[1], [1], [0], [0], [0, 0, 1, 0], [], []>} : vector<128x4xf32>, vector<128x4xf32>, vector<128x128xf32> -> vector<128x128xf32>
    %c0_242 = arith.constant 0 : index
    %c0_243 = arith.constant 0 : index
    %605 = vector.load %arg3[%c0_242, %c0_243] : memref<128x128xf32, #tpu.memory_space<vmem>>, vector<128x128xf32>
    %606 = arith.addf %604, %605 : vector<128x128xf32>
    %cst_244 = arith.constant dense<0xFF800000> : vector<128xf32>
    %607 = vector.multi_reduction <maximumf>, %606, %cst_244 [1] : vector<128x128xf32> to vector<128xf32>
    %608 = vector.shape_cast %607 : vector<128xf32> to vector<128x1xf32>
    %609 = vector.broadcast %608 : vector<128x1xf32> to vector<128x128xf32>
    %610 = arith.subf %606, %609 : vector<128x128xf32>
    %611 = math.exp %610 : vector<128x128xf32>
    %cst_245 = arith.constant dense<0.000000e+00> : vector<128xf32>
    %612 = vector.multi_reduction <add>, %611, %cst_245 [1] : vector<128x128xf32> to vector<128xf32>
    %613 = vector.shape_cast %612 : vector<128xf32> to vector<128x1xf32>
    %614 = tpu.reciprocal %613 {approx = true} : vector<128x1xf32> -> vector<128x1xf32>
    %615 = vector.broadcast %614 : vector<128x1xf32> to vector<128x128xf32>
    %616 = arith.mulf %611, %615 : vector<128x128xf32>
    %cst_246 = arith.constant dense<0.000000e+00> : vector<128x4xf32>
    %617 = tpu.matmul %616, %603, %cst_246 {dimension_numbers = #tpu.dot_dimension_numbers<[1], [0], [0], [1], [0, 0, 1, 1], [], []>} : vector<128x128xf32>, vector<128x4xf32>, vector<128x4xf32> -> vector<128x4xf32>
    %618 = vector.extract_strided_slice %617 {offsets = [0, 0], sizes = [16, 4], strides = [1, 1]} : vector<128x4xf32> to vector<16x4xf32>
    %619 = vector.extract_strided_slice %617 {offsets = [16, 0], sizes = [16, 4], strides = [1, 1]} : vector<128x4xf32> to vector<16x4xf32>
    %620 = vector.extract_strided_slice %617 {offsets = [32, 0], sizes = [16, 4], strides = [1, 1]} : vector<128x4xf32> to vector<16x4xf32>
    %621 = vector.extract_strided_slice %617 {offsets = [48, 0], sizes = [16, 4], strides = [1, 1]} : vector<128x4xf32> to vector<16x4xf32>
    %622 = vector.extract_strided_slice %617 {offsets = [64, 0], sizes = [16, 4], strides = [1, 1]} : vector<128x4xf32> to vector<16x4xf32>
    %623 = vector.extract_strided_slice %617 {offsets = [80, 0], sizes = [16, 4], strides = [1, 1]} : vector<128x4xf32> to vector<16x4xf32>
    %624 = vector.extract_strided_slice %617 {offsets = [96, 0], sizes = [16, 4], strides = [1, 1]} : vector<128x4xf32> to vector<16x4xf32>
    %625 = vector.extract_strided_slice %617 {offsets = [112, 0], sizes = [16, 4], strides = [1, 1]} : vector<128x4xf32> to vector<16x4xf32>
    %626 = tpu.concatenate %618, %619, %620, %621, %622, %623, %624, %625 in 1 : vector<16x4xf32>, vector<16x4xf32>, vector<16x4xf32>, vector<16x4xf32>, vector<16x4xf32>, vector<16x4xf32>, vector<16x4xf32>, vector<16x4xf32> -> vector<16x32xf32>
    %627 = arith.truncf %626 : vector<16x32xf32> to vector<16x32xbf16>
    %c4_247 = arith.constant 4 : index
    %c0_248 = arith.constant 0 : index
    %c0_249 = arith.constant 0 : index
    %628 = vector.load %arg6[%c4_247, %c0_248, %c0_249] : memref<5x32x32xbf16, #tpu.memory_space<vmem>>, vector<1x32x32xbf16>
    %629 = vector.shape_cast %628 : vector<1x32x32xbf16> to vector<32x32xbf16>
    %cst_250 = arith.constant dense<0.000000e+00> : vector<16x32xf32>
    %630 = tpu.matmul %627, %629, %cst_250 {dimension_numbers = #tpu.dot_dimension_numbers<[1], [0], [0], [1], [0, 0, 1, 1], [], []>} : vector<16x32xbf16>, vector<32x32xbf16>, vector<16x32xf32> -> vector<16x32xf32>
    %c4_251 = arith.constant 4 : index
    %c0_252 = arith.constant 0 : index
    %c0_253 = arith.constant 0 : index
    %631 = vector.load %arg7[%c4_251, %c0_252, %c0_253] : memref<5x1x32xf32, #tpu.memory_space<vmem>>, vector<1x1x32xf32>
    %632 = vector.shape_cast %631 : vector<1x1x32xf32> to vector<1x32xf32>
    %633 = vector.broadcast %632 : vector<1x32xf32> to vector<16x32xf32>
    %634 = arith.addf %630, %633 : vector<16x32xf32>
    %635 = arith.addf %566, %634 : vector<16x32xf32>
    %c4_254 = arith.constant 4 : index
    %c0_255 = arith.constant 0 : index
    %c0_256 = arith.constant 0 : index
    %636 = vector.load %arg8[%c4_254, %c0_255, %c0_256] : memref<5x1x32xf32, #tpu.memory_space<vmem>>, vector<1x1x32xf32>
    %637 = vector.shape_cast %636 : vector<1x1x32xf32> to vector<1x32xf32>
    %c4_257 = arith.constant 4 : index
    %c0_258 = arith.constant 0 : index
    %c0_259 = arith.constant 0 : index
    %638 = vector.load %arg9[%c4_257, %c0_258, %c0_259] : memref<5x1x32xf32, #tpu.memory_space<vmem>>, vector<1x1x32xf32>
    %639 = vector.shape_cast %638 : vector<1x1x32xf32> to vector<1x32xf32>
    %cst_260 = arith.constant dense<0.000000e+00> : vector<16xf32>
    %640 = vector.multi_reduction <add>, %635, %cst_260 [1] : vector<16x32xf32> to vector<16xf32>
    %641 = vector.shape_cast %640 : vector<16xf32> to vector<16x1xf32>
    %cst_261 = arith.constant 3.200000e+01 : f32
    %642 = vector.broadcast %cst_261 : f32 to vector<16x1xf32>
    %643 = arith.divf %641, %642 : vector<16x1xf32>
    %644 = vector.broadcast %643 : vector<16x1xf32> to vector<16x32xf32>
    %645 = arith.subf %635, %644 : vector<16x32xf32>
    %646 = arith.mulf %645, %645 : vector<16x32xf32>
    %cst_262 = arith.constant dense<0.000000e+00> : vector<16xf32>
    %647 = vector.multi_reduction <add>, %646, %cst_262 [1] : vector<16x32xf32> to vector<16xf32>
    %648 = vector.shape_cast %647 : vector<16xf32> to vector<16x1xf32>
    %cst_263 = arith.constant 3.200000e+01 : f32
    %649 = vector.broadcast %cst_263 : f32 to vector<16x1xf32>
    %650 = arith.divf %648, %649 : vector<16x1xf32>
    %651 = vector.broadcast %643 : vector<16x1xf32> to vector<16x32xf32>
    %652 = arith.subf %635, %651 : vector<16x32xf32>
    %cst_264 = arith.constant 9.99999974E-6 : f32
    %653 = vector.broadcast %cst_264 : f32 to vector<16x1xf32>
    %654 = arith.addf %650, %653 : vector<16x1xf32>
    %655 = math.rsqrt %654 : vector<16x1xf32>
    %656 = vector.broadcast %655 : vector<16x1xf32> to vector<16x32xf32>
    %657 = arith.mulf %652, %656 : vector<16x32xf32>
    %658 = vector.broadcast %637 : vector<1x32xf32> to vector<16x32xf32>
    %659 = arith.mulf %657, %658 : vector<16x32xf32>
    %660 = vector.broadcast %639 : vector<1x32xf32> to vector<16x32xf32>
    %661 = arith.addf %659, %660 : vector<16x32xf32>
    %662 = arith.truncf %661 : vector<16x32xf32> to vector<16x32xbf16>
    %c4_265 = arith.constant 4 : index
    %c0_266 = arith.constant 0 : index
    %c0_267 = arith.constant 0 : index
    %663 = vector.load %arg12[%c4_265, %c0_266, %c0_267] : memref<5x32x128xbf16, #tpu.memory_space<vmem>>, vector<1x32x128xbf16>
    %664 = vector.shape_cast %663 : vector<1x32x128xbf16> to vector<32x128xbf16>
    %cst_268 = arith.constant dense<0.000000e+00> : vector<16x128xf32>
    %665 = tpu.matmul %662, %664, %cst_268 {dimension_numbers = #tpu.dot_dimension_numbers<[1], [0], [0], [1], [0, 0, 1, 1], [], []>} : vector<16x32xbf16>, vector<32x128xbf16>, vector<16x128xf32> -> vector<16x128xf32>
    %c4_269 = arith.constant 4 : index
    %c0_270 = arith.constant 0 : index
    %c0_271 = arith.constant 0 : index
    %666 = vector.load %arg13[%c4_269, %c0_270, %c0_271] : memref<5x1x128xf32, #tpu.memory_space<vmem>>, vector<1x1x128xf32>
    %667 = vector.shape_cast %666 : vector<1x1x128xf32> to vector<1x128xf32>
    %668 = vector.broadcast %667 : vector<1x128xf32> to vector<16x128xf32>
    %669 = arith.addf %665, %668 : vector<16x128xf32>
    %cst_272 = arith.constant 0.000000e+00 : f32
    %670 = vector.broadcast %cst_272 : f32 to vector<16x128xf32>
    %671 = arith.maximumf %669, %670 : vector<16x128xf32>
    %672 = arith.truncf %671 : vector<16x128xf32> to vector<16x128xbf16>
    %c4_273 = arith.constant 4 : index
    %c0_274 = arith.constant 0 : index
    %c0_275 = arith.constant 0 : index
    %673 = vector.load %arg14[%c4_273, %c0_274, %c0_275] : memref<5x128x32xbf16, #tpu.memory_space<vmem>>, vector<1x128x32xbf16>
    %674 = vector.shape_cast %673 : vector<1x128x32xbf16> to vector<128x32xbf16>
    %cst_276 = arith.constant dense<0.000000e+00> : vector<16x32xf32>
    %675 = tpu.matmul %672, %674, %cst_276 {dimension_numbers = #tpu.dot_dimension_numbers<[1], [0], [0], [1], [0, 0, 1, 1], [], []>} : vector<16x128xbf16>, vector<128x32xbf16>, vector<16x32xf32> -> vector<16x32xf32>
    %c4_277 = arith.constant 4 : index
    %c0_278 = arith.constant 0 : index
    %c0_279 = arith.constant 0 : index
    %676 = vector.load %arg15[%c4_277, %c0_278, %c0_279] : memref<5x1x32xf32, #tpu.memory_space<vmem>>, vector<1x1x32xf32>
    %677 = vector.shape_cast %676 : vector<1x1x32xf32> to vector<1x32xf32>
    %678 = vector.broadcast %677 : vector<1x32xf32> to vector<16x32xf32>
    %679 = arith.addf %675, %678 : vector<16x32xf32>
    %680 = arith.addf %661, %679 : vector<16x32xf32>
    %c4_280 = arith.constant 4 : index
    %c0_281 = arith.constant 0 : index
    %c0_282 = arith.constant 0 : index
    %681 = vector.load %arg10[%c4_280, %c0_281, %c0_282] : memref<5x1x32xf32, #tpu.memory_space<vmem>>, vector<1x1x32xf32>
    %682 = vector.shape_cast %681 : vector<1x1x32xf32> to vector<1x32xf32>
    %c4_283 = arith.constant 4 : index
    %c0_284 = arith.constant 0 : index
    %c0_285 = arith.constant 0 : index
    %683 = vector.load %arg11[%c4_283, %c0_284, %c0_285] : memref<5x1x32xf32, #tpu.memory_space<vmem>>, vector<1x1x32xf32>
    %684 = vector.shape_cast %683 : vector<1x1x32xf32> to vector<1x32xf32>
    %cst_286 = arith.constant dense<0.000000e+00> : vector<16xf32>
    %685 = vector.multi_reduction <add>, %680, %cst_286 [1] : vector<16x32xf32> to vector<16xf32>
    %686 = vector.shape_cast %685 : vector<16xf32> to vector<16x1xf32>
    %cst_287 = arith.constant 3.200000e+01 : f32
    %687 = vector.broadcast %cst_287 : f32 to vector<16x1xf32>
    %688 = arith.divf %686, %687 : vector<16x1xf32>
    %689 = vector.broadcast %688 : vector<16x1xf32> to vector<16x32xf32>
    %690 = arith.subf %680, %689 : vector<16x32xf32>
    %691 = arith.mulf %690, %690 : vector<16x32xf32>
    %cst_288 = arith.constant dense<0.000000e+00> : vector<16xf32>
    %692 = vector.multi_reduction <add>, %691, %cst_288 [1] : vector<16x32xf32> to vector<16xf32>
    %693 = vector.shape_cast %692 : vector<16xf32> to vector<16x1xf32>
    %cst_289 = arith.constant 3.200000e+01 : f32
    %694 = vector.broadcast %cst_289 : f32 to vector<16x1xf32>
    %695 = arith.divf %693, %694 : vector<16x1xf32>
    %696 = vector.broadcast %688 : vector<16x1xf32> to vector<16x32xf32>
    %697 = arith.subf %680, %696 : vector<16x32xf32>
    %cst_290 = arith.constant 9.99999974E-6 : f32
    %698 = vector.broadcast %cst_290 : f32 to vector<16x1xf32>
    %699 = arith.addf %695, %698 : vector<16x1xf32>
    %700 = math.rsqrt %699 : vector<16x1xf32>
    %701 = vector.broadcast %700 : vector<16x1xf32> to vector<16x32xf32>
    %702 = arith.mulf %697, %701 : vector<16x32xf32>
    %703 = vector.broadcast %682 : vector<1x32xf32> to vector<16x32xf32>
    %704 = arith.mulf %702, %703 : vector<16x32xf32>
    %705 = vector.broadcast %684 : vector<1x32xf32> to vector<16x32xf32>
    %706 = arith.addf %704, %705 : vector<16x32xf32>
    %707 = arith.truncf %706 : vector<16x32xf32> to vector<16x32xbf16>
    %c0_291 = arith.constant 0 : index
    %c0_292 = arith.constant 0 : index
    %708 = vector.load %arg16[%c0_291, %c0_292] : memref<32x8xbf16, #tpu.memory_space<vmem>>, vector<32x8xbf16>
    %cst_293 = arith.constant dense<0.000000e+00> : vector<16x8xf32>
    %709 = tpu.matmul %707, %708, %cst_293 {dimension_numbers = #tpu.dot_dimension_numbers<[1], [0], [0], [1], [0, 0, 1, 1], [], []>} : vector<16x32xbf16>, vector<32x8xbf16>, vector<16x8xf32> -> vector<16x8xf32>
    %c0_294 = arith.constant 0 : index
    %c0_295 = arith.constant 0 : index
    %710 = vector.load %arg17[%c0_294, %c0_295] : memref<1x8xf32, #tpu.memory_space<vmem>>, vector<1x8xf32>
    %711 = vector.broadcast %710 : vector<1x8xf32> to vector<16x8xf32>
    %712 = arith.addf %709, %711 : vector<16x8xf32>
    %cst_296 = arith.constant 0.000000e+00 : f32
    %713 = vector.broadcast %cst_296 : f32 to vector<16x8xf32>
    %714 = arith.cmpf oge, %712, %713 : vector<16x8xf32>
    %cst_297 = arith.constant 0.00999999977 : f32
    %715 = vector.broadcast %cst_297 : f32 to vector<16x8xf32>
    %716 = arith.mulf %715, %712 : vector<16x8xf32>
    %717 = arith.select %714, %712, %716 : vector<16x8xi1>, vector<16x8xf32>
    %718 = vector.shape_cast %717 : vector<16x8xf32> to vector<8x2x8xf32>
    %cst_298 = arith.constant dense<0.000000e+00> : vector<2x8xf32>
    %719 = vector.multi_reduction <add>, %718, %cst_298 [0] : vector<8x2x8xf32> to vector<2x8xf32>
    %cst_299 = arith.constant 1.250000e-01 : f32
    %720 = vector.broadcast %cst_299 : f32 to vector<2x8xf32>
    %721 = arith.mulf %719, %720 : vector<2x8xf32>
    %c0_300 = arith.constant 0 : index
    %c0_301 = arith.constant 0 : index
    %722 = vector.load %arg18[%c0_300, %c0_301] : memref<2x8xf32, #tpu.memory_space<vmem>>, vector<2x8xf32>
    tpu.vector_store %arg18[%c0_300, %c0_301], %721 {strides = array<i32>} : memref<2x8xf32, #tpu.memory_space<vmem>>, vector<2x8xf32>,
    return
  }
}

</mosaic_0001>

<bundles_post_ra>
// kernel: _lambda_.1
= control target key start
LH: loop header
LB: loop body
LE: loop exit
PB: predicated region body
PF: predicated region fallthrough
CT: control target
= control target key end

     0   :  { %s11511_s0 = inlined_call_operand.vmem [shape: f32[16,32], index: 0, kind: input, shape index: {}]   ;;  %s11512_s1 = inlined_call_operand.vmem [shape: f32[16,32], index: 1, kind: input, shape index: {}]   ;;  %s11513_s2 = inlined_call_operand.vmem [shape: f32[16,32], index: 2, kind: input, shape index: {}]   ;;  %s11514_s3 = inlined_call_operand.hbm [shape: f32[128,128], index: 3, kind: input, shape index: {}]   ;;  %s11515_s4 = inlined_call_operand.hbm [shape: bf16[5,32,96], index: 4, kind: input, shape index: {}]   ;;  %s11516_s5 = inlined_call_operand.hbm [shape: f32[5,1,96], index: 5, kind: input, shape index: {}]   ;;  %s11517_s6 = inlined_call_operand.hbm [shape: bf16[5,32,32], index: 6, kind: input, shape index: {}]   ;;  %s11518_s7 = inlined_call_operand.hbm [shape: f32[5,1,32], index: 7, kind: input, shape index: {}]   ;;  %s11519_s8 = inlined_call_operand.vmem [shape: f32[5,1,32], index: 8, kind: input, shape index: {}, may-alias: {8,10}]   ;;  %s11520_s9 = inlined_call_operand.vmem [shape: f32[5,1,32], index: 9, kind: input, shape index: {}, may-alias: {9,11}]   ;;  %s11521_s10 = inlined_call_operand.vmem [shape: f32[5,1,32], index: 10, kind: input, shape index: {}, may-alias: {8,10}]   ;;  %s11522_s11 = inlined_call_operand.vmem [shape: f32[5,1,32], index: 11, kind: input, shape index: {}, may-alias: {9,11}]   ;;  %s11523_s12 = inlined_call_operand.vmem [shape: bf16[5,32,128], index: 12, kind: input, shape index: {}]   ;;  %s11524_s13 = inlined_call_operand.hbm [shape: f32[5,1,128], index: 13, kind: input, shape index: {}]   ;;  %s11525_s14 = inlined_call_operand.hbm [shape: bf16[5,128,32], index: 14, kind: input, shape index: {}]   ;;  %s11526_s15 = inlined_call_operand.hbm [shape: f32[5,1,32], index: 15, kind: input, shape index: {}]   ;;  %s11527_s16 = inlined_call_operand.hbm [shape: bf16[32,8], index: 16, kind: input, shape index: {}]   ;;  %s11528_s17 = inlined_call_operand.vmem [shape: f32[1,8], index: 17, kind: input, shape index: {}]   ;;  %s11529_s18 = inlined_call_operand.hbm [shape: f32[2,8], index: 18, kind: output, shape index: {}]  }
   0x1   :  { %11535 = sst [smem:[#allocation24_spill]] %s11511_s0 }
   0x2   :  { %11536 = sst [smem:[#allocation25_spill]] %s11512_s1 }
   0x3   :  { %11537 = sst [smem:[#allocation26_spill]] %s11513_s2 }
   0x4   :  { %23 = vsyncpa [#allocation3], 0 }
   0x5   :  { %24 = vsyncpa [#allocation6], 0 }
   0x6   :  { %25 = vsyncpa [#allocation9], 0 }
   0x7   :  { %26 = vsyncpa [#allocation12], 0 }
   0x8   :  { %27 = vsyncpa [#allocation15], 0 }
   0x9   :  { %28 = vsyncpa [#allocation4], 0  ;;  %s9354_s27 = smov [#allocation5]   ;;  %s9122_s0 = scalar_lea.hbm %s11515_s4, 1280 }
   0xa   :  { %s52_s28 = sshll.u32 %s9354_s27, 4  ;;  %p9123_p0 = scmp.ne.s32.totalorder %s11515_s4, %s9122_s0  ;;  %s53_s28 = int_to_ptr.vmem [resolvable:$true] %s52_s28 }
   0xb   :  { %p9126_p1 = scmp.lt.u32.totalorder %s9122_s0, %s11515_s4 }
   0xd   :  { %p9128_p2 = pnand %p9126_p1, %p9123_p0 }
   0xf   :  { %9131 = shalt.err (!%p9128_p2)
}
  0x10   :  { %s9132_s22 = scalar_lea.vmem %s53_s28, 1280  ;;  %p9137_p4 = scmp.lt.s32.totalorder %s53_s28, %s53_s28 }
  0x11   :  { %p9133_p3 = scmp.ne.s32.totalorder %s53_s28, %s9132_s22  ;;  %p9138_p5 = scmp.lt.s32.totalorder %s9132_s22, %s9132_s22 }
  0x13   :  { %p9139_p6 = por %p9138_p5, %p9137_p4 }
  0x15   :  { %p9140_p7 = pnand %p9139_p6, %p9133_p3 }
  0x17   :  { %9143 = shalt.err (!%p9140_p7)
}
  0x18   :  { %s11533_s2 = smov 64   ;;  %s9356_s23 = smov 4  }
  0x19   :  { %58 = dma.hbm_to_vmem [thread:$0]  %s11515_s4, 1280, %s53_s28, [#allocation6], %s11533_s2, %s11533_s2, %s9356_s23  }
  0x1a   :  { %s9357_s26 = smov [#allocation8]   ;;  %s9144_s0 = scalar_lea.hbm %s11517_s6, 1280 }
  0x1b   :  { %s76_s27 = sshll.u32 %s9357_s26, 4  ;;  %p9145_p8 = scmp.ne.s32.totalorder %s11517_s6, %s9144_s0  ;;  %s77_s27 = int_to_ptr.vmem [resolvable:$true] %s76_s27 }
  0x1c   :  { %p9148_p9 = scmp.lt.u32.totalorder %s9144_s0, %s11517_s6 }
  0x1e   :  { %p9150_p10 = pnand %p9148_p9, %p9145_p8 }
  0x20   :  { %9153 = shalt.err (!%p9150_p10)
}
  0x21   :  { %s9154_s22 = scalar_lea.vmem %s77_s27, 1280  ;;  %p9159_p12 = scmp.lt.s32.totalorder %s77_s27, %s77_s27 }
  0x22   :  { %p9155_p11 = scmp.ne.s32.totalorder %s77_s27, %s9154_s22  ;;  %p9160_p13 = scmp.lt.s32.totalorder %s9154_s22, %s9154_s22 }
  0x24   :  { %p9161_p0 = por %p9160_p13, %p9159_p12 }
  0x26   :  { %p9162_p1 = pnand %p9161_p0, %p9155_p11 }
  0x28   :  { %9165 = shalt.err (!%p9162_p1)
}
  0x29   :  { %82 = dma.hbm_to_vmem [thread:$0]  %s11517_s6, 1280, %s77_s27, [#allocation9], %s11533_s2, %s11533_s2, %s9356_s23  }
  0x2a   :  { %s9358_s24 = smov [#allocation11]   ;;  %s9359_s26 = smov [#allocation14]  }
  0x2b   :  { %s110_s25 = sshll.u32 %s9358_s24, 4  ;;  %s134_s29 = sshll.u32 %s9359_s26, 4  ;;  %s111_s25 = int_to_ptr.vmem [resolvable:$true] %s110_s25  ;;  %s9510_s29 = int_to_ptr.vmem [resolvable:$true] %s134_s29 }
  0x2c   :  { %s9166_s19 = scalar_lea.hbm %s11524_s13, 80 }
  0x2d   :  { %p9167_p2 = scmp.ne.s32.totalorder %s11524_s13, %s9166_s19  ;;  %p9170_p3 = scmp.lt.u32.totalorder %s9166_s19, %s11524_s13 }
  0x2f   :  { %p9172_p4 = pnand %p9170_p3, %p9167_p2 }
  0x31   :  { %9175 = shalt.err (!%p9172_p4)
}
  0x32   :  { %s9176_s6 = scalar_lea.vmem %s111_s25, 80  ;;  %s9180_s27 = scalar_lea.vmem %s111_s25, 96 }
  0x33   :  { %p9177_p5 = scmp.ne.s32.totalorder %s111_s25, %s9176_s6  ;;  %p9181_p6 = scmp.lt.s32.totalorder %s111_s25, %s111_s25 }
  0x34   :  { %p9182_p7 = scmp.lt.s32.totalorder %s9180_s27, %s9176_s6 }
  0x36   :  { %p9183_p8 = por %p9182_p7, %p9181_p6 }
  0x38   :  { %p9184_p9 = pnand %p9183_p8, %p9177_p5 }
  0x3a   :  { %9187 = shalt.err (!%p9184_p9)
}
  0x3b   :  { %s9360_s4 = smov 16   ;;  %s9361_s28 = smov 1  }
  0x3c   :  { %116 = dma.hbm_to_vmem [thread:$0]  %s11524_s13, 80, %s111_s25, [#allocation12], %s9360_s4, %s9360_s4, %s9361_s28  }
  0x3d   :  { %s9188_s19 = scalar_lea.hbm %s11526_s15, 80 }
  0x3e   :  { %p9189_p10 = scmp.ne.s32.totalorder %s11526_s15, %s9188_s19  ;;  %p9192_p11 = scmp.lt.u32.totalorder %s9188_s19, %s11526_s15 }
  0x40   :  { %p9194_p12 = pnand %p9192_p11, %p9189_p10 }
  0x42   :  { %9197 = shalt.err (!%p9194_p12)
}
  0x43   :  { %s9198_s6 = scalar_lea.vmem %s9510_s29, 80  ;;  %s9202_s13 = scalar_lea.vmem %s9510_s29, 96 }
  0x44   :  { %p9199_p13 = scmp.ne.s32.totalorder %s9510_s29, %s9198_s6  ;;  %p9203_p0 = scmp.lt.s32.totalorder %s9510_s29, %s9510_s29 }
  0x45   :  { %p9204_p1 = scmp.lt.s32.totalorder %s9202_s13, %s9198_s6 }
  0x47   :  { %p9205_p2 = por %p9204_p1, %p9203_p0 }
  0x49   :  { %p9206_p3 = pnand %p9205_p2, %p9199_p13 }
  0x4b   :  { %9209 = shalt.err (!%p9206_p3)
}
  0x4c   :  { %140 = dma.hbm_to_vmem [thread:$0]  %s11526_s15, 80, %s9510_s29, [#allocation15], %s9360_s4, %s9360_s4, %s9361_s28  }
  0x4d   :  { %s9362_s24 = smov [#allocation2]   ;;  %s9210_s19 = scalar_lea.hbm %s11514_s3, 2048 }
  0x4e   :  { %s40_s26 = sshll.u32 %s9362_s24, 4  ;;  %p9211_p4 = scmp.ne.s32.totalorder %s11514_s3, %s9210_s19  ;;  %s41_s26 = int_to_ptr.vmem [resolvable:$true] %s40_s26 }
  0x4f   :  { %p9214_p5 = scmp.lt.u32.totalorder %s9210_s19, %s11514_s3 }
  0x51   :  { %p9216_p6 = pnand %p9214_p5, %p9211_p4 }
  0x53   :  { %9219 = shalt.err (!%p9216_p6)
}
  0x54   :  { %s9220_s6 = scalar_lea.vmem %s41_s26, 2048  ;;  %p9225_p8 = scmp.lt.s32.totalorder %s41_s26, %s41_s26 }
  0x55   :  { %p9221_p7 = scmp.ne.s32.totalorder %s41_s26, %s9220_s6  ;;  %p9226_p9 = scmp.lt.s32.totalorder %s9220_s6, %s9220_s6 }
  0x57   :  { %p9227_p10 = por %p9226_p9, %p9225_p8 }
  0x59   :  { %p9228_p11 = pnand %p9227_p10, %p9221_p7 }
  0x5b   :  { %9231 = shalt.err (!%p9228_p11)
}
  0x5c   :  { %s9363_s15 = smov 128   ;;  %s9364_s29 = smov 8  }
  0x5d   :  { %46 = dma.hbm_to_vmem [thread:$0]  %s11514_s3, 2048, %s41_s26, [#allocation3], %s9363_s15, %s9363_s15, %s9364_s29  }
  0x5e   :  { %s9365_s27 = smov [#allocation7]   ;;  %s9366_s30 = smov [#allocation10]  }
  0x5f   :  { %s64_s24 = sshll.u32 %s9365_s27, 4  ;;  %s88_s0 = sshll.u32 %s9366_s30, 4  ;;  %s65_s24 = int_to_ptr.vmem [resolvable:$true] %s64_s24  ;;  %s89_s0 = int_to_ptr.vmem [resolvable:$true] %s88_s0 }
  0x60   :  { %s9232_s20 = scalar_lea.hbm %s11516_s5, 80 }
  0x61   :  { %p9233_p12 = scmp.ne.s32.totalorder %s11516_s5, %s9232_s20  ;;  %p9236_p13 = scmp.lt.u32.totalorder %s9232_s20, %s11516_s5 }
  0x63   :  { %p9238_p0 = pnand %p9236_p13, %p9233_p12 }
  0x65   :  { %9241 = shalt.err (!%p9238_p0)
}
  0x66   :  { %s9242_s3 = scalar_lea.vmem %s65_s24, 80  ;;  %s9246_s26 = scalar_lea.vmem %s65_s24, 96 }
  0x67   :  { %p9243_p1 = scmp.ne.s32.totalorder %s65_s24, %s9242_s3  ;;  %p9247_p2 = scmp.lt.s32.totalorder %s65_s24, %s65_s24 }
  0x68   :  { %p9248_p3 = scmp.lt.s32.totalorder %s9246_s26, %s9242_s3 }
  0x6a   :  { %p9249_p4 = por %p9248_p3, %p9247_p2 }
  0x6c   :  { %p9250_p5 = pnand %p9249_p4, %p9243_p1 }
  0x6e   :  { %9253 = shalt.err (!%p9250_p5)
}
  0x6f   :  { %70 = dma.hbm_to_vmem [thread:$0]  %s11516_s5, 80, %s65_s24, [#allocation6], %s9360_s4, %s9360_s4, %s9361_s28  }
  0x70   :  { %s9254_s27 = scalar_lea.hbm %s11518_s7, 80 }
  0x71   :  { %p9255_p6 = scmp.ne.s32.totalorder %s11518_s7, %s9254_s27  ;;  %p9258_p7 = scmp.lt.u32.totalorder %s9254_s27, %s11518_s7 }
  0x73   :  { %p9260_p8 = pnand %p9258_p7, %p9255_p6 }
  0x75   :  { %9263 = shalt.err (!%p9260_p8)
}
  0x76   :  { %s9264_s21 = scalar_lea.vmem %s89_s0, 80  ;;  %s9268_s22 = scalar_lea.vmem %s89_s0, 96 }
  0x77   :  { %p9265_p9 = scmp.ne.s32.totalorder %s89_s0, %s9264_s21  ;;  %p9269_p10 = scmp.lt.s32.totalorder %s89_s0, %s89_s0 }
  0x78   :  { %p9270_p11 = scmp.lt.s32.totalorder %s9268_s22, %s9264_s21 }
  0x7a   :  { %p9271_p12 = por %p9270_p11, %p9269_p10 }
  0x7c   :  { %p9272_p13 = pnand %p9271_p12, %p9265_p9 }
  0x7e   :  { %9275 = shalt.err (!%p9272_p13)
}
  0x7f   :  { %94 = dma.hbm_to_vmem [thread:$0]  %s11518_s7, 80, %s89_s0, [#allocation9], %s9360_s4, %s9360_s4, %s9361_s28  }
  0x80   :  { %s9367_s6 = smov [#allocation13]   ;;  %s9368_s26 = smov [#allocation16]  }
  0x81   :  { %s122_s3 = sshll.u32 %s9367_s6, 4  ;;  %s146_s15 = sshll.u32 %s9368_s26, 4  ;;  %s123_s3 = int_to_ptr.vmem [resolvable:$true] %s122_s3  ;;  %s147_s15 = int_to_ptr.vmem [resolvable:$true] %s146_s15 }
  0x82   :  { %s9276_s25 = scalar_lea.hbm %s11525_s14, 5120 }
  0x83   :  { %p9277_p0 = scmp.ne.s32.totalorder %s11525_s14, %s9276_s25  ;;  %p9280_p1 = scmp.lt.u32.totalorder %s9276_s25, %s11525_s14 }
  0x85   :  { %p9282_p2 = pnand %p9280_p1, %p9277_p0 }
  0x87   :  { %9285 = shalt.err (!%p9282_p2)
}
  0x88   :  { %s9286_s7 = scalar_lea.vmem %s123_s3, 5120  ;;  %p9291_p4 = scmp.lt.s32.totalorder %s123_s3, %s123_s3 }
  0x89   :  { %p9287_p3 = scmp.ne.s32.totalorder %s123_s3, %s9286_s7  ;;  %p9292_p5 = scmp.lt.s32.totalorder %s9286_s7, %s9286_s7 }
  0x8b   :  { %p9293_p6 = por %p9292_p5, %p9291_p4 }
  0x8d   :  { %p9294_p7 = pnand %p9293_p6, %p9287_p3 }
  0x8f   :  { %9297 = shalt.err (!%p9294_p7)
}
  0x90   :  { %s11538_s28 = smov 64   ;;  %s9298_s5 = scalar_lea.hbm %s11527_s16, 256 }
  0x91   :  { %128 = dma.hbm_to_vmem [thread:$0]  %s11525_s14, 5120, %s123_s3, [#allocation12], %s11538_s28, %s11538_s28, %s9356_s23  }
  0x92   :  { %p9299_p8 = scmp.ne.s32.totalorder %s11527_s16, %s9298_s5  ;;  %p9302_p9 = scmp.lt.u32.totalorder %s9298_s5, %s11527_s16 }
  0x94   :  { %p9304_p10 = pnand %p9302_p9, %p9299_p8 }
  0x96   :  { %9307 = shalt.err (!%p9304_p10)
}
  0x97   :  { %s9308_s2 = scalar_lea.vmem %s147_s15, 256  ;;  %p9313_p12 = scmp.lt.s32.totalorder %s147_s15, %s147_s15 }
  0x98   :  { %p9309_p11 = scmp.ne.s32.totalorder %s147_s15, %s9308_s2  ;;  %p9314_p13 = scmp.lt.s32.totalorder %s9308_s2, %s9308_s2 }
  0x9a   :  { %p9315_p0 = por %p9314_p13, %p9313_p12 }
  0x9c   :  { %p9316_p1 = pnand %p9315_p0, %p9309_p11 }
  0x9e   :  { %9319 = shalt.err (!%p9316_p1)
}
  0x9f   :  { %152 = dma.hbm_to_vmem [thread:$0]  %s11527_s16, 256, %s147_s15, [#allocation15], %s11538_s28, %s11538_s28, %s9356_s23  }
  0xa0   :  { %9342 = dma.done.wait [#allocation3], 2048  }
  0xa1   :  { %9343 = vsyncadd [#allocation3], 4294965248 }
  0xa2   :  { %9344 = dma.done.wait [#allocation6], 1360  }
  0xa3   :  { %9345 = vsyncadd [#allocation6], 4294965936 }
  0xa4   :  { %9346 = dma.done.wait [#allocation9], 1360  }
  0xa5   :  { %9347 = vsyncadd [#allocation9], 4294965936 }
  0xa6   :  { %9348 = dma.done.wait [#allocation12], 5200  }
  0xa7   :  { %9349 = vsyncadd [#allocation12], 4294962096 }
  0xa8   :  { %9350 = dma.done.wait [#allocation15], 336  }
  0xa9   :  { %9351 = vsyncadd [#allocation15], 4294966960  ;;  %v9369_v0 = vmov 0.0   ;;  %vm9370_vm0 = vmmov 0   ;;  %v8626_v1 = vld [vmem:[#allocation5] sm:$0xff]   ;;  %v8627_v2 = vld [vmem:[#allocation5 + $0x8] sm:$0xff]  }
  0xaa   :  { %6832 = vmatprep.subr.bf16.mxu0 %v9369_v0  ;;  %6836 = vmatprep.mubr.msk.bf16.mxu0 %vm9370_vm0, %v9369_v0  ;;  %s11539_s25 = sld [smem:[#allocation24_spill]]  ;;  %s11540_s19 = sld [smem:[#allocation25_spill]]  ;;  %vm219_vm1 = vcmask 261120   ;;  %v6098_v16 = vld [vmem:[#allocation7] ss:$0 sm:$0xff]  ;;  %vm372_vm2 = vcmask 31744  }
  0xab   :  { %6833 = vmatpush3.bf16.msra.mxu0 %v8626_v1  ;;  %s11541_s5 = sld [smem:[#allocation26_spill]]  ;;  %s9371_s26 = smov 120   ;;  %vm9737_vm3 = vmpackc.low %vm372_vm2, %vm372_vm2  ;;  %vm993_vm4 = vcmask 64512   ;;  %vm996_vm5 = vcmask 97280   ;;  %vm999_vm6 = vcmask 130048   ;;  %vm1002_vm7 = vcmask 162816  }
  0xac   :  { %6834 = vmatprep.subr.bf16.mxu0 %v9369_v0  ;;  %s9372_s13 = smov 124   ;;  %s9373_s2 = smov 116   ;;  %vm1005_vm8 = vcmask 195584   ;;  %vm1008_vm9 = vcmask 228352   ;;  %vm6061_vm12 = vcmask 58368  }
  0xad   :  { %s9374_s14 = smov 112   ;;  %s9375_s3 = smov 108  }
  0xae   :  { %s9376_s16 = smov 104   ;;  %s9377_s15 = smov 100  }
  0xaf   :  { %6835 = vmatpush3.bf16.msra.mxu0 %v8627_v2  ;;  %s9379_s27 = smov 12   ;;  %s9380_s30 = smov 20  }
  0xb0   :  { %v183_v3 = vld [vmem:[%s11539_s25] sm:$0xff]  ;;  %v184_v5 = vld [vmem:[%s11539_s25 + $0x8] sm:$0xff]  ;;  %s9378_s25 = smov 96   ;;  %s9382_s1 = smov 28  }
  0xb1   :  { %v185_v4 = vld [vmem:[%s11540_s19] sm:$0xff]  ;;  %v186_v6 = vld [vmem:[%s11540_s19 + $0x8] sm:$0xff]  ;;  %s9381_s19 = smov 24  }
  0xb2   :  { %v187_v7 = vmul.f32 0.03, %v185_v4  ;;  %v188_v8 = vmul.f32 0.03, %v186_v6  ;;  %v191_v9 = vld [vmem:[%s11541_s5] sm:$0xff]  ;;  %v192_v10 = vld [vmem:[%s11541_s5 + $0x8] sm:$0xff] }
  0xb4   :  { %v189_v11 = vadd.f32 %v187_v7, %v183_v3  ;;  %v190_v12 = vadd.f32 %v188_v8, %v184_v5 }
  0xb6   :  { %v9643_v13 = vadd.f32 %v191_v9, %v189_v11  ;;  %v9645_v14 = vadd.f32 %v192_v10, %v190_v12 }
  0xb8   :  { %v195_v15 = vpack.c.bf16 %v9645_v14, %v9643_v13 }
  0xba   :  { %6837 = vmatmul.mubr.msk.bf16.vlgmr.msra.gmra.mrb[0].mxu0 %vm219_vm1, %v195_v15 }
 0x18d   :  { %v257_v17 = vpop.f32.mrb[0].mxu0 }
 0x18e   :  { %v258_v18 = vadd.f32 %v6098_v16, %v257_v17  ;;  %v6838_v19 = vpop.f32.mrb[1].mxu0 }
 0x18f   :  { %v260_v20 = vpop.f32.mrb[2].mxu0 }
 0x190   :  { %v9650_v21 = vadd.f32 %v6098_v16, %v260_v20  ;;  %272 = vrot.lane.b32.xlu1 %v258_v18, %s9371_s26  ;;  %266 = vrot.lane.b32.xlu0 %v258_v18, %s9372_s13  ;;  %v6839_v22 = vpop.f32.mrb[3].mxu0  ;;  %v308_v23 = vmul.f32 0.5, %v258_v18 }
 0x192   :  { %6872 = vmatprep.mubr.msk.f32.mxu1 %vm372_vm2, %v308_v23  ;;  %v8051_v24 = vpack.i.bf16 %v9650_v21, %v258_v18 }
 0x194   :  { %274 = vrot.lane.b32.xlu1 %v9650_v21, %s9371_s26  ;;  %268 = vrot.lane.b32.xlu0 %v9650_v21, %s9372_s13 }
 0x198   :  { %280 = vrot.lane.b32.xlu1 %v9650_v21, %s9373_s2  ;;  %278 = vrot.lane.b32.xlu0 %v258_v18, %s9373_s2 }
 0x19c   :  { %286 = vrot.lane.b32.xlu1 %v9650_v21, %s9374_s14  ;;  %284 = vrot.lane.b32.xlu0 %v258_v18, %s9374_s14 }
 0x1a0   :  { %292 = vrot.lane.b32.xlu1 %v9650_v21, %s9375_s3  ;;  %290 = vrot.lane.b32.xlu0 %v258_v18, %s9375_s3 }
 0x1a4   :  { %298 = vrot.lane.b32.xlu1 %v9650_v21, %s9376_s16  ;;  %296 = vrot.lane.b32.xlu0 %v258_v18, %s9376_s16 }
 0x1a8   :  { %304 = vrot.lane.b32.xlu1 %v9650_v21, %s9377_s15  ;;  %302 = vrot.lane.b32.xlu0 %v258_v18, %s9377_s15 }
 0x1ac   :  { %8052 = vrot.lane.b32.xlu0 %v8051_v24, %s9378_s25 }
 0x202   :  { %v9676_v25 = vpop.permute.xlu1 %272  ;;  %v9678_v26 = vpop.permute.xlu0 %266 }
 0x206   :  { %v9680_v27 = vpop.permute.xlu1 %274  ;;  %v9682_v28 = vpop.permute.xlu0 %268 }
 0x207   :  { %v8061_v29 = vpack.i.bf16 %v9680_v27, %v9676_v25  ;;  %v8056_v30 = vpack.i.bf16 %v9682_v28, %v9678_v26 }
 0x209   :  { %8062 = vrot.lane.b32.xlu0 %v8061_v29, %s9378_s25  ;;  %8057 = vrot.lane.b32.xlu1 %v8056_v30, %s9378_s25 }
 0x20a   :  { %v9690_v31 = vpop.permute.xlu1 %280  ;;  %v9692_v32 = vpop.permute.xlu0 %278 }
 0x20b   :  { %v8066_v33 = vpack.i.bf16 %v9690_v31, %v9692_v32 }
 0x20d   :  { %8067 = vrot.lane.b32.xlu1 %v8066_v33, %s9378_s25 }
 0x20e   :  { %v9697_v34 = vpop.permute.xlu1 %286  ;;  %v9699_v35 = vpop.permute.xlu0 %284 }
 0x20f   :  { %v8071_v36 = vpack.i.bf16 %v9697_v34, %v9699_v35 }
 0x211   :  { %8072 = vrot.lane.b32.xlu0 %v8071_v36, %s9378_s25 }
 0x212   :  { %v9704_v37 = vpop.permute.xlu1 %292  ;;  %v9706_v38 = vpop.permute.xlu0 %290 }
 0x213   :  { %v9710_v39 = vpack.i.bf16 %v9704_v37, %v9706_v38 }
 0x215   :  { %8077 = vrot.lane.b32.xlu1 %v9710_v39, %s9378_s25 }
 0x216   :  { %v9714_v40 = vpop.permute.xlu1 %298  ;;  %v9716_v41 = vpop.permute.xlu0 %296 }
 0x217   :  { %v9720_v42 = vpack.i.bf16 %v9714_v40, %v9716_v41 }
 0x219   :  { %8082 = vrot.lane.b32.xlu0 %v9720_v42, %s9378_s25 }
 0x21a   :  { %v9724_v43 = vpop.permute.xlu1 %304  ;;  %v9726_v44 = vpop.permute.xlu0 %302 }
 0x21b   :  { %v9730_v45 = vpack.i.bf16 %v9724_v43, %v9726_v44 }
 0x21d   :  { %8097 = vrot.lane.b32.xlu0 %v8056_v30, %s11538_s28  ;;  %8087 = vrot.lane.b32.xlu1 %v9730_v45, %s9378_s25 }
 0x21e   :  { %v8053_v46 = vpop.permute.xlu0 %8052 }
 0x21f   :  { %v8055_v47 = vunpack.i.h.bf16 %v8053_v46  ;;  %v8054_v48 = vunpack.i.l.bf16 %v8053_v46 }
 0x221   :  { %8107 = vrot.lane.b32.xlu0 %v8066_v33, %s11538_s28  ;;  %8092 = vrot.lane.b32.xlu1 %v8051_v24, %s11538_s28  ;;  %v7620_v50 = vpack.c.bf16 %v8055_v47, %v8054_v48 }
 0x223   :  { %7622 = vmatprep.subr.msk.bf16.mxu1 %vm9737_vm3, %v7620_v50 }
 0x224   :  { %7625 = vmatpush3.bf16.xpose.msk.msra.mxu1 %vm9737_vm3, %v7620_v50 }
 0x225   :  { %8102 = vrot.lane.b32.xlu1 %v8061_v29, %s11538_s28 }
 0x229   :  { %8112 = vrot.lane.b32.xlu1 %v8071_v36, %s11538_s28 }
 0x27b   :  { %v8058_v51 = vpop.permute.xlu1 %8057  ;;  %v8063_v52 = vpop.permute.xlu0 %8062 }
 0x27c   :  { %v8060_v53 = vunpack.i.h.bf16 %v8058_v51  ;;  %v8059_v54 = vunpack.i.l.bf16 %v8058_v51  ;;  %v8065_v55 = vunpack.i.h.bf16 %v8063_v52  ;;  %v8064_v56 = vunpack.i.l.bf16 %v8063_v52 }
 0x27e   :  { %v7626_v57 = vpack.c.bf16 %v8060_v53, %v8059_v54  ;;  %v7632_v58 = vpack.c.bf16 %v8065_v55, %v8064_v56 }
 0x27f   :  { %v8068_v59 = vpop.permute.xlu1 %8067 }
 0x280   :  { %7628 = vmatprep.subr.msk.bf16.mxu1 %vm9737_vm3, %v7626_v57  ;;  %v8070_v60 = vunpack.i.h.bf16 %v8068_v59  ;;  %v8069_v61 = vunpack.i.l.bf16 %v8068_v59  ;;  %v311_v59 = vmul.f32 0.5, %v9682_v28  ;;  %v318_v28 = vmul.f32 0.5, %v9706_v38  ;;  %v324_v38 = vld [vmem:[#allocation2] sm:$0xff] }
 0x281   :  { %7631 = vmatpush3.bf16.xpose.msk.msra.mxu1 %vm9737_vm3, %v7626_v57  ;;  %v309_v57 = vmul.f32 0.5, %v9650_v21  ;;  %v315_v21 = vmul.f32 0.5, %v9690_v31  ;;  %v321_v31 = vmul.f32 0.5, %v9714_v40 }
 0x282   :  { %7634 = vmatprep.subr.msk.bf16.mxu1 %vm9737_vm3, %v7632_v58  ;;  %v7638_v63 = vpack.c.bf16 %v8070_v60, %v8069_v61  ;;  %v312_v60 = vmul.f32 0.5, %v9676_v25  ;;  %v313_v61 = vmul.f32 0.5, %v9680_v27  ;;  %v317_v25 = vmul.f32 0.5, %v9697_v34 }
 0x283   :  { %v8073_v62 = vpop.permute.xlu0 %8072  ;;  %v319_v27 = vmul.f32 0.5, %v9704_v37  ;;  %v323_v34 = vmul.f32 0.5, %v9724_v43  ;;  %v325_v37 = vld [vmem:[#allocation2 + $0x8] sm:$0xff] }
 0x284   :  { %v8075_v3 = vunpack.i.h.bf16 %v8073_v62  ;;  %v8074_v4 = vunpack.i.l.bf16 %v8073_v62  ;;  %v314_v62 = vmul.f32 0.5, %v9692_v32  ;;  %v320_v32 = vmul.f32 0.5, %v9716_v41 }
 0x286   :  { %v7644_v6 = vpack.c.bf16 %v8075_v3, %v8074_v4  ;;  %v326_v4 = vld [vmem:[#allocation2 + $0x10] sm:$0xff] }
 0x287   :  { %v8078_v1 = vpop.permute.xlu1 %8077 }
 0x288   :  { %v8080_v8 = vunpack.i.h.bf16 %v8078_v1  ;;  %v8079_v9 = vunpack.i.l.bf16 %v8078_v1 }
 0x289   :  { %7637 = vmatpush3.bf16.xpose.msk.msra.mxu1 %vm9737_vm3, %v7632_v58  ;;  %v310_v58 = vmul.f32 0.5, %v9678_v26  ;;  %v316_v26 = vmul.f32 0.5, %v9699_v35  ;;  %v322_v35 = vmul.f32 0.5, %v9726_v44  ;;  %v327_v44 = vld [vmem:[#allocation2 + $0x18] sm:$0xff] }
 0x28a   :  { %7640 = vmatprep.subr.msk.bf16.mxu1 %vm9737_vm3, %v7638_v63  ;;  %v7650_v19 = vpack.c.bf16 %v8080_v8, %v8079_v9 }
 0x28b   :  { %v8083_v2 = vpop.permute.xlu0 %8082 }
 0x28c   :  { %v8085_v29 = vunpack.i.h.bf16 %v8083_v2  ;;  %v8084_v30 = vunpack.i.l.bf16 %v8083_v2 }
 0x28e   :  { %v7656_v48 = vpack.c.bf16 %v8085_v29, %v8084_v30  ;;  %v333_v29 = vld [vmem:[#allocation2 + $0x48] sm:$0xff]  ;;  %v334_v30 = vld [vmem:[#allocation2 + $0x50] sm:$0xff] }
 0x28f   :  { %v8088_v5 = vpop.permute.xlu1 %8087  ;;  %v8098_v7 = vpop.permute.xlu0 %8097 }
 0x290   :  { %v8100_v11 = vunpack.i.h.bf16 %v8098_v7  ;;  %v8099_v12 = vunpack.i.l.bf16 %v8098_v7  ;;  %v8090_v53 = vunpack.i.h.bf16 %v8088_v5  ;;  %v8089_v54 = vunpack.i.l.bf16 %v8088_v5  ;;  %v328_v5 = vld [vmem:[#allocation2 + $0x20] sm:$0xff] }
 0x291   :  { %7643 = vmatpush3.bf16.xpose.msk.msra.mxu1 %vm9737_vm3, %v7638_v63 }
 0x292   :  { %7646 = vmatprep.subr.msk.bf16.mxu1 %vm9737_vm3, %v7644_v6  ;;  %v7672_v23 = vpack.c.bf16 %v8100_v11, %v8099_v12  ;;  %v7662_v56 = vpack.c.bf16 %v8090_v53, %v8089_v54  ;;  %v330_v11 = vld [vmem:[#allocation2 + $0x30] sm:$0xff] }
 0x293   :  { %v8093_v10 = vpop.permute.xlu1 %8092  ;;  %v8108_v24 = vpop.permute.xlu0 %8107 }
 0x294   :  { %v8095_v15 = vunpack.i.h.bf16 %v8093_v10  ;;  %v8094_v16 = vunpack.i.l.bf16 %v8093_v10  ;;  %v8110_v33 = vunpack.i.h.bf16 %v8108_v24  ;;  %v8109_v36 = vunpack.i.l.bf16 %v8108_v24  ;;  %v329_v10 = vld [vmem:[#allocation2 + $0x28] sm:$0xff] }
 0x296   :  { %v7668_v17 = vpack.c.bf16 %v8095_v15, %v8094_v16  ;;  %v7680_v52 = vpack.c.bf16 %v8110_v33, %v8109_v36 }
 0x297   :  { %v8103_v18 = vpop.permute.xlu1 %8102 }
 0x298   :  { %v8105_v20 = vunpack.i.h.bf16 %v8103_v18  ;;  %v8104_v22 = vunpack.i.l.bf16 %v8103_v18  ;;  %7669 = vmatprep.subr.bf16.mxu0 %v7668_v17  ;;  %v331_v18 = vld [vmem:[#allocation2 + $0x38] sm:$0xff] }
 0x299   :  { %7649 = vmatpush3.bf16.xpose.msk.msra.mxu1 %vm9737_vm3, %v7644_v6  ;;  %7671 = vmatpush3.bf16.msra.mxu0 %v7668_v17 }
 0x29a   :  { %7652 = vmatprep.subr.msk.bf16.mxu1 %vm9737_vm3, %v7650_v19  ;;  %7673 = vmatprep.subr.bf16.mxu0 %v7672_v23  ;;  %v7676_v46 = vpack.c.bf16 %v8105_v20, %v8104_v22 }
 0x29b   :  { %v8113_v47 = vpop.permute.xlu1 %8112 }
 0x29c   :  { %v8115_v50 = vunpack.i.h.bf16 %v8113_v47  ;;  %v8114_v51 = vunpack.i.l.bf16 %v8113_v47 }
 0x29d   :  { %7675 = vmatpush3.bf16.msra.mxu0 %v7672_v23 }
 0x29e   :  { %7677 = vmatprep.subr.bf16.mxu0 %v7676_v46  ;;  %v7684_v55 = vpack.c.bf16 %v8115_v50, %v8114_v51  ;;  %v336_v50 = vld [vmem:[#allocation2 + $0x60] sm:$0xff] }
 0x2a1   :  { %7655 = vmatpush3.bf16.xpose.msk.msra.mxu1 %vm9737_vm3, %v7650_v19  ;;  %7679 = vmatpush3.bf16.msra.mxu0 %v7676_v46  ;;  %v332_v19 = vld [vmem:[#allocation2 + $0x40] sm:$0xff] }
 0x2a2   :  { %7658 = vmatprep.subr.msk.bf16.mxu1 %vm9737_vm3, %v7656_v48  ;;  %7681 = vmatprep.subr.bf16.mxu0 %v7680_v52 }
 0x2a5   :  { %7683 = vmatpush3.bf16.msra.mxu0 %v7680_v52 }
 0x2a6   :  { %7685 = vmatprep.subr.bf16.mxu0 %v7684_v55 }
 0x2a9   :  { %7661 = vmatpush3.bf16.xpose.msk.msra.mxu1 %vm9737_vm3, %v7656_v48  ;;  %7687 = vmatpush3.bf16.msra.mxu0 %v7684_v55  ;;  %v335_v48 = vld [vmem:[#allocation2 + $0x58] sm:$0xff]  ;;  %v337_v55 = vld [vmem:[#allocation2 + $0x68] sm:$0xff] }
 0x2aa   :  { %7664 = vmatprep.subr.msk.bf16.mxu1 %vm9737_vm3, %v7662_v56 }
 0x2b1   :  { %7667 = vmatpush3.bf16.xpose.msk.msra.mxu1 %vm9737_vm3, %v7662_v56  ;;  %v338_v56 = vld [vmem:[#allocation2 + $0x70] sm:$0xff] }
 0x2b2   :  { %6968 = vmatprep.subr.bf16.mxu1 %v9369_v0 }
 0x2b8   :  { %6873 = vmatmul.mubr.msk.f32.vlgmr.msra.gmra.mrb[0].mxu1 %vm372_vm2, %v309_v57 }
 0x2b9   :  { %6875 = vmatprep.mubr.msk.f32.mxu1 %vm372_vm2, %v310_v58 }
 0x2bc   :  { %6876 = vmatmul.mubr.msk.f32.gmra.mrb[2].mxu1 %vm372_vm2, %v311_v59 }
 0x2bd   :  { %6878 = vmatprep.mubr.msk.f32.mxu1 %vm372_vm2, %v312_v60 }
 0x2c0   :  { %6879 = vmatmul.mubr.msk.f32.gmra.mrb[4].mxu1 %vm372_vm2, %v313_v61  ;;  %v339_v61 = vld [vmem:[#allocation2 + $0x78] sm:$0xff] }
 0x2c1   :  { %6881 = vmatprep.mubr.msk.f32.mxu1 %vm372_vm2, %v314_v62 }
 0x2c4   :  { %6882 = vmatmul.mubr.msk.f32.gmra.mrb[6].mxu1 %vm372_vm2, %v315_v21 }
 0x2c5   :  { %6884 = vmatprep.mubr.msk.f32.mxu1 %vm372_vm2, %v316_v26 }
 0x2c8   :  { %6885 = vmatmul.mubr.msk.f32.gmra.mrb[8].mxu1 %vm372_vm2, %v317_v25 }
 0x2c9   :  { %6887 = vmatprep.mubr.msk.f32.mxu1 %vm372_vm2, %v318_v28 }
 0x2cc   :  { %6888 = vmatmul.mubr.msk.f32.gmra.mrb[10].mxu1 %vm372_vm2, %v319_v27 }
 0x2cd   :  { %6890 = vmatprep.mubr.msk.f32.mxu1 %vm372_vm2, %v320_v32 }
 0x2d0   :  { %6891 = vmatmul.mubr.msk.f32.gmra.mrb[12].mxu1 %vm372_vm2, %v321_v31 }
 0x2d1   :  { %6893 = vmatprep.mubr.msk.f32.mxu1 %vm372_vm2, %v322_v35 }
 0x2d4   :  { %6894 = vmatmul.mubr.msk.f32.gmra.mrb[14].mxu1 %vm372_vm2, %v323_v34 }
 0x2d5   :  { %6984 = vmatprep.mubr.msk.bf16.mxu1 %vm9370_vm0, %v9369_v0 }
 0x38b   :  { %v6874_v41 = vpop.f32.mrb[0].mxu1 }
 0x38c   :  { %v9810_v63 = vadd.f32 %v6874_v41, %v325_v37  ;;  %v519_v1 = vpop.f32.mrb[1].mxu1 }
 0x38d   :  { %v9812_v40 = vadd.f32 %v519_v1, %v324_v38 }
 0x38e   :  { %600 = vmax.xlane.f32.xlu1 %v9810_v63 }
 0x38f   :  { %v6877_v2 = vpop.f32.mrb[2].mxu1  ;;  %598 = vmax.xlane.f32.xlu0 %v9812_v40 }
 0x390   :  { %v9816_v43 = vadd.f32 %v6877_v2, %v327_v44  ;;  %v529_v3 = vpop.f32.mrb[3].mxu1 }
 0x391   :  { %v9819_v8 = vadd.f32 %v529_v3, %v326_v4 }
 0x393   :  { %v6880_v6 = vpop.f32.mrb[4].mxu1  ;;  %604 = vmax.xlane.f32.xlu0 %v9816_v43 }
 0x394   :  { %v539_v7 = vpop.f32.mrb[5].mxu1  ;;  %v9825_v16 = vadd.f32 %v6880_v6, %v329_v10 }
 0x395   :  { %v9821_v9 = vadd.f32 %v539_v7, %v328_v5 }
 0x397   :  { %v6883_v12 = vpop.f32.mrb[6].mxu1  ;;  %606 = vmax.xlane.f32.xlu1 %v9821_v9  ;;  %602 = vmax.xlane.f32.xlu0 %v9819_v8 }
 0x398   :  { %v549_v15 = vpop.f32.mrb[7].mxu1  ;;  %v9831_v23 = vadd.f32 %v6883_v12, %v331_v18 }
 0x399   :  { %v9827_v17 = vadd.f32 %v549_v15, %v330_v11 }
 0x39b   :  { %v6886_v20 = vpop.f32.mrb[8].mxu1  ;;  %610 = vmax.xlane.f32.xlu1 %v9827_v17  ;;  %608 = vmax.xlane.f32.xlu0 %v9825_v16 }
 0x39c   :  { %v559_v22 = vpop.f32.mrb[9].mxu1  ;;  %v9837_v46 = vadd.f32 %v6886_v20, %v333_v29 }
 0x39d   :  { %v9833_v24 = vadd.f32 %v559_v22, %v332_v19 }
 0x39f   :  { %v6889_v33 = vpop.f32.mrb[10].mxu1  ;;  %614 = vmax.xlane.f32.xlu1 %v9833_v24  ;;  %612 = vmax.xlane.f32.xlu0 %v9831_v23 }
 0x3a0   :  { %v569_v36 = vpop.f32.mrb[11].mxu1  ;;  %v9843_v53 = vadd.f32 %v6889_v33, %v335_v48 }
 0x3a1   :  { %v9839_v47 = vadd.f32 %v569_v36, %v334_v30 }
 0x3a3   :  { %v6892_v51 = vpop.f32.mrb[12].mxu1  ;;  %618 = vmax.xlane.f32.xlu1 %v9839_v47  ;;  %616 = vmax.xlane.f32.xlu0 %v9837_v46 }
 0x3a4   :  { %v579_v52 = vpop.f32.mrb[13].mxu1  ;;  %v9849_v59 = vadd.f32 %v6892_v51, %v337_v55 }
 0x3a5   :  { %v9845_v54 = vadd.f32 %v579_v52, %v336_v50 }
 0x3a7   :  { %v6895_v57 = vpop.f32.mrb[14].mxu1  ;;  %622 = vmax.xlane.f32.xlu1 %v9845_v54  ;;  %620 = vmax.xlane.f32.xlu0 %v9843_v53 }
 0x3a8   :  { %v589_v58 = vpop.f32.mrb[15].mxu1  ;;  %v9855_v62 = vadd.f32 %v6895_v57, %v339_v61 }
 0x3a9   :  { %v9851_v60 = vadd.f32 %v589_v58, %v338_v56 }
 0x3ab   :  { %626 = vmax.xlane.f32.xlu1 %v9851_v60  ;;  %624 = vmax.xlane.f32.xlu0 %v9849_v59 }
 0x3af   :  { %628 = vmax.xlane.f32.xlu0 %v9855_v62 }
 0x3bc   :  { %8117 = vrot.lane.b32.xlu1 %v9710_v39, %s11538_s28 }
 0x3c5   :  { %8122 = vrot.lane.b32.xlu0 %v9720_v42, %s11538_s28 }
 0x41b   :  { %v601_v21 = vpop.xlane.xlu1 %600 }
 0x41c   :  { %v631_v26 = vsub.f32 %v9810_v63, %v601_v21  ;;  %v599_v25 = vpop.xlane.xlu0 %598 }
 0x41d   :  { %v630_v28 = vsub.f32 %v9812_v40, %v599_v25 }
 0x41e   :  { %v648_v27 = vmul.f32 1.442695, %v631_v26 }
 0x41f   :  { %v646_v32 = vmul.f32 1.442695, %v630_v28 }
 0x420   :  { %8698 = vpow2.f32 %v648_v27  ;;  %v605_v31 = vpop.xlane.xlu0 %604 }
 0x421   :  { %8700 = vpow2.f32 %v646_v32  ;;  %v633_v35 = vsub.f32 %v9816_v43, %v605_v31 }
 0x423   :  { %v652_v34 = vmul.f32 1.442695, %v633_v35 }
 0x424   :  { %v607_v37 = vpop.xlane.xlu1 %606  ;;  %v603_v38 = vpop.xlane.xlu0 %602 }
 0x425   :  { %8702 = vpow2.f32 %v652_v34  ;;  %v634_v39 = vsub.f32 %v9821_v9, %v607_v37  ;;  %v632_v42 = vsub.f32 %v9819_v8, %v603_v38 }
 0x427   :  { %v654_v41 = vmul.f32 1.442695, %v634_v39  ;;  %v650_v63 = vmul.f32 1.442695, %v632_v42 }
 0x428   :  { %v611_v1 = vpop.xlane.xlu1 %610  ;;  %v609_v44 = vpop.xlane.xlu0 %608 }
 0x429   :  { %8704 = vpow2.f32 %v654_v41  ;;  %v635_v40 = vsub.f32 %v9825_v16, %v609_v44  ;;  %v636_v7 = vsub.f32 %v9827_v17, %v611_v1 }
 0x42a   :  { %v9868_v2 = vpop.eup %8698  ;;  %8706 = vpow2.f32 %v650_v63 }
 0x42b   :  { %v9870_v3 = vpop.eup %8700  ;;  %v656_v43 = vmul.f32 1.442695, %v635_v40  ;;  %680 = vadd.xlane.f32.xlu0 %v9868_v2  ;;  %v658_v12 = vmul.f32 1.442695, %v636_v7 }
 0x42c   :  { %v615_v4 = vpop.xlane.xlu1 %614  ;;  %678 = vadd.xlane.f32.xlu1 %v9870_v3  ;;  %v613_v5 = vpop.xlane.xlu0 %612 }
 0x42d   :  { %v637_v6 = vsub.f32 %v9831_v23, %v613_v5  ;;  %8708 = vpow2.f32 %v656_v43  ;;  %v638_v15 = vsub.f32 %v9833_v24, %v615_v4 }
 0x42f   :  { %v9876_v8 = vpop.eup %8702  ;;  %v660_v9 = vmul.f32 1.442695, %v637_v6  ;;  %v662_v20 = vmul.f32 1.442695, %v638_v15 }
 0x430   :  { %v619_v10 = vpop.xlane.xlu1 %618  ;;  %684 = vadd.xlane.f32.xlu0 %v9876_v8  ;;  %v617_v11 = vpop.xlane.xlu0 %616 }
 0x431   :  { %8710 = vpow2.f32 %v660_v9  ;;  %v640_v22 = vsub.f32 %v9839_v47, %v619_v10 }
 0x432   :  { %8712 = vpow2.f32 %v658_v12 }
 0x433   :  { %v9880_v16 = vpop.eup %8704  ;;  %8714 = vpow2.f32 %v662_v20  ;;  %v666_v24 = vmul.f32 1.442695, %v640_v22 }
 0x434   :  { %v9882_v18 = vpop.eup %8706  ;;  %v623_v19 = vpop.xlane.xlu1 %622  ;;  %686 = vadd.xlane.f32.xlu1 %v9880_v16 }
 0x435   :  { %v621_v17 = vpop.xlane.xlu0 %620  ;;  %682 = vadd.xlane.f32.xlu0 %v9882_v18  ;;  %v642_v33 = vsub.f32 %v9845_v54, %v623_v19  ;;  %8716 = vpow2.f32 %v666_v24 }
 0x436   :  { %v641_v34 = vsub.f32 %v9843_v53, %v621_v17 }
 0x437   :  { %v9887_v23 = vpop.eup %8708  ;;  %v670_v47 = vmul.f32 1.442695, %v642_v33 }
 0x438   :  { %v627_v29 = vpop.xlane.xlu1 %626  ;;  %v668_v37 = vmul.f32 1.442695, %v641_v34 }
 0x439   :  { %v625_v30 = vpop.xlane.xlu0 %624  ;;  %688 = vadd.xlane.f32.xlu0 %v9887_v23  ;;  %v644_v55 = vsub.f32 %v9851_v60, %v627_v29  ;;  %8718 = vpow2.f32 %v670_v47 }
 0x43a   :  { %v643_v38 = vsub.f32 %v9849_v59, %v625_v30 }
 0x43b   :  { %v9891_v36 = vpop.eup %8710  ;;  %v674_v21 = vmul.f32 1.442695, %v644_v55 }
 0x43c   :  { %v8118_v48 = vpop.permute.xlu1 %8117  ;;  %v9895_v57 = vpop.eup %8712  ;;  %v672_v39 = vmul.f32 1.442695, %v643_v38 }
 0x43d   :  { %v629_v50 = vpop.xlane.xlu0 %628  ;;  %v8120_v51 = vunpack.i.h.bf16 %v8118_v48  ;;  %v8119_v52 = vunpack.i.l.bf16 %v8118_v48  ;;  %692 = vadd.xlane.f32.xlu0 %v9891_v36  ;;  %v9899_v28 = vpop.eup %8714  ;;  %8720 = vpow2.f32 %v674_v21 }
 0x43e   :  { %v645_v26 = vsub.f32 %v9855_v62, %v629_v50 }
 0x43f   :  { %v7688_v56 = vpack.c.bf16 %v8120_v51, %v8119_v52  ;;  %v9904_v27 = vpop.eup %8716 }
 0x440   :  { %v676_v60 = vmul.f32 1.442695, %v645_v26 }
 0x441   :  { %v8123_v58 = vpop.permute.xlu0 %8122  ;;  %690 = vadd.xlane.f32.xlu0 %v9895_v57  ;;  %7689 = vmatprep.subr.bf16.mxu0 %v7688_v56 }
 0x442   :  { %v8125_v61 = vunpack.i.h.bf16 %v8123_v58  ;;  %v8124_v54 = vunpack.i.l.bf16 %v8123_v58  ;;  %7691 = vmatpush3.bf16.msra.mxu0 %v7688_v56  ;;  %8722 = vpow2.f32 %v676_v60 }
 0x443   :  { %v9907_v32 = vpop.eup %8718 }
 0x444   :  { %v7692_v25 = vpack.c.bf16 %v8125_v61, %v8124_v54 }
 0x445   :  { %694 = vadd.xlane.f32.xlu0 %v9899_v28  ;;  %8127 = vrot.lane.b32.xlu1 %v9730_v45, %s11538_s28  ;;  %v639_v45 = vsub.f32 %v9837_v46, %v617_v11 }
 0x446   :  { %7693 = vmatprep.subr.bf16.mxu0 %v7692_v25 }
 0x447   :  { %7695 = vmatpush3.bf16.msra.mxu0 %v7692_v25  ;;  %v9910_v62 = vpop.eup %8720  ;;  %v664_v35 = vmul.f32 1.442695, %v639_v45 }
 0x449   :  { %698 = vadd.xlane.f32.xlu0 %v9904_v27  ;;  %8724 = vpow2.f32 %v664_v35 }
 0x44a   :  { %8726 = vpow2.f32 %v668_v37 }
 0x44b   :  { %8728 = vpow2.f32 %v672_v39 }
 0x44c   :  { %v9913_v31 = vpop.eup %8722 }
 0x44d   :  { %702 = vadd.xlane.f32.xlu0 %v9907_v32 }
 0x451   :  { %706 = vadd.xlane.f32.xlu0 %v9910_v62 }
 0x453   :  { %v9919_v42 = vpop.eup %8724 }
 0x454   :  { %v9922_v41 = vpop.eup %8726 }
 0x455   :  { %708 = vadd.xlane.f32.xlu0 %v9913_v31  ;;  %v9925_v63 = vpop.eup %8728 }
 0x469   :  { %696 = vadd.xlane.f32.xlu1 %v9919_v42 }
 0x46d   :  { %700 = vadd.xlane.f32.xlu1 %v9922_v41 }
 0x471   :  { %704 = vadd.xlane.f32.xlu1 %v9925_v63 }
 0x4b8   :  { %v681_v46 = vpop.xlane.xlu0 %680 }
 0x4b9   :  { %v679_v53 = vpop.xlane.xlu1 %678 }
 0x4ba   :  { %8730 = vrcp.f32 %v679_v53 }
 0x4bb   :  { %8732 = vrcp.f32 %v681_v46 }
 0x4bd   :  { %v685_v1 = vpop.xlane.xlu0 %684 }
 0x4be   :  { %8734 = vrcp.f32 %v685_v1 }
 0x4c1   :  { %v687_v59 = vpop.xlane.xlu1 %686 }
 0x4c2   :  { %v683_v44 = vpop.xlane.xlu0 %682 }
 0x4c3   :  { %8736 = vrcp.f32 %v683_v44  ;;  %v8629_v44 = vld [vmem:[#allocation8 + $0x8] sm:$0xff]  }
 0x4c4   :  { %v8731_v40 = vpop.eup %8730  ;;  %8738 = vrcp.f32 %v687_v59 }
 0x4c5   :  { %v8128_v43 = vpop.permute.xlu1 %8127  ;;  %v726_v4 = vmul.f32 %v8731_v40, %v9870_v3  ;;  %v8733_v10 = vpop.eup %8732 }
 0x4c6   :  { %v8130_v5 = vunpack.i.h.bf16 %v8128_v43  ;;  %v8129_v6 = vunpack.i.l.bf16 %v8128_v43  ;;  %v689_v7 = vpop.xlane.xlu0 %688  ;;  %v727_v15 = vmul.f32 %v8733_v10, %v9868_v2 }
 0x4c7   :  { %8740 = vrcp.f32 %v689_v7  ;;  %6928 = vmatprep.mubr.f32.mxu0 %v726_v4 }
 0x4c8   :  { %v7696_v9 = vpack.c.bf16 %v8130_v5, %v8129_v6  ;;  %v8735_v12 = vpop.eup %8734 }
 0x4c9   :  { %v729_v22 = vmul.f32 %v8735_v12, %v9876_v8 }
 0x4ca   :  { %v693_v11 = vpop.xlane.xlu0 %692  ;;  %7697 = vmatprep.subr.bf16.mxu0 %v7696_v9 }
 0x4cb   :  { %7699 = vmatpush3.bf16.msra.mxu0 %v7696_v9  ;;  %8742 = vrcp.f32 %v693_v11 }
 0x4cc   :  { %6952 = vmatprep.subr.bf16.mxu0 %v9369_v0 }
 0x4cd   :  { %v8737_v19 = vpop.eup %8736 }
 0x4ce   :  { %v8739_v17 = vpop.eup %8738  ;;  %v691_v20 = vpop.xlane.xlu0 %690  ;;  %6929 = vmatmul.mubr.f32.vlgmr.msra.gmra.mrb[4].mxu0 %v727_v15  ;;  %v728_v3 = vmul.f32 %v8737_v19, %v9882_v18 }
 0x4cf   :  { %8744 = vrcp.f32 %v691_v20  ;;  %v730_v30 = vmul.f32 %v8739_v17, %v9880_v16 }
 0x4d0   :  { %6931 = vmatprep.mubr.f32.mxu0 %v728_v3 }
 0x4d1   :  { %v8741_v29 = vpop.eup %8740 }
 0x4d2   :  { %v695_v24 = vpop.xlane.xlu0 %694  ;;  %6932 = vmatmul.mubr.f32.gmra.mrb[6].mxu0 %v729_v22  ;;  %v731_v2 = vmul.f32 %v8741_v29, %v9887_v23 }
 0x4d3   :  { %8746 = vrcp.f32 %v695_v24  ;;  %6934 = vmatprep.mubr.f32.mxu0 %v730_v30 }
 0x4d5   :  { %v8743_v33 = vpop.eup %8742 }
 0x4d6   :  { %6935 = vmatmul.mubr.f32.gmra.mrb[8].mxu0 %v731_v2  ;;  %v733_v18 = vmul.f32 %v8743_v33, %v9891_v36  ;;  %v699_v16 = vpop.xlane.xlu0 %698 }
 0x4d7   :  { %8748 = vrcp.f32 %v699_v16 }
 0x4d9   :  { %v8745_v48 = vpop.eup %8744 }
 0x4da   :  { %v732_v50 = vmul.f32 %v8745_v48, %v9895_v57  ;;  %v703_v52 = vpop.xlane.xlu0 %702 }
 0x4dc   :  { %6937 = vmatprep.mubr.f32.mxu0 %v732_v50 }
 0x4dd   :  { %v8747_v51 = vpop.eup %8746  ;;  %6938 = vmatmul.mubr.f32.gmra.mrb[10].mxu0 %v733_v18 }
 0x4de   :  { %v734_v8 = vmul.f32 %v8747_v51, %v9899_v28  ;;  %v707_v55 = vpop.xlane.xlu0 %706 }
 0x4e0   :  { %6940 = vmatprep.mubr.f32.mxu0 %v734_v8 }
 0x4e1   :  { %v8749_v36 = vpop.eup %8748 }
 0x4e2   :  { %v709_v56 = vpop.xlane.xlu0 %708  ;;  %v736_v54 = vmul.f32 %v8749_v36, %v9904_v27 }
 0x4f6   :  { %v697_v47 = vpop.xlane.xlu1 %696 }
 0x4f7   :  { %8750 = vrcp.f32 %v697_v47 }
 0x4f8   :  { %8752 = vrcp.f32 %v703_v52 }
 0x4fa   :  { %v701_v23 = vpop.xlane.xlu1 %700 }
 0x4fb   :  { %8754 = vrcp.f32 %v701_v23 }
 0x4fc   :  { %8756 = vrcp.f32 %v707_v55 }
 0x4fe   :  { %v705_v57 = vpop.xlane.xlu1 %704 }
 0x4ff   :  { %8758 = vrcp.f32 %v705_v57 }
 0x500   :  { %8760 = vrcp.f32 %v709_v56 }
 0x501   :  { %v8751_v58 = vpop.eup %8750 }
 0x502   :  { %v735_v61 = vmul.f32 %v8751_v58, %v9919_v42  ;;  %v8753_v21 = vpop.eup %8752 }
 0x503   :  { %v738_v28 = vmul.f32 %v8753_v21, %v9907_v32 }
 0x504   :  { %6941 = vmatmul.mubr.f32.gmra.mrb[12].mxu0 %v735_v61 }
 0x505   :  { %v8755_v26 = vpop.eup %8754  ;;  %6943 = vmatprep.mubr.f32.mxu0 %v736_v54 }
 0x506   :  { %v737_v25 = vmul.f32 %v8755_v26, %v9922_v41  ;;  %v8757_v60 = vpop.eup %8756 }
 0x507   :  { %v740_v37 = vmul.f32 %v8757_v60, %v9910_v62 }
 0x508   :  { %6944 = vmatmul.mubr.f32.gmra.mrb[14].mxu0 %v737_v25 }
 0x509   :  { %v8759_v45 = vpop.eup %8758  ;;  %6946 = vmatprep.mubr.f32.mxu0 %v738_v28 }
 0x50a   :  { %v739_v35 = vmul.f32 %v8759_v45, %v9925_v63  ;;  %v8761_v34 = vpop.eup %8760  ;;  %v8628_v63 = vld [vmem:[#allocation8] sm:$0xff]  }
 0x50b   :  { %v741_v27 = vmul.f32 %v8761_v34, %v9913_v31  ;;  %6953 = vmatpush3.bf16.msra.mxu0 %v8628_v63 }
 0x50c   :  { %6947 = vmatmul.mubr.f32.gmra.mrb[16].mxu0 %v739_v35  ;;  %6954 = vmatprep.subr.bf16.mxu0 %v9369_v0 }
 0x50d   :  { %6949 = vmatprep.mubr.f32.mxu0 %v740_v37 }
 0x50f   :  { %6955 = vmatpush3.bf16.msra.mxu0 %v8629_v44 }
 0x510   :  { %6950 = vmatmul.mubr.f32.gmra.mrb[18].mxu0 %v741_v27  ;;  %6960 = vmatprep.subr.bf16.mxu0 %v9369_v0 }
 0x511   :  { %6956 = vmatprep.mubr.msk.bf16.mxu0 %vm9370_vm0, %v9369_v0 }
 0x5a1   :  { %v6930_v38 = vpop.f32.mrb[4].mxu0 }
 0x5a2   :  { %v856_v39 = vpop.f32.mrb[5].mxu0 }
 0x5a5   :  { %v6933_v32 = vpop.f32.mrb[6].mxu0 }
 0x5a6   :  { %v866_v42 = vpop.f32.mrb[7].mxu0 }
 0x5a7   :  { %v8131_v41 = vpack.i.bf16 %v6933_v32, %v866_v42 }
 0x5a9   :  { %8132 = vrot.lane.b32.xlu0 %v8131_v41, %s9356_s23  ;;  %v6936_v46 = vpop.f32.mrb[8].mxu0 }
 0x5aa   :  { %v876_v53 = vpop.f32.mrb[9].mxu0 }
 0x5ab   :  { %v8136_v1 = vpack.i.bf16 %v6936_v46, %v876_v53 }
 0x5ad   :  { %8137 = vrot.lane.b32.xlu0 %v8136_v1, %s9364_s29 }
 0x5b0   :  { %v6939_v62 = vpop.f32.mrb[10].mxu0 }
 0x5b1   :  { %v886_v31 = vpop.f32.mrb[11].mxu0 }
 0x5b2   :  { %v8141_v59 = vpack.i.bf16 %v6939_v62, %v886_v31 }
 0x5b4   :  { %8142 = vrot.lane.b32.xlu0 %v8141_v59, %s9379_s27 }
 0x5d7   :  { %v6942_v40 = vpop.f32.mrb[12].mxu0 }
 0x5d8   :  { %v896_v43 = vpop.f32.mrb[13].mxu0 }
 0x5d9   :  { %v8146_v4 = vpack.i.bf16 %v6942_v40, %v896_v43 }
 0x5db   :  { %8147 = vrot.lane.b32.xlu1 %v8146_v4, %s9360_s4  ;;  %v6945_v5 = vpop.f32.mrb[14].mxu0 }
 0x5dc   :  { %v906_v6 = vpop.f32.mrb[15].mxu0 }
 0x5dd   :  { %v8151_v7 = vpack.i.bf16 %v6945_v5, %v906_v6 }
 0x5df   :  { %8152 = vrot.lane.b32.xlu0 %v8151_v7, %s9380_s30  ;;  %v6948_v9 = vpop.f32.mrb[16].mxu0 }
 0x5e0   :  { %v916_v10 = vpop.f32.mrb[17].mxu0 }
 0x5e1   :  { %v8156_v11 = vpack.i.bf16 %v6948_v9, %v916_v10 }
 0x5e3   :  { %8157 = vrot.lane.b32.xlu0 %v8156_v11, %s9381_s19  ;;  %v6951_v12 = vpop.f32.mrb[18].mxu0  ;;  %v8631_v11 = vld [vmem:[%s11523_s12 + $0x8] sm:$0xff]  }
 0x5e4   :  { %v926_v15 = vpop.f32.mrb[19].mxu0 }
 0x5e5   :  { %v8161_v19 = vpack.i.bf16 %v6951_v12, %v926_v15  ;;  %v8632_v12 = vld [vmem:[#allocation13] sm:$0xff]   ;;  %v8633_v15 = vld [vmem:[#allocation13 + $0x8] sm:$0xff]  }
 0x5e6   :  { %6969 = vmatpush3.bf16.msra.mxu1 %v8632_v12 }
 0x5e7   :  { %8162 = vrot.lane.b32.xlu0 %v8161_v19, %s9382_s1  ;;  %6970 = vmatprep.subr.bf16.mxu1 %v9369_v0  ;;  %v8634_v19 = vld [vmem:[#allocation13 + $0x10] sm:$0xff]  }
 0x5ea   :  { %6971 = vmatpush3.bf16.msra.mxu1 %v8633_v15 }
 0x5eb   :  { %6972 = vmatprep.subr.bf16.mxu1 %v9369_v0 }
 0x5ee   :  { %6973 = vmatpush3.bf16.msra.mxu1 %v8634_v19 }
 0x5ef   :  { %6974 = vmatprep.subr.bf16.mxu1 %v9369_v0 }
 0x61b   :  { %v8133_v17 = vpop.permute.xlu0 %8132 }
 0x61c   :  { %v8135_v29 = vunpack.i.h.bf16 %v8133_v17  ;;  %v8134_v30 = vunpack.i.l.bf16 %v8133_v17  ;;  %v8635_v17 = vld [vmem:[#allocation13 + $0x18] sm:$0xff]  }
 0x61d   :  { %6975 = vmatpush3.bf16.msra.mxu1 %v8635_v17  ;;  %v6153_v17 = vld [vmem:[%s11521_s10] ss:$0 sm:$0xff] }
 0x61e   :  { %v992_v16 = vsel %vm372_vm2, %v6930_v38, %v8135_v29  ;;  %v991_v52 = vsel %vm372_vm2, %v856_v39, %v8134_v30  ;;  %v6134_v39 = vld [vmem:[#allocation10] ss:$0 sm:$0xff]  ;;  %6976 = vmatprep.subr.bf16.mxu1 %v9369_v0 }
 0x61f   :  { %v8138_v20 = vpop.permute.xlu0 %8137 }
 0x620   :  { %v8140_v2 = vunpack.i.h.bf16 %v8138_v20  ;;  %v8139_v33 = vunpack.i.l.bf16 %v8138_v20  ;;  %v8636_v20 = vld [vmem:[#allocation13 + $0x20] sm:$0xff]  }
 0x621   :  { %6977 = vmatpush3.bf16.msra.mxu1 %v8636_v20 }
 0x622   :  { %v995_v23 = vsel %vm993_vm4, %v992_v16, %v8140_v2  ;;  %v994_v56 = vsel %vm993_vm4, %v991_v52, %v8139_v33  ;;  %6978 = vmatprep.subr.bf16.mxu1 %v9369_v0  ;;  %v6139_v52 = vld [vmem:[%s11520_s9] ss:$0 sm:$0xff] }
 0x626   :  { %v8143_v3 = vpop.permute.xlu0 %8142 }
 0x627   :  { %v8145_v48 = vunpack.i.h.bf16 %v8143_v3  ;;  %v8144_v50 = vunpack.i.l.bf16 %v8143_v3  ;;  %v8637_v3 = vld [vmem:[#allocation13 + $0x28] sm:$0xff]  }
 0x628   :  { %6979 = vmatpush3.bf16.msra.mxu1 %v8637_v3 }
 0x629   :  { %v998_v58 = vsel %vm996_vm5, %v995_v23, %v8145_v48  ;;  %v997_v61 = vsel %vm996_vm5, %v994_v56, %v8144_v50  ;;  %6980 = vmatprep.subr.bf16.mxu1 %v9369_v0 }
 0x64d   :  { %v8148_v24 = vpop.permute.xlu1 %8147 }
 0x64e   :  { %v8150_v18 = vunpack.i.h.bf16 %v8148_v24  ;;  %v8149_v51 = vunpack.i.l.bf16 %v8148_v24 }
 0x650   :  { %v1001_v54 = vsel %vm999_vm6, %v998_v58, %v8150_v18  ;;  %v1000_v21 = vsel %vm999_vm6, %v997_v61, %v8149_v51  ;;  %v6138_v18 = vld [vmem:[%s11519_s8] ss:$0 sm:$0xff]  ;;  %v6140_v58 = vld [vmem:[#allocation11] ss:$0 sm:$0xff] }
 0x651   :  { %v8153_v22 = vpop.permute.xlu0 %8152 }
 0x652   :  { %v8155_v47 = vunpack.i.h.bf16 %v8153_v22  ;;  %v8154_v55 = vunpack.i.l.bf16 %v8153_v22 }
 0x654   :  { %v1004_v25 = vsel %vm1002_vm7, %v1001_v54, %v8155_v47  ;;  %v1003_v28 = vsel %vm1002_vm7, %v1000_v21, %v8154_v55 }
 0x655   :  { %v8158_v8 = vpop.permute.xlu0 %8157 }
 0x656   :  { %v8160_v57 = vunpack.i.h.bf16 %v8158_v8  ;;  %v8159_v36 = vunpack.i.l.bf16 %v8158_v8 }
 0x658   :  { %v1007_v35 = vsel %vm1005_vm8, %v1004_v25, %v8160_v57  ;;  %v1006_v34 = vsel %vm1005_vm8, %v1003_v28, %v8159_v36  ;;  %v8638_v57 = vld [vmem:[#allocation13 + $0x30] sm:$0xff]   ;;  %v8639_v36 = vld [vmem:[#allocation13 + $0x38] sm:$0xff]  }
 0x659   :  { %v8163_v26 = vpop.permute.xlu0 %8162  ;;  %6981 = vmatpush3.bf16.msra.mxu1 %v8638_v57 }
 0x65a   :  { %v8165_v60 = vunpack.i.h.bf16 %v8163_v26  ;;  %v8164_v45 = vunpack.i.l.bf16 %v8163_v26  ;;  %6982 = vmatprep.subr.bf16.mxu1 %v9369_v0 }
 0x65c   :  { %v1010_v37 = vsel %vm1008_vm9, %v1007_v35, %v8165_v60  ;;  %v1009_v27 = vsel %vm1008_vm9, %v1006_v34, %v8164_v45  ;;  %v6144_v34 = vld [vmem:[#allocation14] ss:$0 sm:$0xff] }
 0x65d   :  { %v1011_v38 = vpack.c.bf16 %v1010_v37, %v1009_v27  ;;  %6983 = vmatpush3.bf16.msra.mxu1 %v8639_v36 }
 0x65f   :  { %6957 = vmatmul.mubr.msk.bf16.vlgmr.msra.gmra.mrb[20].mxu0 %vm219_vm1, %v1011_v38 }
 0x660   :  { %6964 = vmatprep.mubr.msk.bf16.mxu0 %vm9370_vm0, %v9369_v0 }
 0x732   :  { %v1072_v32 = vpop.f32.mrb[20].mxu0 }
 0x733   :  { %v1073_v42 = vadd.f32 %v6134_v39, %v1072_v32  ;;  %v6958_v41 = vpop.f32.mrb[21].mxu0 }
 0x734   :  { %v1075_v46 = vpop.f32.mrb[22].mxu0 }
 0x735   :  { %v1076_v63 = vadd.f32 %v6134_v39, %v1075_v46  ;;  %v6959_v53 = vpop.f32.mrb[23].mxu0  ;;  %v1079_v1 = vadd.f32 %v1073_v42, %v9643_v13 }
 0x737   :  { %v1083_v62 = vsel %vm219_vm1, %v1079_v1, 0.0  ;;  %v1080_v31 = vadd.f32 %v1076_v63, %v9645_v14  ;;  %v8630_v14 = vld [vmem:[%s11523_s12] sm:$0xff]  }
 0x738   :  { %1084 = vadd.xlane.f32.xlu0 %v1083_v62  ;;  %6961 = vmatpush3.bf16.msra.mxu0 %v8630_v14 }
 0x739   :  { %v1086_v59 = vsel %vm219_vm1, %v1080_v31, 0.0  ;;  %6962 = vmatprep.subr.bf16.mxu0 %v9369_v0 }
 0x73a   :  { %1087 = vadd.xlane.f32.xlu1 %v1086_v59 }
 0x73c   :  { %6963 = vmatpush3.bf16.msra.mxu0 %v8631_v11 }
 0x73d   :  { %6988 = vmatprep.subr.bf16.mxu0 %v9369_v0 }
 0x7c5   :  { %v1085_v44 = vpop.xlane.xlu0 %1084 }
 0x7c6   :  { %v1090_v40 = vmul.f32 0.03125, %v1085_v44 }
 0x7c7   :  { %v1088_v43 = vpop.xlane.xlu1 %1087 }
 0x7c8   :  { %v1092_v4 = vsub.f32 %v1079_v1, %v1090_v40  ;;  %v1091_v5 = vmul.f32 0.03125, %v1088_v43 }
 0x7ca   :  { %v1093_v6 = vsub.f32 %v1080_v31, %v1091_v5  ;;  %v1094_v7 = vmul.f32 %v1092_v4, %v1092_v4 }
 0x7cc   :  { %v1096_v9 = vsel %vm219_vm1, %v1094_v7, 0.0  ;;  %v1095_v10 = vmul.f32 %v1093_v6, %v1093_v6  ;;  %v8640_v7 = vld [vmem:[#allocation5 + $0x10] sm:$0xff]  }
 0x7cd   :  { %1097 = vadd.xlane.f32.xlu0 %v1096_v9  ;;  %v8641_v9 = vld [vmem:[#allocation5 + $0x18] sm:$0xff]  }
 0x7ce   :  { %v1099_v13 = vsel %vm219_vm1, %v1095_v10, 0.0 }
 0x7d1   :  { %1100 = vadd.xlane.f32.xlu0 %v1099_v13 }
 0x85a   :  { %v1098_v22 = vpop.xlane.xlu0 %1097 }
 0x85b   :  { %v1102_v29 = vmul.f32 0.03125, %v1098_v22 }
 0x85d   :  { %v1104_v30 = vadd.f32 1e-05, %v1102_v29 }
 0x85e   :  { %v1101_v24 = vpop.xlane.xlu0 %1100 }
 0x85f   :  { %8762 = vrsqrt.f32 %v1104_v30  ;;  %v1103_v2 = vmul.f32 0.03125, %v1101_v24  ;;  %v6154_v30 = vld [vmem:[%s11522_s11] ss:$0 sm:$0xff] }
 0x861   :  { %v1105_v33 = vadd.f32 1e-05, %v1103_v2 }
 0x863   :  { %8764 = vrsqrt.f32 %v1105_v33 }
 0x869   :  { %v8763_v48 = vpop.eup %8762 }
 0x86a   :  { %v1108_v50 = vmul.f32 %v8763_v48, %v1092_v4 }
 0x86c   :  { %v1116_v8 = vmul.f32 %v6138_v18, %v1108_v50  ;;  %v6155_v50 = vld [vmem:[#allocation7 + $0x1] ss:$0 sm:$0xff] }
 0x86d   :  { %v8765_v51 = vpop.eup %8764 }
 0x86e   :  { %v1109_v16 = vmul.f32 %v8765_v51, %v1093_v6  ;;  %v1124_v55 = vadd.f32 %v6139_v52, %v1116_v8 }
 0x870   :  { %v1117_v47 = vmul.f32 %v6138_v18, %v1109_v16 }
 0x872   :  { %v1125_v23 = vadd.f32 %v6139_v52, %v1117_v47 }
 0x874   :  { %v1126_v56 = vpack.c.bf16 %v1125_v23, %v1124_v55 }
 0x876   :  { %6965 = vmatmul.mubr.msk.bf16.vlgmr.msra.gmra.mrb[24].mxu0 %vm219_vm1, %v1126_v56 }
 0x877   :  { %6992 = vmatprep.mubr.msk.bf16.mxu0 %vm9370_vm0, %v9369_v0  ;;  %6989 = vmatpush3.bf16.msra.mxu0 %v8640_v7 }
 0x878   :  { %6990 = vmatprep.subr.bf16.mxu0 %v9369_v0 }
 0x87b   :  { %6991 = vmatpush3.bf16.msra.mxu0 %v8641_v9 }
 0x949   :  { %v1187_v61 = vpop.f32.mrb[24].mxu0 }
 0x94a   :  { %v1188_v54 = vadd.f32 %v6140_v58, %v1187_v61  ;;  %v6966_v21 = vpop.f32.mrb[25].mxu0 }
 0x94b   :  { %v1190_v26 = vpop.f32.mrb[26].mxu0 }
 0x94c   :  { %v1191_v25 = vadd.f32 %v6140_v58, %v1190_v26  ;;  %v6967_v28 = vpop.f32.mrb[27].mxu0  ;;  %v1194_v60 = vmax.f32 %v1188_v54, 0.0 }
 0x94e   :  { %v1195_v45 = vmax.f32 %v1191_v25, 0.0 }
 0x950   :  { %v1196_v35 = vpack.c.bf16 %v1195_v45, %v1194_v60 }
 0x952   :  { %6985 = vmatmul.mubr.bf16.vlgmr.msra.gmra.mrb[16].mxu1 %v1196_v35 }
 0xa25   :  { %v1302_v37 = vpop.f32.mrb[16].mxu1 }
 0xa26   :  { %v1303_v27 = vadd.f32 %v6144_v34, %v1302_v37  ;;  %v6986_v38 = vpop.f32.mrb[17].mxu1 }
 0xa27   :  { %v1305_v39 = vpop.f32.mrb[18].mxu1 }
 0xa28   :  { %v1306_v32 = vadd.f32 %v6144_v34, %v1305_v39  ;;  %v6987_v42 = vpop.f32.mrb[19].mxu1  ;;  %v1309_v41 = vadd.f32 %v1303_v27, %v1124_v55 }
 0xa2a   :  { %v1313_v46 = vsel %vm219_vm1, %v1309_v41, 0.0  ;;  %v1310_v63 = vadd.f32 %v1306_v32, %v1125_v23 }
 0xa2b   :  { %1314 = vadd.xlane.f32.xlu1 %v1313_v46 }
 0xa2c   :  { %v1316_v53 = vsel %vm219_vm1, %v1310_v63, 0.0 }
 0xa2d   :  { %1317 = vadd.xlane.f32.xlu0 %v1316_v53 }
 0xab8   :  { %v1315_v1 = vpop.xlane.xlu1 %1314 }
 0xab9   :  { %v1319_v62 = vmul.f32 0.03125, %v1315_v1 }
 0xaba   :  { %v1318_v31 = vpop.xlane.xlu0 %1317 }
 0xabb   :  { %v1321_v59 = vsub.f32 %v1309_v41, %v1319_v62  ;;  %v1320_v44 = vmul.f32 0.03125, %v1318_v31 }
 0xabd   :  { %v1322_v40 = vsub.f32 %v1310_v63, %v1320_v44  ;;  %v1323_v43 = vmul.f32 %v1321_v59, %v1321_v59 }
 0xabf   :  { %v1325_v4 = vsel %vm219_vm1, %v1323_v43, 0.0  ;;  %v1324_v5 = vmul.f32 %v1322_v40, %v1322_v40 }
 0xac0   :  { %1326 = vadd.xlane.f32.xlu1 %v1325_v4 }
 0xac1   :  { %v1328_v6 = vsel %vm219_vm1, %v1324_v5, 0.0 }
 0xac2   :  { %1329 = vadd.xlane.f32.xlu0 %v1328_v6 }
 0xb4d   :  { %v1327_v10 = vpop.xlane.xlu1 %1326 }
 0xb4e   :  { %v1331_v13 = vmul.f32 0.03125, %v1327_v10 }
 0xb4f   :  { %v1330_v14 = vpop.xlane.xlu0 %1329 }
 0xb50   :  { %v1333_v11 = vadd.f32 1e-05, %v1331_v13  ;;  %v1332_v12 = vmul.f32 0.03125, %v1330_v14 }
 0xb52   :  { %8766 = vrsqrt.f32 %v1333_v11  ;;  %v1334_v15 = vadd.f32 1e-05, %v1332_v12 }
 0xb54   :  { %8768 = vrsqrt.f32 %v1334_v15 }
 0xb5c   :  { %v8767_v19 = vpop.eup %8766 }
 0xb5d   :  { %v1337_v20 = vmul.f32 %v8767_v19, %v1321_v59 }
 0xb5e   :  { %v8769_v3 = vpop.eup %8768 }
 0xb5f   :  { %v1345_v22 = vmul.f32 %v6153_v17, %v1337_v20  ;;  %v1338_v29 = vmul.f32 %v8769_v3, %v1322_v40 }
 0xb61   :  { %v1346_v24 = vmul.f32 %v6153_v17, %v1338_v29  ;;  %v10014_v2 = vadd.f32 %v6154_v30, %v1345_v22 }
 0xb63   :  { %v10016_v33 = vadd.f32 %v6154_v30, %v1346_v24 }
 0xb65   :  { %v1355_v48 = vpack.c.bf16 %v10016_v33, %v10014_v2 }
 0xb67   :  { %6993 = vmatmul.mubr.msk.bf16.vlgmr.msra.gmra.mrb[28].mxu0 %vm219_vm1, %v1355_v48 }
 0xc3a   :  { %v1418_v18 = vpop.f32.mrb[28].mxu0 }
 0xc3b   :  { %v1419_v51 = vadd.f32 %v6155_v50, %v1418_v18  ;;  %v6994_v8 = vpop.f32.mrb[29].mxu0 }
 0xc3c   :  { %v1421_v16 = vpop.f32.mrb[30].mxu0 }
 0xc3d   :  { %v10021_v52 = vadd.f32 %v6155_v50, %v1421_v16  ;;  %1427 = vrot.lane.b32.xlu1 %v1419_v51, %s9372_s13  ;;  %v6995_v47 = vpop.f32.mrb[31].mxu0  ;;  %v1469_v55 = vmul.f32 0.5, %v1419_v51 }
 0xc3f   :  { %7028 = vmatprep.mubr.msk.f32.mxu0 %vm372_vm2, %v1469_v55  ;;  %1429 = vrot.lane.b32.xlu0 %v10021_v52, %s9372_s13  ;;  %v8166_v23 = vpack.i.bf16 %v10021_v52, %v1419_v51 }
 0xc41   :  { %1433 = vrot.lane.b32.xlu1 %v1419_v51, %s9371_s26 }
 0xc43   :  { %1439 = vrot.lane.b32.xlu0 %v1419_v51, %s9373_s2 }
 0xc45   :  { %1435 = vrot.lane.b32.xlu1 %v10021_v52, %s9371_s26 }
 0xc47   :  { %1445 = vrot.lane.b32.xlu0 %v1419_v51, %s9374_s14 }
 0xc49   :  { %1441 = vrot.lane.b32.xlu1 %v10021_v52, %s9373_s2 }
 0xc4b   :  { %1451 = vrot.lane.b32.xlu0 %v1419_v51, %s9375_s3 }
 0xc4d   :  { %1447 = vrot.lane.b32.xlu1 %v10021_v52, %s9374_s14 }
 0xc4f   :  { %1457 = vrot.lane.b32.xlu0 %v1419_v51, %s9376_s16 }
 0xc51   :  { %1453 = vrot.lane.b32.xlu1 %v10021_v52, %s9375_s3 }
 0xc53   :  { %1463 = vrot.lane.b32.xlu0 %v1419_v51, %s9377_s15 }
 0xc55   :  { %1459 = vrot.lane.b32.xlu1 %v10021_v52, %s9376_s16 }
 0xc57   :  { %8167 = vrot.lane.b32.xlu0 %v8166_v23, %s9378_s25 }
 0xc59   :  { %1465 = vrot.lane.b32.xlu1 %v10021_v52, %s9377_s15 }
 0xcaf   :  { %v10047_v56 = vpop.permute.xlu1 %1427 }
 0xcb1   :  { %v10049_v57 = vpop.permute.xlu0 %1429 }
 0xcb2   :  { %v8171_v36 = vpack.i.bf16 %v10049_v57, %v10047_v56 }
 0xcb3   :  { %v10053_v58 = vpop.permute.xlu1 %1433 }
 0xcb4   :  { %8172 = vrot.lane.b32.xlu1 %v8171_v36, %s9378_s25 }
 0xcb5   :  { %v10056_v61 = vpop.permute.xlu0 %1439 }
 0xcb7   :  { %v10058_v54 = vpop.permute.xlu1 %1435 }
 0xcb8   :  { %v8176_v21 = vpack.i.bf16 %v10058_v54, %v10053_v58 }
 0xcb9   :  { %v10062_v26 = vpop.permute.xlu0 %1445 }
 0xcba   :  { %8177 = vrot.lane.b32.xlu0 %v8176_v21, %s9378_s25 }
 0xcbb   :  { %v10065_v25 = vpop.permute.xlu1 %1441 }
 0xcbc   :  { %v8181_v28 = vpack.i.bf16 %v10065_v25, %v10056_v61 }
 0xcbd   :  { %v10069_v60 = vpop.permute.xlu0 %1451 }
 0xcbe   :  { %8182 = vrot.lane.b32.xlu1 %v8181_v28, %s9378_s25 }
 0xcbf   :  { %v10072_v45 = vpop.permute.xlu1 %1447 }
 0xcc0   :  { %v8186_v35 = vpack.i.bf16 %v10072_v45, %v10062_v26 }
 0xcc1   :  { %v10076_v34 = vpop.permute.xlu0 %1457 }
 0xcc2   :  { %8187 = vrot.lane.b32.xlu0 %v8186_v35, %s9378_s25 }
 0xcc3   :  { %v10079_v37 = vpop.permute.xlu1 %1453 }
 0xcc4   :  { %v10083_v27 = vpack.i.bf16 %v10079_v37, %v10069_v60 }
 0xcc5   :  { %v10085_v38 = vpop.permute.xlu0 %1463 }
 0xcc6   :  { %8192 = vrot.lane.b32.xlu1 %v10083_v27, %s9378_s25 }
 0xcc7   :  { %v10089_v39 = vpop.permute.xlu1 %1459 }
 0xcc8   :  { %v10093_v32 = vpack.i.bf16 %v10089_v39, %v10076_v34 }
 0xcc9   :  { %v8168_v42 = vpop.permute.xlu0 %8167 }
 0xcca   :  { %v8170_v41 = vunpack.i.h.bf16 %v8168_v42  ;;  %v8169_v46 = vunpack.i.l.bf16 %v8168_v42  ;;  %8197 = vrot.lane.b32.xlu0 %v10093_v32, %s9378_s25 }
 0xccb   :  { %v10097_v63 = vpop.permute.xlu1 %1465 }
 0xccc   :  { %v7700_v53 = vpack.c.bf16 %v8170_v41, %v8169_v46  ;;  %v10101_v1 = vpack.i.bf16 %v10097_v63, %v10085_v38 }
 0xcce   :  { %8212 = vrot.lane.b32.xlu0 %v8171_v36, %s11538_s28  ;;  %8202 = vrot.lane.b32.xlu1 %v10101_v1, %s9378_s25 }
 0xccf   :  { %7702 = vmatprep.subr.msk.bf16.mxu0 %vm9737_vm3, %v7700_v53 }
 0xcd0   :  { %7705 = vmatpush3.bf16.xpose.msk.msra.mxu0 %vm9737_vm3, %v7700_v53 }
 0xcd2   :  { %8222 = vrot.lane.b32.xlu0 %v8181_v28, %s11538_s28  ;;  %8207 = vrot.lane.b32.xlu1 %v8166_v23, %s11538_s28 }
 0xcd6   :  { %8217 = vrot.lane.b32.xlu1 %v8176_v21, %s11538_s28 }
 0xcda   :  { %8227 = vrot.lane.b32.xlu1 %v8186_v35, %s11538_s28 }
 0xd26   :  { %v8173_v62 = vpop.permute.xlu1 %8172 }
 0xd27   :  { %v8175_v31 = vunpack.i.h.bf16 %v8173_v62  ;;  %v8174_v59 = vunpack.i.l.bf16 %v8173_v62 }
 0xd29   :  { %v7706_v44 = vpack.c.bf16 %v8175_v31, %v8174_v59 }
 0xd2b   :  { %7708 = vmatprep.subr.msk.bf16.mxu0 %vm9737_vm3, %v7706_v44 }
 0xd2c   :  { %v8178_v40 = vpop.permute.xlu0 %8177  ;;  %7711 = vmatpush3.bf16.xpose.msk.msra.mxu0 %vm9737_vm3, %v7706_v44 }
 0xd2d   :  { %v8180_v43 = vunpack.i.h.bf16 %v8178_v40  ;;  %v8179_v4 = vunpack.i.l.bf16 %v8178_v40 }
 0xd2f   :  { %v7712_v5 = vpack.c.bf16 %v8180_v43, %v8179_v4  ;;  %v1470_v4 = vmul.f32 0.5, %v10021_v52  ;;  %v1476_v52 = vmul.f32 0.5, %v10065_v25  ;;  %v1483_v25 = vmul.f32 0.5, %v10085_v38 }
 0xd30   :  { %v8183_v6 = vpop.permute.xlu1 %8182 }
 0xd31   :  { %v8185_v7 = vunpack.i.h.bf16 %v8183_v6  ;;  %v8184_v9 = vunpack.i.l.bf16 %v8183_v6  ;;  %7714 = vmatprep.subr.msk.bf16.mxu0 %vm9737_vm3, %v7712_v5  ;;  %v1472_v6 = vmul.f32 0.5, %v10049_v57  ;;  %v1478_v57 = vmul.f32 0.5, %v10072_v45 }
 0xd33   :  { %v7718_v10 = vpack.c.bf16 %v8185_v7, %v8184_v9  ;;  %v1473_v7 = vmul.f32 0.5, %v10053_v58  ;;  %v1474_v9 = vmul.f32 0.5, %v10058_v54  ;;  %v1479_v58 = vmul.f32 0.5, %v10069_v60 }
 0xd34   :  { %v8188_v13 = vpop.permute.xlu0 %8187  ;;  %7717 = vmatpush3.bf16.xpose.msk.msra.mxu0 %vm9737_vm3, %v7712_v5  ;;  %v1471_v5 = vmul.f32 0.5, %v10047_v56  ;;  %v1477_v56 = vmul.f32 0.5, %v10062_v26  ;;  %v1481_v54 = vmul.f32 0.5, %v10076_v34  ;;  %v1482_v26 = vmul.f32 0.5, %v10089_v39  ;;  %v9058_v34 = vld [vmem:[#allocation2 + $0x8] sm:$0xff] }
 0xd35   :  { %7720 = vmatprep.subr.msk.bf16.mxu0 %vm9737_vm3, %v7718_v10  ;;  %v8190_v14 = vunpack.i.h.bf16 %v8188_v13  ;;  %v8189_v11 = vunpack.i.l.bf16 %v8188_v13  ;;  %v1484_v60 = vmul.f32 0.5, %v10097_v63 }
 0xd37   :  { %v7724_v12 = vpack.c.bf16 %v8190_v14, %v8189_v11  ;;  %v9059_v14 = vld [vmem:[#allocation2] sm:$0xff]  ;;  %v9060_v11 = vld [vmem:[#allocation2 + $0x18] sm:$0xff] }
 0xd38   :  { %v8193_v15 = vpop.permute.xlu1 %8192 }
 0xd39   :  { %v8195_v17 = vunpack.i.h.bf16 %v8193_v15  ;;  %v8194_v20 = vunpack.i.l.bf16 %v8193_v15 }
 0xd3b   :  { %v7730_v29 = vpack.c.bf16 %v8195_v17, %v8194_v20  ;;  %v9061_v17 = vld [vmem:[#allocation2 + $0x10] sm:$0xff] }
 0xd3c   :  { %v8198_v19 = vpop.permute.xlu0 %8197  ;;  %7723 = vmatpush3.bf16.xpose.msk.msra.mxu0 %vm9737_vm3, %v7718_v10  ;;  %v1475_v10 = vmul.f32 0.5, %v10056_v61  ;;  %v1480_v61 = vmul.f32 0.5, %v10079_v37 }
 0xd3d   :  { %7726 = vmatprep.subr.msk.bf16.mxu0 %vm9737_vm3, %v7724_v12  ;;  %v8200_v51 = vunpack.i.h.bf16 %v8198_v19  ;;  %v8199_v8 = vunpack.i.l.bf16 %v8198_v19 }
 0xd3f   :  { %v7736_v28 = vpack.c.bf16 %v8200_v51, %v8199_v8 }
 0xd40   :  { %v8203_v3 = vpop.permute.xlu1 %8202  ;;  %v8213_v22 = vpop.permute.xlu0 %8212 }
 0xd41   :  { %v8215_v24 = vunpack.i.h.bf16 %v8213_v22  ;;  %v8214_v48 = vunpack.i.l.bf16 %v8213_v22  ;;  %v8205_v53 = vunpack.i.h.bf16 %v8203_v3  ;;  %v8204_v62 = vunpack.i.l.bf16 %v8203_v3  ;;  %v9062_v3 = vld [vmem:[#allocation2 + $0x20] sm:$0xff] }
 0xd43   :  { %v7752_v36 = vpack.c.bf16 %v8215_v24, %v8214_v48  ;;  %v7742_v40 = vpack.c.bf16 %v8205_v53, %v8204_v62  ;;  %v9063_v24 = vld [vmem:[#allocation2 + $0x28] sm:$0xff]  ;;  %v9069_v62 = vld [vmem:[#allocation2 + $0x58] sm:$0xff] }
 0xd44   :  { %v8208_v30 = vpop.permute.xlu1 %8207  ;;  %7729 = vmatpush3.bf16.xpose.msk.msra.mxu0 %vm9737_vm3, %v7724_v12  ;;  %v8223_v21 = vpop.permute.xlu0 %8222 }
 0xd45   :  { %v8210_v50 = vunpack.i.h.bf16 %v8208_v30  ;;  %v8209_v18 = vunpack.i.l.bf16 %v8208_v30  ;;  %7732 = vmatprep.subr.msk.bf16.mxu0 %vm9737_vm3, %v7730_v29  ;;  %v8225_v35 = vunpack.i.h.bf16 %v8223_v21  ;;  %v8224_v42 = vunpack.i.l.bf16 %v8223_v21 }
 0xd47   :  { %v7748_v16 = vpack.c.bf16 %v8210_v50, %v8209_v18  ;;  %v7760_v44 = vpack.c.bf16 %v8225_v35, %v8224_v42  ;;  %v9064_v50 = vld [vmem:[#allocation2 + $0x30] sm:$0xff] }
 0xd48   :  { %v8218_v47 = vpop.permute.xlu1 %8217  ;;  %v9068_v42 = vld [vmem:[#allocation2 + $0x50] sm:$0xff] }
 0xd49   :  { %v8220_v55 = vunpack.i.h.bf16 %v8218_v47  ;;  %v8219_v23 = vunpack.i.l.bf16 %v8218_v47  ;;  %7749 = vmatprep.subr.bf16.mxu1 %v7748_v16 }
 0xd4a   :  { %7751 = vmatpush3.bf16.msra.mxu1 %v7748_v16  ;;  %v9065_v16 = vld [vmem:[#allocation2 + $0x38] sm:$0xff] }
 0xd4b   :  { %7753 = vmatprep.subr.bf16.mxu1 %v7752_v36  ;;  %v7756_v41 = vpack.c.bf16 %v8220_v55, %v8219_v23  ;;  %v9066_v55 = vld [vmem:[#allocation2 + $0x40] sm:$0xff] }
 0xd4c   :  { %7735 = vmatpush3.bf16.xpose.msk.msra.mxu0 %vm9737_vm3, %v7730_v29  ;;  %v8228_v46 = vpop.permute.xlu1 %8227 }
 0xd4d   :  { %7738 = vmatprep.subr.msk.bf16.mxu0 %vm9737_vm3, %v7736_v28  ;;  %v8230_v31 = vunpack.i.h.bf16 %v8228_v46  ;;  %v8229_v59 = vunpack.i.l.bf16 %v8228_v46 }
 0xd4e   :  { %7755 = vmatpush3.bf16.msra.mxu1 %v7752_v36 }
 0xd4f   :  { %7757 = vmatprep.subr.bf16.mxu1 %v7756_v41  ;;  %v7764_v43 = vpack.c.bf16 %v8230_v31, %v8229_v59  ;;  %v9070_v59 = vld [vmem:[#allocation2 + $0x60] sm:$0xff] }
 0xd52   :  { %7759 = vmatpush3.bf16.msra.mxu1 %v7756_v41 }
 0xd53   :  { %7761 = vmatprep.subr.bf16.mxu1 %v7760_v44 }
 0xd54   :  { %7741 = vmatpush3.bf16.xpose.msk.msra.mxu0 %vm9737_vm3, %v7736_v28  ;;  %v9067_v28 = vld [vmem:[#allocation2 + $0x48] sm:$0xff] }
 0xd55   :  { %7744 = vmatprep.subr.msk.bf16.mxu0 %vm9737_vm3, %v7742_v40 }
 0xd56   :  { %7763 = vmatpush3.bf16.msra.mxu1 %v7760_v44 }
 0xd57   :  { %7765 = vmatprep.subr.bf16.mxu1 %v7764_v43 }
 0xd5a   :  { %7767 = vmatpush3.bf16.msra.mxu1 %v7764_v43 }
 0xd5c   :  { %7747 = vmatpush3.bf16.xpose.msk.msra.mxu0 %vm9737_vm3, %v7742_v40 }
 0xd5d   :  { %7124 = vmatprep.subr.bf16.mxu0 %v9369_v0 }
 0xd63   :  { %7029 = vmatmul.mubr.msk.f32.vlgmr.msra.gmra.mrb[32].mxu0 %vm372_vm2, %v1470_v4  ;;  %v9071_v4 = vld [vmem:[#allocation2 + $0x68] sm:$0xff] }
 0xd64   :  { %7031 = vmatprep.mubr.msk.f32.mxu0 %vm372_vm2, %v1471_v5 }
 0xd67   :  { %7032 = vmatmul.mubr.msk.f32.gmra.mrb[34].mxu0 %vm372_vm2, %v1472_v6  ;;  %v9072_v6 = vld [vmem:[#allocation2 + $0x70] sm:$0xff] }
 0xd68   :  { %7034 = vmatprep.mubr.msk.f32.mxu0 %vm372_vm2, %v1473_v7 }
 0xd6b   :  { %7035 = vmatmul.mubr.msk.f32.gmra.mrb[36].mxu0 %vm372_vm2, %v1474_v9  ;;  %v9073_v9 = vld [vmem:[#allocation2 + $0x78] sm:$0xff] }
 0xd6c   :  { %7037 = vmatprep.mubr.msk.f32.mxu0 %vm372_vm2, %v1475_v10 }
 0xd6f   :  { %7038 = vmatmul.mubr.msk.f32.gmra.mrb[38].mxu0 %vm372_vm2, %v1476_v52 }
 0xd70   :  { %7040 = vmatprep.mubr.msk.f32.mxu0 %vm372_vm2, %v1477_v56 }
 0xd73   :  { %7041 = vmatmul.mubr.msk.f32.gmra.mrb[40].mxu0 %vm372_vm2, %v1478_v57 }
 0xd74   :  { %7043 = vmatprep.mubr.msk.f32.mxu0 %vm372_vm2, %v1479_v58 }
 0xd77   :  { %7044 = vmatmul.mubr.msk.f32.gmra.mrb[42].mxu0 %vm372_vm2, %v1480_v61 }
 0xd78   :  { %7046 = vmatprep.mubr.msk.f32.mxu0 %vm372_vm2, %v1481_v54 }
 0xd7b   :  { %7047 = vmatmul.mubr.msk.f32.gmra.mrb[44].mxu0 %vm372_vm2, %v1482_v26 }
 0xd7c   :  { %7049 = vmatprep.mubr.msk.f32.mxu0 %vm372_vm2, %v1483_v25 }
 0xd7f   :  { %7050 = vmatmul.mubr.msk.f32.gmra.mrb[46].mxu0 %vm372_vm2, %v1484_v60 }
 0xd80   :  { %7140 = vmatprep.mubr.msk.bf16.mxu0 %vm9370_vm0, %v9369_v0 }
 0xe36   :  { %v7030_v45 = vpop.f32.mrb[32].mxu0 }
 0xe37   :  { %v10175_v37 = vadd.f32 %v9058_v34, %v7030_v45  ;;  %v1663_v13 = vpop.f32.mrb[33].mxu0 }
 0xe38   :  { %v10177_v39 = vadd.f32 %v9059_v14, %v1663_v13 }
 0xe39   :  { %1744 = vmax.xlane.f32.xlu1 %v10175_v37 }
 0xe3a   :  { %v7033_v38 = vpop.f32.mrb[34].mxu0  ;;  %1742 = vmax.xlane.f32.xlu0 %v10177_v39 }
 0xe3b   :  { %v10181_v63 = vadd.f32 %v9060_v11, %v7033_v38  ;;  %v1673_v12 = vpop.f32.mrb[35].mxu0 }
 0xe3c   :  { %v10184_v20 = vadd.f32 %v9061_v17, %v1673_v12 }
 0xe3e   :  { %v7036_v15 = vpop.f32.mrb[36].mxu0  ;;  %1748 = vmax.xlane.f32.xlu0 %v10181_v63 }
 0xe3f   :  { %v1683_v19 = vpop.f32.mrb[37].mxu0  ;;  %v10190_v48 = vadd.f32 %v9063_v24, %v7036_v15 }
 0xe40   :  { %v10186_v22 = vadd.f32 %v9062_v3, %v1683_v19 }
 0xe42   :  { %v7039_v29 = vpop.f32.mrb[38].mxu0  ;;  %1750 = vmax.xlane.f32.xlu1 %v10186_v22  ;;  %1746 = vmax.xlane.f32.xlu0 %v10184_v20 }
 0xe43   :  { %v1693_v30 = vpop.f32.mrb[39].mxu0  ;;  %v10196_v47 = vadd.f32 %v9065_v16, %v7039_v29 }
 0xe44   :  { %v10192_v18 = vadd.f32 %v9064_v50, %v1693_v30 }
 0xe46   :  { %v7042_v51 = vpop.f32.mrb[40].mxu0  ;;  %1754 = vmax.xlane.f32.xlu1 %v10192_v18  ;;  %1752 = vmax.xlane.f32.xlu0 %v10190_v48 }
 0xe47   :  { %v1703_v8 = vpop.f32.mrb[41].mxu0  ;;  %v10202_v35 = vadd.f32 %v9067_v28, %v7042_v51 }
 0xe48   :  { %v10198_v23 = vadd.f32 %v9066_v55, %v1703_v8 }
 0xe4a   :  { %v7045_v36 = vpop.f32.mrb[42].mxu0  ;;  %1758 = vmax.xlane.f32.xlu1 %v10198_v23  ;;  %1756 = vmax.xlane.f32.xlu0 %v10196_v47 }
 0xe4b   :  { %v1713_v21 = vpop.f32.mrb[43].mxu0  ;;  %v10208_v31 = vadd.f32 %v9069_v62, %v7045_v36 }
 0xe4c   :  { %v10204_v41 = vadd.f32 %v9068_v42, %v1713_v21 }
 0xe4e   :  { %v7048_v46 = vpop.f32.mrb[44].mxu0  ;;  %1762 = vmax.xlane.f32.xlu1 %v10204_v41  ;;  %1760 = vmax.xlane.f32.xlu0 %v10202_v35 }
 0xe4f   :  { %v1723_v53 = vpop.f32.mrb[45].mxu0  ;;  %v10214_v5 = vadd.f32 %v9071_v4, %v7048_v46 }
 0xe50   :  { %v10210_v44 = vadd.f32 %v9070_v59, %v1723_v53 }
 0xe52   :  { %v7051_v40 = vpop.f32.mrb[46].mxu0  ;;  %1766 = vmax.xlane.f32.xlu1 %v10210_v44  ;;  %1764 = vmax.xlane.f32.xlu0 %v10208_v31 }
 0xe53   :  { %v1733_v43 = vpop.f32.mrb[47].mxu0  ;;  %v10220_v10 = vadd.f32 %v9073_v9, %v7051_v40 }
 0xe54   :  { %v10216_v7 = vadd.f32 %v9072_v6, %v1733_v43 }
 0xe56   :  { %1770 = vmax.xlane.f32.xlu1 %v10216_v7  ;;  %1768 = vmax.xlane.f32.xlu0 %v10214_v5 }
 0xe5a   :  { %1772 = vmax.xlane.f32.xlu0 %v10220_v10 }
 0xe67   :  { %8232 = vrot.lane.b32.xlu1 %v10083_v27, %s11538_s28 }
 0xe70   :  { %8237 = vrot.lane.b32.xlu0 %v10093_v32, %s11538_s28 }
 0xec6   :  { %v1745_v52 = vpop.xlane.xlu1 %1744 }
 0xec7   :  { %v1775_v56 = vsub.f32 %v10175_v37, %v1745_v52  ;;  %v1743_v57 = vpop.xlane.xlu0 %1742 }
 0xec8   :  { %v1774_v58 = vsub.f32 %v10177_v39, %v1743_v57 }
 0xec9   :  { %v1792_v61 = vmul.f32 1.442695, %v1775_v56 }
 0xeca   :  { %v1790_v54 = vmul.f32 1.442695, %v1774_v58 }
 0xecb   :  { %8770 = vpow2.f32 %v1792_v61  ;;  %v1749_v26 = vpop.xlane.xlu0 %1748 }
 0xecc   :  { %8772 = vpow2.f32 %v1790_v54  ;;  %v1777_v25 = vsub.f32 %v10181_v63, %v1749_v26 }
 0xece   :  { %v1796_v60 = vmul.f32 1.442695, %v1777_v25 }
 0xecf   :  { %v1751_v45 = vpop.xlane.xlu1 %1750  ;;  %v1747_v34 = vpop.xlane.xlu0 %1746 }
 0xed0   :  { %8774 = vpow2.f32 %v1796_v60  ;;  %v1778_v27 = vsub.f32 %v10186_v22, %v1751_v45  ;;  %v1776_v32 = vsub.f32 %v10184_v20, %v1747_v34 }
 0xed2   :  { %v1798_v13 = vmul.f32 1.442695, %v1778_v27  ;;  %v1794_v37 = vmul.f32 1.442695, %v1776_v32 }
 0xed3   :  { %v1755_v14 = vpop.xlane.xlu1 %1754  ;;  %v1753_v38 = vpop.xlane.xlu0 %1752 }
 0xed4   :  { %8776 = vpow2.f32 %v1798_v13  ;;  %v1779_v39 = vsub.f32 %v10190_v48, %v1753_v38  ;;  %v1780_v20 = vsub.f32 %v10192_v18, %v1755_v14 }
 0xed5   :  { %v10233_v11 = vpop.eup %8770  ;;  %8778 = vpow2.f32 %v1794_v37 }
 0xed6   :  { %v10235_v12 = vpop.eup %8772  ;;  %v1800_v63 = vmul.f32 1.442695, %v1779_v39  ;;  %1824 = vadd.xlane.f32.xlu0 %v10233_v11  ;;  %v1802_v24 = vmul.f32 1.442695, %v1780_v20 }
 0xed7   :  { %v1759_v15 = vpop.xlane.xlu1 %1758  ;;  %1822 = vadd.xlane.f32.xlu1 %v10235_v12  ;;  %v1757_v19 = vpop.xlane.xlu0 %1756 }
 0xed8   :  { %v1781_v17 = vsub.f32 %v10196_v47, %v1757_v19  ;;  %8780 = vpow2.f32 %v1800_v63  ;;  %v1782_v48 = vsub.f32 %v10198_v23, %v1759_v15 }
 0xeda   :  { %v10241_v3 = vpop.eup %8774  ;;  %v1804_v22 = vmul.f32 1.442695, %v1781_v17  ;;  %v1806_v16 = vmul.f32 1.442695, %v1782_v48 }
 0xedb   :  { %v1763_v29 = vpop.xlane.xlu1 %1762  ;;  %1828 = vadd.xlane.f32.xlu0 %v10241_v3  ;;  %v1761_v30 = vpop.xlane.xlu0 %1760 }
 0xedc   :  { %8782 = vpow2.f32 %v1804_v22  ;;  %v1784_v47 = vsub.f32 %v10204_v41, %v1763_v29 }
 0xedd   :  { %8784 = vpow2.f32 %v1802_v24 }
 0xede   :  { %v10245_v50 = vpop.eup %8776  ;;  %8786 = vpow2.f32 %v1806_v16  ;;  %v1810_v23 = vmul.f32 1.442695, %v1784_v47 }
 0xedf   :  { %v10247_v51 = vpop.eup %8778  ;;  %v1767_v8 = vpop.xlane.xlu1 %1766  ;;  %1830 = vadd.xlane.f32.xlu1 %v10245_v50 }
 0xee0   :  { %v1765_v18 = vpop.xlane.xlu0 %1764  ;;  %1826 = vadd.xlane.f32.xlu0 %v10247_v51  ;;  %v1786_v28 = vsub.f32 %v10210_v44, %v1767_v8  ;;  %8788 = vpow2.f32 %v1810_v23 }
 0xee1   :  { %v1785_v60 = vsub.f32 %v10208_v31, %v1765_v18 }
 0xee2   :  { %v10252_v55 = vpop.eup %8780  ;;  %v1814_v41 = vmul.f32 1.442695, %v1786_v28 }
 0xee3   :  { %v1771_v36 = vpop.xlane.xlu1 %1770  ;;  %v1812_v45 = vmul.f32 1.442695, %v1785_v60 }
 0xee4   :  { %v1769_v21 = vpop.xlane.xlu0 %1768  ;;  %1832 = vadd.xlane.f32.xlu0 %v10252_v55  ;;  %v1788_v40 = vsub.f32 %v10216_v7, %v1771_v36  ;;  %8790 = vpow2.f32 %v1814_v41 }
 0xee5   :  { %v1787_v34 = vsub.f32 %v10214_v5, %v1769_v21 }
 0xee6   :  { %v10256_v42 = vpop.eup %8782  ;;  %v1818_v52 = vmul.f32 1.442695, %v1788_v40 }
 0xee7   :  { %v8233_v46 = vpop.permute.xlu1 %8232  ;;  %v10260_v4 = vpop.eup %8784  ;;  %v1816_v27 = vmul.f32 1.442695, %v1787_v34 }
 0xee8   :  { %v1773_v53 = vpop.xlane.xlu0 %1772  ;;  %v8235_v62 = vunpack.i.h.bf16 %v8233_v46  ;;  %v8234_v59 = vunpack.i.l.bf16 %v8233_v46  ;;  %1836 = vadd.xlane.f32.xlu0 %v10256_v42  ;;  %v10264_v58 = vpop.eup %8786  ;;  %8792 = vpow2.f32 %v1818_v52 }
 0xee9   :  { %v1789_v56 = vsub.f32 %v10220_v10, %v1773_v53 }
 0xeea   :  { %v7768_v43 = vpack.c.bf16 %v8235_v62, %v8234_v59  ;;  %v10269_v61 = vpop.eup %8788 }
 0xeeb   :  { %v1820_v7 = vmul.f32 1.442695, %v1789_v56 }
 0xeec   :  { %v8238_v6 = vpop.permute.xlu0 %8237  ;;  %1834 = vadd.xlane.f32.xlu0 %v10260_v4  ;;  %7769 = vmatprep.subr.bf16.mxu1 %v7768_v43 }
 0xeed   :  { %v8240_v9 = vunpack.i.h.bf16 %v8238_v6  ;;  %v8239_v44 = vunpack.i.l.bf16 %v8238_v6  ;;  %7771 = vmatpush3.bf16.msra.mxu1 %v7768_v43  ;;  %8794 = vpow2.f32 %v1820_v7 }
 0xeee   :  { %v10272_v54 = vpop.eup %8790 }
 0xeef   :  { %v7772_v57 = vpack.c.bf16 %v8240_v9, %v8239_v44 }
 0xef0   :  { %1838 = vadd.xlane.f32.xlu0 %v10264_v58  ;;  %8242 = vrot.lane.b32.xlu1 %v10101_v1, %s11538_s28  ;;  %v1783_v1 = vsub.f32 %v10202_v35, %v1761_v30 }
 0xef1   :  { %7773 = vmatprep.subr.bf16.mxu1 %v7772_v57 }
 0xef2   :  { %7775 = vmatpush3.bf16.msra.mxu1 %v7772_v57  ;;  %v10275_v10 = vpop.eup %8792  ;;  %v1808_v25 = vmul.f32 1.442695, %v1783_v1 }
 0xef4   :  { %1842 = vadd.xlane.f32.xlu0 %v10269_v61  ;;  %8796 = vpow2.f32 %v1808_v25 }
 0xef5   :  { %8798 = vpow2.f32 %v1812_v45 }
 0xef6   :  { %8800 = vpow2.f32 %v1816_v27 }
 0xef7   :  { %v10278_v26 = vpop.eup %8794 }
 0xef8   :  { %1846 = vadd.xlane.f32.xlu0 %v10272_v54 }
 0xefc   :  { %1850 = vadd.xlane.f32.xlu0 %v10275_v10 }
 0xefe   :  { %v10284_v32 = vpop.eup %8796 }
 0xeff   :  { %v10287_v13 = vpop.eup %8798 }
 0xf00   :  { %1852 = vadd.xlane.f32.xlu0 %v10278_v26  ;;  %v10290_v37 = vpop.eup %8800 }
 0xf14   :  { %1840 = vadd.xlane.f32.xlu1 %v10284_v32 }
 0xf18   :  { %1844 = vadd.xlane.f32.xlu1 %v10287_v13 }
 0xf1c   :  { %1848 = vadd.xlane.f32.xlu1 %v10290_v37 }
 0xf63   :  { %v1825_v35 = vpop.xlane.xlu0 %1824 }
 0xf64   :  { %v1823_v31 = vpop.xlane.xlu1 %1822 }
 0xf65   :  { %8802 = vrcp.f32 %v1823_v31 }
 0xf66   :  { %8804 = vrcp.f32 %v1825_v35 }
 0xf68   :  { %v1829_v14 = vpop.xlane.xlu0 %1828 }
 0xf69   :  { %8806 = vrcp.f32 %v1829_v14 }
 0xf6c   :  { %v1831_v5 = vpop.xlane.xlu1 %1830 }
 0xf6d   :  { %v1827_v38 = vpop.xlane.xlu0 %1826 }
 0xf6e   :  { %8808 = vrcp.f32 %v1827_v38  ;;  %v8643_v38 = vld [vmem:[#allocation8 + $0x18] sm:$0xff]  }
 0xf6f   :  { %v8803_v39 = vpop.eup %8802  ;;  %8810 = vrcp.f32 %v1831_v5 }
 0xf70   :  { %v8243_v63 = vpop.permute.xlu1 %8242  ;;  %v1870_v15 = vmul.f32 %v8803_v39, %v10235_v12  ;;  %v8805_v29 = vpop.eup %8804 }
 0xf71   :  { %v8245_v19 = vunpack.i.h.bf16 %v8243_v63  ;;  %v8244_v17 = vunpack.i.l.bf16 %v8243_v63  ;;  %v1833_v20 = vpop.xlane.xlu0 %1832  ;;  %v1871_v48 = vmul.f32 %v8805_v29, %v10233_v11 }
 0xf72   :  { %8812 = vrcp.f32 %v1833_v20  ;;  %7084 = vmatprep.mubr.f32.mxu1 %v1870_v15 }
 0xf73   :  { %v7776_v22 = vpack.c.bf16 %v8245_v19, %v8244_v17  ;;  %v8807_v24 = vpop.eup %8806 }
 0xf74   :  { %v1873_v47 = vmul.f32 %v8807_v24, %v10241_v3 }
 0xf75   :  { %v1837_v30 = vpop.xlane.xlu0 %1836  ;;  %7777 = vmatprep.subr.bf16.mxu1 %v7776_v22 }
 0xf76   :  { %7779 = vmatpush3.bf16.msra.mxu1 %v7776_v22  ;;  %8814 = vrcp.f32 %v1837_v30 }
 0xf77   :  { %7108 = vmatprep.subr.bf16.mxu1 %v9369_v0 }
 0xf78   :  { %v8809_v8 = vpop.eup %8808 }
 0xf79   :  { %v8811_v18 = vpop.eup %8810  ;;  %v1835_v16 = vpop.xlane.xlu0 %1834  ;;  %7085 = vmatmul.mubr.f32.vlgmr.msra.gmra.mrb[20].mxu1 %v1871_v48  ;;  %v1872_v12 = vmul.f32 %v8809_v8, %v10247_v51 }
 0xf7a   :  { %8816 = vrcp.f32 %v1835_v16  ;;  %v1874_v21 = vmul.f32 %v8811_v18, %v10245_v50 }
 0xf7b   :  { %7087 = vmatprep.mubr.f32.mxu1 %v1872_v12 }
 0xf7c   :  { %v8813_v36 = vpop.eup %8812 }
 0xf7d   :  { %v1839_v23 = vpop.xlane.xlu0 %1838  ;;  %7088 = vmatmul.mubr.f32.gmra.mrb[22].mxu1 %v1873_v47  ;;  %v1875_v11 = vmul.f32 %v8813_v36, %v10252_v55 }
 0xf7e   :  { %8818 = vrcp.f32 %v1839_v23  ;;  %7090 = vmatprep.mubr.f32.mxu1 %v1874_v21 }
 0xf80   :  { %v8815_v28 = vpop.eup %8814 }
 0xf81   :  { %7091 = vmatmul.mubr.f32.gmra.mrb[24].mxu1 %v1875_v11  ;;  %v1877_v51 = vmul.f32 %v8815_v28, %v10256_v42  ;;  %v1843_v50 = vpop.xlane.xlu0 %1842 }
 0xf82   :  { %8820 = vrcp.f32 %v1843_v50 }
 0xf84   :  { %v8817_v46 = vpop.eup %8816 }
 0xf85   :  { %v1876_v53 = vmul.f32 %v8817_v46, %v10260_v4  ;;  %v1847_v59 = vpop.xlane.xlu0 %1846 }
 0xf87   :  { %7093 = vmatprep.mubr.f32.mxu1 %v1876_v53 }
 0xf88   :  { %v8819_v62 = vpop.eup %8818  ;;  %7094 = vmatmul.mubr.f32.gmra.mrb[26].mxu1 %v1877_v51 }
 0xf89   :  { %v1878_v3 = vmul.f32 %v8819_v62, %v10264_v58  ;;  %v1851_v40 = vpop.xlane.xlu0 %1850 }
 0xf8b   :  { %7096 = vmatprep.mubr.f32.mxu1 %v1878_v3 }
 0xf8c   :  { %v8821_v42 = vpop.eup %8820 }
 0xf8d   :  { %v1853_v43 = vpop.xlane.xlu0 %1852  ;;  %v1880_v44 = vmul.f32 %v8821_v42, %v10269_v61 }
 0xfa1   :  { %v1841_v41 = vpop.xlane.xlu1 %1840 }
 0xfa2   :  { %8822 = vrcp.f32 %v1841_v41 }
 0xfa3   :  { %8824 = vrcp.f32 %v1847_v59 }
 0xfa5   :  { %v1845_v55 = vpop.xlane.xlu1 %1844 }
 0xfa6   :  { %8826 = vrcp.f32 %v1845_v55 }
 0xfa7   :  { %8828 = vrcp.f32 %v1851_v40 }
 0xfa9   :  { %v1849_v4 = vpop.xlane.xlu1 %1848 }
 0xfaa   :  { %8830 = vrcp.f32 %v1849_v4 }
 0xfab   :  { %8832 = vrcp.f32 %v1853_v43 }
 0xfac   :  { %v8823_v6 = vpop.eup %8822 }
 0xfad   :  { %v1879_v9 = vmul.f32 %v8823_v6, %v10284_v32  ;;  %v8825_v52 = vpop.eup %8824 }
 0xfae   :  { %v1882_v58 = vmul.f32 %v8825_v52, %v10272_v54 }
 0xfaf   :  { %7097 = vmatmul.mubr.f32.gmra.mrb[28].mxu1 %v1879_v9 }
 0xfb0   :  { %v8827_v56 = vpop.eup %8826  ;;  %7099 = vmatprep.mubr.f32.mxu1 %v1880_v44 }
 0xfb1   :  { %v1881_v57 = vmul.f32 %v8827_v56, %v10287_v13  ;;  %v8829_v7 = vpop.eup %8828 }
 0xfb2   :  { %v1884_v45 = vmul.f32 %v8829_v7, %v10275_v10 }
 0xfb3   :  { %7100 = vmatmul.mubr.f32.gmra.mrb[30].mxu1 %v1881_v57 }
 0xfb4   :  { %v8831_v1 = vpop.eup %8830  ;;  %7102 = vmatprep.mubr.f32.mxu1 %v1882_v58 }
 0xfb5   :  { %v1883_v25 = vmul.f32 %v8831_v1, %v10290_v37  ;;  %v8833_v60 = vpop.eup %8832  ;;  %v8642_v37 = vld [vmem:[#allocation8 + $0x10] sm:$0xff]  }
 0xfb6   :  { %v1885_v61 = vmul.f32 %v8833_v60, %v10278_v26  ;;  %7109 = vmatpush3.bf16.msra.mxu1 %v8642_v37 }
 0xfb7   :  { %7103 = vmatmul.mubr.f32.gmra.mrb[32].mxu1 %v1883_v25  ;;  %7110 = vmatprep.subr.bf16.mxu1 %v9369_v0 }
 0xfb8   :  { %7105 = vmatprep.mubr.f32.mxu1 %v1884_v45 }
 0xfba   :  { %7111 = vmatpush3.bf16.msra.mxu1 %v8643_v38 }
 0xfbb   :  { %7106 = vmatmul.mubr.f32.gmra.mrb[34].mxu1 %v1885_v61  ;;  %7116 = vmatprep.subr.bf16.mxu1 %v9369_v0 }
 0xfbc   :  { %7112 = vmatprep.mubr.msk.bf16.mxu1 %vm9370_vm0, %v9369_v0 }
0x104c   :  { %v7086_v34 = vpop.f32.mrb[20].mxu1 }
0x104d   :  { %v2000_v27 = vpop.f32.mrb[21].mxu1 }
0x1050   :  { %v7089_v54 = vpop.f32.mrb[22].mxu1 }
0x1051   :  { %v2010_v32 = vpop.f32.mrb[23].mxu1 }
0x1052   :  { %v8246_v13 = vpack.i.bf16 %v7089_v54, %v2010_v32 }
0x1054   :  { %8247 = vrot.lane.b32.xlu0 %v8246_v13, %s9356_s23  ;;  %v7092_v35 = vpop.f32.mrb[24].mxu1 }
0x1055   :  { %v2020_v31 = vpop.f32.mrb[25].mxu1 }
0x1056   :  { %v8251_v14 = vpack.i.bf16 %v7092_v35, %v2020_v31 }
0x1058   :  { %8252 = vrot.lane.b32.xlu0 %v8251_v14, %s9364_s29 }
0x105b   :  { %v7095_v10 = vpop.f32.mrb[26].mxu1 }
0x105c   :  { %v2030_v26 = vpop.f32.mrb[27].mxu1 }
0x105d   :  { %v8256_v5 = vpack.i.bf16 %v7095_v10, %v2030_v26 }
0x105f   :  { %8257 = vrot.lane.b32.xlu0 %v8256_v5, %s9379_s27 }
0x1082   :  { %v7098_v39 = vpop.f32.mrb[28].mxu1 }
0x1083   :  { %v2040_v63 = vpop.f32.mrb[29].mxu1 }
0x1084   :  { %v8261_v15 = vpack.i.bf16 %v7098_v39, %v2040_v63 }
0x1086   :  { %8262 = vrot.lane.b32.xlu1 %v8261_v15, %s9360_s4  ;;  %v7101_v19 = vpop.f32.mrb[30].mxu1 }
0x1087   :  { %v2050_v17 = vpop.f32.mrb[31].mxu1 }
0x1088   :  { %v8266_v20 = vpack.i.bf16 %v7101_v19, %v2050_v17 }
0x108a   :  { %8267 = vrot.lane.b32.xlu0 %v8266_v20, %s9380_s30  ;;  %v7104_v22 = vpop.f32.mrb[32].mxu1 }
0x108b   :  { %v2060_v29 = vpop.f32.mrb[33].mxu1 }
0x108c   :  { %v8271_v30 = vpack.i.bf16 %v7104_v22, %v2060_v29 }
0x108e   :  { %8272 = vrot.lane.b32.xlu0 %v8271_v30, %s9381_s19  ;;  %v7107_v24 = vpop.f32.mrb[34].mxu1  ;;  %v8645_v30 = vld [vmem:[%s11523_s12 + $0x18] sm:$0xff]  }
0x108f   :  { %v2070_v48 = vpop.f32.mrb[35].mxu1 }
0x1090   :  { %v8276_v8 = vpack.i.bf16 %v7107_v24, %v2070_v48  ;;  %v8646_v24 = vld [vmem:[#allocation13 + $0x40] sm:$0xff]   ;;  %v8647_v48 = vld [vmem:[#allocation13 + $0x48] sm:$0xff]  }
0x1091   :  { %7125 = vmatpush3.bf16.msra.mxu0 %v8646_v24 }
0x1092   :  { %8277 = vrot.lane.b32.xlu0 %v8276_v8, %s9382_s1  ;;  %7126 = vmatprep.subr.bf16.mxu0 %v9369_v0  ;;  %v8648_v8 = vld [vmem:[#allocation13 + $0x50] sm:$0xff]  }
0x1095   :  { %7127 = vmatpush3.bf16.msra.mxu0 %v8647_v48 }
0x1096   :  { %7128 = vmatprep.subr.bf16.mxu0 %v9369_v0 }
0x1099   :  { %7129 = vmatpush3.bf16.msra.mxu0 %v8648_v8 }
0x109a   :  { %7130 = vmatprep.subr.bf16.mxu0 %v9369_v0 }
0x10c6   :  { %v8248_v18 = vpop.permute.xlu0 %8247 }
0x10c7   :  { %v8250_v36 = vunpack.i.h.bf16 %v8248_v18  ;;  %v8249_v21 = vunpack.i.l.bf16 %v8248_v18  ;;  %v8649_v18 = vld [vmem:[#allocation13 + $0x58] sm:$0xff]  }
0x10c8   :  { %7131 = vmatpush3.bf16.msra.mxu0 %v8649_v18  ;;  %v6218_v18 = vld [vmem:[%s11521_s10 + $0x1] ss:$0 sm:$0xff] }
0x10c9   :  { %v2136_v50 = vsel %vm372_vm2, %v7086_v34, %v8250_v36  ;;  %v2135_v59 = vsel %vm372_vm2, %v2000_v27, %v8249_v21  ;;  %v6191_v27 = vld [vmem:[#allocation10 + $0x1] ss:$0 sm:$0xff]  ;;  %7132 = vmatprep.subr.bf16.mxu0 %v9369_v0 }
0x10ca   :  { %v8253_v16 = vpop.permute.xlu0 %8252 }
0x10cb   :  { %v8255_v11 = vunpack.i.h.bf16 %v8253_v16  ;;  %v8254_v28 = vunpack.i.l.bf16 %v8253_v16  ;;  %v8650_v16 = vld [vmem:[#allocation13 + $0x60] sm:$0xff]  }
0x10cc   :  { %7133 = vmatpush3.bf16.msra.mxu0 %v8650_v16 }
0x10cd   :  { %v2138_v55 = vsel %vm993_vm4, %v2136_v50, %v8255_v11  ;;  %v2137_v43 = vsel %vm993_vm4, %v2135_v59, %v8254_v28  ;;  %7134 = vmatprep.subr.bf16.mxu0 %v9369_v0  ;;  %v6198_v59 = vld [vmem:[%s11520_s9 + $0x1] ss:$0 sm:$0xff] }
0x10d1   :  { %v8258_v12 = vpop.permute.xlu0 %8257 }
0x10d2   :  { %v8260_v46 = vunpack.i.h.bf16 %v8258_v12  ;;  %v8259_v53 = vunpack.i.l.bf16 %v8258_v12  ;;  %v8651_v12 = vld [vmem:[#allocation13 + $0x68] sm:$0xff]  }
0x10d3   :  { %7135 = vmatpush3.bf16.msra.mxu0 %v8651_v12 }
0x10d4   :  { %v2140_v6 = vsel %vm996_vm5, %v2138_v55, %v8260_v46  ;;  %v2139_v9 = vsel %vm996_vm5, %v2137_v43, %v8259_v53  ;;  %7136 = vmatprep.subr.bf16.mxu0 %v9369_v0 }
0x10f8   :  { %v8263_v23 = vpop.permute.xlu1 %8262 }
0x10f9   :  { %v8265_v51 = vunpack.i.h.bf16 %v8263_v23  ;;  %v8264_v62 = vunpack.i.l.bf16 %v8263_v23 }
0x10fb   :  { %v2142_v44 = vsel %vm999_vm6, %v2140_v6, %v8265_v51  ;;  %v2141_v52 = vsel %vm999_vm6, %v2139_v9, %v8264_v62  ;;  %v6197_v51 = vld [vmem:[%s11519_s8 + $0x1] ss:$0 sm:$0xff]  ;;  %v6203_v6 = vld [vmem:[#allocation11 + $0x1] ss:$0 sm:$0xff] }
0x10fc   :  { %v8268_v47 = vpop.permute.xlu0 %8267 }
0x10fd   :  { %v8270_v41 = vunpack.i.h.bf16 %v8268_v47  ;;  %v8269_v40 = vunpack.i.l.bf16 %v8268_v47 }
0x10ff   :  { %v2144_v57 = vsel %vm1002_vm7, %v2142_v44, %v8270_v41  ;;  %v2143_v58 = vsel %vm1002_vm7, %v2141_v52, %v8269_v40 }
0x1100   :  { %v8273_v3 = vpop.permute.xlu0 %8272 }
0x1101   :  { %v8275_v4 = vunpack.i.h.bf16 %v8273_v3  ;;  %v8274_v42 = vunpack.i.l.bf16 %v8273_v3 }
0x1103   :  { %v2146_v25 = vsel %vm1005_vm8, %v2144_v57, %v8275_v4  ;;  %v2145_v60 = vsel %vm1005_vm8, %v2143_v58, %v8274_v42  ;;  %v8652_v4 = vld [vmem:[#allocation13 + $0x70] sm:$0xff]   ;;  %v8653_v42 = vld [vmem:[#allocation13 + $0x78] sm:$0xff]  }
0x1104   :  { %v8278_v56 = vpop.permute.xlu0 %8277  ;;  %7137 = vmatpush3.bf16.msra.mxu0 %v8652_v4 }
0x1105   :  { %v8280_v7 = vunpack.i.h.bf16 %v8278_v56  ;;  %v8279_v1 = vunpack.i.l.bf16 %v8278_v56  ;;  %7138 = vmatprep.subr.bf16.mxu0 %v9369_v0 }
0x1107   :  { %v2148_v45 = vsel %vm1008_vm9, %v2146_v25, %v8280_v7  ;;  %v2147_v61 = vsel %vm1008_vm9, %v2145_v60, %v8279_v1  ;;  %v6207_v60 = vld [vmem:[#allocation14 + $0x1] ss:$0 sm:$0xff] }
0x1108   :  { %v2149_v34 = vpack.c.bf16 %v2148_v45, %v2147_v61  ;;  %7139 = vmatpush3.bf16.msra.mxu0 %v8653_v42 }
0x110a   :  { %7113 = vmatmul.mubr.msk.bf16.vlgmr.msra.gmra.mrb[36].mxu1 %vm219_vm1, %v2149_v34 }
0x110b   :  { %7120 = vmatprep.mubr.msk.bf16.mxu1 %vm9370_vm0, %v9369_v0 }
0x11dd   :  { %v2212_v54 = vpop.f32.mrb[36].mxu1 }
0x11de   :  { %v2213_v32 = vadd.f32 %v6191_v27, %v2212_v54  ;;  %v7114_v13 = vpop.f32.mrb[37].mxu1 }
0x11df   :  { %v2215_v35 = vpop.f32.mrb[38].mxu1 }
0x11e0   :  { %v2219_v37 = vadd.f32 %v2213_v32, %v10014_v2  ;;  %v2216_v31 = vadd.f32 %v6191_v27, %v2215_v35  ;;  %v7115_v14 = vpop.f32.mrb[39].mxu1 }
0x11e2   :  { %v2220_v10 = vadd.f32 %v2216_v31, %v10016_v33  ;;  %v2225_v26 = vsel %vm219_vm1, %v2219_v37, 0.0  ;;  %v8644_v33 = vld [vmem:[%s11523_s12 + $0x10] sm:$0xff]  }
0x11e3   :  { %2226 = vadd.xlane.f32.xlu0 %v2225_v26  ;;  %7117 = vmatpush3.bf16.msra.mxu1 %v8644_v33 }
0x11e4   :  { %v2228_v5 = vsel %vm219_vm1, %v2220_v10, 0.0  ;;  %7118 = vmatprep.subr.bf16.mxu1 %v9369_v0 }
0x11e5   :  { %2229 = vadd.xlane.f32.xlu1 %v2228_v5 }
0x11e7   :  { %7119 = vmatpush3.bf16.msra.mxu1 %v8645_v30 }
0x11e8   :  { %7144 = vmatprep.subr.bf16.mxu1 %v9369_v0 }
0x1270   :  { %v2227_v38 = vpop.xlane.xlu0 %2226 }
0x1271   :  { %v2231_v39 = vmul.f32 0.03125, %v2227_v38 }
0x1272   :  { %v2230_v63 = vpop.xlane.xlu1 %2229 }
0x1273   :  { %v2233_v15 = vsub.f32 %v2219_v37, %v2231_v39  ;;  %v2232_v19 = vmul.f32 0.03125, %v2230_v63 }
0x1275   :  { %v2234_v17 = vsub.f32 %v2220_v10, %v2232_v19  ;;  %v2235_v20 = vmul.f32 %v2233_v15, %v2233_v15 }
0x1277   :  { %v2237_v22 = vsel %vm219_vm1, %v2235_v20, 0.0  ;;  %v2236_v2 = vmul.f32 %v2234_v17, %v2234_v17  ;;  %v8654_v20 = vld [vmem:[#allocation5 + $0x20] sm:$0xff]  }
0x1278   :  { %2238 = vadd.xlane.f32.xlu0 %v2237_v22  ;;  %v8655_v22 = vld [vmem:[#allocation5 + $0x28] sm:$0xff]  }
0x1279   :  { %v2240_v29 = vsel %vm219_vm1, %v2236_v2, 0.0 }
0x127c   :  { %2241 = vadd.xlane.f32.xlu0 %v2240_v29 }
0x1305   :  { %v2239_v47 = vpop.xlane.xlu0 %2238 }
0x1306   :  { %v2243_v36 = vmul.f32 0.03125, %v2239_v47 }
0x1308   :  { %v2245_v21 = vadd.f32 1e-05, %v2243_v36 }
0x1309   :  { %v2242_v23 = vpop.xlane.xlu0 %2241 }
0x130a   :  { %8834 = vrsqrt.f32 %v2245_v21  ;;  %v2244_v11 = vmul.f32 0.03125, %v2242_v23  ;;  %v6219_v21 = vld [vmem:[%s11522_s11 + $0x1] ss:$0 sm:$0xff] }
0x130c   :  { %v2246_v28 = vadd.f32 1e-05, %v2244_v11 }
0x130e   :  { %8836 = vrsqrt.f32 %v2246_v28 }
0x1314   :  { %v8835_v46 = vpop.eup %8834 }
0x1315   :  { %v2249_v53 = vmul.f32 %v8835_v46, %v2233_v15 }
0x1317   :  { %v2257_v3 = vmul.f32 %v6197_v51, %v2249_v53  ;;  %v6220_v53 = vld [vmem:[#allocation7 + $0x2] ss:$0 sm:$0xff] }
0x1318   :  { %v8837_v62 = vpop.eup %8836 }
0x1319   :  { %v2250_v50 = vmul.f32 %v8837_v62, %v2234_v17  ;;  %v2265_v40 = vadd.f32 %v6198_v59, %v2257_v3 }
0x131b   :  { %v2258_v41 = vmul.f32 %v6197_v51, %v2250_v50 }
0x131d   :  { %v2266_v55 = vadd.f32 %v6198_v59, %v2258_v41 }
0x131f   :  { %v2267_v43 = vpack.c.bf16 %v2266_v55, %v2265_v40 }
0x1321   :  { %7121 = vmatmul.mubr.msk.bf16.vlgmr.msra.gmra.mrb[40].mxu1 %vm219_vm1, %v2267_v43 }
0x1322   :  { %7148 = vmatprep.mubr.msk.bf16.mxu1 %vm9370_vm0, %v9369_v0  ;;  %7145 = vmatpush3.bf16.msra.mxu1 %v8654_v20 }
0x1323   :  { %7146 = vmatprep.subr.bf16.mxu1 %v9369_v0 }
0x1326   :  { %7147 = vmatpush3.bf16.msra.mxu1 %v8655_v22 }
0x13f4   :  { %v2330_v9 = vpop.f32.mrb[40].mxu1 }
0x13f5   :  { %v2331_v44 = vadd.f32 %v6203_v6, %v2330_v9  ;;  %v7122_v52 = vpop.f32.mrb[41].mxu1 }
0x13f6   :  { %v2333_v56 = vpop.f32.mrb[42].mxu1 }
0x13f7   :  { %v2334_v57 = vadd.f32 %v6203_v6, %v2333_v56  ;;  %v7123_v58 = vpop.f32.mrb[43].mxu1  ;;  %v2337_v7 = vmax.f32 %v2331_v44, 0.0 }
0x13f9   :  { %v2338_v1 = vmax.f32 %v2334_v57, 0.0 }
0x13fb   :  { %v2339_v25 = vpack.c.bf16 %v2338_v1, %v2337_v7 }
0x13fd   :  { %7141 = vmatmul.mubr.bf16.vlgmr.msra.gmra.mrb[48].mxu0 %v2339_v25 }
0x14d0   :  { %v2447_v45 = vpop.f32.mrb[48].mxu0 }
0x14d1   :  { %v2448_v61 = vadd.f32 %v6207_v60, %v2447_v45  ;;  %v7142_v34 = vpop.f32.mrb[49].mxu0 }
0x14d2   :  { %v2450_v27 = vpop.f32.mrb[50].mxu0 }
0x14d3   :  { %v2454_v54 = vadd.f32 %v2448_v61, %v2265_v40  ;;  %v2451_v32 = vadd.f32 %v6207_v60, %v2450_v27  ;;  %v7143_v13 = vpop.f32.mrb[51].mxu0 }
0x14d5   :  { %v2455_v35 = vadd.f32 %v2451_v32, %v2266_v55  ;;  %v2460_v37 = vsel %vm219_vm1, %v2454_v54, 0.0 }
0x14d6   :  { %2461 = vadd.xlane.f32.xlu1 %v2460_v37 }
0x14d7   :  { %v2463_v31 = vsel %vm219_vm1, %v2455_v35, 0.0 }
0x14d8   :  { %2464 = vadd.xlane.f32.xlu0 %v2463_v31 }
0x1563   :  { %v2462_v14 = vpop.xlane.xlu1 %2461 }
0x1564   :  { %v2466_v10 = vmul.f32 0.03125, %v2462_v14 }
0x1565   :  { %v2465_v26 = vpop.xlane.xlu0 %2464 }
0x1566   :  { %v2468_v5 = vsub.f32 %v2454_v54, %v2466_v10  ;;  %v2467_v38 = vmul.f32 0.03125, %v2465_v26 }
0x1568   :  { %v2469_v39 = vsub.f32 %v2455_v35, %v2467_v38  ;;  %v2470_v63 = vmul.f32 %v2468_v5, %v2468_v5 }
0x156a   :  { %v2472_v15 = vsel %vm219_vm1, %v2470_v63, 0.0  ;;  %v2471_v19 = vmul.f32 %v2469_v39, %v2469_v39 }
0x156b   :  { %2473 = vadd.xlane.f32.xlu1 %v2472_v15 }
0x156c   :  { %v2475_v17 = vsel %vm219_vm1, %v2471_v19, 0.0 }
0x156d   :  { %2476 = vadd.xlane.f32.xlu0 %v2475_v17 }
0x15f8   :  { %v2474_v2 = vpop.xlane.xlu1 %2473 }
0x15f9   :  { %v2478_v29 = vmul.f32 0.03125, %v2474_v2 }
0x15fa   :  { %v2477_v33 = vpop.xlane.xlu0 %2476 }
0x15fb   :  { %v2480_v30 = vadd.f32 1e-05, %v2478_v29  ;;  %v2479_v24 = vmul.f32 0.03125, %v2477_v33 }
0x15fd   :  { %8838 = vrsqrt.f32 %v2480_v30  ;;  %v2481_v48 = vadd.f32 1e-05, %v2479_v24 }
0x15ff   :  { %8840 = vrsqrt.f32 %v2481_v48 }
0x1607   :  { %v8839_v8 = vpop.eup %8838 }
0x1608   :  { %v2484_v16 = vmul.f32 %v8839_v8, %v2468_v5 }
0x1609   :  { %v8841_v12 = vpop.eup %8840 }
0x160a   :  { %v2492_v47 = vmul.f32 %v6218_v18, %v2484_v16  ;;  %v2485_v36 = vmul.f32 %v8841_v12, %v2469_v39 }
0x160c   :  { %v2493_v23 = vmul.f32 %v6218_v18, %v2485_v36  ;;  %v10379_v11 = vadd.f32 %v6219_v21, %v2492_v47 }
0x160e   :  { %v10381_v28 = vadd.f32 %v6219_v21, %v2493_v23 }
0x1610   :  { %v2502_v46 = vpack.c.bf16 %v10381_v28, %v10379_v11 }
0x1612   :  { %7149 = vmatmul.mubr.msk.bf16.vlgmr.msra.gmra.mrb[44].mxu1 %vm219_vm1, %v2502_v46 }
0x16e5   :  { %v2565_v51 = vpop.f32.mrb[44].mxu1 }
0x16e6   :  { %v2566_v62 = vadd.f32 %v6220_v53, %v2565_v51  ;;  %v7150_v3 = vpop.f32.mrb[45].mxu1 }
0x16e7   :  { %v2568_v50 = vpop.f32.mrb[46].mxu1 }
0x16e8   :  { %v10386_v59 = vadd.f32 %v6220_v53, %v2568_v50  ;;  %2574 = vrot.lane.b32.xlu1 %v2566_v62, %s9372_s13  ;;  %v7151_v41 = vpop.f32.mrb[47].mxu1  ;;  %v2616_v40 = vmul.f32 0.5, %v2566_v62 }
0x16ea   :  { %7184 = vmatprep.mubr.msk.f32.mxu1 %vm372_vm2, %v2616_v40  ;;  %2576 = vrot.lane.b32.xlu0 %v10386_v59, %s9372_s13  ;;  %v8281_v55 = vpack.i.bf16 %v10386_v59, %v2566_v62 }
0x16ec   :  { %2580 = vrot.lane.b32.xlu1 %v2566_v62, %s9371_s26 }
0x16ee   :  { %2586 = vrot.lane.b32.xlu0 %v2566_v62, %s9373_s2 }
0x16f0   :  { %2582 = vrot.lane.b32.xlu1 %v10386_v59, %s9371_s26 }
0x16f2   :  { %2592 = vrot.lane.b32.xlu0 %v2566_v62, %s9374_s14 }
0x16f4   :  { %2588 = vrot.lane.b32.xlu1 %v10386_v59, %s9373_s2 }
0x16f6   :  { %2598 = vrot.lane.b32.xlu0 %v2566_v62, %s9375_s3 }
0x16f8   :  { %2594 = vrot.lane.b32.xlu1 %v10386_v59, %s9374_s14 }
0x16fa   :  { %2604 = vrot.lane.b32.xlu0 %v2566_v62, %s9376_s16 }
0x16fc   :  { %2600 = vrot.lane.b32.xlu1 %v10386_v59, %s9375_s3 }
0x16fe   :  { %2610 = vrot.lane.b32.xlu0 %v2566_v62, %s9377_s15 }
0x1700   :  { %2606 = vrot.lane.b32.xlu1 %v10386_v59, %s9376_s16 }
0x1702   :  { %8282 = vrot.lane.b32.xlu0 %v8281_v55, %s9378_s25 }
0x1704   :  { %2612 = vrot.lane.b32.xlu1 %v10386_v59, %s9377_s15 }
0x175a   :  { %v10412_v43 = vpop.permute.xlu1 %2574 }
0x175c   :  { %v10414_v4 = vpop.permute.xlu0 %2576 }
0x175d   :  { %v8286_v42 = vpack.i.bf16 %v10414_v4, %v10412_v43 }
0x175e   :  { %v10418_v6 = vpop.permute.xlu1 %2580 }
0x175f   :  { %8287 = vrot.lane.b32.xlu1 %v8286_v42, %s9378_s25 }
0x1760   :  { %v10421_v9 = vpop.permute.xlu0 %2586 }
0x1762   :  { %v10423_v44 = vpop.permute.xlu1 %2582 }
0x1763   :  { %v8291_v52 = vpack.i.bf16 %v10423_v44, %v10418_v6 }
0x1764   :  { %v10427_v56 = vpop.permute.xlu0 %2592 }
0x1765   :  { %8292 = vrot.lane.b32.xlu0 %v8291_v52, %s9378_s25 }
0x1766   :  { %v10430_v57 = vpop.permute.xlu1 %2588 }
0x1767   :  { %v8296_v58 = vpack.i.bf16 %v10430_v57, %v10421_v9 }
0x1768   :  { %v10434_v7 = vpop.permute.xlu0 %2598 }
0x1769   :  { %8297 = vrot.lane.b32.xlu1 %v8296_v58, %s9378_s25 }
0x176a   :  { %v10437_v1 = vpop.permute.xlu1 %2594 }
0x176b   :  { %v10441_v25 = vpack.i.bf16 %v10437_v1, %v10427_v56 }
0x176c   :  { %v10443_v60 = vpop.permute.xlu0 %2604 }
0x176d   :  { %8302 = vrot.lane.b32.xlu0 %v10441_v25, %s9378_s25 }
0x176e   :  { %v10447_v45 = vpop.permute.xlu1 %2600 }
0x176f   :  { %v10451_v61 = vpack.i.bf16 %v10447_v45, %v10434_v7 }
0x1770   :  { %v10453_v34 = vpop.permute.xlu0 %2610 }
0x1771   :  { %8307 = vrot.lane.b32.xlu1 %v10451_v61, %s9378_s25 }
0x1772   :  { %v10457_v27 = vpop.permute.xlu1 %2606 }
0x1773   :  { %v10461_v54 = vpack.i.bf16 %v10457_v27, %v10443_v60 }
0x1774   :  { %v8283_v32 = vpop.permute.xlu0 %8282 }
0x1775   :  { %v8285_v13 = vunpack.i.h.bf16 %v8283_v32  ;;  %v8284_v35 = vunpack.i.l.bf16 %v8283_v32  ;;  %8312 = vrot.lane.b32.xlu0 %v10461_v54, %s9378_s25 }
0x1776   :  { %v10465_v37 = vpop.permute.xlu1 %2612 }
0x1777   :  { %v7780_v31 = vpack.c.bf16 %v8285_v13, %v8284_v35  ;;  %v10469_v14 = vpack.i.bf16 %v10465_v37, %v10453_v34 }
0x1779   :  { %8327 = vrot.lane.b32.xlu0 %v8286_v42, %s11538_s28  ;;  %8317 = vrot.lane.b32.xlu1 %v10469_v14, %s9378_s25 }
0x177a   :  { %7782 = vmatprep.subr.msk.bf16.mxu1 %vm9737_vm3, %v7780_v31 }
0x177b   :  { %7785 = vmatpush3.bf16.xpose.msk.msra.mxu1 %vm9737_vm3, %v7780_v31 }
0x177d   :  { %8337 = vrot.lane.b32.xlu0 %v8296_v58, %s11538_s28  ;;  %8322 = vrot.lane.b32.xlu1 %v8281_v55, %s11538_s28 }
0x1781   :  { %8332 = vrot.lane.b32.xlu1 %v8291_v52, %s11538_s28 }
0x17d1   :  { %v8288_v10 = vpop.permute.xlu1 %8287 }
0x17d2   :  { %v8290_v26 = vunpack.i.h.bf16 %v8288_v10  ;;  %v8289_v5 = vunpack.i.l.bf16 %v8288_v10 }
0x17d4   :  { %v7786_v38 = vpack.c.bf16 %v8290_v26, %v8289_v5 }
0x17d6   :  { %7788 = vmatprep.subr.msk.bf16.mxu1 %vm9737_vm3, %v7786_v38 }
0x17d7   :  { %v8293_v39 = vpop.permute.xlu0 %8292  ;;  %7791 = vmatpush3.bf16.xpose.msk.msra.mxu1 %vm9737_vm3, %v7786_v38  ;;  %v2617_v38 = vmul.f32 0.5, %v10386_v59  ;;  %v2623_v59 = vmul.f32 0.5, %v10430_v57  ;;  %v2630_v57 = vmul.f32 0.5, %v10453_v34 }
0x17d8   :  { %v8295_v63 = vunpack.i.h.bf16 %v8293_v39  ;;  %v8294_v15 = vunpack.i.l.bf16 %v8293_v39  ;;  %v2618_v39 = vmul.f32 0.5, %v10412_v43  ;;  %v2624_v43 = vmul.f32 0.5, %v10427_v56 }
0x17d9   :  { %v2629_v56 = vmul.f32 0.5, %v10457_v27 }
0x17da   :  { %v7792_v19 = vpack.c.bf16 %v8295_v63, %v8294_v15  ;;  %v2619_v63 = vmul.f32 0.5, %v10414_v4  ;;  %v2620_v15 = vmul.f32 0.5, %v10418_v6  ;;  %v2625_v4 = vmul.f32 0.5, %v10437_v1 }
0x17db   :  { %v8298_v17 = vpop.permute.xlu1 %8297  ;;  %v2626_v6 = vmul.f32 0.5, %v10434_v7  ;;  %v2631_v7 = vmul.f32 0.5, %v10465_v37 }
0x17dc   :  { %v8300_v20 = vunpack.i.h.bf16 %v8298_v17  ;;  %v8299_v22 = vunpack.i.l.bf16 %v8298_v17  ;;  %7794 = vmatprep.subr.msk.bf16.mxu1 %vm9737_vm3, %v7792_v19  ;;  %v2622_v17 = vmul.f32 0.5, %v10421_v9  ;;  %v2627_v9 = vmul.f32 0.5, %v10447_v45 }
0x17de   :  { %v7798_v2 = vpack.c.bf16 %v8300_v20, %v8299_v22  ;;  %v9075_v22 = vld [vmem:[#allocation2] sm:$0xff] }
0x17df   :  { %v8303_v29 = vpop.permute.xlu0 %8302  ;;  %7797 = vmatpush3.bf16.xpose.msk.msra.mxu1 %vm9737_vm3, %v7792_v19  ;;  %v2621_v19 = vmul.f32 0.5, %v10423_v44  ;;  %v2628_v44 = vmul.f32 0.5, %v10443_v60  ;;  %v9074_v60 = vld [vmem:[#allocation2 + $0x8] sm:$0xff] }
0x17e0   :  { %7800 = vmatprep.subr.msk.bf16.mxu1 %vm9737_vm3, %v7798_v2  ;;  %v8305_v33 = vunpack.i.h.bf16 %v8303_v29  ;;  %v8304_v30 = vunpack.i.l.bf16 %v8303_v29 }
0x17e2   :  { %v7804_v24 = vpack.c.bf16 %v8305_v33, %v8304_v30 }
0x17e3   :  { %v8308_v48 = vpop.permute.xlu1 %8307 }
0x17e4   :  { %v8310_v18 = vunpack.i.h.bf16 %v8308_v48  ;;  %v8309_v16 = vunpack.i.l.bf16 %v8308_v48 }
0x17e6   :  { %v7810_v36 = vpack.c.bf16 %v8310_v18, %v8309_v16 }
0x17e7   :  { %v8313_v8 = vpop.permute.xlu0 %8312  ;;  %7803 = vmatpush3.bf16.xpose.msk.msra.mxu1 %vm9737_vm3, %v7798_v2  ;;  %v9076_v2 = vld [vmem:[#allocation2 + $0x18] sm:$0xff] }
0x17e8   :  { %7806 = vmatprep.subr.msk.bf16.mxu1 %vm9737_vm3, %v7804_v24  ;;  %v8315_v62 = vunpack.i.h.bf16 %v8313_v8  ;;  %v8314_v3 = vunpack.i.l.bf16 %v8313_v8  ;;  %v9078_v8 = vld [vmem:[#allocation2 + $0x20] sm:$0xff] }
0x17ea   :  { %v7816_v58 = vpack.c.bf16 %v8315_v62, %v8314_v3  ;;  %v9082_v3 = vld [vmem:[#allocation2 + $0x40] sm:$0xff] }
0x17eb   :  { %v8318_v12 = vpop.permute.xlu1 %8317  ;;  %v8328_v47 = vpop.permute.xlu0 %8327 }
0x17ec   :  { %v8330_v23 = vunpack.i.h.bf16 %v8328_v47  ;;  %v8329_v46 = vunpack.i.l.bf16 %v8328_v47  ;;  %v8320_v31 = vunpack.i.h.bf16 %v8318_v12  ;;  %v8319_v10 = vunpack.i.l.bf16 %v8318_v12  ;;  %v9079_v47 = vld [vmem:[#allocation2 + $0x28] sm:$0xff] }
0x17ee   :  { %v7832_v42 = vpack.c.bf16 %v8330_v23, %v8329_v46  ;;  %v7822_v5 = vpack.c.bf16 %v8320_v31, %v8319_v10  ;;  %v9086_v10 = vld [vmem:[#allocation2 + $0x60] sm:$0xff] }
0x17ef   :  { %v8323_v21 = vpop.permute.xlu1 %8322  ;;  %7809 = vmatpush3.bf16.xpose.msk.msra.mxu1 %vm9737_vm3, %v7804_v24  ;;  %v8338_v52 = vpop.permute.xlu0 %8337  ;;  %v9077_v24 = vld [vmem:[#allocation2 + $0x10] sm:$0xff] }
0x17f0   :  { %v8325_v53 = vunpack.i.h.bf16 %v8323_v21  ;;  %v8324_v51 = vunpack.i.l.bf16 %v8323_v21  ;;  %7812 = vmatprep.subr.msk.bf16.mxu1 %vm9737_vm3, %v7810_v36  ;;  %v8340_v32 = vunpack.i.h.bf16 %v8338_v52  ;;  %v8339_v13 = vunpack.i.l.bf16 %v8338_v52  ;;  %v9080_v21 = vld [vmem:[#allocation2 + $0x30] sm:$0xff] }
0x17f1   :  { %v9084_v52 = vld [vmem:[#allocation2 + $0x50] sm:$0xff] }
0x17f2   :  { %v7828_v50 = vpack.c.bf16 %v8325_v53, %v8324_v51  ;;  %v7840_v26 = vpack.c.bf16 %v8340_v32, %v8339_v13  ;;  %v9081_v51 = vld [vmem:[#allocation2 + $0x38] sm:$0xff] }
0x17f3   :  { %v8333_v41 = vpop.permute.xlu1 %8332 }
0x17f4   :  { %v8335_v40 = vunpack.i.h.bf16 %v8333_v41  ;;  %v8334_v55 = vunpack.i.l.bf16 %v8333_v41  ;;  %7829 = vmatprep.subr.bf16.mxu0 %v7828_v50 }
0x17f5   :  { %7831 = vmatpush3.bf16.msra.mxu0 %v7828_v50 }
0x17f6   :  { %7833 = vmatprep.subr.bf16.mxu0 %v7832_v42  ;;  %v7836_v35 = vpack.c.bf16 %v8335_v40, %v8334_v55  ;;  %v9083_v55 = vld [vmem:[#allocation2 + $0x48] sm:$0xff] }
0x17f7   :  { %7815 = vmatpush3.bf16.xpose.msk.msra.mxu1 %vm9737_vm3, %v7810_v36 }
0x17f8   :  { %7818 = vmatprep.subr.msk.bf16.mxu1 %vm9737_vm3, %v7816_v58 }
0x17f9   :  { %7835 = vmatpush3.bf16.msra.mxu0 %v7832_v42 }
0x17fa   :  { %7837 = vmatprep.subr.bf16.mxu0 %v7836_v35 }
0x17fd   :  { %7839 = vmatpush3.bf16.msra.mxu0 %v7836_v35  ;;  %v9085_v35 = vld [vmem:[#allocation2 + $0x58] sm:$0xff] }
0x17fe   :  { %7841 = vmatprep.subr.bf16.mxu0 %v7840_v26 }
0x17ff   :  { %7821 = vmatpush3.bf16.xpose.msk.msra.mxu1 %vm9737_vm3, %v7816_v58 }
0x1800   :  { %7824 = vmatprep.subr.msk.bf16.mxu1 %vm9737_vm3, %v7822_v5 }
0x1801   :  { %7843 = vmatpush3.bf16.msra.mxu0 %v7840_v26 }
0x1807   :  { %7827 = vmatpush3.bf16.xpose.msk.msra.mxu1 %vm9737_vm3, %v7822_v5 }
0x1808   :  { %7280 = vmatprep.subr.bf16.mxu1 %v9369_v0 }
0x180e   :  { %7185 = vmatmul.mubr.msk.f32.vlgmr.msra.gmra.mrb[48].mxu1 %vm372_vm2, %v2617_v38 }
0x180f   :  { %7187 = vmatprep.mubr.msk.f32.mxu1 %vm372_vm2, %v2618_v39  ;;  %v9087_v39 = vld [vmem:[#allocation2 + $0x68] sm:$0xff] }
0x1812   :  { %7188 = vmatmul.mubr.msk.f32.gmra.mrb[50].mxu1 %vm372_vm2, %v2619_v63 }
0x1813   :  { %7190 = vmatprep.mubr.msk.f32.mxu1 %vm372_vm2, %v2620_v15  ;;  %v9088_v15 = vld [vmem:[#allocation2 + $0x70] sm:$0xff] }
0x1816   :  { %7191 = vmatmul.mubr.msk.f32.gmra.mrb[52].mxu1 %vm372_vm2, %v2621_v19 }
0x1817   :  { %7193 = vmatprep.mubr.msk.f32.mxu1 %vm372_vm2, %v2622_v17  ;;  %v9089_v17 = vld [vmem:[#allocation2 + $0x78] sm:$0xff] }
0x181a   :  { %7194 = vmatmul.mubr.msk.f32.gmra.mrb[54].mxu1 %vm372_vm2, %v2623_v59 }
0x181b   :  { %7196 = vmatprep.mubr.msk.f32.mxu1 %vm372_vm2, %v2624_v43 }
0x181e   :  { %7197 = vmatmul.mubr.msk.f32.gmra.mrb[56].mxu1 %vm372_vm2, %v2625_v4 }
0x181f   :  { %7199 = vmatprep.mubr.msk.f32.mxu1 %vm372_vm2, %v2626_v6 }
0x1822   :  { %7200 = vmatmul.mubr.msk.f32.gmra.mrb[58].mxu1 %vm372_vm2, %v2627_v9 }
0x1823   :  { %7202 = vmatprep.mubr.msk.f32.mxu1 %vm372_vm2, %v2628_v44 }
0x1826   :  { %7203 = vmatmul.mubr.msk.f32.gmra.mrb[60].mxu1 %vm372_vm2, %v2629_v56 }
0x1827   :  { %7205 = vmatprep.mubr.msk.f32.mxu1 %vm372_vm2, %v2630_v57 }
0x182a   :  { %7206 = vmatmul.mubr.msk.f32.gmra.mrb[62].mxu1 %vm372_vm2, %v2631_v7 }
0x182b   :  { %7296 = vmatprep.mubr.msk.bf16.mxu1 %vm9370_vm0, %v9369_v0 }
0x18e1   :  { %v7186_v1 = vpop.f32.mrb[48].mxu1 }
0x18e2   :  { %v10542_v45 = vadd.f32 %v9074_v60, %v7186_v1  ;;  %v2810_v20 = vpop.f32.mrb[49].mxu1 }
0x18e3   :  { %v10544_v27 = vadd.f32 %v9075_v22, %v2810_v20 }
0x18e4   :  { %2891 = vmax.xlane.f32.xlu1 %v10542_v45 }
0x18e5   :  { %v7189_v34 = vpop.f32.mrb[50].mxu1  ;;  %2889 = vmax.xlane.f32.xlu0 %v10544_v27 }
0x18e6   :  { %v10548_v37 = vadd.f32 %v9076_v2, %v7189_v34  ;;  %v2820_v29 = vpop.f32.mrb[51].mxu1 }
0x18e7   :  { %v10551_v48 = vadd.f32 %v9077_v24, %v2820_v29 }
0x18e9   :  { %v7192_v33 = vpop.f32.mrb[52].mxu1  ;;  %2895 = vmax.xlane.f32.xlu0 %v10548_v37 }
0x18ea   :  { %v2830_v30 = vpop.f32.mrb[53].mxu1  ;;  %v10557_v36 = vadd.f32 %v9079_v47, %v7192_v33 }
0x18eb   :  { %v10553_v18 = vadd.f32 %v9078_v8, %v2830_v30 }
0x18ed   :  { %v7195_v16 = vpop.f32.mrb[54].mxu1  ;;  %2897 = vmax.xlane.f32.xlu1 %v10553_v18  ;;  %2893 = vmax.xlane.f32.xlu0 %v10551_v48 }
0x18ee   :  { %v2840_v12 = vpop.f32.mrb[55].mxu1  ;;  %v10563_v62 = vadd.f32 %v9081_v51, %v7195_v16 }
0x18ef   :  { %v10559_v23 = vadd.f32 %v9080_v21, %v2840_v12 }
0x18f1   :  { %v7198_v46 = vpop.f32.mrb[56].mxu1  ;;  %2901 = vmax.xlane.f32.xlu1 %v10559_v23  ;;  %2899 = vmax.xlane.f32.xlu0 %v10557_v36 }
0x18f2   :  { %v2850_v53 = vpop.f32.mrb[57].mxu1  ;;  %v10569_v42 = vadd.f32 %v9083_v55, %v7198_v46 }
0x18f3   :  { %v10565_v50 = vadd.f32 %v9082_v3, %v2850_v53 }
0x18f5   :  { %v7201_v41 = vpop.f32.mrb[58].mxu1  ;;  %2905 = vmax.xlane.f32.xlu1 %v10565_v50  ;;  %2903 = vmax.xlane.f32.xlu0 %v10563_v62 }
0x18f6   :  { %v2860_v40 = vpop.f32.mrb[59].mxu1  ;;  %v10575_v31 = vadd.f32 %v9085_v35, %v7201_v41 }
0x18f7   :  { %v10571_v58 = vadd.f32 %v9084_v52, %v2860_v40 }
0x18f9   :  { %v7204_v32 = vpop.f32.mrb[60].mxu1  ;;  %2909 = vmax.xlane.f32.xlu1 %v10571_v58  ;;  %2907 = vmax.xlane.f32.xlu0 %v10569_v42 }
0x18fa   :  { %v2870_v13 = vpop.f32.mrb[61].mxu1  ;;  %v10581_v63 = vadd.f32 %v9087_v39, %v7204_v32 }
0x18fb   :  { %v10577_v26 = vadd.f32 %v9086_v10, %v2870_v13 }
0x18fd   :  { %v7207_v5 = vpop.f32.mrb[62].mxu1  ;;  %2913 = vmax.xlane.f32.xlu1 %v10577_v26  ;;  %2911 = vmax.xlane.f32.xlu0 %v10575_v31 }
0x18fe   :  { %v2880_v38 = vpop.f32.mrb[63].mxu1  ;;  %v10587_v59 = vadd.f32 %v9089_v17, %v7207_v5 }
0x18ff   :  { %v10583_v19 = vadd.f32 %v9088_v15, %v2880_v38 }
0x1901   :  { %2917 = vmax.xlane.f32.xlu1 %v10583_v19  ;;  %2915 = vmax.xlane.f32.xlu0 %v10581_v63 }
0x1905   :  { %2919 = vmax.xlane.f32.xlu0 %v10587_v59 }
0x1912   :  { %8342 = vrot.lane.b32.xlu1 %v10441_v25, %s11538_s28 }
0x191b   :  { %8347 = vrot.lane.b32.xlu0 %v10451_v61, %s11538_s28 }
0x1971   :  { %v2892_v43 = vpop.xlane.xlu1 %2891 }
0x1972   :  { %v2922_v4 = vsub.f32 %v10542_v45, %v2892_v43  ;;  %v2890_v6 = vpop.xlane.xlu0 %2889 }
0x1973   :  { %v2921_v9 = vsub.f32 %v10544_v27, %v2890_v6 }
0x1974   :  { %v2939_v44 = vmul.f32 1.442695, %v2922_v4 }
0x1975   :  { %v2937_v56 = vmul.f32 1.442695, %v2921_v9 }
0x1976   :  { %8842 = vpow2.f32 %v2939_v44  ;;  %v2896_v57 = vpop.xlane.xlu0 %2895 }
0x1977   :  { %8844 = vpow2.f32 %v2937_v56  ;;  %v2924_v7 = vsub.f32 %v10548_v37, %v2896_v57 }
0x1979   :  { %v2943_v1 = vmul.f32 1.442695, %v2924_v7 }
0x197a   :  { %v2898_v60 = vpop.xlane.xlu1 %2897  ;;  %v2894_v20 = vpop.xlane.xlu0 %2893 }
0x197b   :  { %8846 = vpow2.f32 %v2943_v1  ;;  %v2925_v25 = vsub.f32 %v10553_v18, %v2898_v60  ;;  %v2923_v61 = vsub.f32 %v10551_v48, %v2894_v20 }
0x197d   :  { %v2945_v22 = vmul.f32 1.442695, %v2925_v25  ;;  %v2941_v45 = vmul.f32 1.442695, %v2923_v61 }
0x197e   :  { %v2902_v34 = vpop.xlane.xlu1 %2901  ;;  %v2900_v2 = vpop.xlane.xlu0 %2899 }
0x197f   :  { %8848 = vpow2.f32 %v2945_v22  ;;  %v2926_v27 = vsub.f32 %v10557_v36, %v2900_v2  ;;  %v2927_v43 = vsub.f32 %v10559_v23, %v2902_v34 }
0x1980   :  { %v10600_v29 = vpop.eup %8842  ;;  %8850 = vpow2.f32 %v2941_v45 }
0x1981   :  { %v10602_v33 = vpop.eup %8844  ;;  %v2947_v37 = vmul.f32 1.442695, %v2926_v27  ;;  %2971 = vadd.xlane.f32.xlu0 %v10600_v29  ;;  %v2949_v9 = vmul.f32 1.442695, %v2927_v43 }
0x1982   :  { %v2906_v30 = vpop.xlane.xlu1 %2905  ;;  %2969 = vadd.xlane.f32.xlu1 %v10602_v33  ;;  %v2904_v24 = vpop.xlane.xlu0 %2903 }
0x1983   :  { %8852 = vpow2.f32 %v2947_v37  ;;  %v2929_v10 = vsub.f32 %v10565_v50, %v2906_v30  ;;  %v2928_v39 = vsub.f32 %v10563_v62, %v2904_v24 }
0x1985   :  { %v10606_v48 = vpop.eup %8846  ;;  %v2953_v5 = vmul.f32 1.442695, %v2929_v10  ;;  %v2951_v4 = vmul.f32 1.442695, %v2928_v39 }
0x1986   :  { %v2910_v8 = vpop.xlane.xlu1 %2909  ;;  %2975 = vadd.xlane.f32.xlu0 %v10606_v48  ;;  %v2908_v18 = vpop.xlane.xlu0 %2907 }
0x1987   :  { %8854 = vpow2.f32 %v2953_v5  ;;  %v2931_v62 = vsub.f32 %v10571_v58, %v2910_v8 }
0x1989   :  { %v10609_v16 = vpop.eup %8848 }
0x198a   :  { %v10611_v12 = vpop.eup %8850  ;;  %v2914_v47 = vpop.xlane.xlu1 %2913  ;;  %2977 = vadd.xlane.f32.xlu1 %v10609_v16 }
0x198b   :  { %v2912_v36 = vpop.xlane.xlu0 %2911  ;;  %2973 = vadd.xlane.f32.xlu0 %v10611_v12  ;;  %v2933_v56 = vsub.f32 %v10577_v26, %v2914_v47 }
0x198c   :  { %v2932_v38 = vsub.f32 %v10575_v31, %v2912_v36 }
0x198d   :  { %v10615_v21 = vpop.eup %8852  ;;  %v2961_v58 = vmul.f32 1.442695, %v2933_v56 }
0x198e   :  { %v2918_v46 = vpop.xlane.xlu1 %2917  ;;  %v2959_v15 = vmul.f32 1.442695, %v2932_v38 }
0x198f   :  { %v2916_v53 = vpop.xlane.xlu0 %2915  ;;  %2979 = vadd.xlane.f32.xlu0 %v10615_v21 }
0x1990   :  { %v2934_v17 = vsub.f32 %v10581_v63, %v2916_v53  ;;  %8856 = vpow2.f32 %v2959_v15 }
0x1991   :  { %8858 = vpow2.f32 %v2951_v4  ;;  %v10631_v63 = vpop.eup %8854 }
0x1992   :  { %v8343_v51 = vpop.permute.xlu1 %8342  ;;  %v2963_v6 = vmul.f32 1.442695, %v2934_v17 }
0x1993   :  { %v2920_v3 = vpop.xlane.xlu0 %2919  ;;  %v8345_v41 = vunpack.i.h.bf16 %v8343_v51  ;;  %v8344_v40 = vunpack.i.l.bf16 %v8343_v51 }
0x1994   :  { %8860 = vpow2.f32 %v2963_v6  ;;  %v2936_v31 = vsub.f32 %v10587_v59, %v2920_v3 }
0x1995   :  { %v7844_v55 = vpack.c.bf16 %v8345_v41, %v8344_v40  ;;  %8862 = vpow2.f32 %v2949_v9 }
0x1996   :  { %v2967_v23 = vmul.f32 1.442695, %v2936_v31 }
0x1997   :  { %v8348_v52 = vpop.permute.xlu0 %8347  ;;  %7845 = vmatprep.subr.bf16.mxu0 %v7844_v55 }
0x1998   :  { %v8350_v32 = vunpack.i.h.bf16 %v8348_v52  ;;  %v8349_v13 = vunpack.i.l.bf16 %v8348_v52  ;;  %7847 = vmatpush3.bf16.msra.mxu0 %v7844_v55 }
0x199a   :  { %v7848_v35 = vpack.c.bf16 %v8350_v32, %v8349_v13  ;;  %v10635_v57 = vpop.eup %8856 }
0x199b   :  { %8352 = vrot.lane.b32.xlu1 %v10461_v54, %s11538_s28  ;;  %v2935_v54 = vsub.f32 %v10583_v19, %v2918_v46  ;;  %v2957_v19 = vmul.f32 1.442695, %v2931_v62 }
0x199c   :  { %7849 = vmatprep.subr.bf16.mxu0 %v7848_v35 }
0x199d   :  { %7851 = vmatpush3.bf16.msra.mxu0 %v7848_v35  ;;  %v2965_v50 = vmul.f32 1.442695, %v2935_v54 }
0x199f   :  { %8864 = vpow2.f32 %v2965_v50 }
0x19a5   :  { %8357 = vrot.lane.b32.xlu0 %v10469_v14, %s11538_s28  ;;  %v2930_v14 = vsub.f32 %v10569_v42, %v2908_v18  ;;  %v10637_v42 = vpop.eup %8858 }
0x19a6   :  { %v10641_v59 = vpop.eup %8860 }
0x19a7   :  { %v2955_v44 = vmul.f32 1.442695, %v2930_v14  ;;  %v10643_v7 = vpop.eup %8862 }
0x19a9   :  { %8866 = vpow2.f32 %v2955_v44  ;;  %v10647_v26 = vpop.eup %8864 }
0x19aa   :  { %8868 = vpow2.f32 %v2967_v23 }
0x19ab   :  { %8870 = vpow2.f32 %v2957_v19 }
0x19ac   :  { %8872 = vpow2.f32 %v2961_v58 }
0x19b3   :  { %v10649_v1 = vpop.eup %8866 }
0x19b4   :  { %v10653_v60 = vpop.eup %8868 }
0x19b5   :  { %v10655_v20 = vpop.eup %8870 }
0x19b6   :  { %v10659_v25 = vpop.eup %8872 }
0x19bf   :  { %2985 = vadd.xlane.f32.xlu1 %v10631_v63 }
0x19c3   :  { %2991 = vadd.xlane.f32.xlu1 %v10635_v57 }
0x19c4   :  { %2983 = vadd.xlane.f32.xlu0 %v10637_v42 }
0x19c7   :  { %2995 = vadd.xlane.f32.xlu1 %v10641_v59 }
0x19c8   :  { %2981 = vadd.xlane.f32.xlu0 %v10643_v7 }
0x19cb   :  { %2997 = vadd.xlane.f32.xlu1 %v10647_v26 }
0x19cc   :  { %2987 = vadd.xlane.f32.xlu0 %v10649_v1 }
0x19cf   :  { %2999 = vadd.xlane.f32.xlu1 %v10653_v60 }
0x19d0   :  { %2989 = vadd.xlane.f32.xlu0 %v10655_v20 }
0x19d4   :  { %2993 = vadd.xlane.f32.xlu0 %v10659_v25 }
0x1a0e   :  { %v2972_v61 = vpop.xlane.xlu0 %2971 }
0x1a0f   :  { %v2970_v22 = vpop.xlane.xlu1 %2969 }
0x1a10   :  { %8874 = vrcp.f32 %v2970_v22 }
0x1a11   :  { %8876 = vrcp.f32 %v2972_v61 }
0x1a13   :  { %v2976_v45 = vpop.xlane.xlu0 %2975 }
0x1a17   :  { %v2978_v34 = vpop.xlane.xlu1 %2977 }
0x1a18   :  { %v2974_v2 = vpop.xlane.xlu0 %2973 }
0x1a19   :  { %8878 = vrcp.f32 %v2974_v2 }
0x1a1a   :  { %v8875_v27 = vpop.eup %8874  ;;  %8880 = vrcp.f32 %v2976_v45  ;;  %v8656_v45 = vld [vmem:[#allocation8 + $0x20] sm:$0xff]  }
0x1a1b   :  { %v8353_v37 = vpop.permute.xlu1 %8352  ;;  %v3017_v30 = vmul.f32 %v8875_v27, %v10602_v33  ;;  %8882 = vrcp.f32 %v2978_v34  ;;  %v8877_v3 = vpop.eup %8876 }
0x1a1c   :  { %v8355_v24 = vunpack.i.h.bf16 %v8353_v37  ;;  %v8354_v8 = vunpack.i.l.bf16 %v8353_v37  ;;  %v2980_v18 = vpop.xlane.xlu0 %2979  ;;  %v3018_v33 = vmul.f32 %v8877_v3, %v10600_v29 }
0x1a1d   :  { %7240 = vmatprep.mubr.f32.mxu0 %v3017_v30  ;;  %8884 = vrcp.f32 %v2980_v18 }
0x1a1e   :  { %v7852_v47 = vpack.c.bf16 %v8355_v24, %v8354_v8 }
0x1a20   :  { %v8358_v36 = vpop.permute.xlu0 %8357  ;;  %7853 = vmatprep.subr.bf16.mxu0 %v7852_v47 }
0x1a21   :  { %v8360_v46 = vunpack.i.h.bf16 %v8358_v36  ;;  %v8359_v53 = vunpack.i.l.bf16 %v8358_v36  ;;  %7855 = vmatpush3.bf16.msra.mxu0 %v7852_v47 }
0x1a23   :  { %v7856_v51 = vpack.c.bf16 %v8360_v46, %v8359_v53  ;;  %v8879_v41 = vpop.eup %8878 }
0x1a24   :  { %v8881_v40 = vpop.eup %8880  ;;  %v3019_v55 = vmul.f32 %v8879_v41, %v10611_v12 }
0x1a25   :  { %7857 = vmatprep.subr.bf16.mxu0 %v7856_v51  ;;  %v8883_v52 = vpop.eup %8882  ;;  %v3020_v32 = vmul.f32 %v8881_v40, %v10606_v48 }
0x1a26   :  { %7859 = vmatpush3.bf16.msra.mxu0 %v7856_v51  ;;  %v3021_v35 = vmul.f32 %v8883_v52, %v10609_v16 }
0x1a27   :  { %7264 = vmatprep.subr.bf16.mxu0 %v9369_v0  ;;  %v8885_v13 = vpop.eup %8884 }
0x1a28   :  { %v3022_v10 = vmul.f32 %v8885_v13, %v10615_v21 }
0x1a29   :  { %7241 = vmatmul.mubr.f32.vlgmr.msra.gmra.mrb[52].mxu0 %v3018_v33 }
0x1a2a   :  { %7243 = vmatprep.mubr.f32.mxu0 %v3019_v55  ;;  %7265 = vmatpush3.bf16.msra.mxu0 %v8656_v45 }
0x1a2b   :  { %7266 = vmatprep.subr.bf16.mxu0 %v9369_v0 }
0x1a2d   :  { %7244 = vmatmul.mubr.f32.gmra.mrb[54].mxu0 %v3020_v32 }
0x1a2e   :  { %7246 = vmatprep.mubr.f32.mxu0 %v3021_v35 }
0x1a31   :  { %7247 = vmatmul.mubr.f32.gmra.mrb[56].mxu0 %v3022_v10 }
0x1a4c   :  { %v2986_v5 = vpop.xlane.xlu1 %2985 }
0x1a4d   :  { %8886 = vrcp.f32 %v2986_v5 }
0x1a50   :  { %v2992_v29 = vpop.xlane.xlu1 %2991 }
0x1a51   :  { %v2984_v38 = vpop.xlane.xlu0 %2983 }
0x1a52   :  { %8888 = vrcp.f32 %v2984_v38 }
0x1a54   :  { %v2996_v12 = vpop.xlane.xlu1 %2995 }
0x1a55   :  { %v2982_v39 = vpop.xlane.xlu0 %2981 }
0x1a56   :  { %8890 = vrcp.f32 %v2982_v39 }
0x1a57   :  { %v8887_v43 = vpop.eup %8886 }
0x1a58   :  { %v2998_v17 = vpop.xlane.xlu1 %2997  ;;  %v3025_v14 = vmul.f32 %v8887_v43, %v10631_v63 }
0x1a59   :  { %v2988_v15 = vpop.xlane.xlu0 %2987 }
0x1a5a   :  { %8892 = vrcp.f32 %v2988_v15 }
0x1a5b   :  { %8894 = vrcp.f32 %v2992_v29 }
0x1a5c   :  { %v8889_v16 = vpop.eup %8888  ;;  %v3000_v6 = vpop.xlane.xlu1 %2999 }
0x1a5d   :  { %v2990_v48 = vpop.xlane.xlu0 %2989  ;;  %v3024_v9 = vmul.f32 %v8889_v16, %v10637_v42 }
0x1a5e   :  { %8896 = vrcp.f32 %v2990_v48 }
0x1a5f   :  { %8898 = vrcp.f32 %v2996_v12 }
0x1a60   :  { %v8891_v4 = vpop.eup %8890  ;;  %8900 = vrcp.f32 %v2998_v17 }
0x1a61   :  { %v2994_v21 = vpop.xlane.xlu0 %2993  ;;  %v3023_v54 = vmul.f32 %v8891_v4, %v10643_v7 }
0x1a62   :  { %8902 = vrcp.f32 %v2994_v21 }
0x1a63   :  { %7249 = vmatprep.mubr.f32.mxu0 %v3023_v54  ;;  %8904 = vrcp.f32 %v3000_v6 }
0x1a64   :  { %v8893_v50 = vpop.eup %8892  ;;  %7250 = vmatmul.mubr.f32.gmra.mrb[58].mxu0 %v3024_v9 }
0x1a65   :  { %7252 = vmatprep.mubr.f32.mxu0 %v3025_v14  ;;  %v3026_v31 = vmul.f32 %v8893_v50, %v10649_v1  ;;  %v8895_v62 = vpop.eup %8894 }
0x1a66   :  { %v3028_v56 = vmul.f32 %v8895_v62, %v10635_v57 }
0x1a68   :  { %v8897_v44 = vpop.eup %8896  ;;  %7253 = vmatmul.mubr.f32.gmra.mrb[60].mxu0 %v3026_v31 }
0x1a69   :  { %v3027_v23 = vmul.f32 %v8897_v44, %v10655_v20  ;;  %v8899_v19 = vpop.eup %8898 }
0x1a6a   :  { %v8901_v58 = vpop.eup %8900  ;;  %v3030_v7 = vmul.f32 %v8899_v19, %v10641_v59 }
0x1a6b   :  { %7255 = vmatprep.mubr.f32.mxu0 %v3027_v23  ;;  %v3031_v1 = vmul.f32 %v8901_v58, %v10647_v26 }
0x1a6c   :  { %v8903_v42 = vpop.eup %8902  ;;  %7256 = vmatmul.mubr.f32.gmra.mrb[62].mxu0 %v3028_v56 }
0x1a6d   :  { %v3029_v63 = vmul.f32 %v8903_v42, %v10659_v25  ;;  %v8905_v61 = vpop.eup %8904 }
0x1a6e   :  { %v3032_v22 = vmul.f32 %v8905_v61, %v10653_v60  ;;  %v8657_v60 = vld [vmem:[#allocation8 + $0x28] sm:$0xff]  }
0x1a6f   :  { %7258 = vmatprep.mubr.f32.mxu0 %v3029_v63  ;;  %7267 = vmatpush3.bf16.msra.mxu0 %v8657_v60 }
0x1a70   :  { %7259 = vmatmul.mubr.f32.gmra.mrb[64].mxu0 %v3030_v7  ;;  %7272 = vmatprep.subr.bf16.mxu0 %v9369_v0 }
0x1a71   :  { %7261 = vmatprep.mubr.f32.mxu0 %v3031_v1 }
0x1a74   :  { %7262 = vmatmul.mubr.f32.gmra.mrb[66].mxu0 %v3032_v22 }
0x1a75   :  { %7268 = vmatprep.mubr.msk.bf16.mxu0 %vm9370_vm0, %v9369_v0 }
0x1afc   :  { %v7242_v57 = vpop.f32.mrb[52].mxu0 }
0x1afd   :  { %v3147_v20 = vpop.f32.mrb[53].mxu0 }
0x1b00   :  { %v7245_v34 = vpop.f32.mrb[54].mxu0 }
0x1b01   :  { %v3157_v59 = vpop.f32.mrb[55].mxu0 }
0x1b02   :  { %v8361_v25 = vpack.i.bf16 %v7245_v34, %v3157_v59 }
0x1b04   :  { %8362 = vrot.lane.b32.xlu1 %v8361_v25, %s9356_s23  ;;  %v7248_v26 = vpop.f32.mrb[56].mxu0 }
0x1b05   :  { %v3167_v2 = vpop.f32.mrb[57].mxu0 }
0x1b06   :  { %v8366_v27 = vpack.i.bf16 %v7248_v26, %v3167_v2 }
0x1b08   :  { %8367 = vrot.lane.b32.xlu0 %v8366_v27, %s9364_s29 }
0x1b37   :  { %v7251_v37 = vpop.f32.mrb[58].mxu0 }
0x1b38   :  { %v3177_v30 = vpop.f32.mrb[59].mxu0 }
0x1b39   :  { %v8371_v24 = vpack.i.bf16 %v7251_v37, %v3177_v30 }
0x1b3b   :  { %8372 = vrot.lane.b32.xlu1 %v8371_v24, %s9379_s27  ;;  %v7254_v8 = vpop.f32.mrb[60].mxu0 }
0x1b3c   :  { %v3187_v18 = vpop.f32.mrb[61].mxu0 }
0x1b3d   :  { %v8376_v47 = vpack.i.bf16 %v7254_v8, %v3187_v18 }
0x1b3f   :  { %8377 = vrot.lane.b32.xlu1 %v8376_v47, %s9360_s4  ;;  %v7257_v36 = vpop.f32.mrb[62].mxu0 }
0x1b40   :  { %v3197_v46 = vpop.f32.mrb[63].mxu0 }
0x1b41   :  { %v8381_v53 = vpack.i.bf16 %v7257_v36, %v3197_v46 }
0x1b43   :  { %8382 = vrot.lane.b32.xlu1 %v8381_v53, %s9380_s30  ;;  %v7260_v51 = vpop.f32.mrb[64].mxu0 }
0x1b44   :  { %v3207_v3 = vpop.f32.mrb[65].mxu0 }
0x1b45   :  { %v8386_v41 = vpack.i.bf16 %v7260_v51, %v3207_v3 }
0x1b47   :  { %8387 = vrot.lane.b32.xlu1 %v8386_v41, %s9381_s19  ;;  %v7263_v33 = vpop.f32.mrb[66].mxu0  ;;  %v8659_v41 = vld [vmem:[%s11523_s12 + $0x28] sm:$0xff]  }
0x1b48   :  { %v3217_v40 = vpop.f32.mrb[67].mxu0 }
0x1b49   :  { %v8391_v55 = vpack.i.bf16 %v7263_v33, %v3217_v40  ;;  %v8660_v33 = vld [vmem:[#allocation13 + $0x80] sm:$0xff]   ;;  %v8661_v40 = vld [vmem:[#allocation13 + $0x88] sm:$0xff]  }
0x1b4a   :  { %7281 = vmatpush3.bf16.msra.mxu1 %v8660_v33 }
0x1b4b   :  { %8392 = vrot.lane.b32.xlu0 %v8391_v55, %s9382_s1  ;;  %7282 = vmatprep.subr.bf16.mxu1 %v9369_v0  ;;  %v8662_v55 = vld [vmem:[#allocation13 + $0x90] sm:$0xff]  }
0x1b4e   :  { %7283 = vmatpush3.bf16.msra.mxu1 %v8661_v40 }
0x1b4f   :  { %7284 = vmatprep.subr.bf16.mxu1 %v9369_v0 }
0x1b52   :  { %7285 = vmatpush3.bf16.msra.mxu1 %v8662_v55 }
0x1b53   :  { %7286 = vmatprep.subr.bf16.mxu1 %v9369_v0 }
0x1b76   :  { %v8363_v52 = vpop.permute.xlu1 %8362 }
0x1b77   :  { %v8365_v5 = vunpack.i.h.bf16 %v8363_v52  ;;  %v8364_v29 = vunpack.i.l.bf16 %v8363_v52  ;;  %v8663_v52 = vld [vmem:[#allocation13 + $0x98] sm:$0xff]  }
0x1b78   :  { %7287 = vmatpush3.bf16.msra.mxu1 %v8663_v52  ;;  %v6283_v52 = vld [vmem:[%s11521_s10 + $0x2] ss:$0 sm:$0xff] }
0x1b79   :  { %v3283_v16 = vsel %vm372_vm2, %v7242_v57, %v8365_v5  ;;  %v3282_v4 = vsel %vm372_vm2, %v3147_v20, %v8364_v29  ;;  %v6256_v20 = vld [vmem:[#allocation10 + $0x2] ss:$0 sm:$0xff]  ;;  %7288 = vmatprep.subr.bf16.mxu1 %v9369_v0 }
0x1b7a   :  { %v8368_v35 = vpop.permute.xlu0 %8367 }
0x1b7b   :  { %v8370_v38 = vunpack.i.h.bf16 %v8368_v35  ;;  %v8369_v39 = vunpack.i.l.bf16 %v8368_v35 }
0x1b7d   :  { %v3285_v6 = vsel %vm993_vm4, %v3283_v16, %v8370_v38  ;;  %v3284_v9 = vsel %vm993_vm4, %v3282_v4, %v8369_v39  ;;  %v6263_v4 = vld [vmem:[%s11520_s9 + $0x2] ss:$0 sm:$0xff] }
0x1bad   :  { %v8373_v32 = vpop.permute.xlu1 %8372 }
0x1bae   :  { %v8375_v12 = vunpack.i.h.bf16 %v8373_v32  ;;  %v8374_v15 = vunpack.i.l.bf16 %v8373_v32  ;;  %v8664_v32 = vld [vmem:[#allocation13 + $0xa0] sm:$0xff]  }
0x1baf   :  { %7289 = vmatpush3.bf16.msra.mxu1 %v8664_v32 }
0x1bb0   :  { %v3287_v31 = vsel %vm996_vm5, %v3285_v6, %v8375_v12  ;;  %v3286_v62 = vsel %vm996_vm5, %v3284_v9, %v8374_v15  ;;  %7290 = vmatprep.subr.bf16.mxu1 %v9369_v0  ;;  %v6262_v15 = vld [vmem:[%s11519_s8 + $0x2] ss:$0 sm:$0xff] }
0x1bb1   :  { %v8378_v13 = vpop.permute.xlu1 %8377 }
0x1bb2   :  { %v8380_v17 = vunpack.i.h.bf16 %v8378_v13  ;;  %v8379_v48 = vunpack.i.l.bf16 %v8378_v13  ;;  %v8665_v13 = vld [vmem:[#allocation13 + $0xa8] sm:$0xff]  }
0x1bb3   :  { %7291 = vmatpush3.bf16.msra.mxu1 %v8665_v13 }
0x1bb4   :  { %v3289_v44 = vsel %vm999_vm6, %v3287_v31, %v8380_v17  ;;  %v3288_v23 = vsel %vm999_vm6, %v3286_v62, %v8379_v48  ;;  %7292 = vmatprep.subr.bf16.mxu1 %v9369_v0  ;;  %v6268_v31 = vld [vmem:[#allocation11 + $0x2] ss:$0 sm:$0xff] }
0x1bb5   :  { %v8383_v10 = vpop.permute.xlu1 %8382 }
0x1bb6   :  { %v8385_v21 = vunpack.i.h.bf16 %v8383_v10  ;;  %v8384_v54 = vunpack.i.l.bf16 %v8383_v10 }
0x1bb8   :  { %v3291_v56 = vsel %vm1002_vm7, %v3289_v44, %v8385_v21  ;;  %v3290_v58 = vsel %vm1002_vm7, %v3288_v23, %v8384_v54 }
0x1bb9   :  { %v8388_v43 = vpop.permute.xlu1 %8387 }
0x1bba   :  { %v8390_v14 = vunpack.i.h.bf16 %v8388_v43  ;;  %v8389_v50 = vunpack.i.l.bf16 %v8388_v43 }
0x1bbc   :  { %v3293_v7 = vsel %vm1005_vm8, %v3291_v56, %v8390_v14  ;;  %v3292_v61 = vsel %vm1005_vm8, %v3290_v58, %v8389_v50  ;;  %v8666_v14 = vld [vmem:[#allocation13 + $0xb0] sm:$0xff]   ;;  %v8667_v50 = vld [vmem:[#allocation13 + $0xb8] sm:$0xff]  }
0x1bbd   :  { %v8393_v19 = vpop.permute.xlu0 %8392  ;;  %7293 = vmatpush3.bf16.msra.mxu1 %v8666_v14 }
0x1bbe   :  { %v8395_v42 = vunpack.i.h.bf16 %v8393_v19  ;;  %v8394_v63 = vunpack.i.l.bf16 %v8393_v19  ;;  %7294 = vmatprep.subr.bf16.mxu1 %v9369_v0 }
0x1bc0   :  { %v3295_v1 = vsel %vm1008_vm9, %v3293_v7, %v8395_v42  ;;  %v3294_v22 = vsel %vm1008_vm9, %v3292_v61, %v8394_v63  ;;  %v6272_v61 = vld [vmem:[#allocation14 + $0x2] ss:$0 sm:$0xff] }
0x1bc1   :  { %v3296_v57 = vpack.c.bf16 %v3295_v1, %v3294_v22  ;;  %7295 = vmatpush3.bf16.msra.mxu1 %v8667_v50 }
0x1bc3   :  { %7269 = vmatmul.mubr.msk.bf16.vlgmr.msra.gmra.mrb[68].mxu0 %vm219_vm1, %v3296_v57 }
0x1bc4   :  { %7276 = vmatprep.mubr.msk.bf16.mxu0 %vm9370_vm0, %v9369_v0 }
0x1c96   :  { %v3359_v45 = vpop.f32.mrb[68].mxu0 }
0x1c97   :  { %v3360_v34 = vadd.f32 %v6256_v20, %v3359_v45  ;;  %v7270_v59 = vpop.f32.mrb[69].mxu0 }
0x1c98   :  { %v3362_v25 = vpop.f32.mrb[70].mxu0 }
0x1c99   :  { %v3366_v26 = vadd.f32 %v3360_v34, %v10379_v11  ;;  %v3363_v2 = vadd.f32 %v6256_v20, %v3362_v25  ;;  %v7271_v27 = vpop.f32.mrb[71].mxu0 }
0x1c9b   :  { %v3367_v60 = vadd.f32 %v3363_v2, %v10381_v28  ;;  %v3372_v37 = vsel %vm219_vm1, %v3366_v26, 0.0  ;;  %v8658_v28 = vld [vmem:[%s11523_s12 + $0x20] sm:$0xff]  }
0x1c9c   :  { %3373 = vadd.xlane.f32.xlu1 %v3372_v37  ;;  %7273 = vmatpush3.bf16.msra.mxu0 %v8658_v28 }
0x1c9d   :  { %v3375_v30 = vsel %vm219_vm1, %v3367_v60, 0.0  ;;  %7274 = vmatprep.subr.bf16.mxu0 %v9369_v0 }
0x1c9e   :  { %3376 = vadd.xlane.f32.xlu0 %v3375_v30 }
0x1ca0   :  { %7275 = vmatpush3.bf16.msra.mxu0 %v8659_v41 }
0x1ca1   :  { %7300 = vmatprep.subr.bf16.mxu0 %v9369_v0 }
0x1d29   :  { %v3374_v24 = vpop.xlane.xlu1 %3373 }
0x1d2a   :  { %v3378_v8 = vmul.f32 0.03125, %v3374_v24 }
0x1d2b   :  { %v3377_v18 = vpop.xlane.xlu0 %3376 }
0x1d2c   :  { %v3380_v47 = vsub.f32 %v3366_v26, %v3378_v8  ;;  %v3379_v36 = vmul.f32 0.03125, %v3377_v18 }
0x1d2e   :  { %v3381_v46 = vsub.f32 %v3367_v60, %v3379_v36  ;;  %v3382_v53 = vmul.f32 %v3380_v47, %v3380_v47 }
0x1d30   :  { %v3384_v51 = vsel %vm219_vm1, %v3382_v53, 0.0  ;;  %v3383_v11 = vmul.f32 %v3381_v46, %v3381_v46  ;;  %v8668_v53 = vld [vmem:[#allocation5 + $0x30] sm:$0xff]  }
0x1d31   :  { %3385 = vadd.xlane.f32.xlu0 %v3384_v51  ;;  %v8669_v51 = vld [vmem:[#allocation5 + $0x38] sm:$0xff]  }
0x1d32   :  { %v3387_v3 = vsel %vm219_vm1, %v3383_v11, 0.0 }
0x1d33   :  { %3388 = vadd.xlane.f32.xlu1 %v3387_v3 }
0x1dbe   :  { %v3386_v35 = vpop.xlane.xlu0 %3385 }
0x1dbf   :  { %v3390_v10 = vmul.f32 0.03125, %v3386_v35 }
0x1dc0   :  { %v3389_v5 = vpop.xlane.xlu1 %3388 }
0x1dc1   :  { %v3392_v29 = vadd.f32 1e-05, %v3390_v10  ;;  %v3391_v38 = vmul.f32 0.03125, %v3389_v5  ;;  %v6284_v5 = vld [vmem:[%s11522_s11 + $0x2] ss:$0 sm:$0xff] }
0x1dc3   :  { %8906 = vrsqrt.f32 %v3392_v29  ;;  %v3393_v39 = vadd.f32 1e-05, %v3391_v38 }
0x1dc5   :  { %8908 = vrsqrt.f32 %v3393_v39 }
0x1dcd   :  { %v8907_v12 = vpop.eup %8906 }
0x1dce   :  { %v3396_v17 = vmul.f32 %v8907_v12, %v3380_v47 }
0x1dcf   :  { %v8909_v48 = vpop.eup %8908 }
0x1dd0   :  { %v3404_v43 = vmul.f32 %v6262_v15, %v3396_v17  ;;  %v3397_v16 = vmul.f32 %v8909_v48, %v3381_v46 }
0x1dd2   :  { %v3405_v21 = vmul.f32 %v6262_v15, %v3397_v16  ;;  %v3412_v54 = vadd.f32 %v6263_v4, %v3404_v43  ;;  %v6285_v15 = vld [vmem:[#allocation7 + $0x3] ss:$0 sm:$0xff] }
0x1dd4   :  { %v3413_v6 = vadd.f32 %v6263_v4, %v3405_v21 }
0x1dd6   :  { %v3414_v9 = vpack.c.bf16 %v3413_v6, %v3412_v54 }
0x1dd8   :  { %7277 = vmatmul.mubr.msk.bf16.vlgmr.msra.gmra.mrb[72].mxu0 %vm219_vm1, %v3414_v9 }
0x1dd9   :  { %7304 = vmatprep.mubr.msk.bf16.mxu0 %vm9370_vm0, %v9369_v0  ;;  %7301 = vmatpush3.bf16.msra.mxu0 %v8668_v53 }
0x1dda   :  { %7302 = vmatprep.subr.bf16.mxu0 %v9369_v0 }
0x1ddd   :  { %7303 = vmatpush3.bf16.msra.mxu0 %v8669_v51 }
0x1eab   :  { %v3477_v62 = vpop.f32.mrb[72].mxu0 }
0x1eac   :  { %v3478_v44 = vadd.f32 %v6268_v31, %v3477_v62  ;;  %v7278_v23 = vpop.f32.mrb[73].mxu0 }
0x1ead   :  { %v3480_v19 = vpop.f32.mrb[74].mxu0 }
0x1eae   :  { %v3481_v56 = vadd.f32 %v6268_v31, %v3480_v19  ;;  %v7279_v58 = vpop.f32.mrb[75].mxu0  ;;  %v3484_v42 = vmax.f32 %v3478_v44, 0.0 }
0x1eb0   :  { %v3485_v63 = vmax.f32 %v3481_v56, 0.0 }
0x1eb2   :  { %v3486_v7 = vpack.c.bf16 %v3485_v63, %v3484_v42 }
0x1eb4   :  { %7297 = vmatmul.mubr.bf16.vlgmr.msra.gmra.mrb[64].mxu1 %v3486_v7 }
0x1f87   :  { %v3594_v1 = vpop.f32.mrb[64].mxu1 }
0x1f88   :  { %v3595_v22 = vadd.f32 %v6272_v61, %v3594_v1  ;;  %v7298_v57 = vpop.f32.mrb[65].mxu1 }
0x1f89   :  { %v3597_v20 = vpop.f32.mrb[66].mxu1 }
0x1f8a   :  { %v3601_v45 = vadd.f32 %v3595_v22, %v3412_v54  ;;  %v3598_v34 = vadd.f32 %v6272_v61, %v3597_v20  ;;  %v7299_v59 = vpop.f32.mrb[67].mxu1 }
0x1f8c   :  { %v3602_v25 = vadd.f32 %v3598_v34, %v3413_v6  ;;  %v3607_v26 = vsel %vm219_vm1, %v3601_v45, 0.0 }
0x1f8d   :  { %3608 = vadd.xlane.f32.xlu0 %v3607_v26 }
0x1f8e   :  { %v3610_v2 = vsel %vm219_vm1, %v3602_v25, 0.0 }
0x1f8f   :  { %3611 = vadd.xlane.f32.xlu1 %v3610_v2 }
0x201a   :  { %v3609_v27 = vpop.xlane.xlu0 %3608 }
0x201b   :  { %v3613_v60 = vmul.f32 0.03125, %v3609_v27 }
0x201c   :  { %v3612_v37 = vpop.xlane.xlu1 %3611 }
0x201d   :  { %v3615_v30 = vsub.f32 %v3601_v45, %v3613_v60  ;;  %v3614_v24 = vmul.f32 0.03125, %v3612_v37 }
0x201f   :  { %v3616_v8 = vsub.f32 %v3602_v25, %v3614_v24  ;;  %v3617_v18 = vmul.f32 %v3615_v30, %v3615_v30 }
0x2021   :  { %v3619_v47 = vsel %vm219_vm1, %v3617_v18, 0.0  ;;  %v3618_v36 = vmul.f32 %v3616_v8, %v3616_v8 }
0x2022   :  { %3620 = vadd.xlane.f32.xlu0 %v3619_v47 }
0x2023   :  { %v3622_v46 = vsel %vm219_vm1, %v3618_v36, 0.0 }
0x2024   :  { %3623 = vadd.xlane.f32.xlu1 %v3622_v46 }
0x20af   :  { %v3621_v11 = vpop.xlane.xlu0 %3620 }
0x20b0   :  { %v3625_v3 = vmul.f32 0.03125, %v3621_v11 }
0x20b1   :  { %v3624_v28 = vpop.xlane.xlu1 %3623 }
0x20b2   :  { %v3627_v41 = vadd.f32 1e-05, %v3625_v3  ;;  %v3626_v33 = vmul.f32 0.03125, %v3624_v28 }
0x20b4   :  { %8910 = vrsqrt.f32 %v3627_v41  ;;  %v3628_v40 = vadd.f32 1e-05, %v3626_v33 }
0x20b6   :  { %8912 = vrsqrt.f32 %v3628_v40 }
0x20be   :  { %v8911_v55 = vpop.eup %8910 }
0x20bf   :  { %v3631_v32 = vmul.f32 %v8911_v55, %v3615_v30 }
0x20c0   :  { %v8913_v13 = vpop.eup %8912 }
0x20c1   :  { %v3639_v35 = vmul.f32 %v6283_v52, %v3631_v32  ;;  %v3632_v10 = vmul.f32 %v8913_v13, %v3616_v8 }
0x20c3   :  { %v3640_v29 = vmul.f32 %v6283_v52, %v3632_v10  ;;  %v10748_v38 = vadd.f32 %v6284_v5, %v3639_v35 }
0x20c5   :  { %v10750_v39 = vadd.f32 %v6284_v5, %v3640_v29 }
0x20c7   :  { %v3649_v12 = vpack.c.bf16 %v10750_v39, %v10748_v38 }
0x20c9   :  { %7305 = vmatmul.mubr.msk.bf16.vlgmr.msra.gmra.mrb[76].mxu0 %vm219_vm1, %v3649_v12 }
0x219c   :  { %v3712_v17 = vpop.f32.mrb[76].mxu0 }
0x219d   :  { %v3713_v48 = vadd.f32 %v6285_v15, %v3712_v17  ;;  %v7306_v43 = vpop.f32.mrb[77].mxu0 }
0x219e   :  { %v3715_v16 = vpop.f32.mrb[78].mxu0 }
0x219f   :  { %v10755_v4 = vadd.f32 %v6285_v15, %v3715_v16  ;;  %3721 = vrot.lane.b32.xlu0 %v3713_v48, %s9372_s13  ;;  %v7307_v21 = vpop.f32.mrb[79].mxu0  ;;  %v3763_v54 = vmul.f32 0.5, %v3713_v48 }
0x21a1   :  { %7340 = vmatprep.mubr.msk.f32.mxu0 %vm372_vm2, %v3763_v54  ;;  %3723 = vrot.lane.b32.xlu1 %v10755_v4, %s9372_s13  ;;  %v8396_v6 = vpack.i.bf16 %v10755_v4, %v3713_v48 }
0x21a3   :  { %3729 = vrot.lane.b32.xlu0 %v10755_v4, %s9371_s26 }
0x21a5   :  { %3727 = vrot.lane.b32.xlu1 %v3713_v48, %s9371_s26 }
0x21a7   :  { %3735 = vrot.lane.b32.xlu0 %v10755_v4, %s9373_s2 }
0x21a9   :  { %3733 = vrot.lane.b32.xlu1 %v3713_v48, %s9373_s2 }
0x21ab   :  { %3741 = vrot.lane.b32.xlu0 %v10755_v4, %s9374_s14 }
0x21ad   :  { %3739 = vrot.lane.b32.xlu1 %v3713_v48, %s9374_s14 }
0x21af   :  { %3747 = vrot.lane.b32.xlu0 %v10755_v4, %s9375_s3 }
0x21b1   :  { %3745 = vrot.lane.b32.xlu1 %v3713_v48, %s9375_s3 }
0x21b3   :  { %3753 = vrot.lane.b32.xlu0 %v10755_v4, %s9376_s16 }
0x21b5   :  { %3751 = vrot.lane.b32.xlu1 %v3713_v48, %s9376_s16 }
0x21b7   :  { %3759 = vrot.lane.b32.xlu0 %v10755_v4, %s9377_s15 }
0x21b9   :  { %3757 = vrot.lane.b32.xlu1 %v3713_v48, %s9377_s15 }
0x21bd   :  { %8397 = vrot.lane.b32.xlu1 %v8396_v6, %s9378_s25 }
0x2211   :  { %v10781_v9 = vpop.permute.xlu0 %3721 }
0x2213   :  { %v10783_v14 = vpop.permute.xlu1 %3723 }
0x2214   :  { %v8401_v50 = vpack.i.bf16 %v10783_v14, %v10781_v9 }
0x2215   :  { %v10787_v31 = vpop.permute.xlu0 %3729 }
0x2216   :  { %8402 = vrot.lane.b32.xlu0 %v8401_v50, %s9378_s25 }
0x2217   :  { %v10790_v62 = vpop.permute.xlu1 %3727 }
0x2218   :  { %v8406_v44 = vpack.i.bf16 %v10787_v31, %v10790_v62 }
0x2219   :  { %v10794_v23 = vpop.permute.xlu0 %3735 }
0x221a   :  { %8407 = vrot.lane.b32.xlu1 %v8406_v44, %s9378_s25 }
0x221b   :  { %v10797_v19 = vpop.permute.xlu1 %3733 }
0x221c   :  { %v8411_v56 = vpack.i.bf16 %v10794_v23, %v10797_v19 }
0x221d   :  { %v10801_v58 = vpop.permute.xlu0 %3741 }
0x221e   :  { %8412 = vrot.lane.b32.xlu0 %v8411_v56, %s9378_s25 }
0x221f   :  { %v10804_v42 = vpop.permute.xlu1 %3739 }
0x2220   :  { %v10808_v63 = vpack.i.bf16 %v10801_v58, %v10804_v42 }
0x2221   :  { %v10810_v7 = vpop.permute.xlu0 %3747 }
0x2222   :  { %8417 = vrot.lane.b32.xlu1 %v10808_v63, %s9378_s25 }
0x2223   :  { %v10814_v61 = vpop.permute.xlu1 %3745 }
0x2224   :  { %v10818_v1 = vpack.i.bf16 %v10810_v7, %v10814_v61 }
0x2225   :  { %v10820_v22 = vpop.permute.xlu0 %3753 }
0x2226   :  { %8422 = vrot.lane.b32.xlu0 %v10818_v1, %s9378_s25 }
0x2227   :  { %v10824_v57 = vpop.permute.xlu1 %3751 }
0x2228   :  { %v10828_v20 = vpack.i.bf16 %v10820_v22, %v10824_v57 }
0x2229   :  { %v10832_v45 = vpop.permute.xlu0 %3759 }
0x222a   :  { %8427 = vrot.lane.b32.xlu1 %v10828_v20, %s9378_s25 }
0x222b   :  { %v10834_v34 = vpop.permute.xlu1 %3757 }
0x222c   :  { %v10838_v59 = vpack.i.bf16 %v10832_v45, %v10834_v34 }
0x222e   :  { %8442 = vrot.lane.b32.xlu1 %v8401_v50, %s11538_s28  ;;  %8432 = vrot.lane.b32.xlu0 %v10838_v59, %s9378_s25 }
0x222f   :  { %v8398_v25 = vpop.permute.xlu1 %8397 }
0x2230   :  { %v8400_v26 = vunpack.i.h.bf16 %v8398_v25  ;;  %v8399_v2 = vunpack.i.l.bf16 %v8398_v25 }
0x2232   :  { %v7860_v27 = vpack.c.bf16 %v8400_v26, %v8399_v2  ;;  %8452 = vrot.lane.b32.xlu1 %v8411_v56, %s11538_s28  ;;  %8437 = vrot.lane.b32.xlu0 %v8396_v6, %s11538_s28 }
0x2234   :  { %7862 = vmatprep.subr.msk.bf16.mxu0 %vm9737_vm3, %v7860_v27 }
0x2235   :  { %7865 = vmatpush3.bf16.xpose.msk.msra.mxu0 %vm9737_vm3, %v7860_v27 }
0x2236   :  { %8447 = vrot.lane.b32.xlu0 %v8406_v44, %s11538_s28 }
0x2288   :  { %v8403_v60 = vpop.permute.xlu0 %8402 }
0x2289   :  { %v8405_v37 = vunpack.i.h.bf16 %v8403_v60  ;;  %v8404_v30 = vunpack.i.l.bf16 %v8403_v60 }
0x228b   :  { %v7866_v24 = vpack.c.bf16 %v8405_v37, %v8404_v30 }
0x228c   :  { %v8408_v8 = vpop.permute.xlu1 %8407 }
0x228d   :  { %v8410_v18 = vunpack.i.h.bf16 %v8408_v8  ;;  %v8409_v47 = vunpack.i.l.bf16 %v8408_v8  ;;  %7868 = vmatprep.subr.msk.bf16.mxu0 %vm9737_vm3, %v7866_v24  ;;  %v3765_v8 = vmul.f32 0.5, %v10781_v9  ;;  %v3771_v9 = vmul.f32 0.5, %v10804_v42 }
0x228e   :  { %7871 = vmatpush3.bf16.xpose.msk.msra.mxu0 %vm9737_vm3, %v7866_v24  ;;  %v3764_v24 = vmul.f32 0.5, %v10755_v4  ;;  %v3770_v4 = vmul.f32 0.5, %v10794_v23  ;;  %v3776_v23 = vmul.f32 0.5, %v10820_v22  ;;  %v3777_v42 = vmul.f32 0.5, %v10834_v34 }
0x228f   :  { %v7872_v36 = vpack.c.bf16 %v8410_v18, %v8409_v47  ;;  %v3766_v18 = vmul.f32 0.5, %v10783_v14  ;;  %v3767_v47 = vmul.f32 0.5, %v10790_v62  ;;  %v3772_v14 = vmul.f32 0.5, %v10801_v58 }
0x2290   :  { %v8413_v46 = vpop.permute.xlu0 %8412  ;;  %v3773_v62 = vmul.f32 0.5, %v10814_v61  ;;  %v3778_v58 = vmul.f32 0.5, %v10832_v45  ;;  %v9090_v61 = vld [vmem:[#allocation2 + $0x8] sm:$0xff] }
0x2291   :  { %v8415_v53 = vunpack.i.h.bf16 %v8413_v46  ;;  %v8414_v51 = vunpack.i.l.bf16 %v8413_v46  ;;  %7874 = vmatprep.subr.msk.bf16.mxu0 %vm9737_vm3, %v7872_v36  ;;  %v3769_v46 = vmul.f32 0.5, %v10797_v19  ;;  %v3775_v19 = vmul.f32 0.5, %v10824_v57 }
0x2293   :  { %v7878_v11 = vpack.c.bf16 %v8415_v53, %v8414_v51  ;;  %v9091_v51 = vld [vmem:[#allocation2] sm:$0xff] }
0x2294   :  { %v8418_v3 = vpop.permute.xlu1 %8417 }
0x2295   :  { %v8420_v28 = vunpack.i.h.bf16 %v8418_v3  ;;  %v8419_v41 = vunpack.i.l.bf16 %v8418_v3 }
0x2296   :  { %7877 = vmatpush3.bf16.xpose.msk.msra.mxu0 %vm9737_vm3, %v7872_v36  ;;  %v3768_v36 = vmul.f32 0.5, %v10787_v31  ;;  %v3774_v31 = vmul.f32 0.5, %v10810_v7 }
0x2297   :  { %7880 = vmatprep.subr.msk.bf16.mxu0 %vm9737_vm3, %v7878_v11  ;;  %v7884_v55 = vpack.c.bf16 %v8420_v28, %v8419_v41  ;;  %v9093_v28 = vld [vmem:[#allocation2 + $0x10] sm:$0xff] }
0x2298   :  { %v8423_v33 = vpop.permute.xlu0 %8422 }
0x2299   :  { %v8425_v52 = vunpack.i.h.bf16 %v8423_v33  ;;  %v8424_v32 = vunpack.i.l.bf16 %v8423_v33 }
0x229b   :  { %v7890_v10 = vpack.c.bf16 %v8425_v52, %v8424_v32  ;;  %v9095_v32 = vld [vmem:[#allocation2 + $0x20] sm:$0xff] }
0x229c   :  { %v8428_v40 = vpop.permute.xlu1 %8427 }
0x229d   :  { %v8430_v43 = vunpack.i.h.bf16 %v8428_v40  ;;  %v8429_v21 = vunpack.i.l.bf16 %v8428_v40  ;;  %v9094_v40 = vld [vmem:[#allocation2 + $0x28] sm:$0xff] }
0x229e   :  { %7883 = vmatpush3.bf16.xpose.msk.msra.mxu0 %vm9737_vm3, %v7878_v11  ;;  %v9092_v11 = vld [vmem:[#allocation2 + $0x18] sm:$0xff] }
0x229f   :  { %7886 = vmatprep.subr.msk.bf16.mxu0 %vm9737_vm3, %v7884_v55  ;;  %v7896_v56 = vpack.c.bf16 %v8430_v43, %v8429_v21  ;;  %v9099_v21 = vld [vmem:[#allocation2 + $0x40] sm:$0xff] }
0x22a0   :  { %v8433_v13 = vpop.permute.xlu0 %8432  ;;  %v8443_v35 = vpop.permute.xlu1 %8442 }
0x22a1   :  { %v8445_v29 = vunpack.i.h.bf16 %v8443_v35  ;;  %v8444_v12 = vunpack.i.l.bf16 %v8443_v35  ;;  %v8435_v27 = vunpack.i.h.bf16 %v8433_v13  ;;  %v8434_v60 = vunpack.i.l.bf16 %v8433_v13 }
0x22a3   :  { %v7912_v50 = vpack.c.bf16 %v8445_v29, %v8444_v12  ;;  %v7902_v30 = vpack.c.bf16 %v8435_v27, %v8434_v60  ;;  %v9097_v12 = vld [vmem:[#allocation2 + $0x30] sm:$0xff]  ;;  %v9102_v27 = vld [vmem:[#allocation2 + $0x68] sm:$0xff] }
0x22a4   :  { %v8438_v5 = vpop.permute.xlu0 %8437  ;;  %v8453_v44 = vpop.permute.xlu1 %8452 }
0x22a5   :  { %v8440_v15 = vunpack.i.h.bf16 %v8438_v5  ;;  %v8439_v17 = vunpack.i.l.bf16 %v8438_v5  ;;  %v8455_v25 = vunpack.i.h.bf16 %v8453_v44  ;;  %v8454_v26 = vunpack.i.l.bf16 %v8453_v44 }
0x22a6   :  { %7889 = vmatpush3.bf16.xpose.msk.msra.mxu0 %vm9737_vm3, %v7884_v55 }
0x22a7   :  { %7892 = vmatprep.subr.msk.bf16.mxu0 %vm9737_vm3, %v7890_v10  ;;  %v7908_v48 = vpack.c.bf16 %v8440_v15, %v8439_v17  ;;  %v7920_v37 = vpack.c.bf16 %v8455_v25, %v8454_v26  ;;  %v9101_v25 = vld [vmem:[#allocation2 + $0x50] sm:$0xff] }
0x22a8   :  { %v8448_v16 = vpop.permute.xlu0 %8447 }
0x22a9   :  { %v8450_v54 = vunpack.i.h.bf16 %v8448_v16  ;;  %v8449_v6 = vunpack.i.l.bf16 %v8448_v16  ;;  %7909 = vmatprep.subr.bf16.mxu1 %v7908_v48 }
0x22aa   :  { %7911 = vmatpush3.bf16.msra.mxu1 %v7908_v48  ;;  %v9098_v48 = vld [vmem:[#allocation2 + $0x48] sm:$0xff] }
0x22ab   :  { %7913 = vmatprep.subr.bf16.mxu1 %v7912_v50  ;;  %v7916_v2 = vpack.c.bf16 %v8450_v54, %v8449_v6 }
0x22ae   :  { %7895 = vmatpush3.bf16.xpose.msk.msra.mxu0 %vm9737_vm3, %v7890_v10  ;;  %7915 = vmatpush3.bf16.msra.mxu1 %v7912_v50  ;;  %v9096_v10 = vld [vmem:[#allocation2 + $0x38] sm:$0xff] }
0x22af   :  { %7898 = vmatprep.subr.msk.bf16.mxu0 %vm9737_vm3, %v7896_v56  ;;  %7917 = vmatprep.subr.bf16.mxu1 %v7916_v2  ;;  %v9100_v50 = vld [vmem:[#allocation2 + $0x58] sm:$0xff] }
0x22b2   :  { %7919 = vmatpush3.bf16.msra.mxu1 %v7916_v2 }
0x22b3   :  { %7921 = vmatprep.subr.bf16.mxu1 %v7920_v37 }
0x22b6   :  { %7901 = vmatpush3.bf16.xpose.msk.msra.mxu0 %vm9737_vm3, %v7896_v56  ;;  %7923 = vmatpush3.bf16.msra.mxu1 %v7920_v37 }
0x22b7   :  { %7904 = vmatprep.subr.msk.bf16.mxu0 %vm9737_vm3, %v7902_v30 }
0x22be   :  { %7907 = vmatpush3.bf16.xpose.msk.msra.mxu0 %vm9737_vm3, %v7902_v30  ;;  %v9103_v30 = vld [vmem:[#allocation2 + $0x60] sm:$0xff] }
0x22bf   :  { %7436 = vmatprep.subr.bf16.mxu0 %v9369_v0 }
0x22c5   :  { %7341 = vmatmul.mubr.msk.f32.vlgmr.msra.gmra.mrb[80].mxu0 %vm372_vm2, %v3764_v24 }
0x22c6   :  { %7343 = vmatprep.mubr.msk.f32.mxu0 %vm372_vm2, %v3765_v8 }
0x22c9   :  { %7344 = vmatmul.mubr.msk.f32.gmra.mrb[82].mxu0 %vm372_vm2, %v3766_v18  ;;  %v9104_v18 = vld [vmem:[#allocation2 + $0x78] sm:$0xff] }
0x22ca   :  { %7346 = vmatprep.mubr.msk.f32.mxu0 %vm372_vm2, %v3767_v47 }
0x22cd   :  { %7347 = vmatmul.mubr.msk.f32.gmra.mrb[84].mxu0 %vm372_vm2, %v3768_v36 }
0x22ce   :  { %7349 = vmatprep.mubr.msk.f32.mxu0 %vm372_vm2, %v3769_v46  ;;  %v9105_v46 = vld [vmem:[#allocation2 + $0x70] sm:$0xff] }
0x22d1   :  { %7350 = vmatmul.mubr.msk.f32.gmra.mrb[86].mxu0 %vm372_vm2, %v3770_v4 }
0x22d2   :  { %7352 = vmatprep.mubr.msk.f32.mxu0 %vm372_vm2, %v3771_v9 }
0x22d5   :  { %7353 = vmatmul.mubr.msk.f32.gmra.mrb[88].mxu0 %vm372_vm2, %v3772_v14 }
0x22d6   :  { %7355 = vmatprep.mubr.msk.f32.mxu0 %vm372_vm2, %v3773_v62 }
0x22d9   :  { %7356 = vmatmul.mubr.msk.f32.gmra.mrb[90].mxu0 %vm372_vm2, %v3774_v31 }
0x22da   :  { %7358 = vmatprep.mubr.msk.f32.mxu0 %vm372_vm2, %v3775_v19 }
0x22dd   :  { %7359 = vmatmul.mubr.msk.f32.gmra.mrb[92].mxu0 %vm372_vm2, %v3776_v23 }
0x22de   :  { %7361 = vmatprep.mubr.msk.f32.mxu0 %vm372_vm2, %v3777_v42 }
0x22e1   :  { %7362 = vmatmul.mubr.msk.f32.gmra.mrb[94].mxu0 %vm372_vm2, %v3778_v58 }
0x22e2   :  { %7452 = vmatprep.mubr.msk.bf16.mxu0 %vm9370_vm0, %v9369_v0 }
0x2398   :  { %v7342_v7 = vpop.f32.mrb[80].mxu0 }
0x2399   :  { %v10911_v57 = vadd.f32 %v9090_v61, %v7342_v7  ;;  %v3957_v53 = vpop.f32.mrb[81].mxu0 }
0x239a   :  { %v10913_v22 = vadd.f32 %v9091_v51, %v3957_v53 }
0x239b   :  { %4038 = vmax.xlane.f32.xlu0 %v10911_v57 }
0x239c   :  { %v7345_v34 = vpop.f32.mrb[82].mxu0  ;;  %4036 = vmax.xlane.f32.xlu1 %v10913_v22 }
0x239d   :  { %v10917_v45 = vadd.f32 %v9092_v11, %v7345_v34  ;;  %v3967_v3 = vpop.f32.mrb[83].mxu0 }
0x239e   :  { %v10919_v41 = vadd.f32 %v9093_v28, %v3967_v3 }
0x23a0   :  { %v7348_v33 = vpop.f32.mrb[84].mxu0  ;;  %4040 = vmax.xlane.f32.xlu0 %v10919_v41  ;;  %4042 = vmax.xlane.f32.xlu1 %v10917_v45 }
0x23a1   :  { %v10923_v55 = vadd.f32 %v9094_v40, %v7348_v33  ;;  %v3977_v52 = vpop.f32.mrb[85].mxu0 }
0x23a2   :  { %v10925_v13 = vadd.f32 %v9095_v32, %v3977_v52 }
0x23a4   :  { %v7351_v35 = vpop.f32.mrb[86].mxu0  ;;  %4044 = vmax.xlane.f32.xlu0 %v10925_v13  ;;  %4046 = vmax.xlane.f32.xlu1 %v10923_v55 }
0x23a5   :  { %v10929_v5 = vadd.f32 %v9096_v10, %v7351_v35  ;;  %v3987_v29 = vpop.f32.mrb[87].mxu0 }
0x23a6   :  { %v10931_v15 = vadd.f32 %v9097_v12, %v3987_v29 }
0x23a8   :  { %v7354_v17 = vpop.f32.mrb[88].mxu0  ;;  %4048 = vmax.xlane.f32.xlu0 %v10931_v15  ;;  %4050 = vmax.xlane.f32.xlu1 %v10929_v5 }
0x23a9   :  { %v10935_v43 = vadd.f32 %v9098_v48, %v7354_v17  ;;  %v3997_v16 = vpop.f32.mrb[89].mxu0 }
0x23aa   :  { %v10937_v54 = vadd.f32 %v9099_v21, %v3997_v16 }
0x23ac   :  { %v7357_v6 = vpop.f32.mrb[90].mxu0  ;;  %4052 = vmax.xlane.f32.xlu0 %v10937_v54  ;;  %4054 = vmax.xlane.f32.xlu1 %v10935_v43 }
0x23ad   :  { %v10941_v44 = vadd.f32 %v9100_v50, %v7357_v6  ;;  %v4007_v56 = vpop.f32.mrb[91].mxu0 }
0x23ae   :  { %v10943_v26 = vadd.f32 %v9101_v25, %v4007_v56 }
0x23b0   :  { %v7360_v2 = vpop.f32.mrb[92].mxu0  ;;  %4056 = vmax.xlane.f32.xlu0 %v10943_v26  ;;  %4058 = vmax.xlane.f32.xlu1 %v10941_v44 }
0x23b1   :  { %v10947_v60 = vadd.f32 %v9102_v27, %v7360_v2  ;;  %v4017_v37 = vpop.f32.mrb[93].mxu0 }
0x23b2   :  { %v10949_v24 = vadd.f32 %v9103_v30, %v4017_v37 }
0x23b4   :  { %v7363_v8 = vpop.f32.mrb[94].mxu0  ;;  %4060 = vmax.xlane.f32.xlu0 %v10949_v24  ;;  %4062 = vmax.xlane.f32.xlu1 %v10947_v60 }
0x23b5   :  { %v10953_v47 = vadd.f32 %v9104_v18, %v7363_v8  ;;  %v4027_v36 = vpop.f32.mrb[95].mxu0 }
0x23b6   :  { %v10955_v4 = vadd.f32 %v9105_v46, %v4027_v36 }
0x23b8   :  { %4064 = vmax.xlane.f32.xlu0 %v10955_v4  ;;  %4066 = vmax.xlane.f32.xlu1 %v10953_v47 }
0x23c9   :  { %8462 = vrot.lane.b32.xlu1 %v10818_v1, %s11538_s28 }
0x23ce   :  { %8457 = vrot.lane.b32.xlu0 %v10808_v63, %s11538_s28 }
0x2428   :  { %v4039_v9 = vpop.xlane.xlu0 %4038 }
0x2429   :  { %v4069_v14 = vsub.f32 %v10911_v57, %v4039_v9  ;;  %v4037_v62 = vpop.xlane.xlu1 %4036 }
0x242a   :  { %v4068_v31 = vsub.f32 %v10913_v22, %v4037_v62 }
0x242b   :  { %v4086_v19 = vmul.f32 1.442695, %v4069_v14 }
0x242c   :  { %v4084_v23 = vmul.f32 1.442695, %v4068_v31 }
0x242d   :  { %8914 = vpow2.f32 %v4086_v19  ;;  %v4041_v42 = vpop.xlane.xlu0 %4040  ;;  %v4043_v58 = vpop.xlane.xlu1 %4042 }
0x242e   :  { %8916 = vpow2.f32 %v4084_v23  ;;  %v4071_v7 = vsub.f32 %v10917_v45, %v4043_v58  ;;  %v4070_v61 = vsub.f32 %v10919_v41, %v4041_v42 }
0x2430   :  { %v4090_v1 = vmul.f32 1.442695, %v4071_v7  ;;  %v4088_v34 = vmul.f32 1.442695, %v4070_v61 }
0x2431   :  { %v4045_v53 = vpop.xlane.xlu0 %4044  ;;  %v4047_v51 = vpop.xlane.xlu1 %4046 }
0x2432   :  { %v4072_v63 = vsub.f32 %v10925_v13, %v4045_v53  ;;  %8918 = vpow2.f32 %v4090_v1  ;;  %v4073_v57 = vsub.f32 %v10923_v55, %v4047_v51 }
0x2434   :  { %v4092_v22 = vmul.f32 1.442695, %v4072_v63  ;;  %v4094_v33 = vmul.f32 1.442695, %v4073_v57 }
0x2435   :  { %v4049_v11 = vpop.xlane.xlu0 %4048  ;;  %v4051_v3 = vpop.xlane.xlu1 %4050 }
0x2436   :  { %8920 = vpow2.f32 %v4092_v22  ;;  %v4075_v18 = vsub.f32 %v10929_v5, %v4051_v3  ;;  %v4074_v9 = vsub.f32 %v10931_v15, %v4049_v11 }
0x2437   :  { %v10969_v28 = vpop.eup %8914  ;;  %8922 = vpow2.f32 %v4088_v34 }
0x2438   :  { %v10971_v45 = vpop.eup %8916  ;;  %4118 = vadd.xlane.f32.xlu0 %v10969_v28  ;;  %8924 = vpow2.f32 %v4094_v33  ;;  %v4098_v14 = vmul.f32 1.442695, %v4075_v18  ;;  %v4096_v31 = vmul.f32 1.442695, %v4074_v9 }
0x2439   :  { %v4053_v41 = vpop.xlane.xlu0 %4052  ;;  %4116 = vadd.xlane.f32.xlu1 %v10971_v45  ;;  %v4055_v40 = vpop.xlane.xlu1 %4054 }
0x243a   :  { %v4076_v37 = vsub.f32 %v10937_v54, %v4053_v41 }
0x243c   :  { %v10975_v52 = vpop.eup %8918  ;;  %v4100_v30 = vmul.f32 1.442695, %v4076_v37 }
0x243d   :  { %v4057_v55 = vpop.xlane.xlu0 %4056  ;;  %v4059_v32 = vpop.xlane.xlu1 %4058  ;;  %4122 = vadd.xlane.f32.xlu1 %v10975_v52 }
0x243e   :  { %v4079_v8 = vsub.f32 %v10941_v44, %v4059_v32  ;;  %8926 = vpow2.f32 %v4100_v30  ;;  %v4078_v19 = vsub.f32 %v10943_v26, %v4057_v55 }
0x2440   :  { %v10978_v13 = vpop.eup %8920  ;;  %v4106_v36 = vmul.f32 1.442695, %v4079_v8 }
0x2441   :  { %v10980_v35 = vpop.eup %8922  ;;  %4124 = vadd.xlane.f32.xlu0 %v10978_v13  ;;  %v4061_v10 = vpop.xlane.xlu0 %4060 }
0x2442   :  { %v4063_v29 = vpop.xlane.xlu1 %4062  ;;  %4120 = vadd.xlane.f32.xlu1 %v10980_v35  ;;  %v10984_v12 = vpop.eup %8924  ;;  %8928 = vpow2.f32 %v4106_v36  ;;  %v4080_v23 = vsub.f32 %v10949_v24, %v4061_v10 }
0x2443   :  { %v4081_v46 = vsub.f32 %v10947_v60, %v4063_v29  ;;  %8930 = vpow2.f32 %v4098_v14 }
0x2444   :  { %v4108_v26 = vmul.f32 1.442695, %v4080_v23 }
0x2445   :  { %v4065_v17 = vpop.xlane.xlu0 %4064  ;;  %v4110_v62 = vmul.f32 1.442695, %v4081_v46 }
0x2446   :  { %v4067_v48 = vpop.xlane.xlu1 %4066  ;;  %4126 = vadd.xlane.f32.xlu1 %v10984_v12 }
0x2447   :  { %8932 = vpow2.f32 %v4110_v62  ;;  %v4083_v44 = vsub.f32 %v10953_v47, %v4067_v48 }
0x2448   :  { %8934 = vpow2.f32 %v4096_v31  ;;  %v11000_v60 = vpop.eup %8926 }
0x2449   :  { %v8458_v16 = vpop.permute.xlu0 %8457  ;;  %v4114_v15 = vmul.f32 1.442695, %v4083_v44 }
0x244a   :  { %v8463_v21 = vpop.permute.xlu1 %8462  ;;  %v8460_v6 = vunpack.i.h.bf16 %v8458_v16  ;;  %v8459_v50 = vunpack.i.l.bf16 %v8458_v16 }
0x244b   :  { %v8465_v56 = vunpack.i.h.bf16 %v8463_v21  ;;  %v8464_v25 = vunpack.i.l.bf16 %v8463_v21 }
0x244c   :  { %v7924_v2 = vpack.c.bf16 %v8460_v6, %v8459_v50  ;;  %v11004_v42 = vpop.eup %8928 }
0x244d   :  { %v7928_v27 = vpack.c.bf16 %v8465_v56, %v8464_v25 }
0x244e   :  { %7925 = vmatprep.subr.bf16.mxu1 %v7924_v2 }
0x244f   :  { %7927 = vmatpush3.bf16.msra.mxu1 %v7924_v2 }
0x2450   :  { %7929 = vmatprep.subr.bf16.mxu1 %v7928_v27 }
0x2453   :  { %7931 = vmatpush3.bf16.msra.mxu1 %v7928_v27 }
0x2457   :  { %8472 = vrot.lane.b32.xlu1 %v10838_v59, %s11538_s28  ;;  %8467 = vrot.lane.b32.xlu0 %v10828_v20, %s11538_s28  ;;  %v4082_v59 = vsub.f32 %v10955_v4, %v4065_v17  ;;  %v4077_v20 = vsub.f32 %v10935_v43, %v4055_v40  ;;  %v4104_v4 = vmul.f32 1.442695, %v4078_v19  ;;  %v11006_v43 = vpop.eup %8930 }
0x2458   :  { %v11010_v47 = vpop.eup %8932 }
0x2459   :  { %v4112_v54 = vmul.f32 1.442695, %v4082_v59  ;;  %v4102_v5 = vmul.f32 1.442695, %v4077_v20  ;;  %v11012_v58 = vpop.eup %8934 }
0x245b   :  { %8936 = vpow2.f32 %v4112_v54 }
0x245c   :  { %8938 = vpow2.f32 %v4102_v5 }
0x245d   :  { %8940 = vpow2.f32 %v4114_v15 }
0x245e   :  { %8942 = vpow2.f32 %v4104_v4 }
0x245f   :  { %8944 = vpow2.f32 %v4108_v26 }
0x2465   :  { %v11016_v24 = vpop.eup %8936 }
0x2466   :  { %v11018_v7 = vpop.eup %8938 }
0x2467   :  { %v11022_v61 = vpop.eup %8940 }
0x2468   :  { %v11024_v1 = vpop.eup %8942 }
0x2469   :  { %v11028_v53 = vpop.eup %8944 }
0x2476   :  { %4132 = vadd.xlane.f32.xlu0 %v11000_v60 }
0x247a   :  { %4138 = vadd.xlane.f32.xlu0 %v11004_v42 }
0x247b   :  { %4130 = vadd.xlane.f32.xlu1 %v11006_v43 }
0x247e   :  { %4142 = vadd.xlane.f32.xlu0 %v11010_v47 }
0x247f   :  { %4128 = vadd.xlane.f32.xlu1 %v11012_v58 }
0x2482   :  { %4144 = vadd.xlane.f32.xlu0 %v11016_v24 }
0x2483   :  { %4134 = vadd.xlane.f32.xlu1 %v11018_v7 }
0x2486   :  { %4146 = vadd.xlane.f32.xlu0 %v11022_v61 }
0x2487   :  { %4136 = vadd.xlane.f32.xlu1 %v11024_v1 }
0x248b   :  { %4140 = vadd.xlane.f32.xlu1 %v11028_v53 }
0x24c5   :  { %v4119_v63 = vpop.xlane.xlu0 %4118 }
0x24c6   :  { %v4117_v51 = vpop.xlane.xlu1 %4116 }
0x24c7   :  { %8946 = vrcp.f32 %v4117_v51 }
0x24c8   :  { %8948 = vrcp.f32 %v4119_v63 }
0x24ca   :  { %v4123_v34 = vpop.xlane.xlu1 %4122 }
0x24ce   :  { %v4125_v57 = vpop.xlane.xlu0 %4124 }
0x24cf   :  { %v4121_v22 = vpop.xlane.xlu1 %4120 }
0x24d0   :  { %8950 = vrcp.f32 %v4121_v22 }
0x24d1   :  { %v8947_v11 = vpop.eup %8946  ;;  %8952 = vrcp.f32 %v4123_v34  ;;  %v8670_v34 = vld [vmem:[#allocation8 + $0x30] sm:$0xff]  }
0x24d2   :  { %v8468_v3 = vpop.permute.xlu0 %8467  ;;  %v4164_v33 = vmul.f32 %v8947_v11, %v10971_v45  ;;  %8954 = vrcp.f32 %v4125_v57  ;;  %v8949_v16 = vpop.eup %8948 }
0x24d3   :  { %v8470_v41 = vunpack.i.h.bf16 %v8468_v3  ;;  %v8469_v40 = vunpack.i.l.bf16 %v8468_v3  ;;  %v4127_v55 = vpop.xlane.xlu1 %4126  ;;  %v4165_v45 = vmul.f32 %v8949_v16, %v10969_v28 }
0x24d4   :  { %7396 = vmatprep.mubr.f32.mxu1 %v4164_v33  ;;  %8956 = vrcp.f32 %v4127_v55 }
0x24d5   :  { %v7932_v32 = vpack.c.bf16 %v8470_v41, %v8469_v40 }
0x24d7   :  { %v8473_v10 = vpop.permute.xlu1 %8472  ;;  %7933 = vmatprep.subr.bf16.mxu1 %v7932_v32 }
0x24d8   :  { %v8475_v29 = vunpack.i.h.bf16 %v8473_v10  ;;  %v8474_v17 = vunpack.i.l.bf16 %v8473_v10  ;;  %7935 = vmatpush3.bf16.msra.mxu1 %v7932_v32 }
0x24da   :  { %v7936_v48 = vpack.c.bf16 %v8475_v29, %v8474_v17  ;;  %v8951_v21 = vpop.eup %8950 }
0x24db   :  { %v8953_v6 = vpop.eup %8952  ;;  %v4166_v50 = vmul.f32 %v8951_v21, %v10980_v35 }
0x24dc   :  { %7937 = vmatprep.subr.bf16.mxu1 %v7936_v48  ;;  %v8955_v56 = vpop.eup %8954  ;;  %v4167_v25 = vmul.f32 %v8953_v6, %v10975_v52 }
0x24dd   :  { %7939 = vmatpush3.bf16.msra.mxu1 %v7936_v48  ;;  %v4168_v27 = vmul.f32 %v8955_v56, %v10978_v13 }
0x24de   :  { %7420 = vmatprep.subr.bf16.mxu1 %v9369_v0  ;;  %v8957_v2 = vpop.eup %8956 }
0x24df   :  { %v4169_v37 = vmul.f32 %v8957_v2, %v10984_v12 }
0x24e0   :  { %7397 = vmatmul.mubr.f32.vlgmr.msra.gmra.mrb[68].mxu1 %v4165_v45 }
0x24e1   :  { %7399 = vmatprep.mubr.f32.mxu1 %v4166_v50  ;;  %7421 = vmatpush3.bf16.msra.mxu1 %v8670_v34 }
0x24e2   :  { %7422 = vmatprep.subr.bf16.mxu1 %v9369_v0 }
0x24e4   :  { %7400 = vmatmul.mubr.f32.gmra.mrb[70].mxu1 %v4167_v25 }
0x24e5   :  { %7402 = vmatprep.mubr.f32.mxu1 %v4168_v27 }
0x24e8   :  { %7403 = vmatmul.mubr.f32.gmra.mrb[72].mxu1 %v4169_v37 }
0x2503   :  { %v4133_v30 = vpop.xlane.xlu0 %4132 }
0x2504   :  { %8958 = vrcp.f32 %v4133_v30 }
0x2507   :  { %v4139_v28 = vpop.xlane.xlu0 %4138 }
0x2508   :  { %v4131_v8 = vpop.xlane.xlu1 %4130 }
0x2509   :  { %8960 = vrcp.f32 %v4131_v8 }
0x250b   :  { %v4143_v35 = vpop.xlane.xlu0 %4142 }
0x250c   :  { %v4129_v18 = vpop.xlane.xlu1 %4128 }
0x250d   :  { %8962 = vrcp.f32 %v4129_v18 }
0x250e   :  { %v8959_v9 = vpop.eup %8958 }
0x250f   :  { %v4145_v46 = vpop.xlane.xlu0 %4144  ;;  %v4172_v20 = vmul.f32 %v8959_v9, %v11000_v60 }
0x2510   :  { %v4135_v36 = vpop.xlane.xlu1 %4134 }
0x2511   :  { %8964 = vrcp.f32 %v4135_v36 }
0x2512   :  { %8966 = vrcp.f32 %v4139_v28 }
0x2513   :  { %v8961_v13 = vpop.eup %8960  ;;  %v4147_v59 = vpop.xlane.xlu0 %4146 }
0x2514   :  { %v4137_v52 = vpop.xlane.xlu1 %4136  ;;  %v4171_v31 = vmul.f32 %v8961_v13, %v11006_v43 }
0x2515   :  { %8968 = vrcp.f32 %v4137_v52 }
0x2516   :  { %8970 = vrcp.f32 %v4143_v35 }
0x2517   :  { %v8963_v14 = vpop.eup %8962  ;;  %8972 = vrcp.f32 %v4145_v46 }
0x2518   :  { %v4141_v12 = vpop.xlane.xlu1 %4140  ;;  %v4170_v62 = vmul.f32 %v8963_v14, %v11012_v58 }
0x2519   :  { %8974 = vrcp.f32 %v4141_v12 }
0x251a   :  { %7405 = vmatprep.mubr.f32.mxu1 %v4170_v62  ;;  %8976 = vrcp.f32 %v4147_v59 }
0x251b   :  { %v8965_v54 = vpop.eup %8964  ;;  %7406 = vmatmul.mubr.f32.gmra.mrb[74].mxu1 %v4171_v31 }
0x251c   :  { %7408 = vmatprep.mubr.f32.mxu1 %v4172_v20  ;;  %v4173_v44 = vmul.f32 %v8965_v54, %v11018_v7  ;;  %v8967_v5 = vpop.eup %8966 }
0x251d   :  { %v4175_v23 = vmul.f32 %v8967_v5, %v11004_v42 }
0x251f   :  { %v8969_v19 = vpop.eup %8968  ;;  %7409 = vmatmul.mubr.f32.gmra.mrb[76].mxu1 %v4173_v44 }
0x2520   :  { %v4174_v15 = vmul.f32 %v8969_v19, %v11024_v1  ;;  %v8971_v4 = vpop.eup %8970 }
0x2521   :  { %v8973_v26 = vpop.eup %8972  ;;  %v4177_v58 = vmul.f32 %v8971_v4, %v11010_v47 }
0x2522   :  { %7411 = vmatprep.mubr.f32.mxu1 %v4174_v15  ;;  %v4178_v7 = vmul.f32 %v8973_v26, %v11016_v24 }
0x2523   :  { %v8975_v43 = vpop.eup %8974  ;;  %7412 = vmatmul.mubr.f32.gmra.mrb[78].mxu1 %v4175_v23 }
0x2524   :  { %v4176_v60 = vmul.f32 %v8975_v43, %v11028_v53  ;;  %v8977_v51 = vpop.eup %8976 }
0x2525   :  { %v4179_v63 = vmul.f32 %v8977_v51, %v11022_v61  ;;  %v8671_v61 = vld [vmem:[#allocation8 + $0x38] sm:$0xff]  }
0x2526   :  { %7414 = vmatprep.mubr.f32.mxu1 %v4176_v60  ;;  %7423 = vmatpush3.bf16.msra.mxu1 %v8671_v61 }
0x2527   :  { %7415 = vmatmul.mubr.f32.gmra.mrb[80].mxu1 %v4177_v58  ;;  %7428 = vmatprep.subr.bf16.mxu1 %v9369_v0 }
0x2528   :  { %7417 = vmatprep.mubr.f32.mxu1 %v4178_v7 }
0x252b   :  { %7418 = vmatmul.mubr.f32.gmra.mrb[82].mxu1 %v4179_v63 }
0x252c   :  { %7424 = vmatprep.mubr.msk.bf16.mxu1 %vm9370_vm0, %v9369_v0 }
0x25b3   :  { %v7398_v42 = vpop.f32.mrb[68].mxu1 }
0x25b4   :  { %v4294_v1 = vpop.f32.mrb[69].mxu1 }
0x25b7   :  { %v7401_v57 = vpop.f32.mrb[70].mxu1 }
0x25b8   :  { %v4304_v47 = vpop.f32.mrb[71].mxu1 }
0x25b9   :  { %v8476_v53 = vpack.i.bf16 %v7401_v57, %v4304_v47 }
0x25bb   :  { %8477 = vrot.lane.b32.xlu0 %v8476_v53, %s9356_s23  ;;  %v7404_v24 = vpop.f32.mrb[72].mxu1 }
0x25bc   :  { %v4314_v22 = vpop.f32.mrb[73].mxu1 }
0x25bd   :  { %v8481_v11 = vpack.i.bf16 %v7404_v24, %v4314_v22 }
0x25bf   :  { %8482 = vrot.lane.b32.xlu1 %v8481_v11, %s9364_s29 }
0x25ee   :  { %v7407_v3 = vpop.f32.mrb[74].mxu1 }
0x25ef   :  { %v4324_v33 = vpop.f32.mrb[75].mxu1 }
0x25f0   :  { %v8486_v41 = vpack.i.bf16 %v7407_v3, %v4324_v33 }
0x25f2   :  { %8487 = vrot.lane.b32.xlu0 %v8486_v41, %s9379_s27  ;;  %v7410_v40 = vpop.f32.mrb[76].mxu1 }
0x25f3   :  { %v4334_v55 = vpop.f32.mrb[77].mxu1 }
0x25f4   :  { %v8491_v32 = vpack.i.bf16 %v7410_v40, %v4334_v55 }
0x25f6   :  { %8492 = vrot.lane.b32.xlu0 %v8491_v32, %s9360_s4  ;;  %v7413_v10 = vpop.f32.mrb[78].mxu1 }
0x25f7   :  { %v4344_v29 = vpop.f32.mrb[79].mxu1 }
0x25f8   :  { %v8496_v17 = vpack.i.bf16 %v7413_v10, %v4344_v29 }
0x25fa   :  { %8497 = vrot.lane.b32.xlu1 %v8496_v17, %s9380_s30  ;;  %v7416_v48 = vpop.f32.mrb[80].mxu1 }
0x25fb   :  { %v4354_v16 = vpop.f32.mrb[81].mxu1 }
0x25fc   :  { %v8501_v21 = vpack.i.bf16 %v7416_v48, %v4354_v16 }
0x25fe   :  { %8502 = vrot.lane.b32.xlu0 %v8501_v21, %s9381_s19  ;;  %v7419_v45 = vpop.f32.mrb[82].mxu1  ;;  %v8673_v21 = vld [vmem:[%s11523_s12 + $0x38] sm:$0xff]  }
0x25ff   :  { %v4364_v6 = vpop.f32.mrb[83].mxu1 }
0x2600   :  { %v8506_v50 = vpack.i.bf16 %v7419_v45, %v4364_v6  ;;  %v8674_v45 = vld [vmem:[#allocation13 + $0xc0] sm:$0xff]   ;;  %v8675_v6 = vld [vmem:[#allocation13 + $0xc8] sm:$0xff]  }
0x2601   :  { %7437 = vmatpush3.bf16.msra.mxu0 %v8674_v45 }
0x2602   :  { %8507 = vrot.lane.b32.xlu1 %v8506_v50, %s9382_s1  ;;  %7438 = vmatprep.subr.bf16.mxu0 %v9369_v0  ;;  %v8676_v50 = vld [vmem:[#allocation13 + $0xd0] sm:$0xff]  }
0x2605   :  { %7439 = vmatpush3.bf16.msra.mxu0 %v8675_v6 }
0x2606   :  { %7440 = vmatprep.subr.bf16.mxu0 %v9369_v0 }
0x2609   :  { %7441 = vmatpush3.bf16.msra.mxu0 %v8676_v50 }
0x260a   :  { %7442 = vmatprep.subr.bf16.mxu0 %v9369_v0 }
0x262d   :  { %v8478_v56 = vpop.permute.xlu0 %8477 }
0x262e   :  { %v8480_v37 = vunpack.i.h.bf16 %v8478_v56  ;;  %v8479_v30 = vunpack.i.l.bf16 %v8478_v56  ;;  %v8677_v56 = vld [vmem:[#allocation13 + $0xd8] sm:$0xff]  }
0x262f   :  { %7443 = vmatpush3.bf16.msra.mxu0 %v8677_v56  ;;  %v6348_v56 = vld [vmem:[%s11521_s10 + $0x3] ss:$0 sm:$0xff] }
0x2630   :  { %v4430_v13 = vsel %vm372_vm2, %v7398_v42, %v8480_v37  ;;  %v4429_v14 = vsel %vm372_vm2, %v4294_v1, %v8479_v30  ;;  %v6321_v1 = vld [vmem:[#allocation10 + $0x3] ss:$0 sm:$0xff]  ;;  %7444 = vmatprep.subr.bf16.mxu0 %v9369_v0 }
0x2631   :  { %v8483_v2 = vpop.permute.xlu1 %8482 }
0x2632   :  { %v8485_v28 = vunpack.i.h.bf16 %v8483_v2  ;;  %v8484_v8 = vunpack.i.l.bf16 %v8483_v2  ;;  %v8679_v2 = vld [vmem:[#allocation13 + $0xe8] sm:$0xff]  }
0x2634   :  { %v4432_v59 = vsel %vm993_vm4, %v4430_v13, %v8485_v28  ;;  %v4431_v31 = vsel %vm993_vm4, %v4429_v14, %v8484_v8  ;;  %v6328_v14 = vld [vmem:[%s11520_s9 + $0x3] ss:$0 sm:$0xff] }
0x2664   :  { %v8488_v25 = vpop.permute.xlu0 %8487 }
0x2665   :  { %v8490_v35 = vunpack.i.h.bf16 %v8488_v25  ;;  %v8489_v36 = vunpack.i.l.bf16 %v8488_v25  ;;  %v8678_v25 = vld [vmem:[#allocation13 + $0xe0] sm:$0xff]  }
0x2666   :  { %7445 = vmatpush3.bf16.msra.mxu0 %v8678_v25 }
0x2667   :  { %v4434_v44 = vsel %vm996_vm5, %v4432_v59, %v8490_v35  ;;  %v4433_v5 = vsel %vm996_vm5, %v4431_v31, %v8489_v36  ;;  %7446 = vmatprep.subr.bf16.mxu0 %v9369_v0 }
0x2668   :  { %v8493_v27 = vpop.permute.xlu0 %8492 }
0x2669   :  { %v8495_v46 = vunpack.i.h.bf16 %v8493_v27  ;;  %v8494_v52 = vunpack.i.l.bf16 %v8493_v27 }
0x266a   :  { %7447 = vmatpush3.bf16.msra.mxu0 %v8679_v2 }
0x266b   :  { %v4436_v19 = vsel %vm999_vm6, %v4434_v44, %v8495_v46  ;;  %v4435_v15 = vsel %vm999_vm6, %v4433_v5, %v8494_v52  ;;  %7448 = vmatprep.subr.bf16.mxu0 %v9369_v0  ;;  %v6327_v46 = vld [vmem:[%s11519_s8 + $0x3] ss:$0 sm:$0xff]  ;;  %v6333_v44 = vld [vmem:[#allocation11 + $0x3] ss:$0 sm:$0xff] }
0x266c   :  { %v8498_v18 = vpop.permute.xlu1 %8497 }
0x266d   :  { %v8500_v12 = vunpack.i.h.bf16 %v8498_v18  ;;  %v8499_v62 = vunpack.i.l.bf16 %v8498_v18 }
0x266f   :  { %v4438_v23 = vsel %vm1002_vm7, %v4436_v19, %v8500_v12  ;;  %v4437_v26 = vsel %vm1002_vm7, %v4435_v15, %v8499_v62 }
0x2670   :  { %v8503_v9 = vpop.permute.xlu0 %8502 }
0x2671   :  { %v8505_v20 = vunpack.i.h.bf16 %v8503_v9  ;;  %v8504_v54 = vunpack.i.l.bf16 %v8503_v9 }
0x2673   :  { %v4440_v58 = vsel %vm1005_vm8, %v4438_v23, %v8505_v20  ;;  %v4439_v51 = vsel %vm1005_vm8, %v4437_v26, %v8504_v54  ;;  %v8680_v20 = vld [vmem:[#allocation13 + $0xf0] sm:$0xff]   ;;  %v8681_v54 = vld [vmem:[#allocation13 + $0xf8] sm:$0xff]  }
0x2674   :  { %v8508_v4 = vpop.permute.xlu1 %8507  ;;  %7449 = vmatpush3.bf16.msra.mxu0 %v8680_v20 }
0x2675   :  { %v8510_v43 = vunpack.i.h.bf16 %v8508_v4  ;;  %v8509_v60 = vunpack.i.l.bf16 %v8508_v4  ;;  %7450 = vmatprep.subr.bf16.mxu0 %v9369_v0 }
0x2677   :  { %v4442_v7 = vsel %vm1008_vm9, %v4440_v58, %v8510_v43  ;;  %v4441_v63 = vsel %vm1008_vm9, %v4439_v51, %v8509_v60  ;;  %v6337_v51 = vld [vmem:[#allocation14 + $0x3] ss:$0 sm:$0xff] }
0x2678   :  { %v4443_v42 = vpack.c.bf16 %v4442_v7, %v4441_v63  ;;  %7451 = vmatpush3.bf16.msra.mxu0 %v8681_v54 }
0x267a   :  { %7425 = vmatmul.mubr.msk.bf16.vlgmr.msra.gmra.mrb[84].mxu1 %vm219_vm1, %v4443_v42 }
0x267b   :  { %7432 = vmatprep.mubr.msk.bf16.mxu1 %vm9370_vm0, %v9369_v0 }
0x274d   :  { %v4506_v34 = vpop.f32.mrb[84].mxu1 }
0x274e   :  { %v4507_v57 = vadd.f32 %v6321_v1, %v4506_v34  ;;  %v7426_v47 = vpop.f32.mrb[85].mxu1 }
0x274f   :  { %v4509_v53 = vpop.f32.mrb[86].mxu1 }
0x2750   :  { %v4513_v24 = vadd.f32 %v4507_v57, %v10748_v38  ;;  %v4510_v22 = vadd.f32 %v6321_v1, %v4509_v53  ;;  %v7427_v11 = vpop.f32.mrb[87].mxu1 }
0x2752   :  { %v4514_v61 = vadd.f32 %v4510_v22, %v10750_v39  ;;  %v4519_v3 = vsel %vm219_vm1, %v4513_v24, 0.0  ;;  %v8672_v39 = vld [vmem:[%s11523_s12 + $0x30] sm:$0xff]  }
0x2753   :  { %4520 = vadd.xlane.f32.xlu0 %v4519_v3  ;;  %7429 = vmatpush3.bf16.msra.mxu1 %v8672_v39 }
0x2754   :  { %v4522_v33 = vsel %vm219_vm1, %v4514_v61, 0.0  ;;  %7430 = vmatprep.subr.bf16.mxu1 %v9369_v0 }
0x2755   :  { %4523 = vadd.xlane.f32.xlu1 %v4522_v33 }
0x2757   :  { %7431 = vmatpush3.bf16.msra.mxu1 %v8673_v21 }
0x2758   :  { %7456 = vmatprep.subr.bf16.mxu1 %v9369_v0 }
0x27e0   :  { %v4521_v41 = vpop.xlane.xlu0 %4520 }
0x27e1   :  { %v4525_v40 = vmul.f32 0.03125, %v4521_v41 }
0x27e2   :  { %v4524_v55 = vpop.xlane.xlu1 %4523 }
0x27e3   :  { %v4527_v32 = vsub.f32 %v4513_v24, %v4525_v40  ;;  %v4526_v10 = vmul.f32 0.03125, %v4524_v55 }
0x27e5   :  { %v4528_v29 = vsub.f32 %v4514_v61, %v4526_v10  ;;  %v4529_v17 = vmul.f32 %v4527_v32, %v4527_v32 }
0x27e7   :  { %v4531_v48 = vsel %vm219_vm1, %v4529_v17, 0.0  ;;  %v4530_v38 = vmul.f32 %v4528_v29, %v4528_v29  ;;  %v8682_v17 = vld [vmem:[#allocation5 + $0x40] sm:$0xff]  }
0x27e8   :  { %4532 = vadd.xlane.f32.xlu0 %v4531_v48  ;;  %v8683_v48 = vld [vmem:[#allocation5 + $0x48] sm:$0xff]  }
0x27e9   :  { %v4534_v16 = vsel %vm219_vm1, %v4530_v38, 0.0 }
0x27ec   :  { %4535 = vadd.xlane.f32.xlu0 %v4534_v16 }
0x2875   :  { %v4533_v27 = vpop.xlane.xlu0 %4532 }
0x2876   :  { %v4537_v37 = vmul.f32 0.03125, %v4533_v27 }
0x2878   :  { %v4539_v30 = vadd.f32 1e-05, %v4537_v37 }
0x2879   :  { %v4536_v28 = vpop.xlane.xlu0 %4535 }
0x287a   :  { %8978 = vrsqrt.f32 %v4539_v30  ;;  %v4538_v8 = vmul.f32 0.03125, %v4536_v28  ;;  %v6349_v30 = vld [vmem:[%s11522_s11 + $0x3] ss:$0 sm:$0xff] }
0x287c   :  { %v4540_v18 = vadd.f32 1e-05, %v4538_v8 }
0x287e   :  { %8980 = vrsqrt.f32 %v4540_v18 }
0x2884   :  { %v8979_v35 = vpop.eup %8978 }
0x2885   :  { %v4543_v36 = vmul.f32 %v8979_v35, %v4527_v32 }
0x2887   :  { %v4551_v9 = vmul.f32 %v6327_v46, %v4543_v36  ;;  %v6350_v36 = vld [vmem:[#allocation7 + $0x4] ss:$0 sm:$0xff] }
0x2888   :  { %v8981_v52 = vpop.eup %8980 }
0x2889   :  { %v4544_v13 = vmul.f32 %v8981_v52, %v4528_v29  ;;  %v4559_v62 = vadd.f32 %v6328_v14, %v4551_v9 }
0x288b   :  { %v4552_v12 = vmul.f32 %v6327_v46, %v4544_v13 }
0x288d   :  { %v4560_v59 = vadd.f32 %v6328_v14, %v4552_v12 }
0x288f   :  { %v4561_v31 = vpack.c.bf16 %v4560_v59, %v4559_v62 }
0x2891   :  { %7433 = vmatmul.mubr.msk.bf16.vlgmr.msra.gmra.mrb[88].mxu1 %vm219_vm1, %v4561_v31 }
0x2892   :  { %7460 = vmatprep.mubr.msk.bf16.mxu1 %vm9370_vm0, %v9369_v0  ;;  %7457 = vmatpush3.bf16.msra.mxu1 %v8682_v17 }
0x2893   :  { %7458 = vmatprep.subr.bf16.mxu1 %v9369_v0 }
0x2896   :  { %7459 = vmatpush3.bf16.msra.mxu1 %v8683_v48 }
0x2964   :  { %v4624_v5 = vpop.f32.mrb[88].mxu1 }
0x2965   :  { %v4625_v19 = vadd.f32 %v6333_v44, %v4624_v5  ;;  %v7434_v15 = vpop.f32.mrb[89].mxu1 }
0x2966   :  { %v4627_v4 = vpop.f32.mrb[90].mxu1 }
0x2967   :  { %v4628_v23 = vadd.f32 %v6333_v44, %v4627_v4  ;;  %v7435_v26 = vpop.f32.mrb[91].mxu1  ;;  %v4631_v43 = vmax.f32 %v4625_v19, 0.0 }
0x2969   :  { %v4632_v60 = vmax.f32 %v4628_v23, 0.0 }
0x296b   :  { %v4633_v58 = vpack.c.bf16 %v4632_v60, %v4631_v43 }
0x296d   :  { %7453 = vmatmul.mubr.bf16.vlgmr.msra.gmra.mrb[96].mxu0 %v4633_v58 }
0x2a40   :  { %v4741_v7 = vpop.f32.mrb[96].mxu0 }
0x2a41   :  { %v4742_v63 = vadd.f32 %v6337_v51, %v4741_v7  ;;  %v7454_v42 = vpop.f32.mrb[97].mxu0 }
0x2a42   :  { %v4744_v1 = vpop.f32.mrb[98].mxu0 }
0x2a43   :  { %v4748_v34 = vadd.f32 %v4742_v63, %v4559_v62  ;;  %v4745_v57 = vadd.f32 %v6337_v51, %v4744_v1  ;;  %v7455_v47 = vpop.f32.mrb[99].mxu0 }
0x2a45   :  { %v4749_v53 = vadd.f32 %v4745_v57, %v4560_v59  ;;  %v4754_v24 = vsel %vm219_vm1, %v4748_v34, 0.0 }
0x2a46   :  { %4755 = vadd.xlane.f32.xlu1 %v4754_v24 }
0x2a47   :  { %v4757_v22 = vsel %vm219_vm1, %v4749_v53, 0.0 }
0x2a48   :  { %4758 = vadd.xlane.f32.xlu0 %v4757_v22 }
0x2ad3   :  { %v4756_v11 = vpop.xlane.xlu1 %4755 }
0x2ad4   :  { %v4760_v61 = vmul.f32 0.03125, %v4756_v11 }
0x2ad5   :  { %v4759_v3 = vpop.xlane.xlu0 %4758 }
0x2ad6   :  { %v4762_v33 = vsub.f32 %v4748_v34, %v4760_v61  ;;  %v4761_v41 = vmul.f32 0.03125, %v4759_v3 }
0x2ad8   :  { %v4763_v40 = vsub.f32 %v4749_v53, %v4761_v41  ;;  %v4764_v55 = vmul.f32 %v4762_v33, %v4762_v33 }
0x2ada   :  { %v4766_v32 = vsel %vm219_vm1, %v4764_v55, 0.0  ;;  %v4765_v10 = vmul.f32 %v4763_v40, %v4763_v40 }
0x2adb   :  { %4767 = vadd.xlane.f32.xlu1 %v4766_v32 }
0x2adc   :  { %v4769_v29 = vsel %vm219_vm1, %v4765_v10, 0.0 }
0x2add   :  { %4770 = vadd.xlane.f32.xlu0 %v4769_v29 }
0x2b68   :  { %v4768_v38 = vpop.xlane.xlu1 %4767 }
0x2b69   :  { %v4772_v16 = vmul.f32 0.03125, %v4768_v38 }
0x2b6a   :  { %v4771_v39 = vpop.xlane.xlu0 %4770 }
0x2b6b   :  { %v4774_v21 = vadd.f32 1e-05, %v4772_v16  ;;  %v4773_v45 = vmul.f32 0.03125, %v4771_v39 }
0x2b6d   :  { %8982 = vrsqrt.f32 %v4774_v21  ;;  %v4775_v6 = vadd.f32 1e-05, %v4773_v45 }
0x2b6f   :  { %8984 = vrsqrt.f32 %v4775_v6 }
0x2b77   :  { %v8983_v50 = vpop.eup %8982 }
0x2b78   :  { %v4778_v25 = vmul.f32 %v8983_v50, %v4762_v33 }
0x2b79   :  { %v8985_v2 = vpop.eup %8984 }
0x2b7a   :  { %v4786_v27 = vmul.f32 %v6348_v56, %v4778_v25  ;;  %v4779_v37 = vmul.f32 %v8985_v2, %v4763_v40 }
0x2b7c   :  { %v4787_v28 = vmul.f32 %v6348_v56, %v4779_v37  ;;  %v11117_v8 = vadd.f32 %v6349_v30, %v4786_v27 }
0x2b7e   :  { %v11119_v18 = vadd.f32 %v6349_v30, %v4787_v28 }
0x2b80   :  { %v4796_v35 = vpack.c.bf16 %v11119_v18, %v11117_v8 }
0x2b82   :  { %7461 = vmatmul.mubr.msk.bf16.vlgmr.msra.gmra.mrb[92].mxu1 %vm219_vm1, %v4796_v35 }
0x2c55   :  { %v4859_v46 = vpop.f32.mrb[92].mxu1 }
0x2c56   :  { %v4860_v52 = vadd.f32 %v6350_v36, %v4859_v46  ;;  %v7462_v9 = vpop.f32.mrb[93].mxu1 }
0x2c57   :  { %v4862_v13 = vpop.f32.mrb[94].mxu1 }
0x2c58   :  { %v11124_v14 = vadd.f32 %v6350_v36, %v4862_v13  ;;  %4868 = vrot.lane.b32.xlu1 %v4860_v52, %s9372_s13  ;;  %v7463_v12 = vpop.f32.mrb[95].mxu1  ;;  %v4910_v62 = vmul.f32 0.5, %v4860_v52 }
0x2c5a   :  { %7496 = vmatprep.mubr.msk.f32.mxu1 %vm372_vm2, %v4910_v62  ;;  %4870 = vrot.lane.b32.xlu0 %v11124_v14, %s9372_s13  ;;  %v8511_v59 = vpack.i.bf16 %v11124_v14, %v4860_v52 }
0x2c5c   :  { %4874 = vrot.lane.b32.xlu1 %v4860_v52, %s9371_s26 }
0x2c5e   :  { %4880 = vrot.lane.b32.xlu0 %v4860_v52, %s9373_s2 }
0x2c60   :  { %4876 = vrot.lane.b32.xlu1 %v11124_v14, %s9371_s26 }
0x2c62   :  { %4886 = vrot.lane.b32.xlu0 %v4860_v52, %s9374_s14 }
0x2c64   :  { %4882 = vrot.lane.b32.xlu1 %v11124_v14, %s9373_s2 }
0x2c66   :  { %4892 = vrot.lane.b32.xlu0 %v4860_v52, %s9375_s3 }
0x2c68   :  { %4888 = vrot.lane.b32.xlu1 %v11124_v14, %s9374_s14 }
0x2c6a   :  { %4898 = vrot.lane.b32.xlu0 %v4860_v52, %s9376_s16 }
0x2c6c   :  { %4894 = vrot.lane.b32.xlu1 %v11124_v14, %s9375_s3 }
0x2c6e   :  { %4904 = vrot.lane.b32.xlu0 %v4860_v52, %s9377_s15 }
0x2c70   :  { %4900 = vrot.lane.b32.xlu1 %v11124_v14, %s9376_s16 }
0x2c72   :  { %8512 = vrot.lane.b32.xlu0 %v8511_v59, %s9378_s25 }
0x2c74   :  { %4906 = vrot.lane.b32.xlu1 %v11124_v14, %s9377_s15 }
0x2cca   :  { %v11150_v31 = vpop.permute.xlu1 %4868 }
0x2ccc   :  { %v11152_v20 = vpop.permute.xlu0 %4870 }
0x2ccd   :  { %v8516_v54 = vpack.i.bf16 %v11152_v20, %v11150_v31 }
0x2cce   :  { %v11156_v44 = vpop.permute.xlu1 %4874 }
0x2ccf   :  { %8517 = vrot.lane.b32.xlu1 %v8516_v54, %s9378_s25 }
0x2cd0   :  { %v11159_v5 = vpop.permute.xlu0 %4880 }
0x2cd2   :  { %v11161_v19 = vpop.permute.xlu1 %4876 }
0x2cd3   :  { %v8521_v15 = vpack.i.bf16 %v11161_v19, %v11156_v44  ;;  %v4915_v49 = vmul.f32 0.5, %v11161_v19 }
0x2cd4   :  { %v11165_v4 = vpop.permute.xlu0 %4886 }
0x2cd5   :  { %8522 = vrot.lane.b32.xlu0 %v8521_v15, %s9378_s25 }
0x2cd6   :  { %v11168_v23 = vpop.permute.xlu1 %4882 }
0x2cd7   :  { %v8526_v26 = vpack.i.bf16 %v11168_v23, %v11159_v5 }
0x2cd8   :  { %v11172_v43 = vpop.permute.xlu0 %4892 }
0x2cd9   :  { %8527 = vrot.lane.b32.xlu1 %v8526_v26, %s9378_s25 }
0x2cda   :  { %v11175_v60 = vpop.permute.xlu1 %4888 }
0x2cdb   :  { %v11179_v58 = vpack.i.bf16 %v11175_v60, %v11165_v4 }
0x2cdc   :  { %v11181_v51 = vpop.permute.xlu0 %4898 }
0x2cdd   :  { %8532 = vrot.lane.b32.xlu0 %v11179_v58, %s9378_s25  ;;  %v4922_v19 = vmul.f32 0.5, %v11181_v51 }
0x2cde   :  { %v11185_v7 = vpop.permute.xlu1 %4894 }
0x2cdf   :  { %v11189_v63 = vpack.i.bf16 %v11185_v7, %v11172_v43 }
0x2ce0   :  { %v11191_v42 = vpop.permute.xlu0 %4904 }
0x2ce1   :  { %8537 = vrot.lane.b32.xlu1 %v11189_v63, %s9378_s25 }
0x2ce2   :  { %v11195_v1 = vpop.permute.xlu1 %4900 }
0x2ce3   :  { %v11199_v34 = vpack.i.bf16 %v11195_v1, %v11181_v51  ;;  %v9106_v51 = vld [vmem:[#allocation2 + $0x8] sm:$0xff] }
0x2ce4   :  { %v8513_v57 = vpop.permute.xlu0 %8512 }
0x2ce5   :  { %v8515_v47 = vunpack.i.h.bf16 %v8513_v57  ;;  %v8514_v53 = vunpack.i.l.bf16 %v8513_v57  ;;  %8542 = vrot.lane.b32.xlu0 %v11199_v34, %s9378_s25 }
0x2ce6   :  { %v11203_v24 = vpop.permute.xlu1 %4906 }
0x2ce7   :  { %v7940_v22 = vpack.c.bf16 %v8515_v47, %v8514_v53  ;;  %v11207_v11 = vpack.i.bf16 %v11203_v24, %v11191_v42 }
0x2ce9   :  { %8557 = vrot.lane.b32.xlu0 %v8516_v54, %s11538_s28  ;;  %8547 = vrot.lane.b32.xlu1 %v11207_v11, %s9378_s25 }
0x2cea   :  { %7942 = vmatprep.subr.msk.bf16.mxu1 %vm9737_vm3, %v7940_v22 }
0x2ceb   :  { %7945 = vmatpush3.bf16.xpose.msk.msra.mxu1 %vm9737_vm3, %v7940_v22 }
0x2ced   :  { %8567 = vrot.lane.b32.xlu0 %v8526_v26, %s11538_s28  ;;  %8552 = vrot.lane.b32.xlu1 %v8511_v59, %s11538_s28 }
0x2cf1   :  { %8562 = vrot.lane.b32.xlu1 %v8521_v15, %s11538_s28 }
0x2d41   :  { %v8518_v61 = vpop.permute.xlu1 %8517 }
0x2d42   :  { %v8520_v3 = vunpack.i.h.bf16 %v8518_v61  ;;  %v8519_v33 = vunpack.i.l.bf16 %v8518_v61 }
0x2d44   :  { %v7946_v41 = vpack.c.bf16 %v8520_v3, %v8519_v33 }
0x2d46   :  { %7948 = vmatprep.subr.msk.bf16.mxu1 %vm9737_vm3, %v7946_v41 }
0x2d47   :  { %v8523_v40 = vpop.permute.xlu0 %8522  ;;  %7951 = vmatpush3.bf16.xpose.msk.msra.mxu1 %vm9737_vm3, %v7946_v41  ;;  %v4911_v41 = vmul.f32 0.5, %v11124_v14  ;;  %v4917_v14 = vmul.f32 0.5, %v11168_v23  ;;  %v4924_v23 = vmul.f32 0.5, %v11191_v42 }
0x2d48   :  { %v8525_v55 = vunpack.i.h.bf16 %v8523_v40  ;;  %v8524_v32 = vunpack.i.l.bf16 %v8523_v40  ;;  %v4912_v40 = vmul.f32 0.5, %v11150_v31  ;;  %v4918_v31 = vmul.f32 0.5, %v11165_v4 }
0x2d49   :  { %v4923_v4 = vmul.f32 0.5, %v11195_v1 }
0x2d4a   :  { %v7952_v10 = vpack.c.bf16 %v8525_v55, %v8524_v32  ;;  %v4913_v55 = vmul.f32 0.5, %v11152_v20  ;;  %v4914_v32 = vmul.f32 0.5, %v11156_v44  ;;  %v4919_v20 = vmul.f32 0.5, %v11175_v60 }
0x2d4b   :  { %v8528_v29 = vpop.permute.xlu1 %8527  ;;  %v4920_v44 = vmul.f32 0.5, %v11172_v43  ;;  %v4925_v43 = vmul.f32 0.5, %v11203_v24 }
0x2d4c   :  { %v8530_v17 = vunpack.i.h.bf16 %v8528_v29  ;;  %v8529_v48 = vunpack.i.l.bf16 %v8528_v29  ;;  %7954 = vmatprep.subr.msk.bf16.mxu1 %vm9737_vm3, %v7952_v10 }
0x2d4e   :  { %v7958_v38 = vpack.c.bf16 %v8530_v17, %v8529_v48  ;;  %v9107_v17 = vld [vmem:[#allocation2] sm:$0xff]  ;;  %v9108_v48 = vld [vmem:[#allocation2 + $0x18] sm:$0xff] }
0x2d4f   :  { %v8533_v16 = vpop.permute.xlu0 %8532  ;;  %7957 = vmatpush3.bf16.xpose.msk.msra.mxu1 %vm9737_vm3, %v7952_v10  ;;  %v4916_v10 = vmul.f32 0.5, %v11159_v5  ;;  %v4921_v5 = vmul.f32 0.5, %v11185_v7 }
0x2d50   :  { %7960 = vmatprep.subr.msk.bf16.mxu1 %vm9737_vm3, %v7958_v38  ;;  %v8535_v39 = vunpack.i.h.bf16 %v8533_v16  ;;  %v8534_v21 = vunpack.i.l.bf16 %v8533_v16 }
0x2d52   :  { %v7964_v45 = vpack.c.bf16 %v8535_v39, %v8534_v21  ;;  %v9109_v21 = vld [vmem:[#allocation2 + $0x10] sm:$0xff] }
0x2d53   :  { %v8538_v6 = vpop.permute.xlu1 %8537 }
0x2d54   :  { %v8540_v56 = vunpack.i.h.bf16 %v8538_v6  ;;  %v8539_v25 = vunpack.i.l.bf16 %v8538_v6  ;;  %v9110_v6 = vld [vmem:[#allocation2 + $0x20] sm:$0xff] }
0x2d56   :  { %v7970_v37 = vpack.c.bf16 %v8540_v56, %v8539_v25 }
0x2d57   :  { %v8543_v50 = vpop.permute.xlu0 %8542  ;;  %7963 = vmatpush3.bf16.xpose.msk.msra.mxu1 %vm9737_vm3, %v7958_v38 }
0x2d58   :  { %7966 = vmatprep.subr.msk.bf16.mxu1 %vm9737_vm3, %v7964_v45  ;;  %v8545_v52 = vunpack.i.h.bf16 %v8543_v50  ;;  %v8544_v9 = vunpack.i.l.bf16 %v8543_v50 }
0x2d5a   :  { %v7976_v26 = vpack.c.bf16 %v8545_v52, %v8544_v9  ;;  %v9114_v52 = vld [vmem:[#allocation2 + $0x40] sm:$0xff] }
0x2d5b   :  { %v8548_v2 = vpop.permute.xlu1 %8547  ;;  %v8558_v27 = vpop.permute.xlu0 %8557 }
0x2d5c   :  { %v8560_v28 = vunpack.i.h.bf16 %v8558_v27  ;;  %v8559_v35 = vunpack.i.l.bf16 %v8558_v27  ;;  %v8550_v22 = vunpack.i.h.bf16 %v8548_v2  ;;  %v8549_v61 = vunpack.i.l.bf16 %v8548_v2  ;;  %v9111_v2 = vld [vmem:[#allocation2 + $0x28] sm:$0xff] }
0x2d5e   :  { %v7992_v62 = vpack.c.bf16 %v8560_v28, %v8559_v35  ;;  %v7982_v33 = vpack.c.bf16 %v8550_v22, %v8549_v61  ;;  %v9118_v22 = vld [vmem:[#allocation2 + $0x60] sm:$0xff] }
0x2d5f   :  { %v8553_v30 = vpop.permute.xlu1 %8552  ;;  %7969 = vmatpush3.bf16.xpose.msk.msra.mxu1 %vm9737_vm3, %v7964_v45  ;;  %v8568_v15 = vpop.permute.xlu0 %8567 }
0x2d60   :  { %v8555_v36 = vunpack.i.h.bf16 %v8553_v30  ;;  %v8554_v46 = vunpack.i.l.bf16 %v8553_v30  ;;  %7972 = vmatprep.subr.msk.bf16.mxu1 %vm9737_vm3, %v7970_v37  ;;  %v8570_v57 = vunpack.i.h.bf16 %v8568_v15  ;;  %v8569_v47 = vunpack.i.l.bf16 %v8568_v15 }
0x2d62   :  { %v7988_v13 = vpack.c.bf16 %v8555_v36, %v8554_v46  ;;  %v8000_v3 = vpack.c.bf16 %v8570_v57, %v8569_v47  ;;  %v9113_v36 = vld [vmem:[#allocation2 + $0x38] sm:$0xff] }
0x2d63   :  { %v8563_v12 = vpop.permute.xlu1 %8562  ;;  %v9117_v47 = vld [vmem:[#allocation2 + $0x58] sm:$0xff] }
0x2d64   :  { %v8565_v59 = vunpack.i.h.bf16 %v8563_v12  ;;  %v8564_v54 = vunpack.i.l.bf16 %v8563_v12  ;;  %7989 = vmatprep.subr.bf16.mxu0 %v7988_v13 }
0x2d65   :  { %7991 = vmatpush3.bf16.msra.mxu0 %v7988_v13 }
0x2d66   :  { %7993 = vmatprep.subr.bf16.mxu0 %v7992_v62  ;;  %v7996_v53 = vpack.c.bf16 %v8565_v59, %v8564_v54  ;;  %v9116_v54 = vld [vmem:[#allocation2 + $0x50] sm:$0xff] }
0x2d67   :  { %7975 = vmatpush3.bf16.xpose.msk.msra.mxu1 %vm9737_vm3, %v7970_v37  ;;  %v9112_v37 = vld [vmem:[#allocation2 + $0x30] sm:$0xff] }
0x2d68   :  { %7978 = vmatprep.subr.msk.bf16.mxu1 %vm9737_vm3, %v7976_v26 }
0x2d69   :  { %7995 = vmatpush3.bf16.msra.mxu0 %v7992_v62  ;;  %v9115_v62 = vld [vmem:[#allocation2 + $0x48] sm:$0xff] }
0x2d6a   :  { %7997 = vmatprep.subr.bf16.mxu0 %v7996_v53 }
0x2d6d   :  { %7999 = vmatpush3.bf16.msra.mxu0 %v7996_v53 }
0x2d6e   :  { %8001 = vmatprep.subr.bf16.mxu0 %v8000_v3 }
0x2d6f   :  { %7981 = vmatpush3.bf16.xpose.msk.msra.mxu1 %vm9737_vm3, %v7976_v26 }
0x2d70   :  { %7984 = vmatprep.subr.msk.bf16.mxu1 %vm9737_vm3, %v7982_v33 }
0x2d71   :  { %8003 = vmatpush3.bf16.msra.mxu0 %v8000_v3 }
0x2d77   :  { %7987 = vmatpush3.bf16.xpose.msk.msra.mxu1 %vm9737_vm3, %v7982_v33 }
0x2d78   :  { %7592 = vmatprep.subr.bf16.mxu1 %v9369_v0 }
0x2d7e   :  { %7497 = vmatmul.mubr.msk.f32.vlgmr.msra.gmra.mrb[96].mxu1 %vm372_vm2, %v4911_v41  ;;  %v9119_v41 = vld [vmem:[#allocation2 + $0x68] sm:$0xff] }
0x2d7f   :  { %7499 = vmatprep.mubr.msk.f32.mxu1 %vm372_vm2, %v4912_v40 }
0x2d82   :  { %7500 = vmatmul.mubr.msk.f32.gmra.mrb[98].mxu1 %vm372_vm2, %v4913_v55  ;;  %v9120_v55 = vld [vmem:[#allocation2 + $0x70] sm:$0xff] }
0x2d83   :  { %7502 = vmatprep.mubr.msk.f32.mxu1 %vm372_vm2, %v4914_v32 }
0x2d86   :  { %7503 = vmatmul.mubr.msk.f32.gmra.mrb[100].mxu1 %vm372_vm2, %v4915_v49  ;;  %v9121_v49 = vld [vmem:[#allocation2 + $0x78] sm:$0xff] }
0x2d87   :  { %7505 = vmatprep.mubr.msk.f32.mxu1 %vm372_vm2, %v4916_v10 }
0x2d8a   :  { %7506 = vmatmul.mubr.msk.f32.gmra.mrb[102].mxu1 %vm372_vm2, %v4917_v14 }
0x2d8b   :  { %7508 = vmatprep.mubr.msk.f32.mxu1 %vm372_vm2, %v4918_v31 }
0x2d8e   :  { %7509 = vmatmul.mubr.msk.f32.gmra.mrb[104].mxu1 %vm372_vm2, %v4919_v20 }
0x2d8f   :  { %7511 = vmatprep.mubr.msk.f32.mxu1 %vm372_vm2, %v4920_v44 }
0x2d92   :  { %7512 = vmatmul.mubr.msk.f32.gmra.mrb[106].mxu1 %vm372_vm2, %v4921_v5 }
0x2d93   :  { %7514 = vmatprep.mubr.msk.f32.mxu1 %vm372_vm2, %v4922_v19 }
0x2d96   :  { %7515 = vmatmul.mubr.msk.f32.gmra.mrb[108].mxu1 %vm372_vm2, %v4923_v4 }
0x2d97   :  { %7517 = vmatprep.mubr.msk.f32.mxu1 %vm372_vm2, %v4924_v23 }
0x2d9a   :  { %7518 = vmatmul.mubr.msk.f32.gmra.mrb[110].mxu1 %vm372_vm2, %v4925_v43 }
0x2d9b   :  { %7608 = vmatprep.mubr.msk.bf16.mxu1 %vm9370_vm0, %v9369_v0 }
0x2e51   :  { %v7498_v60 = vpop.f32.mrb[96].mxu1 }
0x2e52   :  { %v11280_v7 = vadd.f32 %v9106_v51, %v7498_v60  ;;  %v5104_v29 = vpop.f32.mrb[97].mxu1 }
0x2e53   :  { %v11282_v1 = vadd.f32 %v9107_v17, %v5104_v29 }
0x2e54   :  { %5185 = vmax.xlane.f32.xlu1 %v11280_v7 }
0x2e55   :  { %v7501_v42 = vpop.f32.mrb[98].mxu1  ;;  %5183 = vmax.xlane.f32.xlu0 %v11282_v1 }
0x2e56   :  { %v11286_v24 = vadd.f32 %v9108_v48, %v7501_v42  ;;  %v5114_v38 = vpop.f32.mrb[99].mxu1 }
0x2e57   :  { %v11289_v45 = vadd.f32 %v9109_v21, %v5114_v38 }
0x2e59   :  { %v7504_v16 = vpop.f32.mrb[100].mxu1  ;;  %5189 = vmax.xlane.f32.xlu0 %v11286_v24 }
0x2e5a   :  { %v5124_v39 = vpop.f32.mrb[101].mxu1  ;;  %v11295_v27 = vadd.f32 %v9111_v2, %v7504_v16 }
0x2e5b   :  { %v11291_v50 = vadd.f32 %v9110_v6, %v5124_v39 }
0x2e5d   :  { %v7507_v56 = vpop.f32.mrb[102].mxu1  ;;  %5191 = vmax.xlane.f32.xlu1 %v11291_v50  ;;  %5187 = vmax.xlane.f32.xlu0 %v11289_v45 }
0x2e5e   :  { %v5134_v25 = vpop.f32.mrb[103].mxu1  ;;  %v11301_v46 = vadd.f32 %v9113_v36, %v7507_v56 }
0x2e5f   :  { %v11297_v30 = vadd.f32 %v9112_v37, %v5134_v25 }
0x2e61   :  { %v7510_v28 = vpop.f32.mrb[104].mxu1  ;;  %5195 = vmax.xlane.f32.xlu1 %v11297_v30  ;;  %5193 = vmax.xlane.f32.xlu0 %v11295_v27 }
0x2e62   :  { %v5144_v35 = vpop.f32.mrb[105].mxu1  ;;  %v11307_v59 = vadd.f32 %v9115_v62, %v7510_v28 }
0x2e63   :  { %v11303_v9 = vadd.f32 %v9114_v52, %v5144_v35 }
0x2e65   :  { %v7513_v13 = vpop.f32.mrb[106].mxu1  ;;  %5199 = vmax.xlane.f32.xlu1 %v11303_v9  ;;  %5197 = vmax.xlane.f32.xlu0 %v11301_v46 }
0x2e66   :  { %v5154_v12 = vpop.f32.mrb[107].mxu1  ;;  %v11313_v53 = vadd.f32 %v9117_v47, %v7513_v13 }
0x2e67   :  { %v11309_v15 = vadd.f32 %v9116_v54, %v5154_v12 }
0x2e69   :  { %v7516_v26 = vpop.f32.mrb[108].mxu1  ;;  %5203 = vmax.xlane.f32.xlu1 %v11309_v15  ;;  %5201 = vmax.xlane.f32.xlu0 %v11307_v59 }
0x2e6a   :  { %v5164_v57 = vpop.f32.mrb[109].mxu1  ;;  %v11319_v40 = vadd.f32 %v9119_v41, %v7516_v26 }
0x2e6b   :  { %v11315_v61 = vadd.f32 %v9118_v22, %v5164_v57 }
0x2e6d   :  { %v7519_v3 = vpop.f32.mrb[110].mxu1  ;;  %5207 = vmax.xlane.f32.xlu1 %v11315_v61  ;;  %5205 = vmax.xlane.f32.xlu0 %v11313_v53 }
0x2e6e   :  { %v5174_v33 = vpop.f32.mrb[111].mxu1  ;;  %v11325_v10 = vadd.f32 %v9121_v49, %v7519_v3 }
0x2e6f   :  { %v11321_v32 = vadd.f32 %v9120_v55, %v5174_v33 }
0x2e71   :  { %5211 = vmax.xlane.f32.xlu1 %v11321_v32  ;;  %5209 = vmax.xlane.f32.xlu0 %v11319_v40 }
0x2e75   :  { %5213 = vmax.xlane.f32.xlu0 %v11325_v10 }
0x2e82   :  { %8572 = vrot.lane.b32.xlu1 %v11179_v58, %s11538_s28 }
0x2e8b   :  { %8577 = vrot.lane.b32.xlu0 %v11189_v63, %s11538_s28 }
0x2ee1   :  { %v5186_v14 = vpop.xlane.xlu1 %5185 }
0x2ee2   :  { %v5216_v31 = vsub.f32 %v11280_v7, %v5186_v14  ;;  %v5184_v20 = vpop.xlane.xlu0 %5183 }
0x2ee3   :  { %v5215_v44 = vsub.f32 %v11282_v1, %v5184_v20 }
0x2ee4   :  { %v5233_v5 = vmul.f32 1.442695, %v5216_v31 }
0x2ee5   :  { %v5231_v19 = vmul.f32 1.442695, %v5215_v44 }
0x2ee6   :  { %8986 = vpow2.f32 %v5233_v5  ;;  %v5190_v4 = vpop.xlane.xlu0 %5189 }
0x2ee7   :  { %8988 = vpow2.f32 %v5231_v19  ;;  %v5218_v23 = vsub.f32 %v11286_v24, %v5190_v4 }
0x2ee9   :  { %v5237_v43 = vmul.f32 1.442695, %v5218_v23 }
0x2eea   :  { %v5192_v60 = vpop.xlane.xlu1 %5191  ;;  %v5188_v51 = vpop.xlane.xlu0 %5187 }
0x2eeb   :  { %8990 = vpow2.f32 %v5237_v43  ;;  %v5219_v58 = vsub.f32 %v11291_v50, %v5192_v60  ;;  %v5217_v63 = vsub.f32 %v11289_v45, %v5188_v51 }
0x2eed   :  { %v5239_v29 = vmul.f32 1.442695, %v5219_v58  ;;  %v5235_v7 = vmul.f32 1.442695, %v5217_v63 }
0x2eee   :  { %v5196_v17 = vpop.xlane.xlu1 %5195  ;;  %v5194_v42 = vpop.xlane.xlu0 %5193 }
0x2eef   :  { %8992 = vpow2.f32 %v5239_v29  ;;  %v5220_v1 = vsub.f32 %v11295_v27, %v5194_v42  ;;  %v5221_v49 = vsub.f32 %v11297_v30, %v5196_v17 }
0x2ef0   :  { %v11338_v48 = vpop.eup %8986  ;;  %8994 = vpow2.f32 %v5235_v7 }
0x2ef1   :  { %v11340_v38 = vpop.eup %8988  ;;  %v5241_v24 = vmul.f32 1.442695, %v5220_v1  ;;  %5265 = vadd.xlane.f32.xlu0 %v11338_v48  ;;  %v5243_v20 = vmul.f32 1.442695, %v5221_v49 }
0x2ef2   :  { %v5200_v16 = vpop.xlane.xlu1 %5199  ;;  %5263 = vadd.xlane.f32.xlu1 %v11340_v38  ;;  %v5198_v39 = vpop.xlane.xlu0 %5197 }
0x2ef3   :  { %8996 = vpow2.f32 %v5241_v24  ;;  %v5223_v47 = vsub.f32 %v11303_v9, %v5200_v16  ;;  %v5222_v33 = vsub.f32 %v11301_v46, %v5198_v39 }
0x2ef5   :  { %v11344_v21 = vpop.eup %8990  ;;  %v5247_v22 = vmul.f32 1.442695, %v5223_v47  ;;  %v5245_v14 = vmul.f32 1.442695, %v5222_v33 }
0x2ef6   :  { %v5204_v45 = vpop.xlane.xlu1 %5203  ;;  %5269 = vadd.xlane.f32.xlu0 %v11344_v21  ;;  %v5202_v6 = vpop.xlane.xlu0 %5201 }
0x2ef7   :  { %8998 = vpow2.f32 %v5247_v22  ;;  %v5225_v46 = vsub.f32 %v11309_v15, %v5204_v45 }
0x2ef9   :  { %v11347_v50 = vpop.eup %8992 }
0x2efa   :  { %v11349_v56 = vpop.eup %8994  ;;  %v5208_v25 = vpop.xlane.xlu1 %5207  ;;  %5271 = vadd.xlane.f32.xlu1 %v11347_v50 }
0x2efb   :  { %v5206_v2 = vpop.xlane.xlu0 %5205  ;;  %5267 = vadd.xlane.f32.xlu0 %v11349_v56  ;;  %v5227_v5 = vsub.f32 %v11315_v61, %v5208_v25 }
0x2efc   :  { %v5226_v3 = vsub.f32 %v11313_v53, %v5206_v2 }
0x2efd   :  { %v11353_v27 = vpop.eup %8996  ;;  %v5255_v15 = vmul.f32 1.442695, %v5227_v5 }
0x2efe   :  { %v5212_v37 = vpop.xlane.xlu1 %5211  ;;  %v5253_v41 = vmul.f32 1.442695, %v5226_v3 }
0x2eff   :  { %v5210_v28 = vpop.xlane.xlu0 %5209  ;;  %5273 = vadd.xlane.f32.xlu0 %v11353_v27 }
0x2f00   :  { %v5228_v55 = vsub.f32 %v11319_v40, %v5210_v28  ;;  %9000 = vpow2.f32 %v5253_v41 }
0x2f01   :  { %9002 = vpow2.f32 %v5245_v14  ;;  %v11369_v40 = vpop.eup %8998 }
0x2f02   :  { %v8573_v35 = vpop.permute.xlu1 %8572  ;;  %v5257_v31 = vmul.f32 1.442695, %v5228_v55 }
0x2f03   :  { %v5214_v36 = vpop.xlane.xlu0 %5213  ;;  %v8575_v52 = vunpack.i.h.bf16 %v8573_v35  ;;  %v8574_v13 = vunpack.i.l.bf16 %v8573_v35 }
0x2f04   :  { %9004 = vpow2.f32 %v5257_v31  ;;  %v5230_v53 = vsub.f32 %v11325_v10, %v5214_v36 }
0x2f05   :  { %v8004_v12 = vpack.c.bf16 %v8575_v52, %v8574_v13  ;;  %9006 = vpow2.f32 %v5243_v20 }
0x2f06   :  { %v5261_v30 = vmul.f32 1.442695, %v5230_v53 }
0x2f07   :  { %v8578_v62 = vpop.permute.xlu0 %8577  ;;  %8005 = vmatprep.subr.bf16.mxu0 %v8004_v12 }
0x2f08   :  { %v8580_v54 = vunpack.i.h.bf16 %v8578_v62  ;;  %v8579_v26 = vunpack.i.l.bf16 %v8578_v62  ;;  %8007 = vmatpush3.bf16.msra.mxu0 %v8004_v12 }
0x2f0a   :  { %v8008_v57 = vpack.c.bf16 %v8580_v54, %v8579_v26  ;;  %v11373_v19 = vpop.eup %9000 }
0x2f0b   :  { %8582 = vrot.lane.b32.xlu1 %v11199_v34, %s11538_s28  ;;  %v5229_v34 = vsub.f32 %v11321_v32, %v5212_v37  ;;  %v5251_v32 = vmul.f32 1.442695, %v5225_v46 }
0x2f0c   :  { %8009 = vmatprep.subr.bf16.mxu0 %v8008_v57 }
0x2f0d   :  { %8011 = vmatpush3.bf16.msra.mxu0 %v8008_v57  ;;  %v5259_v9 = vmul.f32 1.442695, %v5229_v34 }
0x2f0f   :  { %9008 = vpow2.f32 %v5259_v9 }
0x2f15   :  { %8587 = vrot.lane.b32.xlu0 %v11207_v11, %s11538_s28  ;;  %v5224_v11 = vsub.f32 %v11307_v59, %v5202_v6  ;;  %v11375_v59 = vpop.eup %9002 }
0x2f16   :  { %v11379_v10 = vpop.eup %9004 }
0x2f17   :  { %v5249_v44 = vmul.f32 1.442695, %v5224_v11  ;;  %v11381_v4 = vpop.eup %9006 }
0x2f19   :  { %9010 = vpow2.f32 %v5249_v44  ;;  %v11385_v61 = vpop.eup %9008 }
0x2f1a   :  { %9012 = vpow2.f32 %v5261_v30 }
0x2f1b   :  { %9014 = vpow2.f32 %v5251_v32 }
0x2f1c   :  { %9016 = vpow2.f32 %v5255_v15 }
0x2f23   :  { %v11387_v23 = vpop.eup %9010 }
0x2f24   :  { %v11391_v43 = vpop.eup %9012 }
0x2f25   :  { %v11393_v60 = vpop.eup %9014 }
0x2f26   :  { %v11397_v51 = vpop.eup %9016 }
0x2f2f   :  { %5279 = vadd.xlane.f32.xlu1 %v11369_v40 }
0x2f33   :  { %5285 = vadd.xlane.f32.xlu1 %v11373_v19 }
0x2f34   :  { %5277 = vadd.xlane.f32.xlu0 %v11375_v59 }
0x2f37   :  { %5289 = vadd.xlane.f32.xlu1 %v11379_v10 }
0x2f38   :  { %5275 = vadd.xlane.f32.xlu0 %v11381_v4 }
0x2f3b   :  { %5291 = vadd.xlane.f32.xlu1 %v11385_v61 }
0x2f3c   :  { %5281 = vadd.xlane.f32.xlu0 %v11387_v23 }
0x2f3f   :  { %5293 = vadd.xlane.f32.xlu1 %v11391_v43 }
0x2f40   :  { %5283 = vadd.xlane.f32.xlu0 %v11393_v60 }
0x2f44   :  { %5287 = vadd.xlane.f32.xlu0 %v11397_v51 }
0x2f7e   :  { %v5266_v58 = vpop.xlane.xlu0 %5265 }
0x2f7f   :  { %v5264_v63 = vpop.xlane.xlu1 %5263 }
0x2f80   :  { %9018 = vrcp.f32 %v5264_v63  ;;  %v8684_v63 = vld [vmem:[#allocation8 + $0x40] sm:$0xff]  }
0x2f81   :  { %9020 = vrcp.f32 %v5266_v58 }
0x2f83   :  { %v5270_v29 = vpop.xlane.xlu0 %5269 }
0x2f87   :  { %v5272_v7 = vpop.xlane.xlu1 %5271 }
0x2f88   :  { %v5268_v17 = vpop.xlane.xlu0 %5267 }
0x2f89   :  { %9022 = vrcp.f32 %v5268_v17 }
0x2f8a   :  { %v9019_v42 = vpop.eup %9018  ;;  %9024 = vrcp.f32 %v5270_v29 }
0x2f8b   :  { %v8583_v1 = vpop.permute.xlu1 %8582  ;;  %v5311_v24 = vmul.f32 %v9019_v42, %v11340_v38  ;;  %9026 = vrcp.f32 %v5272_v7  ;;  %v9021_v35 = vpop.eup %9020 }
0x2f8c   :  { %v8585_v16 = vunpack.i.h.bf16 %v8583_v1  ;;  %v8584_v39 = vunpack.i.l.bf16 %v8583_v1  ;;  %v5274_v45 = vpop.xlane.xlu0 %5273  ;;  %v5312_v38 = vmul.f32 %v9021_v35, %v11338_v48 }
0x2f8d   :  { %7552 = vmatprep.mubr.f32.mxu0 %v5311_v24  ;;  %9028 = vrcp.f32 %v5274_v45 }
0x2f8e   :  { %v8012_v6 = vpack.c.bf16 %v8585_v16, %v8584_v39 }
0x2f90   :  { %v8588_v25 = vpop.permute.xlu0 %8587  ;;  %8013 = vmatprep.subr.bf16.mxu0 %v8012_v6 }
0x2f91   :  { %v8590_v2 = vunpack.i.h.bf16 %v8588_v25  ;;  %v8589_v37 = vunpack.i.l.bf16 %v8588_v25  ;;  %8015 = vmatpush3.bf16.msra.mxu0 %v8012_v6 }
0x2f93   :  { %v8016_v28 = vpack.c.bf16 %v8590_v2, %v8589_v37  ;;  %v9023_v36 = vpop.eup %9022 }
0x2f94   :  { %v9025_v52 = vpop.eup %9024  ;;  %v5313_v13 = vmul.f32 %v9023_v36, %v11349_v56 }
0x2f95   :  { %8017 = vmatprep.subr.bf16.mxu0 %v8016_v28  ;;  %v9027_v12 = vpop.eup %9026  ;;  %v5314_v62 = vmul.f32 %v9025_v52, %v11344_v21 }
0x2f96   :  { %8019 = vmatpush3.bf16.msra.mxu0 %v8016_v28  ;;  %v5315_v26 = vmul.f32 %v9027_v12, %v11347_v50 }
0x2f97   :  { %7576 = vmatprep.subr.bf16.mxu0 %v9369_v0  ;;  %v9029_v54 = vpop.eup %9028 }
0x2f98   :  { %v5316_v57 = vmul.f32 %v9029_v54, %v11353_v27 }
0x2f99   :  { %7553 = vmatmul.mubr.f32.vlgmr.msra.gmra.mrb[100].mxu0 %v5312_v38 }
0x2f9a   :  { %7555 = vmatprep.mubr.f32.mxu0 %v5313_v13  ;;  %7577 = vmatpush3.bf16.msra.mxu0 %v8684_v63 }
0x2f9b   :  { %7578 = vmatprep.subr.bf16.mxu0 %v9369_v0 }
0x2f9d   :  { %7556 = vmatmul.mubr.f32.gmra.mrb[102].mxu0 %v5314_v62 }
0x2f9e   :  { %7558 = vmatprep.mubr.f32.mxu0 %v5315_v26 }
0x2fa1   :  { %7559 = vmatmul.mubr.f32.gmra.mrb[104].mxu0 %v5316_v57 }
0x2fbc   :  { %v5280_v47 = vpop.xlane.xlu1 %5279 }
0x2fbd   :  { %9030 = vrcp.f32 %v5280_v47 }
0x2fc0   :  { %v5286_v48 = vpop.xlane.xlu1 %5285 }
0x2fc1   :  { %v5278_v22 = vpop.xlane.xlu0 %5277 }
0x2fc2   :  { %9032 = vrcp.f32 %v5278_v22 }
0x2fc4   :  { %v5290_v56 = vpop.xlane.xlu1 %5289 }
0x2fc5   :  { %v5276_v3 = vpop.xlane.xlu0 %5275 }
0x2fc6   :  { %9034 = vrcp.f32 %v5276_v3 }
0x2fc7   :  { %v9031_v55 = vpop.eup %9030 }
0x2fc8   :  { %v5292_v41 = vpop.xlane.xlu1 %5291  ;;  %v5319_v20 = vmul.f32 %v9031_v55, %v11369_v40 }
0x2fc9   :  { %v5282_v33 = vpop.xlane.xlu0 %5281 }
0x2fca   :  { %9036 = vrcp.f32 %v5282_v33 }
0x2fcb   :  { %9038 = vrcp.f32 %v5286_v48 }
0x2fcc   :  { %v9033_v50 = vpop.eup %9032  ;;  %v5294_v34 = vpop.xlane.xlu1 %5293 }
0x2fcd   :  { %v5284_v21 = vpop.xlane.xlu0 %5283  ;;  %v5318_v31 = vmul.f32 %v9033_v50, %v11375_v59 }
0x2fce   :  { %9040 = vrcp.f32 %v5284_v21 }
0x2fcf   :  { %9042 = vrcp.f32 %v5290_v56 }
0x2fd0   :  { %v9035_v49 = vpop.eup %9034  ;;  %9044 = vrcp.f32 %v5292_v41 }
0x2fd1   :  { %v5288_v27 = vpop.xlane.xlu0 %5287  ;;  %v5317_v14 = vmul.f32 %v9035_v49, %v11381_v4 }
0x2fd2   :  { %9046 = vrcp.f32 %v5288_v27 }
0x2fd3   :  { %7561 = vmatprep.mubr.f32.mxu0 %v5317_v14  ;;  %9048 = vrcp.f32 %v5294_v34 }
0x2fd4   :  { %v9037_v11 = vpop.eup %9036  ;;  %7562 = vmatmul.mubr.f32.gmra.mrb[106].mxu0 %v5318_v31 }
0x2fd5   :  { %7564 = vmatprep.mubr.f32.mxu0 %v5319_v20  ;;  %v5320_v9 = vmul.f32 %v9037_v11, %v11387_v23  ;;  %v9039_v53 = vpop.eup %9038 }
0x2fd6   :  { %v5322_v32 = vmul.f32 %v9039_v53, %v11373_v19 }
0x2fd8   :  { %v9041_v46 = vpop.eup %9040  ;;  %7565 = vmatmul.mubr.f32.gmra.mrb[108].mxu0 %v5320_v9 }
0x2fd9   :  { %v5321_v44 = vmul.f32 %v9041_v46, %v11393_v60  ;;  %v9043_v30 = vpop.eup %9042 }
0x2fda   :  { %v9045_v5 = vpop.eup %9044  ;;  %v5324_v15 = vmul.f32 %v9043_v30, %v11379_v10 }
0x2fdb   :  { %7567 = vmatprep.mubr.f32.mxu0 %v5321_v44  ;;  %v5325_v23 = vmul.f32 %v9045_v5, %v11385_v61 }
0x2fdc   :  { %v9047_v59 = vpop.eup %9046  ;;  %7568 = vmatmul.mubr.f32.gmra.mrb[110].mxu0 %v5322_v32 }
0x2fdd   :  { %v5323_v40 = vmul.f32 %v9047_v59, %v11397_v51  ;;  %v9049_v4 = vpop.eup %9048 }
0x2fde   :  { %v5326_v58 = vmul.f32 %v9049_v4, %v11391_v43  ;;  %v8685_v43 = vld [vmem:[#allocation8 + $0x48] sm:$0xff]  }
0x2fdf   :  { %7570 = vmatprep.mubr.f32.mxu0 %v5323_v40  ;;  %7579 = vmatpush3.bf16.msra.mxu0 %v8685_v43 }
0x2fe0   :  { %7571 = vmatmul.mubr.f32.gmra.mrb[112].mxu0 %v5324_v15  ;;  %7584 = vmatprep.subr.bf16.mxu0 %v9369_v0 }
0x2fe1   :  { %7573 = vmatprep.mubr.f32.mxu0 %v5325_v23 }
0x2fe4   :  { %7574 = vmatmul.mubr.f32.gmra.mrb[114].mxu0 %v5326_v58 }
0x2fe5   :  { %7580 = vmatprep.mubr.msk.bf16.mxu0 %vm9370_vm0, %v9369_v0 }
0x306c   :  { %v7554_v19 = vpop.f32.mrb[100].mxu0 }
0x306d   :  { %v5441_v60 = vpop.f32.mrb[101].mxu0 }
0x3070   :  { %v7557_v29 = vpop.f32.mrb[102].mxu0 }
0x3071   :  { %v5451_v10 = vpop.f32.mrb[103].mxu0 }
0x3072   :  { %v8591_v51 = vpack.i.bf16 %v7557_v29, %v5451_v10 }
0x3074   :  { %8592 = vrot.lane.b32.xlu1 %v8591_v51, %s9356_s23  ;;  %v7560_v61 = vpop.f32.mrb[104].mxu0 }
0x3075   :  { %v5461_v7 = vpop.f32.mrb[105].mxu0 }
0x3076   :  { %v8596_v17 = vpack.i.bf16 %v7560_v61, %v5461_v7 }
0x3078   :  { %8597 = vrot.lane.b32.xlu0 %v8596_v17, %s9364_s29 }
0x30a7   :  { %v7563_v42 = vpop.f32.mrb[106].mxu0 }
0x30a8   :  { %v5471_v1 = vpop.f32.mrb[107].mxu0 }
0x30a9   :  { %v8601_v24 = vpack.i.bf16 %v7563_v42, %v5471_v1 }
0x30ab   :  { %8602 = vrot.lane.b32.xlu1 %v8601_v24, %s9379_s27  ;;  %v7566_v16 = vpop.f32.mrb[108].mxu0 }
0x30ac   :  { %v5481_v39 = vpop.f32.mrb[109].mxu0 }
0x30ad   :  { %v8606_v45 = vpack.i.bf16 %v7566_v16, %v5481_v39 }
0x30af   :  { %8607 = vrot.lane.b32.xlu1 %v8606_v45, %s9360_s4  ;;  %v7569_v6 = vpop.f32.mrb[110].mxu0 }
0x30b0   :  { %v5491_v25 = vpop.f32.mrb[111].mxu0 }
0x30b1   :  { %v8611_v2 = vpack.i.bf16 %v7569_v6, %v5491_v25 }
0x30b3   :  { %8612 = vrot.lane.b32.xlu1 %v8611_v2, %s9380_s30  ;;  %v7572_v37 = vpop.f32.mrb[112].mxu0 }
0x30b4   :  { %v5501_v28 = vpop.f32.mrb[113].mxu0 }
0x30b5   :  { %v8616_v35 = vpack.i.bf16 %v7572_v37, %v5501_v28  ;;  %v8687_v28 = vld [vmem:[%s11523_s12 + $0x48] sm:$0xff]  }
0x30b7   :  { %8617 = vrot.lane.b32.xlu1 %v8616_v35, %s9381_s19  ;;  %v7575_v36 = vpop.f32.mrb[114].mxu0  ;;  %v8688_v35 = vld [vmem:[#allocation13 + $0x100] sm:$0xff]  }
0x30b8   :  { %v5511_v38 = vpop.f32.mrb[115].mxu0  ;;  %7593 = vmatpush3.bf16.msra.mxu1 %v8688_v35 }
0x30b9   :  { %v8621_v52 = vpack.i.bf16 %v7575_v36, %v5511_v38  ;;  %v8689_v36 = vld [vmem:[#allocation13 + $0x108] sm:$0xff]   ;;  %7594 = vmatprep.subr.bf16.mxu1 %v9369_v0  ;;  %v8690_v38 = vld [vmem:[#allocation13 + $0x110] sm:$0xff]  }
0x30bb   :  { %8622 = vrot.lane.b32.xlu0 %v8621_v52, %s9382_s1  ;;  %v8691_v52 = vld [vmem:[#allocation13 + $0x118] sm:$0xff]  }
0x30bc   :  { %7595 = vmatpush3.bf16.msra.mxu1 %v8689_v36 }
0x30bd   :  { %7596 = vmatprep.subr.bf16.mxu1 %v9369_v0 }
0x30c0   :  { %7597 = vmatpush3.bf16.msra.mxu1 %v8690_v38  ;;  %v6413_v38 = vld [vmem:[%s11521_s10 + $0x4] ss:$0 sm:$0xff]  ;;  %s9384_s10 = smov [#allocation17]  }
0x30c1   :  { %7598 = vmatprep.subr.bf16.mxu1 %v9369_v0 }
0x30c4   :  { %7599 = vmatpush3.bf16.msra.mxu1 %v8691_v52 }
0x30c5   :  { %7600 = vmatprep.subr.bf16.mxu1 %v9369_v0 }
0x30e6   :  { %v8593_v13 = vpop.permute.xlu1 %8592 }
0x30e7   :  { %v8595_v57 = vunpack.i.h.bf16 %v8593_v13  ;;  %v8594_v47 = vunpack.i.l.bf16 %v8593_v13  ;;  %v8692_v13 = vld [vmem:[#allocation13 + $0x120] sm:$0xff]  }
0x30e8   :  { %7601 = vmatpush3.bf16.msra.mxu1 %v8692_v13 }
0x30e9   :  { %v5577_v55 = vsel %vm372_vm2, %v7554_v19, %v8595_v57  ;;  %v5576_v50 = vsel %vm372_vm2, %v5441_v60, %v8594_v47  ;;  %v6386_v19 = vld [vmem:[#allocation10 + $0x4] ss:$0 sm:$0xff]  ;;  %7602 = vmatprep.subr.bf16.mxu1 %v9369_v0 }
0x30ea   :  { %v8598_v54 = vpop.permute.xlu0 %8597 }
0x30eb   :  { %v8600_v48 = vunpack.i.h.bf16 %v8598_v54  ;;  %v8599_v22 = vunpack.i.l.bf16 %v8598_v54 }
0x30ed   :  { %v5579_v14 = vsel %vm993_vm4, %v5577_v55, %v8600_v48  ;;  %v5578_v34 = vsel %vm993_vm4, %v5576_v50, %v8599_v22  ;;  %v6393_v55 = vld [vmem:[%s11520_s9 + $0x4] ss:$0 sm:$0xff] }
0x311d   :  { %v8603_v12 = vpop.permute.xlu1 %8602 }
0x311e   :  { %v8605_v3 = vunpack.i.h.bf16 %v8603_v12  ;;  %v8604_v56 = vunpack.i.l.bf16 %v8603_v12  ;;  %v8693_v12 = vld [vmem:[#allocation13 + $0x128] sm:$0xff]  }
0x311f   :  { %7603 = vmatpush3.bf16.msra.mxu1 %v8693_v12 }
0x3120   :  { %v5581_v11 = vsel %vm996_vm5, %v5579_v14, %v8605_v3  ;;  %v5580_v9 = vsel %vm996_vm5, %v5578_v34, %v8604_v56  ;;  %7604 = vmatprep.subr.bf16.mxu1 %v9369_v0  ;;  %v6392_v3 = vld [vmem:[%s11519_s8 + $0x4] ss:$0 sm:$0xff] }
0x3121   :  { %v8608_v62 = vpop.permute.xlu1 %8607  ;;  %v8694_v34 = vld [vmem:[#allocation13 + $0x130] sm:$0xff]  }
0x3122   :  { %v8610_v33 = vunpack.i.h.bf16 %v8608_v62  ;;  %v8609_v41 = vunpack.i.l.bf16 %v8608_v62 }
0x3123   :  { %7605 = vmatpush3.bf16.msra.mxu1 %v8694_v34 }
0x3124   :  { %v5583_v53 = vsel %vm999_vm6, %v5581_v11, %v8610_v33  ;;  %v5582_v46 = vsel %vm999_vm6, %v5580_v9, %v8609_v41  ;;  %7606 = vmatprep.subr.bf16.mxu1 %v9369_v0 }
0x3125   :  { %v8613_v26 = vpop.permute.xlu1 %8612 }
0x3126   :  { %v8615_v49 = vunpack.i.h.bf16 %v8613_v26  ;;  %v8614_v27 = vunpack.i.l.bf16 %v8613_v26 }
0x3128   :  { %v5585_v30 = vsel %vm1002_vm7, %v5583_v53, %v8615_v49  ;;  %v5584_v32 = vsel %vm1002_vm7, %v5582_v46, %v8614_v27 }
0x3129   :  { %v8618_v21 = vpop.permute.xlu1 %8617 }
0x312a   :  { %v8620_v31 = vunpack.i.h.bf16 %v8618_v21  ;;  %v8619_v20 = vunpack.i.l.bf16 %v8618_v21 }
0x312c   :  { %v5587_v40 = vsel %vm1005_vm8, %v5585_v30, %v8620_v31  ;;  %v5586_v15 = vsel %vm1005_vm8, %v5584_v32, %v8619_v20  ;;  %v8695_v31 = vld [vmem:[#allocation13 + $0x138] sm:$0xff]  }
0x312d   :  { %v8623_v44 = vpop.permute.xlu0 %8622  ;;  %7607 = vmatpush3.bf16.msra.mxu1 %v8695_v31  ;;  %v6398_v20 = vld [vmem:[#allocation11 + $0x4] ss:$0 sm:$0xff] }
0x312e   :  { %v8625_v5 = vunpack.i.h.bf16 %v8623_v44  ;;  %v8624_v59 = vunpack.i.l.bf16 %v8623_v44 }
0x3130   :  { %v5589_v4 = vsel %vm1008_vm9, %v5587_v40, %v8625_v5  ;;  %v5588_v23 = vsel %vm1008_vm9, %v5586_v15, %v8624_v59  ;;  %v6402_v40 = vld [vmem:[#allocation14 + $0x4] ss:$0 sm:$0xff] }
0x3131   :  { %v5590_v58 = vpack.c.bf16 %v5589_v4, %v5588_v23 }
0x3133   :  { %7581 = vmatmul.mubr.msk.bf16.vlgmr.msra.gmra.mrb[116].mxu0 %vm219_vm1, %v5590_v58 }
0x3134   :  { %7588 = vmatprep.mubr.msk.bf16.mxu0 %vm9370_vm0, %v9369_v0 }
0x3206   :  { %v5653_v60 = vpop.f32.mrb[116].mxu0 }
0x3207   :  { %v5654_v63 = vadd.f32 %v6386_v19, %v5653_v60  ;;  %v7582_v29 = vpop.f32.mrb[117].mxu0 }
0x3208   :  { %v5656_v10 = vpop.f32.mrb[118].mxu0 }
0x3209   :  { %v5660_v51 = vadd.f32 %v5654_v63, %v11117_v8  ;;  %v5657_v61 = vadd.f32 %v6386_v19, %v5656_v10  ;;  %v7583_v7 = vpop.f32.mrb[119].mxu0 }
0x320b   :  { %v5661_v17 = vadd.f32 %v5657_v61, %v11119_v18  ;;  %v5666_v43 = vsel %vm219_vm1, %v5660_v51, 0.0  ;;  %v8686_v18 = vld [vmem:[%s11523_s12 + $0x40] sm:$0xff]  }
0x320c   :  { %5667 = vadd.xlane.f32.xlu1 %v5666_v43  ;;  %7585 = vmatpush3.bf16.msra.mxu0 %v8686_v18 }
0x320d   :  { %v5669_v42 = vsel %vm219_vm1, %v5661_v17, 0.0  ;;  %7586 = vmatprep.subr.bf16.mxu0 %v9369_v0 }
0x320e   :  { %5670 = vadd.xlane.f32.xlu0 %v5669_v42 }
0x3210   :  { %7587 = vmatpush3.bf16.msra.mxu0 %v8687_v28 }
0x3211   :  { %7612 = vmatprep.subr.bf16.mxu0 %v9369_v0 }
0x3299   :  { %v5668_v1 = vpop.xlane.xlu1 %5667 }
0x329a   :  { %v5672_v24 = vmul.f32 0.03125, %v5668_v1 }
0x329b   :  { %v5671_v16 = vpop.xlane.xlu0 %5670 }
0x329c   :  { %v5674_v39 = vsub.f32 %v5660_v51, %v5672_v24  ;;  %v5673_v45 = vmul.f32 0.03125, %v5671_v16 }
0x329e   :  { %v5675_v6 = vsub.f32 %v5661_v17, %v5673_v45  ;;  %v5676_v25 = vmul.f32 %v5674_v39, %v5674_v39 }
0x32a0   :  { %v5678_v2 = vsel %vm219_vm1, %v5676_v25, 0.0  ;;  %v5677_v8 = vmul.f32 %v5675_v6, %v5675_v6  ;;  %v8697_v25 = vld [vmem:[#allocation16 + $0x8] sm:$0xff]  }
0x32a1   :  { %5679 = vadd.xlane.f32.xlu0 %v5678_v2 }
0x32a2   :  { %v5681_v37 = vsel %vm219_vm1, %v5677_v8, 0.0 }
0x32a3   :  { %5682 = vadd.xlane.f32.xlu1 %v5681_v37 }
0x332e   :  { %v5680_v62 = vpop.xlane.xlu0 %5679 }
0x332f   :  { %v5684_v54 = vmul.f32 0.03125, %v5680_v62 }
0x3330   :  { %v5683_v26 = vpop.xlane.xlu1 %5682 }
0x3331   :  { %v5686_v57 = vadd.f32 1e-05, %v5684_v54  ;;  %v5685_v47 = vmul.f32 0.03125, %v5683_v26 }
0x3333   :  { %9050 = vrsqrt.f32 %v5686_v57  ;;  %v5687_v48 = vadd.f32 1e-05, %v5685_v47 }
0x3335   :  { %9052 = vrsqrt.f32 %v5687_v48  ;;  %v9383_v48 = vmov 1983009808  }
0x333d   :  { %v9051_v22 = vpop.eup %9050 }
0x333e   :  { %v5690_v56 = vmul.f32 %v9051_v22, %v5674_v39  ;;  %v6021_v22 = vunpack.c.l.s4 %v9383_v48 }
0x333f   :  { %v9053_v33 = vpop.eup %9052 }
0x3340   :  { %v5698_v41 = vmul.f32 %v6392_v3, %v5690_v56  ;;  %v5691_v21 = vmul.f32 %v9053_v33, %v5675_v6  ;;  %v8696_v6 = vld [vmem:[#allocation16] sm:$0xff]   ;;  %v6415_v56 = vld [vmem:[%s11528_s17] ss:$0 sm:$0xff]  ;;  %v6022_v33 = vunpack.c.0.s8 %v6021_v22 }
0x3342   :  { %v5699_v50 = vmul.f32 %v6392_v3, %v5691_v21  ;;  %v5706_v49 = vadd.f32 %v6393_v55, %v5698_v41  ;;  %v6023_v3 = vlaneseq }
0x3344   :  { %v5707_v27 = vadd.f32 %v6393_v55, %v5699_v50  ;;  %v6024_v41 = vshrl.u32 %v6023_v3, 7 }
0x3346   :  { %v5708_v14 = vpack.c.bf16 %v5707_v27, %v5706_v49 }
0x3348   :  { %7589 = vmatmul.mubr.msk.bf16.vlgmr.msra.gmra.mrb[120].mxu0 %vm219_vm1, %v5708_v14 }
0x3349   :  { %7616 = vmatprep.mubr.msk.bf16.mxu0 %vm9370_vm0, %v9369_v0  ;;  %7613 = vmatpush3.bf16.msra.mxu0 %v8696_v6 }
0x334a   :  { %7614 = vmatprep.subr.bf16.mxu0 %v9369_v0  ;;  %v6414_v0 = vld [vmem:[%s11522_s11 + $0x4] ss:$0 sm:$0xff]  ;;  %s6085_s11 = sshll.u32 %s9384_s10, 4  ;;  %s6086_s11 = int_to_ptr.vmem [resolvable:$true] %s6085_s11 }
0x334b   :  { %s9320_s17 = scalar_lea.vmem %s6086_s11, 32  ;;  %p9325_p3 = scmp.lt.s32.totalorder %s6086_s11, %s6086_s11 }
0x334c   :  { %p9321_p2 = scmp.ne.s32.totalorder %s6086_s11, %s9320_s17  ;;  %p9326_p4 = scmp.lt.s32.totalorder %s9320_s17, %s9320_s17 }
0x334d   :  { %7615 = vmatpush3.bf16.msra.mxu0 %v8697_v25 }
0x334e   :  { %p9327_p5 = por %p9326_p4, %p9325_p3 }
0x3350   :  { %p9328_p6 = pnand %p9327_p5, %p9321_p2 }
0x341b   :  { %v5771_v11 = vpop.f32.mrb[120].mxu0 }
0x341c   :  { %v5772_v9 = vadd.f32 %v6398_v20, %v5771_v11  ;;  %v7590_v53 = vpop.f32.mrb[121].mxu0 }
0x341d   :  { %v5774_v46 = vpop.f32.mrb[122].mxu0 }
0x341e   :  { %v5775_v44 = vadd.f32 %v6398_v20, %v5774_v46  ;;  %v7591_v30 = vpop.f32.mrb[123].mxu0  ;;  %v5778_v32 = vmax.f32 %v5772_v9, 0.0 }
0x3420   :  { %v5779_v5 = vmax.f32 %v5775_v44, 0.0 }
0x3422   :  { %v5780_v59 = vpack.c.bf16 %v5779_v5, %v5778_v32 }
0x3424   :  { %7609 = vmatmul.mubr.bf16.vlgmr.msra.gmra.mrb[112].mxu1 %v5780_v59 }
0x34f7   :  { %v5888_v15 = vpop.f32.mrb[112].mxu1 }
0x34f8   :  { %v5889_v4 = vadd.f32 %v6402_v40, %v5888_v15  ;;  %v7610_v23 = vpop.f32.mrb[113].mxu1 }
0x34f9   :  { %v5891_v58 = vpop.f32.mrb[114].mxu1 }
0x34fa   :  { %v5895_v19 = vadd.f32 %v5889_v4, %v5706_v49  ;;  %v5892_v60 = vadd.f32 %v6402_v40, %v5891_v58  ;;  %v7611_v63 = vpop.f32.mrb[115].mxu1  ;;  %v6025_v49 = vsub.s32 %v6022_v33, %v6024_v41 }
0x34fc   :  { %v5896_v29 = vadd.f32 %v5892_v60, %v5707_v27  ;;  %v5901_v10 = vsel %vm219_vm1, %v5895_v19, 0.0 }
0x34fd   :  { %5902 = vadd.xlane.f32.xlu0 %v5901_v10 }
0x34fe   :  { %v5904_v51 = vsel %vm219_vm1, %v5896_v29, 0.0 }
0x34ff   :  { %5905 = vadd.xlane.f32.xlu1 %v5904_v51 }
0x358a   :  { %v5903_v61 = vpop.xlane.xlu0 %5902 }
0x358b   :  { %v5907_v7 = vmul.f32 0.03125, %v5903_v61 }
0x358c   :  { %v5906_v17 = vpop.xlane.xlu1 %5905 }
0x358d   :  { %v5909_v43 = vsub.f32 %v5895_v19, %v5907_v7  ;;  %v5908_v42 = vmul.f32 0.03125, %v5906_v17 }
0x358f   :  { %v5910_v1 = vsub.f32 %v5896_v29, %v5908_v42  ;;  %v5911_v24 = vmul.f32 %v5909_v43, %v5909_v43 }
0x3591   :  { %v5913_v16 = vsel %vm219_vm1, %v5911_v24, 0.0  ;;  %v5912_v39 = vmul.f32 %v5910_v1, %v5910_v1 }
0x3592   :  { %5914 = vadd.xlane.f32.xlu0 %v5913_v16 }
0x3593   :  { %v5916_v45 = vsel %vm219_vm1, %v5912_v39, 0.0 }
0x3594   :  { %5917 = vadd.xlane.f32.xlu1 %v5916_v45 }
0x361f   :  { %v5915_v2 = vpop.xlane.xlu0 %5914 }
0x3620   :  { %v5919_v8 = vmul.f32 0.03125, %v5915_v2 }
0x3621   :  { %v5918_v37 = vpop.xlane.xlu1 %5917 }
0x3622   :  { %v5921_v18 = vadd.f32 1e-05, %v5919_v8  ;;  %v5920_v28 = vmul.f32 0.03125, %v5918_v37 }
0x3624   :  { %9054 = vrsqrt.f32 %v5921_v18  ;;  %v5922_v35 = vadd.f32 1e-05, %v5920_v28 }
0x3626   :  { %9056 = vrsqrt.f32 %v5922_v35 }
0x362e   :  { %v9055_v36 = vpop.eup %9054 }
0x362f   :  { %v5925_v52 = vmul.f32 %v9055_v36, %v5909_v43 }
0x3630   :  { %v9057_v13 = vpop.eup %9056 }
0x3631   :  { %v5933_v12 = vmul.f32 %v6413_v38, %v5925_v52  ;;  %v5926_v62 = vmul.f32 %v9057_v13, %v5910_v1 }
0x3633   :  { %v5934_v54 = vmul.f32 %v6413_v38, %v5926_v62  ;;  %v5941_v26 = vadd.f32 %v6414_v0, %v5933_v12 }
0x3635   :  { %v5942_v57 = vadd.f32 %v6414_v0, %v5934_v54 }
0x3637   :  { %v5943_v47 = vpack.c.bf16 %v5942_v57, %v5941_v26 }
0x3639   :  { %7617 = vmatmul.mubr.msk.bf16.vlgmr.msra.gmra.mrb[124].mxu0 %vm219_vm1, %v5943_v47 }
0x370c   :  { %v6004_v21 = vpop.f32.mrb[124].mxu0 }
0x370d   :  { %v6005_v55 = vadd.f32 %v6415_v56, %v6004_v21  ;;  %v7618_v50 = vpop.f32.mrb[125].mxu0 }
0x370e   :  { %v6007_v27 = vpop.f32.mrb[126].mxu0 }
0x370f   :  { %vm6011_vm10 = vcmp.ge.f32.partialorder %v6005_v55, 0.0  ;;  %v6013_v14 = vmul.f32 0.01, %v6005_v55  ;;  %v6008_v34 = vadd.f32 %v6415_v56, %v6007_v27  ;;  %v7619_v31 = vpop.f32.mrb[127].mxu0 }
0x3711   :  { %v6015_v20 = vsel %vm6011_vm10, %v6005_v55, %v6013_v14  ;;  %vm6012_vm11 = vcmp.ge.f32.partialorder %v6008_v34, 0.0  ;;  %v6014_v11 = vmul.f32 0.01, %v6008_v34 }
0x3712   :  { %v6019_v9 = vcombine.high %v6015_v20, %v6015_v20  ;;  %v6026_v53 = vrot.slane %v6015_v20, %v6025_v49 }
0x3713   :  { %v6016_v46 = vsel %vm6012_vm11, %v6008_v34, %v6014_v11 }
0x3714   :  { %v6033_v44 = vrot.slane %v6019_v9, %v6025_v49  ;;  %v6034_v30 = vcombine.high %v6026_v53, %v6026_v53  ;;  %v6062_v32 = vsel %vm6061_vm12, %v6026_v53, 0.0  ;;  %v6036_v40 = vcombine.high %v6016_v46, %v6016_v46 }
0x3715   :  { %v6043_v15 = vrot.slane %v6016_v46, %v6025_v49 }
0x3716   :  { %v6035_v5 = vcombine.high %v6033_v44, %v6033_v44  ;;  %v6063_v59 = vsel %vm6061_vm12, %v6034_v30, 0.0  ;;  %v6065_v23 = vsel %vm6061_vm12, %v6033_v44, 0.0  ;;  %v6050_v19 = vrot.slane %v6036_v40, %v6025_v49 }
0x3717   :  { %v6064_v4 = vadd.f32 %v6063_v59, %v6062_v32  ;;  %v6051_v60 = vcombine.high %v6043_v15, %v6043_v15  ;;  %v6069_v10 = vsel %vm6061_vm12, %v6043_v15, 0.0 }
0x3718   :  { %v6067_v63 = vsel %vm6061_vm12, %v6035_v5, 0.0  ;;  %v6052_v7 = vcombine.high %v6050_v19, %v6050_v19  ;;  %v6073_v43 = vsel %vm6061_vm12, %v6050_v19, 0.0 }
0x3719   :  { %v6066_v58 = vadd.f32 %v6065_v23, %v6064_v4  ;;  %v6071_v61 = vsel %vm6061_vm12, %v6051_v60, 0.0 }
0x371a   :  { %v6075_v1 = vsel %vm6061_vm12, %v6052_v7, 0.0 }
0x371b   :  { %v6068_v29 = vadd.f32 %v6067_v63, %v6066_v58 }
0x371d   :  { %v6070_v51 = vadd.f32 %v6069_v10, %v6068_v29 }
0x371f   :  { %v6072_v17 = vadd.f32 %v6071_v61, %v6070_v51 }
0x3721   :  { %v6074_v42 = vadd.f32 %v6073_v43, %v6072_v17 }
0x3723   :  { %v6076_v24 = vadd.f32 %v6075_v1, %v6074_v42 }
0x3725   :  { %v6077_v16 = vmul.f32 0.125, %v6076_v24 }
0x3727   :  { %6078 = vst.msk [vmem:[#allocation17] sm:$0x3] %vm6061_vm12, %v6077_v16 }
0x3728   :  { %9331 = shalt.err (!%p9328_p6)
}
0x3729   :  { %s9332_s30 = scalar_lea.hbm %s11529_s18, 32 }
0x372a   :  { %p9333_p7 = scmp.ne.s32.totalorder %s11529_s18, %s9332_s30  ;;  %p9336_p8 = scmp.lt.u32.totalorder %s9332_s30, %s11529_s18 }
0x372c   :  { %p9338_p9 = pnand %p9336_p8, %p9333_p7 }
0x372e   :  { %9341 = shalt.err (!%p9338_p9)
}
0x372f   :  { %6088 = dma.vmem_to_hbm [thread:$0]  %s6086_s11, 32, %s11529_s18, [#allocation4]  }
0x3730   :  { %9352 = dma.done.wait [#allocation4], 32  }
0x3731   :  { %9353 = vsyncadd [#allocation4], 4294967264 }
0x3732   :  { %6092 = vsyncpa [#allocation3], 1 }
0x3733   :  { %6093 = vsyncpa [#allocation6], 1 }
0x3734   :  { %6094 = vsyncpa [#allocation9], 1 }
0x3735   :  { %6095 = vsyncpa [#allocation12], 1 }
0x3736   :  { %6096 = vsyncpa [#allocation15], 1 }
0x3737   :  { %6097 = vsyncpa [#allocation4], 1 }

</bundles_post_ra>
